<compile_context>
chip_gen: v5e
topology: v5e:2x2
jax: 0.10.0
libtpu: 0.0.40
codegen_flags: <defaults>
</compile_context>

<pallas_src>
import functools

import jax
import jax.numpy as jnp
from jax import lax
from jax.experimental import pallas as pl
from jax.experimental.pallas import tpu as pltpu

BN_EPS = 1e-5


# ----------------------------- Pallas kernel ------------------------------ #
def _basic_block_kernel(xp_ref, w1_ref, s1_ref, b1_ref,
                        w2_ref, s2_ref, b2_ref,
                        wsc_ref, ssc_ref, bsc_ref,
                        out_ref, pad1_ref,
                        *, stride, has_proj, H, W, Cin, Cout):
    Ho = (H - 1) // stride + 1
    Wo = (W - 1) // stride + 1

    def in_tap(dh, dw):
        # shifted (and possibly strided) 3x3 tap from the pre-padded bf16 image
        if stride == 1:
            t = xp_ref[0, dh:dh + Ho, dw:dw + Wo, :]
        else:
            t = xp_ref[0, pl.ds(dh, Ho, stride), pl.ds(dw, Wo, stride), :]
        return t.reshape(Ho * Wo, Cin)

    # ---- conv1 (3x3, stride, pad=1) as a single MXU matmul + BN1 + ReLU ----
    p1 = jnp.concatenate([in_tap(dh, dw) for dh in range(3) for dw in range(3)],
                         axis=-1)                               # (Ho*Wo, 9*Cin) bf16
    acc1 = jnp.dot(p1, w1_ref[...], preferred_element_type=jnp.float32)
    y1 = jnp.maximum(acc1 * s1_ref[...] + b1_ref[...], 0.0)     # f32

    # padded conv1 activation kept in bf16 VMEM scratch for conv2.
    # Only the 1-wide zero border is written (cheap, megacore-safe); the
    # interior is fully overwritten every grid step.
    zrow = jnp.zeros((1, Wo + 2, Cout), jnp.bfloat16)
    zcol = jnp.zeros((Ho + 2, 1, Cout), jnp.bfloat16)
    pad1_ref[0:1, :, :] = zrow
    pad1_ref[Ho + 1:Ho + 2, :, :] = zrow
    pad1_ref[:, 0:1, :] = zcol
    pad1_ref[:, Wo + 1:Wo + 2, :] = zcol
    pad1_ref[1:1 + Ho, 1:1 + Wo, :] = y1.astype(jnp.bfloat16).reshape(Ho, Wo, Cout)

    # ---- conv2 (3x3, stride=1, pad=1) as a single MXU matmul + BN2 ----
    def y_tap(dh, dw):
        return pad1_ref[dh:dh + Ho, dw:dw + Wo, :].reshape(Ho * Wo, Cout)

    p2 = jnp.concatenate([y_tap(dh, dw) for dh in range(3) for dw in range(3)],
                         axis=-1)                               # (Ho*Wo, 9*Cout) bf16
    acc2 = jnp.dot(p2, w2_ref[...], preferred_element_type=jnp.float32)
    y2 = acc2 * s2_ref[...] + b2_ref[...]

    # ---- shortcut ----
    if has_proj:
        # 1x1 conv (bias folded into bsc) + BN, stride `stride`
        if stride == 1:
            xs = xp_ref[0, 1:1 + H, 1:1 + W, :].reshape(H * W, Cin)
        else:
            xs = xp_ref[0, pl.ds(1, Ho, stride), pl.ds(1, Wo, stride), :].reshape(Ho * Wo, Cin)
        sc = jnp.dot(xs, wsc_ref[...], preferred_element_type=jnp.float32)
        sc = sc * ssc_ref[...] + bsc_ref[...]
    else:
        # identity (stride == 1 and Cin == Cout)
        sc = xp_ref[0, 1:1 + H, 1:1 + W, :].reshape(H * W, Cin).astype(jnp.float32)

    out_ref[0] = jnp.maximum(y2 + sc, 0.0)                      # (Ho*Wo, Cout) f32


# ------------------------------ JAX wrapper ------------------------------- #
def _fold_bn(gamma, beta, mean, var):
    s = gamma / jnp.sqrt(var + BN_EPS)
    b = beta - mean * s
    return s, b


def basic_block_pallas(x_nchw, params, stride):
    x = jnp.transpose(x_nchw, (0, 2, 3, 1)).astype(jnp.float32)   # NCHW -> NHWC
    B, H, W, Cin = x.shape
    Cout = params["w1"].shape[0]
    has_proj = (stride != 1) or (Cin != Cout)
    Ho = (H - 1) // stride + 1
    Wo = (W - 1) // stride + 1

    # torch conv weights (Cout, Cin, 3, 3) -> (3*3*Cin, Cout), row order (kh, kw, cin)
    w1 = jnp.transpose(params["w1"], (2, 3, 1, 0)).reshape(9 * Cin, Cout).astype(jnp.bfloat16)
    w2 = jnp.transpose(params["w2"], (2, 3, 1, 0)).reshape(9 * Cout, Cout).astype(jnp.bfloat16)
    s1, b1 = _fold_bn(params["g1"], params["be1"], params["m1"], params["v1"])
    s2, b2 = _fold_bn(params["g2"], params["be2"], params["m2"], params["v2"])

    if has_proj:
        wsc = jnp.transpose(params["wsc"], (2, 3, 1, 0)).reshape(Cin, Cout).astype(jnp.bfloat16)
        ssc, bsc = _fold_bn(params["gsc"], params["besc"], params["msc"], params["vsc"])
        bsc = bsc + params["bsc_conv"] * ssc            # fold 1x1-conv bias into BN bias
    else:
        wsc = jnp.zeros((Cin, Cout), jnp.bfloat16)
        ssc = jnp.zeros((Cout,), jnp.float32)
        bsc = jnp.zeros((Cout,), jnp.float32)

    s1, b1 = s1.reshape(1, Cout), b1.reshape(1, Cout)
    s2, b2 = s2.reshape(1, Cout), b2.reshape(1, Cout)
    ssc, bsc = ssc.reshape(1, Cout), bsc.reshape(1, Cout)

    # pad=1 for the 3x3 convs; bf16 input halves HBM->VMEM DMA bytes
    xp = jnp.pad(x, ((0, 0), (1, 1), (1, 1), (0, 0))).astype(jnp.bfloat16)

    kernel = functools.partial(_basic_block_kernel, stride=stride,
                               has_proj=has_proj, H=H, W=W, Cin=Cin, Cout=Cout)

    out = pl.pallas_call(
        kernel,
        out_shape=jax.ShapeDtypeStruct((B, Ho * Wo, Cout), jnp.float32),
        grid=(B,),
        in_specs=[
            pl.BlockSpec((1, H + 2, W + 2, Cin), lambda b: (b, 0, 0, 0)),
            pl.BlockSpec((9 * Cin, Cout), lambda b: (0, 0)),
            pl.BlockSpec((1, Cout), lambda b: (0, 0)),
            pl.BlockSpec((1, Cout), lambda b: (0, 0)),
            pl.BlockSpec((9 * Cout, Cout), lambda b: (0, 0)),
            pl.BlockSpec((1, Cout), lambda b: (0, 0)),
            pl.BlockSpec((1, Cout), lambda b: (0, 0)),
            pl.BlockSpec((Cin, Cout), lambda b: (0, 0)),
            pl.BlockSpec((1, Cout), lambda b: (0, 0)),
            pl.BlockSpec((1, Cout), lambda b: (0, 0)),
        ],
        out_specs=pl.BlockSpec((1, Ho * Wo, Cout), lambda b: (b, 0, 0)),
        scratch_shapes=[pltpu.VMEM((Ho + 2, Wo + 2, Cout), jnp.bfloat16)],
        compiler_params=pltpu.CompilerParams(dimension_semantics=("parallel",)),
    )(xp, w1, s1, b1, w2, s2, b2, wsc, ssc, bsc)

    out = out.reshape(B, Ho, Wo, Cout)                  # free HBM-side reshape
    return jnp.transpose(out, (0, 3, 1, 2))             # NHWC -> NCHW


# --------------------------- pure-JAX reference ---------------------------- #
def _conv2d_ref(x_nhwc, w_oihw, stride, pad):
    w = jnp.transpose(w_oihw, (2, 3, 1, 0))
    return lax.conv_general_dilated(
        x_nhwc, w, (stride, stride), [(pad, pad), (pad, pad)],
        dimension_numbers=("NHWC", "HWIO", "NHWC"))


def _bn_ref(x, g, b, m, v):
    return (x - m) / jnp.sqrt(v + BN_EPS) * g + b


def basic_block_ref(x_nchw, params, stride):
    x = jnp.transpose(x_nchw, (0, 2, 3, 1)).astype(jnp.float32)
    Cin, Cout = x.shape[-1], params["w1"].shape[0]
    out = jax.nn.relu(_bn_ref(_conv2d_ref(x, params["w1"], stride, 1),
                              params["g1"], params["be1"], params["m1"], params["v1"]))
    out = _bn_ref(_conv2d_ref(out, params["w2"], 1, 1),
                  params["g2"], params["be2"], params["m2"], params["v2"])
    if stride != 1 or Cin != Cout:
        sc = _conv2d_ref(x, params["wsc"], stride, 0) + params["bsc_conv"]
        sc = _bn_ref(sc, params["gsc"], params["besc"], params["msc"], params["vsc"])
    else:
        sc = x
    return jnp.transpose(jax.nn.relu(out + sc), (0, 3, 1, 2))


# ------------------------------- params init ------------------------------- #
def init_params(key, in_planes, planes, stride):
    ks = jax.random.split(key, 20)
    p = {
        "w1": 0.1 * jax.random.normal(ks[0], (planes, in_planes, 3, 3), jnp.float32),
        "g1": 1.0 + 0.1 * jax.random.normal(ks[1], (planes,), jnp.float32),
        "be1": 0.1 * jax.random.normal(ks[2], (planes,), jnp.float32),
        "m1": 0.1 * jax.random.normal(ks[3], (planes,), jnp.float32),
        "v1": 1.0 + 0.1 * jnp.abs(jax.random.normal(ks[4], (planes,), jnp.float32)),
        "w2": 0.1 * jax.random.normal(ks[5], (planes, planes, 3, 3), jnp.float32),
        "g2": 1.0 + 0.1 * jax.random.normal(ks[6], (planes,), jnp.float32),
        "be2": 0.1 * jax.random.normal(ks[7], (planes,), jnp.float32),
        "m2": 0.1 * jax.random.normal(ks[8], (planes,), jnp.float32),
        "v2": 1.0 + 0.1 * jnp.abs(jax.random.normal(ks[9], (planes,), jnp.float32)),
    }
    if stride != 1 or in_planes != planes:
        p.update({
            "wsc": 0.1 * jax.random.normal(ks[10], (planes, in_planes, 1, 1), jnp.float32),
            "bsc_conv": 0.1 * jax.random.normal(ks[11], (planes,), jnp.float32),
            "gsc": 1.0 + 0.1 * jax.random.normal(ks[12], (planes,), jnp.float32),
            "besc": 0.1 * jax.random.normal(ks[13], (planes,), jnp.float32),
            "msc": 0.1 * jax.random.normal(ks[14], (planes,), jnp.float32),
            "vsc": 1.0 + 0.1 * jnp.abs(jax.random.normal(ks[15], (planes,), jnp.float32)),
        })
    return p


def _run_and_check(key, in_planes, planes, stride, B, H, W):
    kx, kp = jax.random.split(key)
    x = jax.random.normal(kx, (B, in_planes, H, W), jnp.float32)   # NCHW input
    params = init_params(kp, in_planes, planes, stride)

    out = jax.block_until_ready(basic_block_pallas(x, params, stride))
    ref = basic_block_ref(x, params, stride)
    assert out.shape == ref.shape, (out.shape, ref.shape)
    max_err = float(jnp.max(jnp.abs(out - ref)))
    # bf16 matmul inputs -> loosened tolerance vs. the f32 reference
    if not bool(jnp.allclose(out, ref, atol=3e-2, rtol=3e-2)):
        raise AssertionError(f"Pallas/ref mismatch (in={in_planes}, out={planes}, "
                             f"stride={stride}), max abs err {max_err}")


# ---------------------------------- main ----------------------------------- #
if __name__ == "__main__":
    key = jax.random.PRNGKey(0)
    k1, k2 = jax.random.split(key)

    # identity-shortcut configuration
    _run_and_check(k1, in_planes=4, planes=4, stride=1, B=2, H=16, W=16)
    # projection-shortcut configuration (1x1 conv + BN), stride=1
    _run_and_check(k2, in_planes=4, planes=8, stride=1, B=2, H=16, W=16)

    print("KERNEL_OK")
</pallas_src>

<mosaic_0001>
module attributes {stable_mosaic.version = 11 : i64} {
  func.func @_basic_block_kernel(%arg0: i32, %arg1: memref<1x18x18x4xbf16, #tpu.memory_space<vmem>>, %arg2: memref<36x4xbf16, #tpu.memory_space<vmem>>, %arg3: memref<1x4xf32, #tpu.memory_space<vmem>>, %arg4: memref<1x4xf32, #tpu.memory_space<vmem>>, %arg5: memref<36x4xbf16, #tpu.memory_space<vmem>>, %arg6: memref<1x4xf32, #tpu.memory_space<vmem>>, %arg7: memref<1x4xf32, #tpu.memory_space<vmem>>, %arg8: memref<4x4xbf16, #tpu.memory_space<vmem>>, %arg9: memref<1x4xf32, #tpu.memory_space<vmem>>, %arg10: memref<1x4xf32, #tpu.memory_space<vmem>>, %arg11: memref<1x256x4xf32, #tpu.memory_space<vmem>>, %arg12: memref<18x18x4xbf16, #tpu.memory_space<vmem>>) attributes {dimension_semantics = [#tpu.dimension_semantics<parallel>], iteration_bounds = array<i64: 2>, scalar_prefetch = 0 : i64, scratch_operands = 1 : i64, tpu.core_type = #tpu.core_type<tc>, window_params = [{transform_indices = @transform_0, window_bounds = array<i64: 1, 18, 18, 4>}, {pipeline_mode = #tpu.pipeline_mode<synchronous>, transform_indices = @transform_1, window_bounds = array<i64: 36, 4>}, {pipeline_mode = #tpu.pipeline_mode<synchronous>, transform_indices = @transform_2, window_bounds = array<i64: 1, 4>}, {pipeline_mode = #tpu.pipeline_mode<synchronous>, transform_indices = @transform_3, window_bounds = array<i64: 1, 4>}, {pipeline_mode = #tpu.pipeline_mode<synchronous>, transform_indices = @transform_4, window_bounds = array<i64: 36, 4>}, {pipeline_mode = #tpu.pipeline_mode<synchronous>, transform_indices = @transform_5, window_bounds = array<i64: 1, 4>}, {pipeline_mode = #tpu.pipeline_mode<synchronous>, transform_indices = @transform_6, window_bounds = array<i64: 1, 4>}, {pipeline_mode = #tpu.pipeline_mode<synchronous>, transform_indices = @transform_7, window_bounds = array<i64: 4, 4>}, {pipeline_mode = #tpu.pipeline_mode<synchronous>, transform_indices = @transform_8, window_bounds = array<i64: 1, 4>}, {pipeline_mode = #tpu.pipeline_mode<synchronous>, transform_indices = @transform_9, window_bounds = array<i64: 1, 4>}, {transform_indices = @transform_10, window_bounds = array<i64: 1, 256, 4>}]} {
    %c0 = arith.constant 0 : index
    %c0_0 = arith.constant 0 : index
    %c0_1 = arith.constant 0 : index
    %c0_2 = arith.constant 0 : index
    %0 = vector.load %arg1[%c0, %c0_0, %c0_1, %c0_2] : memref<1x18x18x4xbf16, #tpu.memory_space<vmem>>, vector<1x16x16x4xbf16>
    %1 = vector.shape_cast %0 : vector<1x16x16x4xbf16> to vector<16x16x4xbf16>
    %2 = vector.shape_cast %1 : vector<16x16x4xbf16> to vector<256x4xbf16>
    %c0_3 = arith.constant 0 : index
    %c0_4 = arith.constant 0 : index
    %c1 = arith.constant 1 : index
    %c0_5 = arith.constant 0 : index
    %3 = vector.load %arg1[%c0_3, %c0_4, %c1, %c0_5] : memref<1x18x18x4xbf16, #tpu.memory_space<vmem>>, vector<1x16x16x4xbf16>
    %4 = vector.shape_cast %3 : vector<1x16x16x4xbf16> to vector<16x16x4xbf16>
    %5 = vector.shape_cast %4 : vector<16x16x4xbf16> to vector<256x4xbf16>
    %c0_6 = arith.constant 0 : index
    %c0_7 = arith.constant 0 : index
    %c2 = arith.constant 2 : index
    %c0_8 = arith.constant 0 : index
    %6 = vector.load %arg1[%c0_6, %c0_7, %c2, %c0_8] : memref<1x18x18x4xbf16, #tpu.memory_space<vmem>>, vector<1x16x16x4xbf16>
    %7 = vector.shape_cast %6 : vector<1x16x16x4xbf16> to vector<16x16x4xbf16>
    %8 = vector.shape_cast %7 : vector<16x16x4xbf16> to vector<256x4xbf16>
    %c0_9 = arith.constant 0 : index
    %c1_10 = arith.constant 1 : index
    %c0_11 = arith.constant 0 : index
    %c0_12 = arith.constant 0 : index
    %9 = vector.load %arg1[%c0_9, %c1_10, %c0_11, %c0_12] : memref<1x18x18x4xbf16, #tpu.memory_space<vmem>>, vector<1x16x16x4xbf16>
    %10 = vector.shape_cast %9 : vector<1x16x16x4xbf16> to vector<16x16x4xbf16>
    %11 = vector.shape_cast %10 : vector<16x16x4xbf16> to vector<256x4xbf16>
    %c0_13 = arith.constant 0 : index
    %c1_14 = arith.constant 1 : index
    %c1_15 = arith.constant 1 : index
    %c0_16 = arith.constant 0 : index
    %12 = vector.load %arg1[%c0_13, %c1_14, %c1_15, %c0_16] : memref<1x18x18x4xbf16, #tpu.memory_space<vmem>>, vector<1x16x16x4xbf16>
    %13 = vector.shape_cast %12 : vector<1x16x16x4xbf16> to vector<16x16x4xbf16>
    %14 = vector.shape_cast %13 : vector<16x16x4xbf16> to vector<256x4xbf16>
    %c0_17 = arith.constant 0 : index
    %c1_18 = arith.constant 1 : index
    %c2_19 = arith.constant 2 : index
    %c0_20 = arith.constant 0 : index
    %15 = vector.load %arg1[%c0_17, %c1_18, %c2_19, %c0_20] : memref<1x18x18x4xbf16, #tpu.memory_space<vmem>>, vector<1x16x16x4xbf16>
    %16 = vector.shape_cast %15 : vector<1x16x16x4xbf16> to vector<16x16x4xbf16>
    %17 = vector.shape_cast %16 : vector<16x16x4xbf16> to vector<256x4xbf16>
    %c0_21 = arith.constant 0 : index
    %c2_22 = arith.constant 2 : index
    %c0_23 = arith.constant 0 : index
    %c0_24 = arith.constant 0 : index
    %18 = vector.load %arg1[%c0_21, %c2_22, %c0_23, %c0_24] : memref<1x18x18x4xbf16, #tpu.memory_space<vmem>>, vector<1x16x16x4xbf16>
    %19 = vector.shape_cast %18 : vector<1x16x16x4xbf16> to vector<16x16x4xbf16>
    %20 = vector.shape_cast %19 : vector<16x16x4xbf16> to vector<256x4xbf16>
    %c0_25 = arith.constant 0 : index
    %c2_26 = arith.constant 2 : index
    %c1_27 = arith.constant 1 : index
    %c0_28 = arith.constant 0 : index
    %21 = vector.load %arg1[%c0_25, %c2_26, %c1_27, %c0_28] : memref<1x18x18x4xbf16, #tpu.memory_space<vmem>>, vector<1x16x16x4xbf16>
    %22 = vector.shape_cast %21 : vector<1x16x16x4xbf16> to vector<16x16x4xbf16>
    %23 = vector.shape_cast %22 : vector<16x16x4xbf16> to vector<256x4xbf16>
    %c0_29 = arith.constant 0 : index
    %c2_30 = arith.constant 2 : index
    %c2_31 = arith.constant 2 : index
    %c0_32 = arith.constant 0 : index
    %24 = vector.load %arg1[%c0_29, %c2_30, %c2_31, %c0_32] : memref<1x18x18x4xbf16, #tpu.memory_space<vmem>>, vector<1x16x16x4xbf16>
    %25 = vector.shape_cast %24 : vector<1x16x16x4xbf16> to vector<16x16x4xbf16>
    %26 = vector.shape_cast %25 : vector<16x16x4xbf16> to vector<256x4xbf16>
    %27 = tpu.concatenate %2, %5, %8, %11, %14, %17, %20, %23, %26 in 1 : vector<256x4xbf16>, vector<256x4xbf16>, vector<256x4xbf16>, vector<256x4xbf16>, vector<256x4xbf16>, vector<256x4xbf16>, vector<256x4xbf16>, vector<256x4xbf16>, vector<256x4xbf16> -> vector<256x36xbf16>
    %c0_33 = arith.constant 0 : index
    %c0_34 = arith.constant 0 : index
    %28 = vector.load %arg2[%c0_33, %c0_34] : memref<36x4xbf16, #tpu.memory_space<vmem>>, vector<36x4xbf16>
    %cst = arith.constant dense<0.000000e+00> : vector<256x4xf32>
    %29 = tpu.matmul %27, %28, %cst {dimension_numbers = #tpu.dot_dimension_numbers<[1], [0], [0], [1], [0, 0, 1, 1], [], []>} : vector<256x36xbf16>, vector<36x4xbf16>, vector<256x4xf32> -> vector<256x4xf32>
    %c0_35 = arith.constant 0 : index
    %c0_36 = arith.constant 0 : index
    %30 = vector.load %arg3[%c0_35, %c0_36] : memref<1x4xf32, #tpu.memory_space<vmem>>, vector<1x4xf32>
    %31 = vector.broadcast %30 : vector<1x4xf32> to vector<256x4xf32>
    %32 = arith.mulf %29, %31 : vector<256x4xf32>
    %c0_37 = arith.constant 0 : index
    %c0_38 = arith.constant 0 : index
    %33 = vector.load %arg4[%c0_37, %c0_38] : memref<1x4xf32, #tpu.memory_space<vmem>>, vector<1x4xf32>
    %34 = vector.broadcast %33 : vector<1x4xf32> to vector<256x4xf32>
    %35 = arith.addf %32, %34 : vector<256x4xf32>
    %cst_39 = arith.constant 0.000000e+00 : f32
    %36 = vector.broadcast %cst_39 : f32 to vector<256x4xf32>
    %37 = arith.maximumf %35, %36 : vector<256x4xf32>
    %cst_40 = arith.constant 0.000000e+00 : bf16
    %38 = vector.broadcast %cst_40 : bf16 to vector<1x18x4xbf16>
    %cst_41 = arith.constant 0.000000e+00 : bf16
    %39 = vector.broadcast %cst_41 : bf16 to vector<18x1x4xbf16>
    %c0_42 = arith.constant 0 : index
    %c0_43 = arith.constant 0 : index
    %c0_44 = arith.constant 0 : index
    %40 = vector.load %arg12[%c0_42, %c0_43, %c0_44] : memref<18x18x4xbf16, #tpu.memory_space<vmem>>, vector<1x18x4xbf16>
    tpu.vector_store %arg12[%c0_42, %c0_43, %c0_44], %38 {strides = array<i32>} : memref<18x18x4xbf16, #tpu.memory_space<vmem>>, vector<1x18x4xbf16>,
    %c17 = arith.constant 17 : index
    %c0_45 = arith.constant 0 : index
    %c0_46 = arith.constant 0 : index
    %41 = vector.load %arg12[%c17, %c0_45, %c0_46] : memref<18x18x4xbf16, #tpu.memory_space<vmem>>, vector<1x18x4xbf16>
    tpu.vector_store %arg12[%c17, %c0_45, %c0_46], %38 {strides = array<i32>} : memref<18x18x4xbf16, #tpu.memory_space<vmem>>, vector<1x18x4xbf16>,
    %c0_47 = arith.constant 0 : index
    %c0_48 = arith.constant 0 : index
    %c0_49 = arith.constant 0 : index
    %42 = vector.load %arg12[%c0_47, %c0_48, %c0_49] : memref<18x18x4xbf16, #tpu.memory_space<vmem>>, vector<18x1x4xbf16>
    tpu.vector_store %arg12[%c0_47, %c0_48, %c0_49], %39 {strides = array<i32>} : memref<18x18x4xbf16, #tpu.memory_space<vmem>>, vector<18x1x4xbf16>,
    %c0_50 = arith.constant 0 : index
    %c17_51 = arith.constant 17 : index
    %c0_52 = arith.constant 0 : index
    %43 = vector.load %arg12[%c0_50, %c17_51, %c0_52] : memref<18x18x4xbf16, #tpu.memory_space<vmem>>, vector<18x1x4xbf16>
    tpu.vector_store %arg12[%c0_50, %c17_51, %c0_52], %39 {strides = array<i32>} : memref<18x18x4xbf16, #tpu.memory_space<vmem>>, vector<18x1x4xbf16>,
    %44 = arith.truncf %37 : vector<256x4xf32> to vector<256x4xbf16>
    %45 = vector.shape_cast %44 : vector<256x4xbf16> to vector<16x16x4xbf16>
    %c1_53 = arith.constant 1 : index
    %c1_54 = arith.constant 1 : index
    %c0_55 = arith.constant 0 : index
    %46 = vector.load %arg12[%c1_53, %c1_54, %c0_55] : memref<18x18x4xbf16, #tpu.memory_space<vmem>>, vector<16x16x4xbf16>
    tpu.vector_store %arg12[%c1_53, %c1_54, %c0_55], %45 {strides = array<i32>} : memref<18x18x4xbf16, #tpu.memory_space<vmem>>, vector<16x16x4xbf16>,
    %c0_56 = arith.constant 0 : index
    %c0_57 = arith.constant 0 : index
    %c0_58 = arith.constant 0 : index
    %47 = vector.load %arg12[%c0_56, %c0_57, %c0_58] : memref<18x18x4xbf16, #tpu.memory_space<vmem>>, vector<16x16x4xbf16>
    %48 = vector.shape_cast %47 : vector<16x16x4xbf16> to vector<256x4xbf16>
    %c0_59 = arith.constant 0 : index
    %c1_60 = arith.constant 1 : index
    %c0_61 = arith.constant 0 : index
    %49 = vector.load %arg12[%c0_59, %c1_60, %c0_61] : memref<18x18x4xbf16, #tpu.memory_space<vmem>>, vector<16x16x4xbf16>
    %50 = vector.shape_cast %49 : vector<16x16x4xbf16> to vector<256x4xbf16>
    %c0_62 = arith.constant 0 : index
    %c2_63 = arith.constant 2 : index
    %c0_64 = arith.constant 0 : index
    %51 = vector.load %arg12[%c0_62, %c2_63, %c0_64] : memref<18x18x4xbf16, #tpu.memory_space<vmem>>, vector<16x16x4xbf16>
    %52 = vector.shape_cast %51 : vector<16x16x4xbf16> to vector<256x4xbf16>
    %c1_65 = arith.constant 1 : index
    %c0_66 = arith.constant 0 : index
    %c0_67 = arith.constant 0 : index
    %53 = vector.load %arg12[%c1_65, %c0_66, %c0_67] : memref<18x18x4xbf16, #tpu.memory_space<vmem>>, vector<16x16x4xbf16>
    %54 = vector.shape_cast %53 : vector<16x16x4xbf16> to vector<256x4xbf16>
    %c1_68 = arith.constant 1 : index
    %c1_69 = arith.constant 1 : index
    %c0_70 = arith.constant 0 : index
    %55 = vector.load %arg12[%c1_68, %c1_69, %c0_70] : memref<18x18x4xbf16, #tpu.memory_space<vmem>>, vector<16x16x4xbf16>
    %56 = vector.shape_cast %55 : vector<16x16x4xbf16> to vector<256x4xbf16>
    %c1_71 = arith.constant 1 : index
    %c2_72 = arith.constant 2 : index
    %c0_73 = arith.constant 0 : index
    %57 = vector.load %arg12[%c1_71, %c2_72, %c0_73] : memref<18x18x4xbf16, #tpu.memory_space<vmem>>, vector<16x16x4xbf16>
    %58 = vector.shape_cast %57 : vector<16x16x4xbf16> to vector<256x4xbf16>
    %c2_74 = arith.constant 2 : index
    %c0_75 = arith.constant 0 : index
    %c0_76 = arith.constant 0 : index
    %59 = vector.load %arg12[%c2_74, %c0_75, %c0_76] : memref<18x18x4xbf16, #tpu.memory_space<vmem>>, vector<16x16x4xbf16>
    %60 = vector.shape_cast %59 : vector<16x16x4xbf16> to vector<256x4xbf16>
    %c2_77 = arith.constant 2 : index
    %c1_78 = arith.constant 1 : index
    %c0_79 = arith.constant 0 : index
    %61 = vector.load %arg12[%c2_77, %c1_78, %c0_79] : memref<18x18x4xbf16, #tpu.memory_space<vmem>>, vector<16x16x4xbf16>
    %62 = vector.shape_cast %61 : vector<16x16x4xbf16> to vector<256x4xbf16>
    %c2_80 = arith.constant 2 : index
    %c2_81 = arith.constant 2 : index
    %c0_82 = arith.constant 0 : index
    %63 = vector.load %arg12[%c2_80, %c2_81, %c0_82] : memref<18x18x4xbf16, #tpu.memory_space<vmem>>, vector<16x16x4xbf16>
    %64 = vector.shape_cast %63 : vector<16x16x4xbf16> to vector<256x4xbf16>
    %65 = tpu.concatenate %48, %50, %52, %54, %56, %58, %60, %62, %64 in 1 : vector<256x4xbf16>, vector<256x4xbf16>, vector<256x4xbf16>, vector<256x4xbf16>, vector<256x4xbf16>, vector<256x4xbf16>, vector<256x4xbf16>, vector<256x4xbf16>, vector<256x4xbf16> -> vector<256x36xbf16>
    %c0_83 = arith.constant 0 : index
    %c0_84 = arith.constant 0 : index
    %66 = vector.load %arg5[%c0_83, %c0_84] : memref<36x4xbf16, #tpu.memory_space<vmem>>, vector<36x4xbf16>
    %cst_85 = arith.constant dense<0.000000e+00> : vector<256x4xf32>
    %67 = tpu.matmul %65, %66, %cst_85 {dimension_numbers = #tpu.dot_dimension_numbers<[1], [0], [0], [1], [0, 0, 1, 1], [], []>} : vector<256x36xbf16>, vector<36x4xbf16>, vector<256x4xf32> -> vector<256x4xf32>
    %c0_86 = arith.constant 0 : index
    %c0_87 = arith.constant 0 : index
    %68 = vector.load %arg6[%c0_86, %c0_87] : memref<1x4xf32, #tpu.memory_space<vmem>>, vector<1x4xf32>
    %69 = vector.broadcast %68 : vector<1x4xf32> to vector<256x4xf32>
    %70 = arith.mulf %67, %69 : vector<256x4xf32>
    %c0_88 = arith.constant 0 : index
    %c0_89 = arith.constant 0 : index
    %71 = vector.load %arg7[%c0_88, %c0_89] : memref<1x4xf32, #tpu.memory_space<vmem>>, vector<1x4xf32>
    %72 = vector.broadcast %71 : vector<1x4xf32> to vector<256x4xf32>
    %73 = arith.addf %70, %72 : vector<256x4xf32>
    %c0_90 = arith.constant 0 : index
    %c1_91 = arith.constant 1 : index
    %c1_92 = arith.constant 1 : index
    %c0_93 = arith.constant 0 : index
    %74 = vector.load %arg1[%c0_90, %c1_91, %c1_92, %c0_93] : memref<1x18x18x4xbf16, #tpu.memory_space<vmem>>, vector<1x16x16x4xbf16>
    %75 = vector.shape_cast %74 : vector<1x16x16x4xbf16> to vector<16x16x4xbf16>
    %76 = vector.shape_cast %75 : vector<16x16x4xbf16> to vector<256x4xbf16>
    %77 = arith.extf %76 : vector<256x4xbf16> to vector<256x4xf32>
    %78 = arith.addf %73, %77 : vector<256x4xf32>
    %cst_94 = arith.constant 0.000000e+00 : f32
    %79 = vector.broadcast %cst_94 : f32 to vector<256x4xf32>
    %80 = arith.maximumf %78, %79 : vector<256x4xf32>
    %c0_95 = arith.constant 0 : index
    %c0_96 = arith.constant 0 : index
    %c0_97 = arith.constant 0 : index
    %81 = vector.load %arg11[%c0_95, %c0_96, %c0_97] : memref<1x256x4xf32, #tpu.memory_space<vmem>>, vector<1x256x4xf32>
    %82 = vector.shape_cast %81 : vector<1x256x4xf32> to vector<256x4xf32>
    %83 = vector.shape_cast %80 : vector<256x4xf32> to vector<1x256x4xf32>
    tpu.vector_store %arg11[%c0_95, %c0_96, %c0_97], %83 {strides = array<i32>} : memref<1x256x4xf32, #tpu.memory_space<vmem>>, vector<1x256x4xf32>,
    return
  }
  func.func @transform_0(%arg0: i32) -> (i32, i32, i32, i32) {
    %c0_i32 = arith.constant 0 : i32
    %c0_i32_0 = arith.constant 0 : i32
    %c0_i32_1 = arith.constant 0 : i32
    %c0_i32_2 = arith.constant 0 : i32
    return %arg0, %c0_i32, %c0_i32_0, %c0_i32_1 : i32, i32, i32, i32
  }
  func.func @transform_1(%arg0: i32) -> (i32, i32) {
    %c0_i32 = arith.constant 0 : i32
    %c0_i32_0 = arith.constant 0 : i32
    %c0_i32_1 = arith.constant 0 : i32
    return %c0_i32, %c0_i32_0 : i32, i32
  }
  func.func @transform_2(%arg0: i32) -> (i32, i32) {
    %c0_i32 = arith.constant 0 : i32
    %c0_i32_0 = arith.constant 0 : i32
    %c0_i32_1 = arith.constant 0 : i32
    return %c0_i32, %c0_i32_0 : i32, i32
  }
  func.func @transform_3(%arg0: i32) -> (i32, i32) {
    %c0_i32 = arith.constant 0 : i32
    %c0_i32_0 = arith.constant 0 : i32
    %c0_i32_1 = arith.constant 0 : i32
    return %c0_i32, %c0_i32_0 : i32, i32
  }
  func.func @transform_4(%arg0: i32) -> (i32, i32) {
    %c0_i32 = arith.constant 0 : i32
    %c0_i32_0 = arith.constant 0 : i32
    %c0_i32_1 = arith.constant 0 : i32
    return %c0_i32, %c0_i32_0 : i32, i32
  }
  func.func @transform_5(%arg0: i32) -> (i32, i32) {
    %c0_i32 = arith.constant 0 : i32
    %c0_i32_0 = arith.constant 0 : i32
    %c0_i32_1 = arith.constant 0 : i32
    return %c0_i32, %c0_i32_0 : i32, i32
  }
  func.func @transform_6(%arg0: i32) -> (i32, i32) {
    %c0_i32 = arith.constant 0 : i32
    %c0_i32_0 = arith.constant 0 : i32
    %c0_i32_1 = arith.constant 0 : i32
    return %c0_i32, %c0_i32_0 : i32, i32
  }
  func.func @transform_7(%arg0: i32) -> (i32, i32) {
    %c0_i32 = arith.constant 0 : i32
    %c0_i32_0 = arith.constant 0 : i32
    %c0_i32_1 = arith.constant 0 : i32
    return %c0_i32, %c0_i32_0 : i32, i32
  }
  func.func @transform_8(%arg0: i32) -> (i32, i32) {
    %c0_i32 = arith.constant 0 : i32
    %c0_i32_0 = arith.constant 0 : i32
    %c0_i32_1 = arith.constant 0 : i32
    return %c0_i32, %c0_i32_0 : i32, i32
  }
  func.func @transform_9(%arg0: i32) -> (i32, i32) {
    %c0_i32 = arith.constant 0 : i32
    %c0_i32_0 = arith.constant 0 : i32
    %c0_i32_1 = arith.constant 0 : i32
    return %c0_i32, %c0_i32_0 : i32, i32
  }
  func.func @transform_10(%arg0: i32) -> (i32, i32, i32) {
    %c0_i32 = arith.constant 0 : i32
    %c0_i32_0 = arith.constant 0 : i32
    %c0_i32_1 = arith.constant 0 : i32
    return %arg0, %c0_i32, %c0_i32_0 : i32, i32, i32
  }
}

</mosaic_0001>

<bundles_post_ra>
// kernel: tpu_custom_call.1
= control target key start
LH: loop header
LB: loop body
LE: loop exit
PB: predicated region body
PF: predicated region fallthrough
CT: control target
= control target key end

     0   :  { %s8681_s13 = smov 0   ;;  %s12470_s0 = inlined_call_operand.vmem [shape: bf16[2,18,18,4], index: 0, kind: input, shape index: {}]   ;;  %s12471_s1 = inlined_call_operand.vmem [shape: bf16[36,4], index: 1, kind: input, shape index: {}]   ;;  %s12472_s2 = inlined_call_operand.vmem [shape: f32[1,4], index: 2, kind: input, shape index: {}]   ;;  %s12473_s3 = inlined_call_operand.vmem [shape: f32[1,4], index: 3, kind: input, shape index: {}]   ;;  %s12474_s4 = inlined_call_operand.vmem [shape: bf16[36,4], index: 4, kind: input, shape index: {}]   ;;  %s12475_s5 = inlined_call_operand.vmem [shape: f32[1,4], index: 5, kind: input, shape index: {}]   ;;  %s12476_s6 = inlined_call_operand.vmem [shape: f32[1,4], index: 6, kind: input, shape index: {}]   ;;  %s12477_s7 = inlined_call_operand.vmem [shape: bf16[4,4], index: 7, kind: input, shape index: {}]   ;;  %s12478_s8 = inlined_call_operand.vmem [shape: f32[1,4], index: 8, kind: input, shape index: {}]   ;;  %s12479_s9 = inlined_call_operand.vmem [shape: f32[1,4], index: 9, kind: input, shape index: {}]   ;;  %s12480_s10 = inlined_call_operand.vmem [shape: f32[2,256,4], index: 10, kind: output, shape index: {}]  }
   0x1 LB: > { %s7746_s7 = sadd.s32 4294967295, %s8615_s13   ;;  %p7750_p0 = scmp.ge.s32.totalorder %s8615_s13, 1  ;;  %s8615_s13 = sphi %s8681_s13, %s20_s13  }
   0x2   : > { %p312_p1 = scmp.lt.s32.totalorder %s8615_s13, 3 }
   0x4   : > { %p313_p2 = pnand %p7750_p0, %p312_p1 }
   0x6   : > { %316 = sbr.rel (%p313_p2) target bundleno = 1220 (0x4c4), region = 60 }
   0xb   : > { %p350_p3 = scmp.lt.s32.totalorder %s7746_s7, 1  ;;  %vm409_vm0 = vsmask.f32 3328  ;;  %vm410_vm1 = vsmask.f32 7440  ;;  %s8617_s16 = smov 4  }
   0xc   : > { %vm8723_vm2 = vmor %vm409_vm0, %vm410_vm1  ;;  %vm860_vm3 = vcmask 1042432   ;;  %vm861_vm4 = vcmask 1046532   ;;  %s8618_s17 = smov 8   ;;  %s8619_s18 = smov 12   ;;  %vm2929_vm6 = vcmask 31744   ;;  %vm12484_vm7 = vcmask 64512  }
   0xd   : > { %s12604_s7 = smov (!%p350_p3, %s7746_s7), 1  ;;  %vm8925_vm5 = vmor %vm860_vm3, %vm861_vm4  ;;  %s8620_s19 = smov 24   ;;  %vm3011_vm8 = vcmask 97280   ;;  %vm12481_vm9 = vcmask 1041408   ;;  %vm12483_vm10 = vcmask 130048   ;;  %vm3077_vm11 = vcmask 162816  }
   0xe   : > { %s8567_s8 = smul.u32 216, %s12604_s7  ;;  %s8621_s20 = smov 20   ;;  %vm3110_vm12 = vcmask 195584   ;;  %vm3143_vm13 = vcmask 228352   ;;  %vm12485_vm14 = vcmask 261120   ;;  %vm3229_vm15 = vcmask 293888  }
   0xf   : > { %s8622_s21 = smov 16   ;;  %s8623_s22 = smov 32   ;;  %vm3462_vm0 = vcmask 24576   ;;  %vm12482_vm1 = vsmask.f32 256 }
  0x10   : > { %s8695_s15 = scalar_lea.vmem %s12470_s0, %s8567_s8  ;;  %s8624_s23 = smov 28   ;;  %vm10211_vm3 = vmand %vm3462_vm0, %vm12482_vm1  ;;  %vm3525_vm4 = vsmask.f32 7938  ;;  %vm3459_vm1 = vcmask 27648  }
  0x11   : > { %v369_v0 = vld [vmem:[%s8695_s15 + $0x30] sm:$0xf]  ;;  %v8699_v1 = vld [vmem:[%s8695_s15 + $0x34] sm:$0xf]  ;;  %v8702_v2 = vld [vmem:[%s8695_s15 + $0x38] sm:$0x1] }
  0x12   : > { %v509_v3 = vshrl.u32 %v369_v0, 16  ;;  %v512_v4 = vshll.u32 %v369_v0, 16  ;;  %v518_v5 = vshll.u32 %v8699_v1, 16  ;;  %v522_v6 = vshrl.u32 %v8699_v1, 16  ;;  %v365_v7 = vld [vmem:[%s8695_s15 + $0x18] sm:$0xf] }
  0x13   : > { %v528_v8 = vshll.u32 %v8702_v2, 16  ;;  %v8709_v9 = vld [vmem:[%s8695_s15 + $0x1c] sm:$0xf]  ;;  %v8712_v10 = vld [vmem:[%s8695_s15 + $0x20] sm:$0x1]  ;;  %v461_v11 = vshrl.u32 %v365_v7, 16 }
  0x14   : > { %v511_v12 = vrot.slane %v509_v3, 4  ;;  %v514_v13 = vrot.slane %v512_v4, 5  ;;  %v520_v14 = vrot.slane %v518_v5, 5  ;;  %v524_v15 = vrot.slane %v522_v6, 4  ;;  %v361_v16 = vld [vmem:[%s8695_s15] sm:$0xf] }
  0x15   : > { %v530_v17 = vrot.slane %v528_v8, 5  ;;  %v463_v18 = vrot.slane %v461_v11, 4  ;;  %v464_v19 = vshll.u32 %v365_v7, 16  ;;  %v470_v20 = vshll.u32 %v8709_v9, 16  ;;  %v8719_v25 = vld [vmem:[%s8695_s15 + $0x4] sm:$0xf] }
  0x16   : > { %v515_v21 = vor.u32 %v514_v13, %v511_v12  ;;  %v525_v22 = vor.u32 %v524_v15, %v520_v14  ;;  %v474_v23 = vshrl.u32 %v8709_v9, 16  ;;  %v480_v24 = vshll.u32 %v8712_v10, 16  ;;  %v8728_v36 = vld [vmem:[%s8695_s15 + $0x8] sm:$0x1]  ;;  %v371_v44 = vld [vmem:[%s8695_s15 + $0x3c] sm:$0xf] }
  0x17   : > { %v466_v27 = vrot.slane %v464_v19, 5  ;;  %v472_v28 = vrot.slane %v470_v20, 5  ;;  %v413_v29 = vshrl.u32 %v361_v16, 16  ;;  %v416_v30 = vshll.u32 %v361_v16, 16  ;;  %v8741_v56 = vld [vmem:[%s8695_s15 + $0x40] sm:$0xf] }
  0x18   : > { %v516_v31 = vrot.slane %v515_v21, 4  ;;  %v526_v32 = vrot.slane %v525_v22, 4  ;;  %v476_v33 = vrot.slane %v474_v23, 4  ;;  %v482_v34 = vrot.slane %v480_v24, 5  ;;  %v8746_v62 = vld [vmem:[%s8695_s15 + $0x44] sm:$0x1] }
  0x19   : > { %v467_v35 = vor.u32 %v466_v27, %v463_v18  ;;  %v415_v37 = vrot.slane %v413_v29, 4  ;;  %v418_v38 = vrot.slane %v416_v30, 5  ;;  %v422_v39 = vshll.u32 %v8719_v25, 16  ;;  %v367_v63 = vld [vmem:[%s8695_s15 + $0x24] sm:$0xf] }
  0x1a   : > { %v521_v40 = vsel %vm8723_vm2, %v516_v31, %v520_v14  ;;  %v531_v41 = vsel %vm8723_vm2, %v526_v32, %v530_v17  ;;  %v477_v42 = vor.u32 %v476_v33, %v472_v28  ;;  %v426_v43 = vshrl.u32 %v8719_v25, 16  ;;  %v8755_v12 = vld [vmem:[%s8695_s15 + $0x28] sm:$0xf]  ;;  %v8759_v16 = vld [vmem:[%s8695_s15 + $0x2c] sm:$0x1] }
  0x1b   : > { %v2265_v45 = vunpack.c.l.b16 %v521_v40  ;;  %v2266_v46 = vunpack.c.l.b16 %v531_v41  ;;  %v468_v47 = vrot.slane %v467_v35, 4  ;;  %v419_v48 = vor.u32 %v418_v38, %v415_v37  ;;  %v363_v22 = vld [vmem:[%s8695_s15 + $0xc] sm:$0xf]  ;;  %v8769_v37 = vld [vmem:[%s8695_s15 + $0x10] sm:$0xf] }
  0x1c   : > { %v478_v49 = vrot.slane %v477_v42, 4  ;;  %v424_v50 = vrot.slane %v422_v39, 5  ;;  %v428_v51 = vrot.slane %v426_v43, 4  ;;  %v432_v52 = vshll.u32 %v8728_v36, 16  ;;  %v8772_v43 = vld [vmem:[%s8695_s15 + $0x14] sm:$0x1] }
  0x1d   : > { %v2293_v53 = vpack.c.b16 %v2266_v46, %v2265_v45  ;;  %v473_v54 = vsel %vm8723_vm2, %v468_v47, %v472_v28  ;;  %v420_v55 = vrot.slane %v419_v48, 4  ;;  %v533_v57 = vshrl.u32 %v371_v44, 16  ;;  %v377_v48 = vld [vmem:[%s8695_s15 + $0x60] sm:$0xf] }
  0x1e   : > { %v483_v58 = vsel %vm8723_vm2, %v478_v49, %v482_v34  ;;  %v2261_v59 = vunpack.c.l.b16 %v473_v54  ;;  %v429_v60 = vor.u32 %v428_v51, %v424_v50  ;;  %v434_v61 = vrot.slane %v432_v52, 5 }
  0x1f   : > { %2313 = vrot.lane.b32.xlu2 %v2293_v53, %s8617_s16  ;;  %v2262_v0 = vunpack.c.l.b16 %v483_v58  ;;  %v425_v3 = vsel %vm8723_vm2, %v420_v55, %v424_v50  ;;  %v535_v4 = vrot.slane %v533_v57, 4  ;;  %v536_v5 = vshll.u32 %v371_v44, 16 }
  0x20   : > { %v430_v6 = vrot.slane %v429_v60, 4  ;;  %v2257_v7 = vunpack.c.l.b16 %v425_v3  ;;  %v542_v8 = vshll.u32 %v8741_v56, 16  ;;  %v546_v11 = vshrl.u32 %v8741_v56, 16 }
  0x21   : > { %v2291_v13 = vpack.c.b16 %v2262_v0, %v2261_v59  ;;  %v538_v14 = vrot.slane %v536_v5, 5  ;;  %v552_v15 = vshll.u32 %v8746_v62, 16  ;;  %v485_v17 = vshrl.u32 %v367_v63, 16 }
  0x22   : > { %v435_v18 = vsel %vm8723_vm2, %v430_v6, %v434_v61  ;;  %v544_v19 = vrot.slane %v542_v8, 5  ;;  %v548_v20 = vrot.slane %v546_v11, 4  ;;  %v488_v21 = vshll.u32 %v367_v63, 16  ;;  %v8786_v61 = vld [vmem:[%s8695_s15 + $0x64] sm:$0xf] }
  0x23   : > { %2309 = vrot.lane.b32.xlu1 %v2291_v13, %s8617_s16  ;;  %v2258_v23 = vunpack.c.l.b16 %v435_v18  ;;  %v539_v24 = vor.u32 %v538_v14, %v535_v4  ;;  %v554_v27 = vrot.slane %v552_v15, 5  ;;  %v487_v28 = vrot.slane %v485_v17, 4  ;;  %v8789_v6 = vld [vmem:[%s8695_s15 + $0x68] sm:$0x1] }
  0x24   : > { %v549_v29 = vor.u32 %v548_v20, %v544_v19  ;;  %v490_v30 = vrot.slane %v488_v21, 5  ;;  %v494_v31 = vshll.u32 %v8755_v12, 16  ;;  %v498_v32 = vshrl.u32 %v8755_v12, 16 }
  0x25   : > { %v2289_v33 = vpack.c.b16 %v2258_v23, %v2257_v7  ;;  %v540_v34 = vrot.slane %v539_v24, 4  ;;  %v504_v35 = vshll.u32 %v8759_v16, 16  ;;  %v437_v38 = vshrl.u32 %v363_v22, 16  ;;  %v375_v7 = vld [vmem:[%s8695_s15 + $0x54] sm:$0xf] }
  0x26   : > { %v550_v39 = vrot.slane %v549_v29, 4  ;;  %v491_v40 = vor.u32 %v490_v30, %v487_v28  ;;  %v496_v41 = vrot.slane %v494_v31, 5  ;;  %v500_v42 = vrot.slane %v498_v32, 4  ;;  %v8799_v23 = vld [vmem:[%s8695_s15 + $0x58] sm:$0xf] }
  0x27   : > { %2305 = vrot.lane.b32.xlu0 %v2289_v33, %s8617_s16  ;;  %v545_v44 = vsel %vm8723_vm2, %v540_v34, %v544_v19  ;;  %v506_v45 = vrot.slane %v504_v35, 5  ;;  %v439_v46 = vrot.slane %v437_v38, 4  ;;  %v440_v47 = vshll.u32 %v363_v22, 16  ;;  %v8804_v31 = vld [vmem:[%s8695_s15 + $0x5c] sm:$0x1] }
  0x28   : > { %v555_v49 = vsel %vm8723_vm2, %v550_v39, %v554_v27  ;;  %v2267_v50 = vunpack.c.l.b16 %v545_v44  ;;  %v492_v51 = vrot.slane %v491_v40, 4  ;;  %v501_v52 = vor.u32 %v500_v42, %v496_v41  ;;  %v373_v42 = vld [vmem:[%s8695_s15 + $0x48] sm:$0xf] }
  0x29   : > { %v2268_v53 = vunpack.c.l.b16 %v555_v49  ;;  %v442_v54 = vrot.slane %v440_v47, 5  ;;  %v446_v55 = vshll.u32 %v8769_v37, 16  ;;  %v450_v57 = vshrl.u32 %v8769_v37, 16 }
  0x2a   : > { %v497_v58 = vsel %vm8723_vm2, %v492_v51, %v496_v41  ;;  %v502_v59 = vrot.slane %v501_v52, 4  ;;  %v456_v60 = vshll.u32 %v8772_v43, 16  ;;  %v605_v63 = vshrl.u32 %v377_v48, 16 }
  0x2b   : > { %v2294_v0 = vpack.c.b16 %v2268_v53, %v2267_v50  ;;  %v2263_v3 = vunpack.c.l.b16 %v497_v58  ;;  %v443_v4 = vor.u32 %v442_v54, %v439_v46  ;;  %v448_v5 = vrot.slane %v446_v55, 5  ;;  %v8814_v55 = vld [vmem:[%s8695_s15 + $0x4c] sm:$0xf] }
  0x2c   : > { %v507_v8 = vsel %vm8723_vm2, %v502_v59, %v506_v45  ;;  %v452_v11 = vrot.slane %v450_v57, 4  ;;  %v458_v13 = vrot.slane %v456_v60, 5  ;;  %v607_v14 = vrot.slane %v605_v63, 4  ;;  %v8819_v63 = vld [vmem:[%s8695_s15 + $0x50] sm:$0x1] }
  0x2d   : > { %2315 = vrot.lane.b32.xlu2 %v2294_v0, %s8617_s16  ;;  %v2264_v15 = vunpack.c.l.b16 %v507_v8  ;;  %v444_v17 = vrot.slane %v443_v4, 4  ;;  %v608_v18 = vshll.u32 %v377_v48, 16  ;;  %v614_v19 = vshll.u32 %v8786_v61, 16 }
  0x2e   : > { %v453_v20 = vor.u32 %v452_v11, %v448_v5  ;;  %v618_v21 = vshrl.u32 %v8786_v61, 16  ;;  %v624_v22 = vshll.u32 %v8789_v6, 16  ;;  %v581_v24 = vshrl.u32 %v375_v7, 16 }
  0x2f   : > { %v2292_v27 = vpack.c.b16 %v2264_v15, %v2263_v3  ;;  %v449_v28 = vsel %vm8723_vm2, %v444_v17, %v448_v5  ;;  %v610_v29 = vrot.slane %v608_v18, 5  ;;  %v616_v30 = vrot.slane %v614_v19, 5  ;;  %v383_v3 = vld [vmem:[%s8695_s15 + $0x84] sm:$0xf] }
  0x30   : > { %v454_v32 = vrot.slane %v453_v20, 4  ;;  %v2259_v33 = vunpack.c.l.b16 %v449_v28  ;;  %v620_v34 = vrot.slane %v618_v21, 4  ;;  %v626_v35 = vrot.slane %v624_v22, 5  ;;  %v8831_v28 = vld [vmem:[%s8695_s15 + $0x88] sm:$0xf] }
  0x31   : > { %2311 = vrot.lane.b32.xlu1 %v2292_v27, %s8617_s16  ;;  %v611_v38 = vor.u32 %v610_v29, %v607_v14  ;;  %v583_v39 = vrot.slane %v581_v24, 4  ;;  %v584_v40 = vshll.u32 %v375_v7, 16  ;;  %v590_v41 = vshll.u32 %v8799_v23, 16  ;;  %v8834_v29 = vld [vmem:[%s8695_s15 + $0x8c] sm:$0x1] }
  0x32   : > { %v459_v44 = vsel %vm8723_vm2, %v454_v32, %v458_v13  ;;  %v621_v45 = vor.u32 %v620_v34, %v616_v30  ;;  %v594_v46 = vshrl.u32 %v8799_v23, 16  ;;  %v600_v47 = vshll.u32 %v8804_v31, 16 }
  0x33   : > { %v2260_v48 = vunpack.c.l.b16 %v459_v44  ;;  %v612_v49 = vrot.slane %v611_v38, 4  ;;  %v586_v50 = vrot.slane %v584_v40, 5  ;;  %v592_v51 = vrot.slane %v590_v41, 5 }
  0x34   : > { %v622_v52 = vrot.slane %v621_v45, 4  ;;  %v596_v53 = vrot.slane %v594_v46, 4  ;;  %v602_v54 = vrot.slane %v600_v47, 5  ;;  %v557_v57 = vshrl.u32 %v373_v42, 16 }
  0x35   : > { %v2290_v58 = vpack.c.b16 %v2260_v48, %v2259_v33  ;;  %v617_v59 = vsel %vm8723_vm2, %v612_v49, %v616_v30  ;;  %v587_v60 = vor.u32 %v586_v50, %v583_v39  ;;  %v560_v0 = vshll.u32 %v373_v42, 16  ;;  %v8846_v50 = vld [vmem:[%s8695_s15 + $0x7c] sm:$0xf] }
  0x36   : > { %v627_v4 = vsel %vm8723_vm2, %v622_v52, %v626_v35  ;;  %v2273_v5 = vunpack.c.l.b16 %v617_v59  ;;  %v597_v7 = vor.u32 %v596_v53, %v592_v51  ;;  %v559_v8 = vrot.slane %v557_v57, 4  ;;  %v381_v35 = vld [vmem:[%s8695_s15 + $0x78] sm:$0xf] }
  0x37   : > { %2307 = vrot.lane.b32.xlu0 %v2290_v58, %s8617_s16  ;;  %v2274_v11 = vunpack.c.l.b16 %v627_v4  ;;  %v588_v13 = vrot.slane %v587_v60, 4  ;;  %v562_v14 = vrot.slane %v560_v0, 5  ;;  %v566_v15 = vshll.u32 %v8814_v55, 16  ;;  %v8849_v58 = vld [vmem:[%s8695_s15 + $0x80] sm:$0x1] }
  0x38   : > { %v598_v17 = vrot.slane %v597_v7, 4  ;;  %v570_v18 = vshrl.u32 %v8814_v55, 16  ;;  %v576_v19 = vshll.u32 %v8819_v63, 16  ;;  %v677_v20 = vshrl.u32 %v383_v3, 16  ;;  %v379_v4 = vld [vmem:[%s8695_s15 + $0x6c] sm:$0xf] }
  0x39   : > { %v2297_v21 = vpack.c.b16 %v2274_v11, %v2273_v5  ;;  %v593_v22 = vsel %vm8723_vm2, %v588_v13, %v592_v51  ;;  %v563_v24 = vor.u32 %v562_v14, %v559_v8  ;;  %v568_v27 = vrot.slane %v566_v15, 5 }
  0x3a   : > { %v603_v30 = vsel %vm8723_vm2, %v598_v17, %v602_v54  ;;  %v2271_v32 = vunpack.c.l.b16 %v593_v22  ;;  %v572_v33 = vrot.slane %v570_v18, 4  ;;  %v578_v34 = vrot.slane %v576_v19, 5 }
  0x3b   : > { %2321 = vrot.lane.b32.xlu2 %v2297_v21, %s8617_s16  ;;  %v2272_v38 = vunpack.c.l.b16 %v603_v30  ;;  %v564_v39 = vrot.slane %v563_v24, 4  ;;  %v679_v40 = vrot.slane %v677_v20, 4  ;;  %v680_v41 = vshll.u32 %v383_v3, 16  ;;  %v8859_v21 = vld [vmem:[%s8695_s15 + $0x70] sm:$0xf] }
  0x3c   : > { %v573_v42 = vor.u32 %v572_v33, %v568_v27  ;;  %v686_v44 = vshll.u32 %v8831_v28, 16  ;;  %v690_v45 = vshrl.u32 %v8831_v28, 16  ;;  %v696_v46 = vshll.u32 %v8834_v29, 16  ;;  %v8864_v33 = vld [vmem:[%s8695_s15 + $0x74] sm:$0x1] }
  0x3d   : > { %v2296_v47 = vpack.c.b16 %v2272_v38, %v2271_v32  ;;  %v569_v48 = vsel %vm8723_vm2, %v564_v39, %v568_v27  ;;  %v682_v49 = vrot.slane %v680_v41, 5  ;;  %v653_v51 = vshrl.u32 %v381_v35, 16 }
  0x3e   : > { %v574_v52 = vrot.slane %v573_v42, 4  ;;  %v2269_v53 = vunpack.c.l.b16 %v569_v48  ;;  %v688_v54 = vrot.slane %v686_v44, 5  ;;  %v692_v57 = vrot.slane %v690_v45, 4 }
  0x3f   : > { %2319 = vrot.lane.b32.xlu1 %v2296_v47, %s8617_s16  ;;  %v683_v59 = vor.u32 %v682_v49, %v679_v40  ;;  %v698_v60 = vrot.slane %v696_v46, 5  ;;  %v655_v0 = vrot.slane %v653_v51, 4  ;;  %v656_v3 = vshll.u32 %v381_v35, 16 }
  0x40   : > { %v579_v5 = vsel %vm8723_vm2, %v574_v52, %v578_v34  ;;  %v693_v7 = vor.u32 %v692_v57, %v688_v54  ;;  %v662_v8 = vshll.u32 %v8846_v50, 16  ;;  %v666_v11 = vshrl.u32 %v8846_v50, 16  ;;  %v389_v34 = vld [vmem:[%s8695_s15 + $0xa8] sm:$0xf]  ;;  %v8876_v57 = vld [vmem:[%s8695_s15 + $0xac] sm:$0xf] }
  0x41   : > { %v2270_v13 = vunpack.c.l.b16 %v579_v5  ;;  %v684_v14 = vrot.slane %v683_v59, 4  ;;  %v658_v15 = vrot.slane %v656_v3, 5  ;;  %v672_v17 = vshll.u32 %v8849_v58, 16  ;;  %v8879_v59 = vld [vmem:[%s8695_s15 + $0xb0] sm:$0x1] }
  0x42   : > { %v694_v18 = vrot.slane %v693_v7, 4  ;;  %v664_v19 = vrot.slane %v662_v8, 5  ;;  %v668_v20 = vrot.slane %v666_v11, 4  ;;  %v629_v22 = vshrl.u32 %v379_v4, 16  ;;  %v387_v5 = vld [vmem:[%s8695_s15 + $0x9c] sm:$0xf] }
  0x43   : > { %v2295_v24 = vpack.c.b16 %v2270_v13, %v2269_v53  ;;  %v689_v27 = vsel %vm8723_vm2, %v684_v14, %v688_v54  ;;  %v659_v30 = vor.u32 %v658_v15, %v655_v0  ;;  %v674_v32 = vrot.slane %v672_v17, 5 }
  0x44   : > { %v699_v35 = vsel %vm8723_vm2, %v694_v18, %v698_v60  ;;  %v2279_v38 = vunpack.c.l.b16 %v689_v27  ;;  %v669_v39 = vor.u32 %v668_v20, %v664_v19  ;;  %v631_v40 = vrot.slane %v629_v22, 4 }
  0x45   : > { %2317 = vrot.lane.b32.xlu0 %v2295_v24, %s8617_s16  ;;  %v2280_v41 = vunpack.c.l.b16 %v699_v35  ;;  %v660_v42 = vrot.slane %v659_v30, 4  ;;  %v632_v44 = vshll.u32 %v379_v4, 16  ;;  %v638_v45 = vshll.u32 %v8859_v21, 16  ;;  %v8889_v24 = vld [vmem:[%s8695_s15 + $0xa0] sm:$0xf] }
  0x46   : > { %v670_v46 = vrot.slane %v669_v39, 4  ;;  %v642_v47 = vshrl.u32 %v8859_v21, 16  ;;  %v648_v48 = vshll.u32 %v8864_v33, 16  ;;  %v749_v49 = vshrl.u32 %v389_v34, 16 }
  0x47   : > { %v2300_v51 = vpack.c.b16 %v2280_v41, %v2279_v38  ;;  %v665_v52 = vsel %vm8723_vm2, %v660_v42, %v664_v19  ;;  %v634_v53 = vrot.slane %v632_v44, 5  ;;  %v640_v54 = vrot.slane %v638_v45, 5  ;;  %v385_v44 = vld [vmem:[%s8695_s15 + $0x90] sm:$0xf] }
  0x48   : > { %v675_v60 = vsel %vm8723_vm2, %v670_v46, %v674_v32  ;;  %v2277_v0 = vunpack.c.l.b16 %v665_v52  ;;  %v644_v3 = vrot.slane %v642_v47, 4  ;;  %v650_v4 = vrot.slane %v648_v48, 5 }
  0x49   : > { %2327 = vrot.lane.b32.xlu2 %v2300_v51, %s8617_s16  ;;  %v2278_v7 = vunpack.c.l.b16 %v675_v60  ;;  %v635_v8 = vor.u32 %v634_v53, %v631_v40  ;;  %v751_v11 = vrot.slane %v749_v49, 4  ;;  %v752_v13 = vshll.u32 %v389_v34, 16  ;;  %v8895_v40 = vld [vmem:[%s8695_s15 + $0xa4] sm:$0x1] }
  0x4a   : > { %v645_v14 = vor.u32 %v644_v3, %v640_v54  ;;  %v758_v15 = vshll.u32 %v8876_v57, 16  ;;  %v762_v17 = vshrl.u32 %v8876_v57, 16  ;;  %v768_v18 = vshll.u32 %v8879_v59, 16 }
  0x4b   : > { %v2299_v19 = vpack.c.b16 %v2278_v7, %v2277_v0  ;;  %v636_v20 = vrot.slane %v635_v8, 4  ;;  %v754_v22 = vrot.slane %v752_v13, 5  ;;  %v725_v27 = vshrl.u32 %v387_v5, 16  ;;  %v8909_v13 = vld [vmem:[%s8695_s15 + $0x98] sm:$0x1] }
  0x4c   : > { %v646_v30 = vrot.slane %v645_v14, 4  ;;  %v760_v32 = vrot.slane %v758_v15, 5  ;;  %v764_v35 = vrot.slane %v762_v17, 4  ;;  %v770_v38 = vrot.slane %v768_v18, 5 }
  0x4d   : > { %2325 = vrot.lane.b32.xlu1 %v2299_v19, %s8617_s16  ;;  %v641_v34 = vsel %vm8723_vm2, %v636_v20, %v640_v54  ;;  %v755_v39 = vor.u32 %v754_v22, %v751_v11  ;;  %v727_v41 = vrot.slane %v725_v27, 4  ;;  %v728_v42 = vshll.u32 %v387_v5, 16  ;;  %v8906_v11 = vld [vmem:[%s8695_s15 + $0x94] sm:$0xf] }
  0x4e   : > { %v651_v45 = vsel %vm8723_vm2, %v646_v30, %v650_v4  ;;  %v2275_v46 = vunpack.c.l.b16 %v641_v34  ;;  %v765_v47 = vor.u32 %v764_v35, %v760_v32  ;;  %v734_v48 = vshll.u32 %v8889_v24, 16  ;;  %v797_v34 = vld [vmem:[%s8695_s15 + $0xc] sm:$0xe] }
  0x4f   : > { %v2276_v49 = vunpack.c.l.b16 %v651_v45  ;;  %v756_v51 = vrot.slane %v755_v39, 4  ;;  %v730_v52 = vrot.slane %v728_v42, 5  ;;  %v738_v53 = vshrl.u32 %v8889_v24, 16 }
  0x50   : > { %v766_v54 = vrot.slane %v765_v47, 4  ;;  %v736_v60 = vrot.slane %v734_v48, 5  ;;  %v744_v0 = vshll.u32 %v8895_v40, 16  ;;  %v701_v3 = vshrl.u32 %v385_v44, 16 }
  0x51   : > { %v2298_v5 = vpack.c.b16 %v2276_v49, %v2275_v46  ;;  %v761_v4 = vsel %vm8723_vm2, %v756_v51, %v760_v32  ;;  %v731_v7 = vor.u32 %v730_v52, %v727_v41  ;;  %v740_v8 = vrot.slane %v738_v53, 4  ;;  %v796_v49 = vld [vmem:[%s8695_s15] sm:$0xe] }
  0x52   : > { %v771_v14 = vsel %vm8723_vm2, %v766_v54, %v770_v38  ;;  %v2285_v15 = vunpack.c.l.b16 %v761_v4  ;;  %v746_v17 = vrot.slane %v744_v0, 5  ;;  %v703_v18 = vrot.slane %v701_v3, 4 }
  0x53   : > { %2323 = vrot.lane.b32.xlu0 %v2298_v5, %s8617_s16  ;;  %v2286_v19 = vunpack.c.l.b16 %v771_v14  ;;  %v732_v20 = vrot.slane %v731_v7, 4  ;;  %v741_v22 = vor.u32 %v740_v8, %v736_v60  ;;  %v704_v27 = vshll.u32 %v385_v44, 16 }
  0x54   : > { %v710_v30 = vshll.u32 %v8906_v11, 16  ;;  %v714_v32 = vshrl.u32 %v8906_v11, 16  ;;  %v720_v35 = vshll.u32 %v8909_v13, 16  ;;  %v7755_v52 = vrot.slane %v797_v34, 9 }
  0x55   : > { %v2303_v39 = vpack.c.b16 %v2286_v19, %v2285_v15  ;;  %v737_v38 = vsel %vm8723_vm2, %v732_v20, %v736_v60  ;;  %v742_v41 = vrot.slane %v741_v22, 4  ;;  %v706_v42 = vrot.slane %v704_v27, 5  ;;  %v391_v19 = vld [vmem:[%s8695_s15 + $0xb4] sm:$0xf]  ;;  %v8411_v60 = vld [vmem:[%s8695_s15 + $0x10] sm:$0xf] }
  0x56   : > { %v2283_v45 = vunpack.c.l.b16 %v737_v38  ;;  %v712_v46 = vrot.slane %v710_v30, 5  ;;  %v716_v47 = vrot.slane %v714_v32, 4  ;;  %v722_v48 = vrot.slane %v720_v35, 5  ;;  %v8949_v35 = vld [vmem:[%s8695_s15 + $0xbc] sm:$0x1] }
  0x57   : > { %2333 = vrot.lane.b32.xlu2 %v2303_v39, %s8617_s16  ;;  %v747_v44 = vsel %vm8723_vm2, %v742_v41, %v746_v17  ;;  %v707_v51 = vor.u32 %v706_v42, %v703_v18  ;;  %v872_v0 = vrot.slane %v8769_v37, 5  ;;  %v875_v3 = vrot.slane %v8772_v43, 5 }
  0x58   : > { %v2284_v53 = vunpack.c.l.b16 %v747_v44  ;;  %v717_v54 = vor.u32 %v716_v47, %v712_v46  ;;  %v7754_v4 = vrot.slane %v796_v49, 9  ;;  %v865_v7 = vrot.slane %v8719_v25, 5  ;;  %v8941_v25 = vld [vmem:[%s8695_s15 + $0xb8] sm:$0xf] }
  0x59   : > { %v708_v5 = vrot.slane %v707_v51, 4  ;;  %v868_v8 = vrot.slane %v8728_v36, 5  ;;  %v873_v17 = vsel %vm8925_vm5, %v7755_v52, %v872_v0  ;;  %v874_v18 = vrot.slane %v872_v0, 4 }
  0x5a   : > { %v2302_v14 = vpack.c.b16 %v2284_v53, %v2283_v45  ;;  %v718_v15 = vrot.slane %v717_v54, 4  ;;  %v2339_v37 = vunpack.c.l.b16 %v873_v17  ;;  %v866_v43 = vsel %vm8925_vm5, %v7754_v4, %v865_v7  ;;  %v799_v53 = vld [vmem:[%s8695_s15 + $0x24] sm:$0xe]  ;;  %v798_v4 = vld [vmem:[%s8695_s15 + $0x18] sm:$0xe] }
  0x5b   : > { %v713_v20 = vsel %vm8723_vm2, %v708_v5, %v712_v46  ;;  %v867_v22 = vrot.slane %v865_v7, 4  ;;  %v876_v30 = vsel %vm8925_vm5, %v874_v18, %v875_v3  ;;  %v2337_v32 = vunpack.c.l.b16 %v866_v43 }
  0x5c   : > { %2331 = vrot.lane.b32.xlu1 %v2302_v14, %s8617_s16  ;;  %v723_v36 = vsel %vm8723_vm2, %v718_v15, %v722_v48  ;;  %v2281_v27 = vunpack.c.l.b16 %v713_v20  ;;  %v2340_v39 = vunpack.c.l.b16 %v876_v30  ;;  %v773_v41 = vshrl.u32 %v391_v19, 16  ;;  %v800_v48 = vld [vmem:[%s8695_s15 + $0x30] sm:$0xe] }
  0x5d   : > { %v2282_v34 = vunpack.c.l.b16 %v723_v36  ;;  %v869_v38 = vsel %vm8925_vm5, %v867_v22, %v868_v8  ;;  %v776_v45 = vshll.u32 %v391_v19, 16  ;;  %v782_v46 = vshll.u32 %v8941_v25, 16 }
  0x5e   : > { %v2338_v42 = vunpack.c.l.b16 %v869_v38  ;;  %v786_v47 = vshrl.u32 %v8941_v25, 16  ;;  %v2370_v44 = vpack.c.b16 %v2340_v39, %v2339_v37  ;;  %v775_v51 = vrot.slane %v773_v41, 4 }
  0x5f   : > { %v2301_v49 = vpack.c.b16 %v2282_v34, %v2281_v27  ;;  %v792_v52 = vshll.u32 %v8949_v35, 16  ;;  %v778_v0 = vrot.slane %v776_v45, 5  ;;  %v784_v3 = vrot.slane %v782_v46, 5  ;;  %v803_v45 = vld [vmem:[%s8695_s15 + $0x54] sm:$0xe] }
  0x60   : > { %v2369_v54 = vpack.c.b16 %v2338_v42, %v2337_v32  ;;  %v788_v5 = vrot.slane %v786_v47, 4  ;;  %2387 = vrot.lane.b32.xlu2 %v2370_v44, %s8618_s17  ;;  %v7758_v8 = vrot.slane %v800_v48, 9  ;;  %v893_v14 = vrot.slane %v8699_v1, 5 }
  0x61   : > { %2329 = vrot.lane.b32.xlu0 %v2301_v49, %s8617_s16  ;;  %v794_v7 = vrot.slane %v792_v52, 5  ;;  %v896_v15 = vrot.slane %v8702_v2, 5  ;;  %v779_v17 = vor.u32 %v778_v0, %v775_v51  ;;  %v7757_v19 = vrot.slane %v799_v53, 9 }
  0x62   : > { %v789_v18 = vor.u32 %v788_v5, %v784_v3  ;;  %v886_v20 = vrot.slane %v8755_v12, 5  ;;  %v894_v37 = vsel %vm8925_vm5, %v7758_v8, %v893_v14  ;;  %v895_v43 = vrot.slane %v893_v14, 4  ;;  %v801_v5 = vld [vmem:[%s8695_s15 + $0x3c] sm:$0xe] }
  0x63   : > { %v889_v22 = vrot.slane %v8759_v16, 5  ;;  %v7756_v36 = vrot.slane %v798_v4, 9  ;;  %v780_v27 = vrot.slane %v779_v17, 4  ;;  %v2345_v1 = vunpack.c.l.b16 %v894_v37 }
  0x64   : > { %2385 = vrot.lane.b32.xlu1 %v2369_v54, %s8618_s17  ;;  %v790_v30 = vrot.slane %v789_v18, 4  ;;  %v887_v2 = vsel %vm8925_vm5, %v7757_v19, %v886_v20  ;;  %v897_v12 = vsel %vm8925_vm5, %v895_v43, %v896_v15  ;;  %v888_v32 = vrot.slane %v886_v20, 4  ;;  %v806_v18 = vld [vmem:[%s8695_s15 + $0x78] sm:$0xe] }
  0x65   : > { %v2343_v34 = vunpack.c.l.b16 %v887_v2  ;;  %v879_v39 = vrot.slane %v8709_v9, 5  ;;  %v785_v16 = vsel %vm8723_vm2, %v780_v27, %v784_v3  ;;  %v2346_v41 = vunpack.c.l.b16 %v897_v12  ;;  %v802_v9 = vld [vmem:[%s8695_s15 + $0x48] sm:$0xe] }
  0x66   : > { %v795_v38 = vsel %vm8723_vm2, %v790_v30, %v794_v7  ;;  %v882_v42 = vrot.slane %v8712_v10, 5  ;;  %v2287_v46 = vunpack.c.l.b16 %v785_v16  ;;  %v890_v48 = vsel %vm8925_vm5, %v888_v32, %v889_v22  ;;  %v805_v30 = vld [vmem:[%s8695_s15 + $0x6c] sm:$0xe] }
  0x67   : > { %v2288_v47 = vunpack.c.l.b16 %v795_v38  ;;  %v880_v49 = vsel %vm8925_vm5, %v7756_v36, %v879_v39  ;;  %v2373_v44 = vpack.c.b16 %v2346_v41, %v2345_v1  ;;  %v2344_v51 = vunpack.c.l.b16 %v890_v48 }
  0x68   : > { %v881_v52 = vrot.slane %v879_v39, 4  ;;  %v2341_v53 = vunpack.c.l.b16 %v880_v49  ;;  %v7761_v0 = vrot.slane %v803_v45, 9  ;;  %v914_v3 = vrot.slane %v8799_v23, 5 }
  0x69   : > { %v2304_v54 = vpack.c.b16 %v2288_v47, %v2287_v46  ;;  %v917_v10 = vrot.slane %v8804_v31, 5  ;;  %2393 = vrot.lane.b32.xlu2 %v2373_v44, %s8618_s17  ;;  %v2372_v4 = vpack.c.b16 %v2344_v51, %v2343_v34  ;;  %v7760_v8 = vrot.slane %v802_v9, 9 }
  0x6a   : > { %v883_v7 = vsel %vm8925_vm5, %v881_v52, %v882_v42  ;;  %v907_v14 = vrot.slane %v8814_v55, 5  ;;  %v915_v17 = vsel %vm8925_vm5, %v7761_v0, %v914_v3  ;;  %v916_v23 = vrot.slane %v914_v3, 4  ;;  %v804_v42 = vld [vmem:[%s8695_s15 + $0x60] sm:$0xe]  ;;  %v808_v3 = vld [vmem:[%s8695_s15 + $0x90] sm:$0xe] }
  0x6b   : > { %2335 = vrot.lane.b32.xlu0 %v2304_v54, %s8617_s16  ;;  %v2342_v15 = vunpack.c.l.b16 %v883_v7  ;;  %v910_v31 = vrot.slane %v8819_v63, 5  ;;  %v2351_v19 = vunpack.c.l.b16 %v915_v17  ;;  %v7759_v43 = vrot.slane %v801_v5, 9 }
  0x6c   : > { %2391 = vrot.lane.b32.xlu1 %v2372_v4, %s8618_s17  ;;  %v908_v20 = vsel %vm8925_vm5, %v7760_v8, %v907_v14  ;;  %v909_v37 = vrot.slane %v907_v14, 4  ;;  %v918_v22 = vsel %vm8925_vm5, %v916_v23, %v917_v10  ;;  %v900_v27 = vrot.slane %v8741_v56, 5 }
  0x6d   : > { %v2371_v55 = vpack.c.b16 %v2342_v15, %v2341_v53  ;;  %v2349_v36 = vunpack.c.l.b16 %v908_v20  ;;  %v2352_v1 = vunpack.c.l.b16 %v918_v22  ;;  %v903_v2 = vrot.slane %v8746_v62, 5  ;;  %v807_v15 = vld [vmem:[%s8695_s15 + $0x84] sm:$0xe] }
  0x6e   : > { %v911_v63 = vsel %vm8925_vm5, %v909_v37, %v910_v31  ;;  %v7764_v12 = vrot.slane %v806_v18, 9  ;;  %v901_v34 = vsel %vm8925_vm5, %v7759_v43, %v900_v27  ;;  %v902_v39 = vrot.slane %v900_v27, 4 }
  0x6f   : > { %v2350_v32 = vunpack.c.l.b16 %v911_v63  ;;  %v935_v16 = vrot.slane %v8846_v50, 5  ;;  %v2376_v38 = vpack.c.b16 %v2352_v1, %v2351_v19  ;;  %v938_v41 = vrot.slane %v8849_v58, 5  ;;  %v809_v58 = vld [vmem:[%s8695_s15 + $0x9c] sm:$0xe] }
  0x70   : > { %v7763_v56 = vrot.slane %v805_v30, 9  ;;  %v904_v46 = vsel %vm8925_vm5, %v902_v39, %v903_v2  ;;  %v2347_v48 = vunpack.c.l.b16 %v901_v34  ;;  %v928_v50 = vrot.slane %v8859_v21, 5 }
  0x71   : > { %v2375_v45 = vpack.c.b16 %v2350_v32, %v2349_v36  ;;  %v936_v62 = vsel %vm8925_vm5, %v7764_v12, %v935_v16  ;;  %v937_v47 = vrot.slane %v935_v16, 4  ;;  %2399 = vrot.lane.b32.xlu2 %v2376_v38, %s8618_s17  ;;  %v931_v9 = vrot.slane %v8864_v33, 5  ;;  %v811_v36 = vld [vmem:[%s8695_s15 + $0xb4] sm:$0xe] }
  0x72   : > { %v2357_v49 = vunpack.c.l.b16 %v936_v62  ;;  %v2348_v44 = vunpack.c.l.b16 %v904_v46  ;;  %v7762_v52 = vrot.slane %v804_v42, 9  ;;  %v921_v53 = vrot.slane %v8786_v61, 5 }
  0x73   : > { %2389 = vrot.lane.b32.xlu0 %v2371_v55, %s8618_s17  ;;  %v939_v51 = vsel %vm8925_vm5, %v937_v47, %v938_v41  ;;  %v929_v0 = vsel %vm8925_vm5, %v7763_v56, %v928_v50  ;;  %v930_v21 = vrot.slane %v928_v50, 4  ;;  %v924_v33 = vrot.slane %v8789_v6, 5 }
  0x74   : > { %2397 = vrot.lane.b32.xlu1 %v2375_v45, %s8618_s17  ;;  %v2358_v54 = vunpack.c.l.b16 %v939_v51  ;;  %v2355_v10 = vunpack.c.l.b16 %v929_v0  ;;  %v923_v5 = vrot.slane %v921_v53, 4  ;;  %v7767_v4 = vrot.slane %v809_v58, 9 }
  0x75   : > { %v932_v8 = vsel %vm8925_vm5, %v930_v21, %v931_v9  ;;  %v922_v61 = vsel %vm8925_vm5, %v7762_v52, %v921_v53  ;;  %v956_v14 = vrot.slane %v8889_v24, 5  ;;  %v2374_v17 = vpack.c.b16 %v2348_v44, %v2347_v48  ;;  %v810_v48 = vld [vmem:[%s8695_s15 + $0xa8] sm:$0xe]  ;;  %v8477_v52 = vld [vmem:[%s8695_s15 + $0xc] sm:$0xff] }
  0x76   : > { %v2379_v7 = vpack.c.b16 %v2358_v54, %v2357_v49  ;;  %v2356_v23 = vunpack.c.l.b16 %v932_v8  ;;  %v959_v31 = vrot.slane %v8895_v40, 5  ;;  %v7766_v6 = vrot.slane %v808_v3, 9  ;;  %v8480_v3 = vld [vmem:[%s8695_s15 + $0x30] sm:$0xff] }
  0x77   : > { %v925_v18 = vsel %vm8925_vm5, %v923_v5, %v924_v33  ;;  %v957_v19 = vsel %vm8925_vm5, %v7767_v4, %v956_v14  ;;  %v958_v20 = vrot.slane %v956_v14, 4  ;;  %v949_v37 = vrot.slane %v8906_v11, 5  ;;  %v8479_v5 = vld [vmem:[%s8695_s15 + $0x24] sm:$0xff]  ;;  %v7770_v4 = vld [vmem:[%s8695_s15 + $0xc] sm:$0xf] }
  0x78   : > { %v2378_v43 = vpack.c.b16 %v2356_v23, %v2355_v10  ;;  %v2353_v55 = vunpack.c.l.b16 %v922_v61  ;;  %v952_v22 = vrot.slane %v8909_v13, 5  ;;  %v7765_v24 = vrot.slane %v807_v15, 9  ;;  %v9087_v8 = vld [vmem:[%s8695_s15 + $0x10] sm:$0xf]  ;;  %v7850_v15 = vld [vmem:[%s8695_s15 + $0x18] sm:$0xf] }
  0x79   : > { %2405 = vrot.lane.b32.xlu2 %v2379_v7, %s8618_s17  ;;  %v960_v40 = vsel %vm8925_vm5, %v958_v20, %v959_v31  ;;  %v2363_v27 = vunpack.c.l.b16 %v957_v19  ;;  %v950_v30 = vsel %vm8925_vm5, %v7766_v6, %v949_v37  ;;  %v951_v1 = vrot.slane %v949_v37, 4  ;;  %v9074_v21 = vpop.permute.xlu2 %2313  ;;  %v9095_v6 = vld [vmem:[%s8695_s15 + $0x1c] sm:$0xf]  ;;  %v8482_v19 = vld [vmem:[%s8695_s15 + $0x48] sm:$0xff] }
  0x7a   : > { %v2354_v63 = vunpack.c.l.b16 %v925_v18  ;;  %v2364_v11 = vunpack.c.l.b16 %v960_v40  ;;  %v942_v2 = vrot.slane %v8831_v28, 5  ;;  %v945_v13 = vrot.slane %v8834_v29, 5  ;;  %v8478_v18 = vld [vmem:[%s8695_s15 + $0x18] sm:$0xff] }
  0x7b   : > { %2395 = vrot.lane.b32.xlu0 %v2374_v17, %s8618_s17  ;;  %v953_v12 = vsel %vm8925_vm5, %v951_v1, %v952_v22  ;;  %v2361_v32 = vunpack.c.l.b16 %v950_v30  ;;  %v7769_v34 = vrot.slane %v811_v36, 9  ;;  %v970_v39 = vrot.slane %v8941_v25, 5  ;;  %v8483_v17 = vld [vmem:[%s8695_s15 + $0x54] sm:$0xff] }
  0x7c   : > { %2403 = vrot.lane.b32.xlu1 %v2378_v43, %s8618_s17  ;;  %v2362_v16 = vunpack.c.l.b16 %v953_v12  ;;  %v943_v38 = vsel %vm8925_vm5, %v7765_v24, %v942_v2  ;;  %v944_v41 = vrot.slane %v942_v2, 4  ;;  %v973_v56 = vrot.slane %v8949_v35, 5 }
  0x7d   : > { %v2382_v28 = vpack.c.b16 %v2364_v11, %v2363_v27  ;;  %v2359_v42 = vunpack.c.l.b16 %v943_v38  ;;  %v972_v29 = vrot.slane %v970_v39, 4  ;;  %v2377_v45 = vpack.c.b16 %v2354_v63, %v2353_v55  ;;  %v7802_v27 = vld [vmem:[%s8695_s15 + $0x14] sm:$0x1]  ;;  %v8481_v38 = vld [vmem:[%s8695_s15 + $0x3c] sm:$0xff] }
  0x7e   : > { %v946_v46 = vsel %vm8925_vm5, %v944_v41, %v945_v13  ;;  %v2381_v62 = vpack.c.b16 %v2362_v16, %v2361_v32  ;;  %v963_v25 = vrot.slane %v8876_v57, 5  ;;  %v971_v49 = vsel %vm8925_vm5, %v7769_v34, %v970_v39  ;;  %v7882_v32 = vld [vmem:[%s8695_s15 + $0x20] sm:$0x1]  ;;  %v8486_v34 = vld [vmem:[%s8695_s15 + $0x78] sm:$0xff]  ;;  %v7818_v41 = vld [vmem:[%s8695_s15 + $0xc] sm:$0xe] }
  0x7f   : > { %v2360_v47 = vunpack.c.l.b16 %v946_v46  ;;  %v974_v50 = vsel %vm8925_vm5, %v972_v29, %v973_v56  ;;  %v7768_v9 = vrot.slane %v810_v48, 9  ;;  %v2367_v58 = vunpack.c.l.b16 %v971_v49 }
  0x80   : > { %v2368_v44 = vunpack.c.l.b16 %v974_v50  ;;  %v965_v51 = vrot.slane %v963_v25, 4  ;;  %v966_v57 = vrot.slane %v8879_v59, 5  ;;  %v1025_v61 = vshrl.u32 %v7770_v4, 16 }
  0x81   : > { %2411 = vrot.lane.b32.xlu2 %v2382_v28, %s8618_s17  ;;  %v2380_v35 = vpack.c.b16 %v2360_v47, %v2359_v42  ;;  %v964_v54 = vsel %vm8925_vm5, %v7768_v9, %v963_v25  ;;  %v1028_v14 = vshll.u32 %v7770_v4, 16  ;;  %v1034_v23 = vshll.u32 %v9087_v8, 16  ;;  %v8485_v28 = vld [vmem:[%s8695_s15 + $0x6c] sm:$0xff]  ;;  %v7898_v42 = vld [vmem:[%s8695_s15 + $0x18] sm:$0xe] }
  0x82   : > { %v2384_v53 = vpack.c.b16 %v2368_v44, %v2367_v58  ;;  %v967_v0 = vsel %vm8925_vm5, %v965_v51, %v966_v57  ;;  %v2365_v59 = vunpack.c.l.b16 %v964_v54  ;;  %v1038_v31 = vshrl.u32 %v9087_v8, 16 }
  0x83   : > { %2401 = vrot.lane.b32.xlu0 %v2377_v45, %s8618_s17  ;;  %v2366_v33 = vunpack.c.l.b16 %v967_v0  ;;  %v1634_v20 = vshrl.u32 %v7850_v15, 16  ;;  %v1637_v37 = vshll.u32 %v7850_v15, 16  ;;  %v1027_v43 = vrot.slane %v1025_v61, 4  ;;  %v8465_v0 = vld [vmem:[%s8695_s15 + $0x30] sm:$0xff]  ;;  %v7774_v61 = vld [vmem:[%s8695_s15 + $0x24] sm:$0xf] }
  0x84   : > { %2409 = vrot.lane.b32.xlu1 %v2381_v62, %s8618_s17  ;;  %v1030_v55 = vrot.slane %v1028_v14, 5  ;;  %v1643_v22 = vshll.u32 %v9095_v6, 16  ;;  %v1647_v24 = vshrl.u32 %v9095_v6, 16  ;;  %v9102_v36 = vrot.slane %v1034_v23, 5  ;;  %v7772_v62 = vld [vmem:[%s8695_s15 + $0x18] sm:$0xf] }
  0x85   : > { %v2383_v10 = vpack.c.b16 %v2366_v33, %v2365_v59  ;;  %v1040_v40 = vrot.slane %v1038_v31, 4  ;;  %v1636_v30 = vrot.slane %v1634_v20, 4  ;;  %v1639_v1 = vrot.slane %v1637_v37, 5  ;;  %v9127_v59 = vld [vmem:[%s8695_s15 + $0x1c] sm:$0xf]  ;;  %v8484_v14 = vld [vmem:[%s8695_s15 + $0x60] sm:$0xff] }
  0x86   : > { %v9107_v63 = vrot.slane %v1643_v22, 5  ;;  %v1649_v11 = vrot.slane %v1647_v24, 4  ;;  %v1474_v13 = vrot.slane %v9087_v8, 5  ;;  %v1031_v12 = vor.u32 %v1030_v55, %v1027_v43  ;;  %v8489_v33 = vld [vmem:[%s8695_s15 + $0x9c] sm:$0xff] }
  0x87   : > { %v9084_v7 = vpop.permute.xlu2 %2315  ;;  %v1041_v39 = vor.u32 %v1040_v40, %v9102_v36  ;;  %v1044_v16 = vshll.u32 %v7802_v27, 16  ;;  %v2083_v56 = vrot.slane %v9095_v6, 5  ;;  %v1640_v29 = vor.u32 %v1639_v1, %v1636_v30  ;;  %v7803_v1 = vld [vmem:[%s8695_s15 + $0x20] sm:$0x1] }
  0x88   : > { %v1650_v45 = vor.u32 %v1649_v11, %v9107_v63  ;;  %v1653_v46 = vshll.u32 %v7882_v32, 16  ;;  %v1476_v47 = vrot.slane %v1474_v13, 4  ;;  %v1477_v48 = vrot.slane %v7802_v27, 5 }
  0x89   : > { %2481 = vrot.lane.b32.xlu2 %v8477_v52, %s8619_s18  ;;  %v1032_v25 = vrot.slane %v1031_v12, 4  ;;  %v7834_v49 = vrot.slane %v7818_v41, 9  ;;  %v1042_v50 = vrot.slane %v1041_v39, 4  ;;  %v2086_v9 = vrot.slane %v7882_v32, 5  ;;  %v9177_v39 = vld [vmem:[%s8695_s15 + $0x28] sm:$0xf] }
  0x8a   : > { %v7914_v58 = vrot.slane %v7898_v42, 9  ;;  %v2085_v44 = vrot.slane %v2083_v56, 4  ;;  %v1049_v51 = vshrl.u32 %v7772_v62, 16  ;;  %v1052_v57 = vshll.u32 %v7772_v62, 16  ;;  %v9184_v42 = vld [vmem:[%s8695_s15 + $0x28] sm:$0xf] }
  0x8b   : > { %2407 = vrot.lane.b32.xlu0 %v2380_v35, %s8618_s17  ;;  %v1046_v35 = vrot.slane %v1044_v16, 5  ;;  %v1641_v52 = vrot.slane %v1640_v29, 4  ;;  %v1655_v54 = vrot.slane %v1653_v46, 5  ;;  %v1037_v4 = vsel %vm8723_vm2, %v1032_v25, %v9102_v36  ;;  %v7852_v16 = vld [vmem:[%s8695_s15 + $0x24] sm:$0xf] }
  0x8c   : > { %2415 = vrot.lane.b32.xlu1 %v2384_v53, %s8618_s17  ;;  %v1651_v53 = vrot.slane %v1650_v45, 4  ;;  %v2087_v23 = vsel %vm8925_vm5, %v2085_v44, %v2086_v9  ;;  %v1051_v31 = vrot.slane %v1049_v51, 4  ;;  %v1054_v6 = vrot.slane %v1052_v57, 5 }
  0x8d   : > { %v1047_v8 = vsel %vm8723_vm2, %v1042_v50, %v1046_v35  ;;  %v1058_v37 = vshll.u32 %v9127_v59, 16  ;;  %v1062_v43 = vshrl.u32 %v9127_v59, 16  ;;  %v9159_v55 = vsel %vm2929_vm6, %v8465_v0, %v9074_v21  ;;  %v8487_v35 = vld [vmem:[%s8695_s15 + $0x84] sm:$0xff] }
  0x8e   : > { %v1656_v20 = vsel %vm8723_vm2, %v1651_v53, %v1655_v54  ;;  %v1481_v24 = vrot.slane %v9127_v59, 5  ;;  %v1073_v36 = vshrl.u32 %v7774_v61, 16  ;;  %v9163_v27 = vunpack.c.l.b16 %v1037_v4  ;;  %v7854_v59 = vld [vmem:[%s8695_s15 + $0x30] sm:$0xf] }
  0x8f   : > { %v9165_v30 = vunpack.c.l.b16 %v1047_v8  ;;  %v1076_v11 = vshll.u32 %v7774_v61, 16  ;;  %v2850_v12 = vunpack.c.l.b16 %v2087_v23  ;;  %v1055_v41 = vor.u32 %v1054_v6, %v1051_v31  ;;  %v9216_v8 = vld [vmem:[%s8695_s15 + $0x2c] sm:$0x1]  ;;  %v7899_v6 = vld [vmem:[%s8695_s15 + $0x24] sm:$0xe] }
  0x90   : > { %v1483_v45 = vrot.slane %v1481_v24, 4  ;;  %v1068_v46 = vshll.u32 %v7803_v1, 16  ;;  %v1075_v62 = vrot.slane %v1073_v36, 4  ;;  %v1082_v25 = vshll.u32 %v9177_v39, 16 }
  0x91   : > { %2487 = vrot.lane.b32.xlu2 %v8480_v3, %s8619_s18  ;;  %v1658_v50 = vshrl.u32 %v7852_v16, 16  ;;  %v1661_v44 = vshll.u32 %v7852_v16, 16  ;;  %v1667_v51 = vshll.u32 %v9184_v42, 16  ;;  %v9199_v54 = vrot.slane %v1055_v41, 4  ;;  %v9238_v16 = vld [vmem:[%s8695_s15 + $0x38] sm:$0x1] }
  0x92   : > { %v9213_v4 = vrot.slane %v1068_v46, 5  ;;  %v1671_v61 = vshrl.u32 %v9184_v42, 16  ;;  %v9223_v23 = vrot.slane %v1082_v25, 5  ;;  %v1685_v36 = vshll.u32 %v7854_v59, 16  ;;  %v8490_v41 = vld [vmem:[%s8695_s15 + $0xa8] sm:$0xff] }
  0x93   : > { %2413 = vrot.lane.b32.xlu0 %v2383_v10, %s8618_s17  ;;  %v1475_v10 = vsel %vm8925_vm5, %v7834_v49, %v1474_v13  ;;  %v1086_v49 = vshrl.u32 %v9177_v39, 16 }
  0x94   : > { %2485 = vrot.lane.b32.xlu1 %v8479_v5, %s8619_s18  ;;  %v1478_v5 = vsel %vm8925_vm5, %v1476_v47, %v1477_v48  ;;  %v2593_v40 = vunpack.c.l.b16 %v1475_v10  ;;  %v8493_v47 = vld [vmem:[%s8695_s15 + $0x18] sm:$0xff]  ;;  %v1078_v48 = vrot.slane %v1076_v11, 5  ;;  %v1092_v11 = vshll.u32 %v9216_v8, 16 }
  0x95   : > { %v9109_v2 = vpop.permute.xlu2 %2321  ;;  %v9130_v3 = vpop.permute.xlu1 %2309  ;;  %v2594_v22 = vunpack.c.l.b16 %v1478_v5  ;;  %v1088_v31 = vrot.slane %v1086_v49, 4 }
  0x97   : > { %v2625_v9 = vpack.c.b16 %v2594_v22, %v2593_v40 }
  0x99   : > { %2493 = vrot.lane.b32.xlu2 %v8483_v17, %s8619_s18  ;;  %v2084_v17 = vsel %vm8925_vm5, %v7914_v58, %v2083_v56  ;;  %v9170_v21 = vpop.permute.xlu0 %2305  ;;  %v9181_v56 = vrot.slane %v1058_v37, 5  ;;  %v2545_v58 = vpack.c.b16 %v9165_v30, %v9163_v27  ;;  %v1673_v37 = vrot.slane %v1671_v61, 4 }
  0x9a   : > { %v2849_v13 = vunpack.c.l.b16 %v2084_v17  ;;  %v1079_v17 = vor.u32 %v1078_v48, %v1075_v62  ;;  %v1089_v62 = vor.u32 %v1088_v31, %v9223_v23  ;;  %v1094_v61 = vrot.slane %v1092_v11, 5 }
  0x9b   : > { %2483 = vrot.lane.b32.xlu0 %v8478_v18, %s8619_s18  ;;  %v8488_v18 = vld [vmem:[%s8695_s15 + $0x90] sm:$0xff]  ;;  %v1488_v27 = vrot.slane %v9177_v39, 5 }
  0x9c   : > { %2491 = vrot.lane.b32.xlu1 %v8482_v19, %s8619_s18  ;;  %v1646_v19 = vsel %vm8723_vm2, %v1641_v52, %v9107_v63  ;;  %v7819_v63 = vld [vmem:[%s8695_s15 + $0x18] sm:$0xe]  ;;  %v9195_v52 = vpack.c.b16 %v2850_v12, %v2849_v13  ;;  %v7915_v13 = vrot.slane %v7899_v6, 9  ;;  %v2090_v12 = vrot.slane %v9184_v42, 5 }
  0x9d   : > { %v9172_v32 = vunpack.c.l.b16 %v1646_v19  ;;  %v7835_v29 = vrot.slane %v7819_v63, 9  ;;  %v1663_v19 = vrot.slane %v1661_v44, 5  ;;  %v1061_v44 = vsel %vm8723_vm2, %v9199_v54, %v9181_v56 }
  0x9f   : > { %v9207_v10 = vsel %vm8925_vm5, %v7835_v29, %v1481_v24  ;;  %v7883_v24 = vld [vmem:[%s8695_s15 + $0x2c] sm:$0x1]  ;;  %v1687_v29 = vrot.slane %v1685_v36, 5  ;;  %v8494_v36 = vld [vmem:[%s8695_s15 + $0x24] sm:$0xff] }
  0xa0   : > { %v1677_v25 = vshll.u32 %v7883_v24, 16 }
  0xa1   : > { %2499 = vrot.lane.b32.xlu2 %v8486_v34, %s8619_s18  ;;  %v9174_v34 = vunpack.c.l.b16 %v1656_v20  ;;  %v9227_v20 = vrot.slane %v1667_v51, 5  ;;  %v2092_v51 = vrot.slane %v2090_v12, 4 }
  0xa2   : > { %v1679_v6 = vrot.slane %v1677_v25, 5 }
  0xa3   : > { %2489 = vrot.lane.b32.xlu0 %v8481_v38, %s8619_s18  ;;  %v9143_v15 = vpop.permute.xlu2 %2327  ;;  %v1484_v38 = vrot.slane %v7803_v1, 5  ;;  %v9193_v57 = vpop.permute.xlu1 %2311  ;;  %v2801_v53 = vpack.c.b16 %v9174_v34, %v9172_v32  ;;  %v1674_v48 = vor.u32 %v1673_v37, %v9227_v20 }
  0xa4   : > { %2497 = vrot.lane.b32.xlu1 %v8485_v28, %s8619_s18  ;;  %v1064_v28 = vrot.slane %v1062_v43, 4  ;;  %v1682_v43 = vshrl.u32 %v7854_v59, 16 }
  0xa5   : > { %v9211_v5 = vsel %vm8925_vm5, %v1483_v45, %v1484_v38  ;;  %v1675_v31 = vrot.slane %v1674_v48, 4  ;;  %v1491_v48 = vrot.slane %v9216_v8, 5 }
  0xa6   : > { %v1065_v0 = vor.u32 %v1064_v28, %v9181_v56  ;;  %v1684_v38 = vrot.slane %v1682_v43, 4  ;;  %v1080_v28 = vrot.slane %v1079_v17, 4  ;;  %v2596_v49 = vunpack.c.l.b16 %v9211_v5  ;;  %v7820_v43 = vld [vmem:[%s8695_s15 + $0x24] sm:$0xe] }
  0xa7   : > { %v9264_v56 = vsel %vm8925_vm5, %v7915_v13, %v2090_v12  ;;  %v1090_v17 = vrot.slane %v1089_v62, 4 }
  0xa8   : > { %v1066_v22 = vrot.slane %v1065_v0, 4  ;;  %v2093_v0 = vrot.slane %v7883_v24, 5 }
  0xa9   : > { %2505 = vrot.lane.b32.xlu2 %v8489_v33, %s8619_s18  ;;  %v9233_v63 = vpop.permute.xlu0 %2307  ;;  %v1095_v39 = vsel %vm8723_vm2, %v1090_v17, %v1094_v61 }
  0xaa   : > { %v1071_v5 = vsel %vm8723_vm2, %v1066_v22, %v9213_v4  ;;  %v2094_v24 = vsel %vm8925_vm5, %v2092_v51, %v2093_v0 }
  0xab   : > { %2495 = vrot.lane.b32.xlu0 %v8484_v14, %s8619_s18  ;;  %v9220_v14 = vld [vmem:[%s8695_s15 + $0x34] sm:$0xf]  ;;  %v9279_v22 = vunpack.c.l.b16 %v1071_v5  ;;  %v2852_v25 = vunpack.c.l.b16 %v2094_v24  ;;  %v7900_v24 = vld [vmem:[%s8695_s15 + $0x30] sm:$0xe] }
  0xac   : > { %2503 = vrot.lane.b32.xlu1 %v8488_v18, %s8619_s18  ;;  %v1660_v18 = vrot.slane %v1658_v50, 4  ;;  %v1691_v40 = vshll.u32 %v9220_v14, 16  ;;  %v1695_v1 = vshrl.u32 %v9220_v14, 16  ;;  %v1688_v50 = vor.u32 %v1687_v29, %v1684_v38  ;;  %v8466_v29 = vld [vmem:[%s8695_s15 + $0x3c] sm:$0xff] }
  0xae   : > { %v9241_v45 = vrot.slane %v1691_v40, 5  ;;  %v1697_v46 = vrot.slane %v1695_v1, 4  ;;  %v7777_v1 = vld [vmem:[%s8695_s15 + $0x34] sm:$0xf] }
  0xb0   : > { %v1698_v42 = vor.u32 %v1697_v46, %v9241_v45 }
  0xb1   : > { %v9203_v33 = vpop.permute.xlu2 %2333  ;;  %2737 = vrot.lane.b32.xlu2 %v8493_v47, %s8620_s19  ;;  %v1664_v47 = vor.u32 %v1663_v19, %v1660_v18  ;;  %v9254_v59 = vpop.permute.xlu1 %2319  ;;  %v1689_v18 = vrot.slane %v1688_v50, 4  ;;  %v1495_v50 = vrot.slane %v7777_v1, 5 }
  0xb2   : > { %12490 = vst [vmem:[#allocation3_spill] sm:$0xff] %v9203_v33  ;;  %v1699_v19 = vrot.slane %v1698_v42, 4  ;;  %v1106_v42 = vshll.u32 %v7777_v1, 16 }
  0xb3   : > { %2501 = vrot.lane.b32.xlu0 %v8487_v35, %s8619_s18  ;;  %v1701_v35 = vshll.u32 %v9238_v16, 16  ;;  %v1665_v4 = vrot.slane %v1664_v47, 4  ;;  %v1694_v46 = vsel %vm8723_vm2, %v1689_v18, %v9241_v45  ;;  %v1490_v47 = vrot.slane %v1488_v27, 4  ;;  %v7856_v18 = vld [vmem:[%s8695_s15 + $0x3c] sm:$0xf] }
  0xb4   : > { %2641 = vrot.lane.b32.xlu1 %v2625_v9, %s8621_s20  ;;  %v2595_v9 = vunpack.c.l.b16 %v9207_v10  ;;  %v1085_v10 = vsel %vm8723_vm2, %v1080_v28, %v9223_v23  ;;  %v7776_v23 = vld [vmem:[%s8695_s15 + $0x30] sm:$0xf]  ;;  %v7836_v28 = vrot.slane %v7820_v43, 9  ;;  %v9314_v51 = vunpack.c.l.b16 %v1694_v46 }
  0xb5   : > { %v1703_v37 = vrot.slane %v1701_v35, 5  ;;  %v9284_v40 = vunpack.c.l.b16 %v1085_v10  ;;  %v1097_v11 = vshrl.u32 %v7776_v23, 16  ;;  %v1100_v13 = vshll.u32 %v7776_v23, 16 }
  0xb6   : > { %v2626_v30 = vpack.c.b16 %v2596_v49, %v2595_v9  ;;  %v1670_v38 = vsel %vm8723_vm2, %v1665_v4, %v9227_v20  ;;  %v7821_v49 = vld [vmem:[%s8695_s15 + $0x30] sm:$0xe]  ;;  %v1110_v20 = vshrl.u32 %v7777_v1, 16  ;;  %v2518_v35 = vunpack.c.l.b16 %v1095_v39  ;;  %v9335_v4 = vld [vmem:[%s8695_s15 + $0x40] sm:$0xf] }
  0xb7   : > { %v9288_v12 = vpop.permute.xlu0 %2317  ;;  %v1704_v62 = vsel %vm8723_vm2, %v1699_v19, %v1703_v37  ;;  %v9306_v9 = vunpack.c.l.b16 %v1670_v38  ;;  %v1102_v45 = vrot.slane %v1100_v13, 5  ;;  %v1489_v5 = vsel %vm8925_vm5, %v7836_v28, %v1488_v27 }
  0xb8   : > { %v9316_v0 = vunpack.c.l.b16 %v1704_v62  ;;  %v9322_v10 = vsel %vm2929_vm6, %v8466_v29, %v9084_v7  ;;  %v1492_v61 = vsel %vm8925_vm5, %v1490_v47, %v1491_v48  ;;  %v7837_v17 = vrot.slane %v7821_v49, 9  ;;  %v7901_v29 = vld [vmem:[%s8695_s15 + $0x3c] sm:$0xe]  ;;  %v7885_v62 = vld [vmem:[%s8695_s15 + $0x44] sm:$0x1] }
  0xb9   : > { %2507 = vrot.lane.b32.xlu2 %v8490_v41, %s8619_s18  ;;  %v1680_v41 = vsel %vm8723_vm2, %v1675_v31, %v1679_v6  ;;  %v1497_v31 = vrot.slane %v1495_v50, 4  ;;  %v9337_v6 = vrot.slane %v1106_v42, 5  ;;  %v1112_v23 = vrot.slane %v1110_v20, 4  ;;  %v7778_v20 = vld [vmem:[%s8695_s15 + $0x3c] sm:$0xf] }
  0xba   : > { %v9270_v54 = vpop.permute.xlu2 %2387  ;;  %v9312_v8 = vunpack.c.l.b16 %v1680_v41  ;;  %v2547_v19 = vpack.c.b16 %v2518_v35, %v9284_v40  ;;  %v2597_v43 = vunpack.c.l.b16 %v1489_v5  ;;  %v1706_v1 = vshrl.u32 %v7856_v18, 16 }
  0xbb   : > { %2561 = vrot.lane.b32.xlu0 %v2545_v58, %s8622_s21  ;;  %v9277_v58 = vunpack.c.l.b16 %v1061_v44  ;;  %v1099_v44 = vrot.slane %v1097_v11, 4  ;;  %v1709_v11 = vshll.u32 %v7856_v18, 16  ;;  %v1715_v13 = vshll.u32 %v9335_v4, 16 }
  0xbc   : > { %2897 = vrot.lane.b32.xlu1 %v9195_v52, %s8623_s22  ;;  %v2851_v52 = vunpack.c.l.b16 %v9264_v56  ;;  %v7805_v56 = vld [vmem:[%s8695_s15 + $0x38] sm:$0x1]  ;;  %v1719_v40 = vshrl.u32 %v9335_v4, 16  ;;  %v1496_v39 = vsel %vm8925_vm5, %v7837_v17, %v1495_v50  ;;  %v1113_v41 = vor.u32 %v1112_v23, %v9337_v6 }
  0xbd   : > { %v2546_v32 = vpack.c.b16 %v9279_v22, %v9277_v58  ;;  %v1498_v7 = vrot.slane %v7805_v56, 5  ;;  %v1103_v27 = vor.u32 %v1102_v45, %v1099_v44  ;;  %v2803_v58 = vpack.c.b16 %v9316_v0, %v9314_v51 }
  0xbe   : > { %v2882_v37 = vpack.c.b16 %v2852_v25, %v2851_v52  ;;  %v2598_v22 = vunpack.c.l.b16 %v1492_v61  ;;  %v1116_v28 = vshll.u32 %v7805_v56, 16  ;;  %v7916_v46 = vrot.slane %v7900_v24, 9 }
  0xbf   : > { %v9327_v34 = vpop.permute.xlu1 %2325  ;;  %v1499_v38 = vsel %vm8925_vm5, %v1497_v31, %v1498_v7  ;;  %v1708_v47 = vrot.slane %v1706_v1, 4  ;;  %v1711_v48 = vrot.slane %v1709_v11, 5  ;;  %v2100_v49 = vrot.slane %v9238_v16, 5 }
  0xc0   : > { %v9361_v50 = vrot.slane %v1715_v13, 5  ;;  %v1721_v42 = vrot.slane %v1719_v40, 4  ;;  %v2599_v44 = vunpack.c.l.b16 %v1496_v39  ;;  %v2600_v45 = vunpack.c.l.b16 %v1499_v38  ;;  %v7806_v38 = vld [vmem:[%s8695_s15 + $0x44] sm:$0x1] }
  0xc1   : > { %2739 = vrot.lane.b32.xlu2 %v8494_v36, %s8620_s19  ;;  %v2097_v36 = vrot.slane %v9220_v14, 5  ;;  %v1104_v14 = vrot.slane %v1103_v27, 4  ;;  %v1114_v51 = vrot.slane %v1113_v41, 4  ;;  %v1118_v0 = vrot.slane %v1116_v28, 5 }
  0xc2   : > { %v2104_v5 = vrot.slane %v9335_v4, 5  ;;  %v1725_v16 = vshll.u32 %v7885_v62, 16  ;;  %v1712_v56 = vor.u32 %v1711_v48, %v1708_v47  ;;  %v1722_v17 = vor.u32 %v1721_v42, %v9361_v50 }
  0xc3   : > { %2817 = vrot.lane.b32.xlu0 %v2801_v53, %s8624_s23  ;;  %v9329_v53 = vpop.permute.xlu2 %2393  ;;  %v2099_v25 = vrot.slane %v2097_v36, 4  ;;  %v1121_v31 = vshrl.u32 %v7778_v20, 16  ;;  %v1124_v7 = vshll.u32 %v7778_v20, 16  ;;  %v1109_v23 = vsel %vm8723_vm2, %v1104_v14, %v9337_v6  ;;  %v7858_v20 = vld [vmem:[%s8695_s15 + $0x48] sm:$0xf] }
  0xc4   : > { %2643 = vrot.lane.b32.xlu1 %v2626_v30, %s8621_s20  ;;  %v2802_v30 = vpack.c.b16 %v9312_v8, %v9306_v9  ;;  %v9367_v9 = vpack.c.b16 %v2598_v22, %v2597_v43  ;;  %v7917_v8 = vrot.slane %v7901_v29, 9  ;;  %v9379_v18 = vsel %vm8925_vm5, %v7916_v46, %v2097_v36  ;;  %v8495_v43 = vld [vmem:[%s8695_s15 + $0x30] sm:$0xff] }
  0xc5   : > { %v9349_v52 = vpop.permute.xlu0 %2323  ;;  %v9383_v4 = vsel %vm8925_vm5, %v2099_v25, %v2100_v49  ;;  %v1123_v22 = vrot.slane %v1121_v31, 4  ;;  %v1126_v24 = vrot.slane %v1124_v7, 5  ;;  %v1119_v6 = vsel %vm8723_vm2, %v1114_v51, %v1118_v0  ;;  %v7859_v51 = vld [vmem:[%s8695_s15 + $0x4c] sm:$0xf]  ;;  %v7902_v31 = vld [vmem:[%s8695_s15 + $0x48] sm:$0xe] }
  0xc6   : > { %v9389_v27 = vsel %vm8925_vm5, %v7917_v8, %v2104_v5  ;;  %v2106_v36 = vrot.slane %v2104_v5, 4  ;;  %v2107_v11 = vrot.slane %v7885_v62, 5  ;;  %v1727_v13 = vrot.slane %v1725_v16, 5 }
  0xc7   : > { %v1713_v40 = vrot.slane %v1712_v56, 4  ;;  %v1723_v39 = vrot.slane %v1722_v17, 4  ;;  %v2628_v14 = vpack.c.b16 %v2600_v45, %v2599_v44  ;;  %v2519_v46 = vunpack.c.l.b16 %v1109_v23 }
  0xc8   : > { %v1505_v48 = vrot.slane %v7806_v38, 5  ;;  %v2853_v25 = vunpack.c.l.b16 %v9379_v18  ;;  %v1127_v49 = vor.u32 %v1126_v24, %v1123_v22  ;;  %v2108_v8 = vsel %vm8925_vm5, %v2106_v36, %v2107_v11  ;;  %v8461_v22 = vld [vmem:[%s8695_s15] sm:$0xff] }
  0xc9   : > { %2565 = vrot.lane.b32.xlu2 %v2547_v19, %s8622_s21  ;;  %v7822_v19 = vld [vmem:[%s8695_s15 + $0x3c] sm:$0xe]  ;;  %v2855_v44 = vunpack.c.l.b16 %v9389_v27  ;;  %v1718_v5 = vsel %vm8723_vm2, %v1713_v40, %v9361_v50  ;;  %v1728_v16 = vsel %vm8723_vm2, %v1723_v39, %v1727_v13  ;;  %v1140_v56 = vshll.u32 %v7806_v38, 16  ;;  %v7886_v40 = vld [vmem:[%s8695_s15 + $0x50] sm:$0x1] }
  0xca   : > { %v7838_v41 = vrot.slane %v7822_v19, 9  ;;  %v2111_v7 = vrot.slane %v7859_v51, 5  ;;  %v1730_v23 = vshrl.u32 %v7858_v20, 16  ;;  %v1733_v18 = vshll.u32 %v7858_v20, 16  ;;  %v8463_v27 = vld [vmem:[%s8695_s15 + $0x18] sm:$0xff] }
  0xcb   : > { %2563 = vrot.lane.b32.xlu0 %v2546_v32, %s8622_s21  ;;  %v9365_v35 = vpop.permute.xlu2 %2399  ;;  %v7779_v32 = vld [vmem:[%s8695_s15 + $0x40] sm:$0xf]  ;;  %v1128_v19 = vrot.slane %v1127_v49, 4  ;;  %v1739_v50 = vshll.u32 %v7859_v51, 16  ;;  %v2856_v24 = vunpack.c.l.b16 %v2108_v8  ;;  %v2776_v36 = vunpack.c.l.b16 %v1728_v16  ;;  %v7780_v38 = vld [vmem:[%s8695_s15 + $0x48] sm:$0xf] }
  0xcc   : > { %2899 = vrot.lane.b32.xlu1 %v2882_v37, %s8623_s22  ;;  %v1502_v37 = vrot.slane %v7779_v32, 5  ;;  %v1130_v1 = vshll.u32 %v7779_v32, 16  ;;  %v1134_v28 = vshrl.u32 %v7779_v32, 16  ;;  %v1142_v13 = vrot.slane %v1140_v56, 5 }
  0xcd   : > { %v7918_v39 = vrot.slane %v7902_v31, 9  ;;  %v9432_v49 = vrot.slane %v1739_v50, 5  ;;  %v9436_v8 = vsel %vm2929_vm6, %v8463_v27, %v9130_v3  ;;  %v1145_v16 = vshrl.u32 %v7780_v38, 16  ;;  %v7782_v31 = vld [vmem:[%s8695_s15 + $0x54] sm:$0xf] }
  0xce   : > { %v9371_v61 = vpop.permute.xlu1 %2331  ;;  %v1504_v47 = vrot.slane %v1502_v37, 4  ;;  %v1132_v42 = vrot.slane %v1130_v1, 5  ;;  %v1136_v45 = vrot.slane %v1134_v28, 4  ;;  %v1503_v32 = vsel %vm8925_vm5, %v7838_v41, %v1502_v37 }
  0xcf   : > { %12491 = vst [vmem:[#allocation4_spill] sm:$0xff] %v9371_v61  ;;  %v2775_v1 = vunpack.c.l.b16 %v1718_v5  ;;  %v1743_v37 = vshrl.u32 %v7859_v51, 16  ;;  %v2113_v41 = vrot.slane %v2111_v7, 4  ;;  %v2114_v28 = vrot.slane %v7886_v40, 5  ;;  %v9445_v5 = vld [vmem:[%s8695_s15 + $0x4c] sm:$0xf] }
  0xd0   : > { %v1506_v17 = vsel %vm8925_vm5, %v1504_v47, %v1505_v48  ;;  %v1735_v47 = vrot.slane %v1733_v18, 5  ;;  %v9451_v3 = vsel %vm8925_vm5, %v7918_v39, %v2111_v7  ;;  %v1148_v7 = vshll.u32 %v7780_v38, 16  ;;  %v9479_v39 = vld [vmem:[%s8695_s15 + $0x5c] sm:$0x1] }
  0xd1   : > { %2821 = vrot.lane.b32.xlu2 %v2803_v58, %s8624_s23  ;;  %v2520_v58 = vunpack.c.l.b16 %v1119_v6  ;;  %v2601_v6 = vunpack.c.l.b16 %v1503_v32  ;;  %v2602_v11 = vunpack.c.l.b16 %v1506_v17  ;;  %v1745_v20 = vrot.slane %v1743_v37, 4 }
  0xd2   : > { %v2884_v32 = vpack.c.b16 %v2856_v24, %v2855_v44  ;;  %v2804_v56 = vpack.c.b16 %v2776_v36, %v2775_v1  ;;  %v1749_v17 = vshll.u32 %v7886_v40, 16  ;;  %v1147_v50 = vrot.slane %v1145_v16, 4 }
  0xd3   : > { %2819 = vrot.lane.b32.xlu0 %v2802_v30, %s8624_s23  ;;  %v9396_v29 = vpop.permute.xlu0 %2329  ;;  %v9399_v62 = vpop.permute.xlu2 %2405  ;;  %v2854_v30 = vunpack.c.l.b16 %v9383_v4  ;;  %v2548_v4 = vpack.c.b16 %v2520_v58, %v2519_v46  ;;  %v1732_v46 = vrot.slane %v1730_v23, 4  ;;  %v1746_v18 = vor.u32 %v1745_v20, %v9432_v49 }
  0xd4   : > { %12492 = vst [vmem:[#allocation5_spill] sm:$0xff] %v9396_v29  ;;  %2741 = vrot.lane.b32.xlu1 %v8495_v43, %s8620_s19  ;;  %v1137_v43 = vor.u32 %v1136_v45, %v1132_v42  ;;  %v1158_v27 = vshrl.u32 %v9445_v5, 16  ;;  %v1169_v24 = vshrl.u32 %v7782_v31, 16  ;;  %v1751_v1 = vrot.slane %v1749_v17, 5  ;;  %v8496_v17 = vld [vmem:[%s8695_s15 + $0x3c] sm:$0xff] }
  0xd5   : > { %v2883_v51 = vpack.c.b16 %v2854_v30, %v2853_v25  ;;  %v9458_v25 = vsel %vm8925_vm5, %v2113_v41, %v2114_v28  ;;  %v1736_v30 = vor.u32 %v1735_v47, %v1732_v46  ;;  %v1509_v37 = vrot.slane %v9445_v5, 5 }
  0xd6   : > { %v9408_v0 = vpop.permute.xlu1 %2385  ;;  %v1138_v58 = vrot.slane %v1137_v43, 4  ;;  %v1150_v36 = vrot.slane %v1148_v7, 5  ;;  %v1160_v40 = vrot.slane %v1158_v27, 4  ;;  %v1171_v38 = vrot.slane %v1169_v24, 4  ;;  %v7861_v24 = vld [vmem:[%s8695_s15 + $0x58] sm:$0xf] }
  0xd7   : > { %v1172_v41 = vshll.u32 %v7782_v31, 16  ;;  %v1737_v46 = vrot.slane %v1736_v30, 4  ;;  %v1747_v47 = vrot.slane %v1746_v18, 4  ;;  %v1188_v18 = vshll.u32 %v9479_v39, 16 }
  0xd8   : > { %v1143_v44 = vsel %vm8723_vm2, %v1138_v58, %v1142_v13  ;;  %v2858_v7 = vunpack.c.l.b16 %v9458_v25 }
  0xd9   : > { %2647 = vrot.lane.b32.xlu2 %v2628_v14, %s8621_s20  ;;  %v1133_v14 = vsel %vm8723_vm2, %v1128_v19, %v1132_v42  ;;  %v1154_v19 = vshll.u32 %v9445_v5, 16  ;;  %v2522_v13 = vunpack.c.l.b16 %v1143_v44  ;;  %v1752_v25 = vsel %vm8723_vm2, %v1747_v47, %v1751_v1 }
  0xda   : > { %v9454_v23 = vunpack.c.l.b16 %v1133_v14  ;;  %v12495_v47 = vunpack.c.l.b16 %v9451_v3 }
  0xdb   : > { %2645 = vrot.lane.b32.xlu0 %v9367_v9, %s8621_s20  ;;  %v9428_v48 = vpop.permute.xlu2 %2411  ;;  %v9440_v9 = vsel %vm2929_vm6, %v8461_v22, %v9170_v21  ;;  %v2629_v21 = vpack.c.b16 %v2602_v11, %v2601_v6  ;;  %v9470_v22 = vld [vmem:[%s8695_s15 + $0x58] sm:$0xf]  ;;  %v7823_v6 = vld [vmem:[%s8695_s15 + $0x48] sm:$0xe]  ;;  %v9475_v11 = vrot.slane %v1154_v19, 5  ;;  %v1511_v19 = vrot.slane %v1509_v37, 4 }
  0xdc   : > { %2567 = vrot.lane.b32.xlu1 %v2548_v4, %s8622_s21  ;;  %12493 = vst [vmem:[#allocation6_spill] sm:$0xff] %v9428_v48  ;;  %v9464_v4 = vld [vmem:[%s8695_s15 + $0x50] sm:$0x1]  ;;  %v1178_v14 = vshll.u32 %v9470_v22, 16  ;;  %v1182_v58 = vshrl.u32 %v9470_v22, 16  ;;  %v7839_v31 = vrot.slane %v7823_v6, 9  ;;  %v1742_v6 = vsel %vm8723_vm2, %v1737_v46, %v9432_v49 }
  0xdd   : > { %v9442_v45 = vpop.permute.xlu0 %2335  ;;  %v1161_v5 = vor.u32 %v1160_v40, %v9475_v11  ;;  %v1164_v16 = vshll.u32 %v9464_v4, 16  ;;  %v2549_v40 = vpack.c.b16 %v2522_v13, %v9454_v23  ;;  %v1190_v13 = vrot.slane %v1188_v18, 5 }
  0xde   : > { %12494 = vst [vmem:[#allocation7_spill] sm:$0xff] %v9442_v45  ;;  %v9447_v42 = vpop.permute.xlu1 %2391  ;;  %v9493_v30 = vrot.slane %v1178_v14, 5  ;;  %v1184_v44 = vrot.slane %v1182_v58, 4  ;;  %v2118_v14 = vrot.slane %v7861_v24, 5  ;;  %v7860_v58 = vld [vmem:[%s8695_s15 + $0x54] sm:$0xf] }
  0xdf   : > { %v1162_v45 = vrot.slane %v1161_v5, 4  ;;  %v1754_v33 = vshrl.u32 %v7860_v58, 16  ;;  %v1757_v48 = vshll.u32 %v7860_v58, 16  ;;  %v2778_v5 = vunpack.c.l.b16 %v1752_v25 }
  0xe1   : > { %2903 = vrot.lane.b32.xlu2 %v2884_v32, %s8623_s22  ;;  %v1174_v32 = vrot.slane %v1172_v41, 5  ;;  %v1185_v41 = vor.u32 %v1184_v44, %v9493_v30  ;;  %v2120_v44 = vrot.slane %v2118_v14, 4 }
  0xe3   : > { %2901 = vrot.lane.b32.xlu0 %v2883_v51, %s8623_s22  ;;  %v9482_v28 = vpop.permute.xlu2 %2481  ;;  %v1151_v51 = vor.u32 %v1150_v36, %v1147_v50  ;;  %v1512_v50 = vrot.slane %v9464_v4, 5  ;;  %v1175_v27 = vor.u32 %v1174_v32, %v1171_v38  ;;  %v7903_v36 = vld [vmem:[%s8695_s15 + $0x54] sm:$0xe]  ;;  %v1166_v4 = vrot.slane %v1164_v16, 5  ;;  %v9509_v38 = vld [vmem:[%s8695_s15 + $0x5c] sm:$0x1] }
  0xe4   : > { %2823 = vrot.lane.b32.xlu1 %v2804_v56, %s8624_s23  ;;  %v7919_v32 = vrot.slane %v7903_v36, 9  ;;  %v2121_v49 = vrot.slane %v9509_v38, 5  ;;  %v1186_v46 = vrot.slane %v1185_v41, 4  ;;  %v1510_v16 = vsel %vm8925_vm5, %v7839_v31, %v1509_v37  ;;  %v8464_v41 = vld [vmem:[%s8695_s15 + $0x24] sm:$0xff] }
  0xe5   : > { %v9486_v20 = vpop.permute.xlu0 %2389  ;;  %v1152_v43 = vrot.slane %v1151_v51, 4  ;;  %v1176_v23 = vrot.slane %v1175_v27, 4  ;;  %v2777_v51 = vunpack.c.l.b16 %v1742_v6  ;;  %v1513_v18 = vsel %vm8925_vm5, %v1511_v19, %v1512_v50  ;;  %v8462_v19 = vld [vmem:[%s8695_s15 + $0xc] sm:$0xff]  ;;  %v8491_v50 = vld [vmem:[%s8695_s15 + $0xb4] sm:$0xff] }
  0xe6   : > { %v9491_v56 = vpop.permute.xlu1 %2397  ;;  %v1167_v3 = vsel %vm8723_vm2, %v1162_v45, %v1166_v4  ;;  %v1756_v36 = vrot.slane %v1754_v33, 4  ;;  %v1759_v37 = vrot.slane %v1757_v48, 5  ;;  %v1763_v31 = vshll.u32 %v7861_v24, 16  ;;  %v7786_v4 = vld [vmem:[%s8695_s15 + $0x6c] sm:$0xf] }
  0xe7   : > { %v1157_v27 = vsel %vm8723_vm2, %v1152_v43, %v9475_v11  ;;  %v1767_v6 = vshrl.u32 %v7861_v24, 16  ;;  %v2603_v58 = vunpack.c.l.b16 %v1510_v16  ;;  %v1181_v43 = vsel %vm8723_vm2, %v1176_v23, %v9493_v30  ;;  %v7826_v24 = vld [vmem:[%s8695_s15 + $0x6c] sm:$0xe] }
  0xe8   : > { %v1191_v33 = vsel %vm8723_vm2, %v1186_v46, %v1190_v13  ;;  %v2122_v45 = vsel %vm8925_vm5, %v2120_v44, %v2121_v49  ;;  %v2805_v11 = vpack.c.b16 %v2778_v5, %v2777_v51  ;;  %v9544_v25 = vrot.slane %v1763_v31, 5  ;;  %v7787_v5 = vld [vmem:[%s8695_s15 + $0x70] sm:$0xf] }
  0xe9   : > { %2649 = vrot.lane.b32.xlu2 %v2629_v21, %s8621_s20  ;;  %v2885_v21 = vpack.c.b16 %v2858_v7, %v12495_v47  ;;  %v1769_v48 = vrot.slane %v1767_v6, 4  ;;  %v9550_v47 = vunpack.c.l.b16 %v1167_v3  ;;  %v1760_v30 = vor.u32 %v1759_v37, %v1756_v36 }
  0xea   : > { %v9553_v23 = vunpack.c.l.b16 %v1181_v43  ;;  %v9555_v13 = vunpack.c.l.b16 %v1191_v33  ;;  %v2860_v49 = vunpack.c.l.b16 %v2122_v45  ;;  %v1773_v46 = vshll.u32 %v9509_v38, 16  ;;  %v9596_v43 = vld [vmem:[%s8695_s15 + $0x64] sm:$0xf] }
  0xeb   : > { %2743 = vrot.lane.b32.xlu0 %v8496_v17, %s8620_s19  ;;  %v9515_v1 = vpop.permute.xlu2 %2487  ;;  %v9560_v44 = vsel %vm2929_vm6, %v8464_v41, %v9193_v57  ;;  %v2935_v51 = vsel %vm2929_vm6, %v8462_v19, %v9233_v63  ;;  %v1770_v57 = vor.u32 %v1769_v48, %v9544_v25  ;;  %v1530_v3 = vrot.slane %v7787_v5, 5  ;;  %v7824_v63 = vld [vmem:[%s8695_s15 + $0x54] sm:$0xe]  ;;  %v7862_v48 = vld [vmem:[%s8695_s15 + $0x60] sm:$0xf] }
  0xec   : > { %2569 = vrot.lane.b32.xlu1 %v2549_v40, %s8622_s21  ;;  %v2119_v40 = vsel %vm8925_vm5, %v7919_v32, %v2118_v14  ;;  %v2604_v14 = vunpack.c.l.b16 %v1513_v18  ;;  %v9548_v32 = vunpack.c.l.b16 %v1157_v27  ;;  %v1217_v18 = vshrl.u32 %v7786_v4, 16 }
  0xed   : > { %v9521_v17 = vpop.permute.xlu0 %2395  ;;  %v2859_v16 = vunpack.c.l.b16 %v2119_v40  ;;  %v9568_v27 = vsel %vm12484_vm7, %v2935_v51, %v9270_v54  ;;  %v1220_v36 = vshll.u32 %v7786_v4, 16  ;;  %v1761_v6 = vrot.slane %v1760_v30, 4  ;;  %v7810_v54 = vld [vmem:[%s8695_s15 + $0x74] sm:$0x1] }
  0xee   : > { %v9530_v7 = vpop.permute.xlu1 %2403  ;;  %v2630_v37 = vpack.c.b16 %v2604_v14, %v2603_v58  ;;  %v1516_v41 = vrot.slane %v9470_v22, 5  ;;  %v1775_v45 = vrot.slane %v1773_v46, 5  ;;  %v8497_v58 = vld [vmem:[%s8695_s15 + $0x48] sm:$0xff]  ;;  %v1519_v22 = vrot.slane %v9479_v39, 5 }
  0xef   : > { %v9586_v33 = vpack.c.b16 %v2860_v49, %v2859_v16  ;;  %v1219_v4 = vrot.slane %v1217_v18, 4  ;;  %v1771_v30 = vrot.slane %v1770_v57, 4  ;;  %v1532_v51 = vrot.slane %v1530_v3, 4 }
  0xf0   : > { %v1222_v31 = vrot.slane %v1220_v36, 5  ;;  %v1766_v16 = vsel %vm8723_vm2, %v1761_v6, %v9544_v25  ;;  %v1518_v49 = vrot.slane %v1516_v41, 4  ;;  %v1230_v46 = vshrl.u32 %v7787_v5, 16  ;;  %v9614_v6 = vld [vmem:[%s8695_s15 + $0x68] sm:$0x1] }
  0xf1   : > { %2905 = vrot.lane.b32.xlu2 %v2885_v21, %s8623_s22  ;;  %v7842_v21 = vrot.slane %v7826_v24, 9  ;;  %v7840_v24 = vrot.slane %v7824_v63, 9  ;;  %v1236_v18 = vshll.u32 %v7810_v54, 16  ;;  %v1781_v29 = vshll.u32 %v7862_v48, 16 }
  0xf2   : > { %v1223_v63 = vor.u32 %v1222_v31, %v1219_v4  ;;  %v1787_v61 = vshll.u32 %v9596_v43, 16 }
  0xf3   : > { %2509 = vrot.lane.b32.xlu0 %v8491_v50, %s8619_s18  ;;  %v9571_v38 = vpop.permute.xlu2 %2493  ;;  %v8498_v50 = vld [vmem:[%s8695_s15 + $0x54] sm:$0xff]  ;;  %v9592_v14 = vsel %vm8925_vm5, %v7842_v21, %v1530_v3  ;;  %v1778_v21 = vshrl.u32 %v7862_v48, 16  ;;  %v1517_v57 = vsel %vm8925_vm5, %v7840_v24, %v1516_v41  ;;  %v1232_v3 = vrot.slane %v1230_v46, 4 }
  0xf4   : > { %2825 = vrot.lane.b32.xlu1 %v2805_v11, %s8624_s23  ;;  %v1533_v11 = vrot.slane %v7810_v54, 5  ;;  %v1783_v54 = vrot.slane %v1781_v29, 5  ;;  %v1791_v41 = vshrl.u32 %v9596_v43, 16  ;;  %v1238_v4 = vrot.slane %v1236_v18, 5 }
  0xf5   : > { %v9575_v40 = vpop.permute.xlu0 %2401  ;;  %v1780_v36 = vrot.slane %v1778_v21, 4  ;;  %v9624_v29 = vunpack.c.l.b16 %v1766_v16  ;;  %v1797_v21 = vshll.u32 %v9614_v6, 16  ;;  %v2980_v16 = vsel %vm12484_vm7, %v9440_v9, %v9408_v0  ;;  %v7904_v9 = vld [vmem:[%s8695_s15 + $0x60] sm:$0xe] }
  0xf6   : > { %v9581_v19 = vpop.permute.xlu1 %2409  ;;  %v1534_v31 = vsel %vm8925_vm5, %v1532_v51, %v1533_v11 }
  0xf7   : > { %12496 = vst [vmem:[#allocation8_spill] sm:$0xff] %v9581_v19  ;;  %v1226_v19 = vshll.u32 %v7787_v5, 16  ;;  %v1776_v5 = vsel %vm8723_vm2, %v1771_v30, %v1775_v45  ;;  %v2609_v45 = vunpack.c.l.b16 %v9592_v14  ;;  %v1784_v11 = vor.u32 %v1783_v54, %v1780_v36  ;;  %v7867_v36 = vld [vmem:[%s8695_s15 + $0x7c] sm:$0xf] }
  0xf8   : > { %v1793_v30 = vrot.slane %v1791_v41, 4  ;;  %v2610_v51 = vunpack.c.l.b16 %v1534_v31  ;;  %v9631_v14 = vsel %vm12484_vm7, %v9159_v55, %v9329_v53  ;;  %v2139_v0 = vrot.slane %v7867_v36, 5 }
  0xf9   : > { %2747 = vrot.lane.b32.xlu2 %v8498_v50, %s8620_s19  ;;  %v1228_v39 = vrot.slane %v1226_v19, 5  ;;  %v1520_v50 = vsel %vm8925_vm5, %v1518_v49, %v1519_v22  ;;  %v2780_v22 = vunpack.c.l.b16 %v1776_v5  ;;  %v2605_v49 = vunpack.c.l.b16 %v1517_v57 }
  0xfa   : > { %v9642_v57 = vsel %vm12484_vm7, %v9560_v44, %v9447_v42  ;;  %v12499_v5 = vpack.c.b16 %v9555_v13, %v9553_v23  ;;  %v9654_v31 = vsel %vm3011_vm8, %v2980_v16, %v9482_v28  ;;  %v12500_v42 = vpack.c.b16 %v9550_v47, %v9548_v32 }
  0xfb   : > { %2745 = vrot.lane.b32.xlu0 %v8497_v58, %s8620_s19  ;;  %v9607_v25 = vpop.permute.xlu2 %2499  ;;  %v1233_v48 = vor.u32 %v1232_v3, %v1228_v39  ;;  %v1789_v58 = vrot.slane %v1787_v61, 5  ;;  %v2606_v61 = vunpack.c.l.b16 %v1520_v50  ;;  %v1785_v3 = vrot.slane %v1784_v11, 4 }
  0xfc   : > { %2651 = vrot.lane.b32.xlu1 %v2630_v37, %s8621_s20  ;;  %v1224_v37 = vrot.slane %v1223_v63, 4  ;;  %v1799_v23 = vrot.slane %v1797_v21, 5  ;;  %v2125_v13 = vrot.slane %v9596_v43, 5  ;;  %v2806_v54 = vpack.c.b16 %v2780_v22, %v9624_v29  ;;  %v7890_v43 = vld [vmem:[%s8695_s15 + $0x80] sm:$0x1] }
  0xfd   : > { %v9617_v19 = vpop.permute.xlu0 %2407  ;;  %v1234_v46 = vrot.slane %v1233_v48, 4  ;;  %v1794_v63 = vor.u32 %v1793_v30, %v1789_v58  ;;  %v2631_v50 = vpack.c.b16 %v2606_v61, %v2605_v49  ;;  %v1790_v47 = vsel %vm8723_vm2, %v1785_v3, %v1789_v58  ;;  %v9685_v22 = vld [vmem:[%s8695_s15 + $0x64] sm:$0xf] }
  0xfe   : > { %12497 = vst [vmem:[#allocation9_spill] sm:$0xff] %v9617_v19  ;;  %v9621_v24 = vpop.permute.xlu1 %2415  ;;  %v7906_v19 = vld [vmem:[%s8695_s15 + $0x78] sm:$0xe]  ;;  %v1229_v18 = vsel %vm8723_vm2, %v1224_v37, %v1228_v39  ;;  %v7920_v48 = vrot.slane %v7904_v9, 9  ;;  %v2141_v11 = vrot.slane %v2139_v0, 4  ;;  %v2142_v30 = vrot.slane %v7890_v43, 5 }
  0xff   : > { %12498 = vst [vmem:[#allocation10_spill] sm:$0xff] %v9621_v24  ;;  %v1239_v55 = vsel %vm8723_vm2, %v1234_v46, %v1238_v4  ;;  %v7922_v53 = vrot.slane %v7906_v19, 9  ;;  %v7866_v39 = vld [vmem:[%s8695_s15 + $0x78] sm:$0xf]  ;;  %v1795_v44 = vrot.slane %v1794_v63, 4  ;;  %v2633_v19 = vpack.c.b16 %v2610_v51, %v2609_v45 }
 0x100   : > { %v9666_v28 = vunpack.c.l.b16 %v1229_v18  ;;  %v9670_v32 = vunpack.c.l.b16 %v1239_v55  ;;  %v1829_v29 = vshll.u32 %v7866_v39, 16  ;;  %v2127_v46 = vrot.slane %v2125_v13, 4  ;;  %v7788_v18 = vld [vmem:[%s8695_s15 + $0x78] sm:$0xf] }
 0x101   : > { %2573 = vrot.lane.b32.xlu2 %v12499_v5, %s8622_s21  ;;  %v9679_v45 = vsel %vm8925_vm5, %v7922_v53, %v2139_v0  ;;  %v1800_v51 = vsel %vm8723_vm2, %v1795_v44, %v1799_v23  ;;  %v2128_v58 = vrot.slane %v9614_v6, 5  ;;  %v2781_v49 = vunpack.c.l.b16 %v1790_v47  ;;  %v7825_v6 = vld [vmem:[%s8695_s15 + $0x60] sm:$0xe] }
 0x102   : > { %v1831_v61 = vrot.slane %v1829_v29, 5  ;;  %v1835_v63 = vshll.u32 %v7867_v36, 16  ;;  %v1839_v16 = vshrl.u32 %v7867_v36, 16  ;;  %v2553_v3 = vpack.c.b16 %v9670_v32, %v9666_v28  ;;  %v9709_v28 = vld [vmem:[%s8695_s15 + $0x68] sm:$0x1] }
 0x103   : > { %2571 = vrot.lane.b32.xlu0 %v12500_v42, %s8622_s21  ;;  %v9664_v41 = vpop.permute.xlu2 %2505  ;;  %v9693_v55 = vsel %vm8925_vm5, %v7920_v48, %v2125_v13  ;;  %v1523_v53 = vrot.slane %v9685_v22, 5  ;;  %v2782_v0 = vunpack.c.l.b16 %v1800_v51  ;;  %v2143_v36 = vsel %vm8925_vm5, %v2141_v11, %v2142_v30  ;;  %v9703_v42 = vld [vmem:[%s8695_s15 + $0x7c] sm:$0xf]  ;;  %v9719_v29 = vld [vmem:[%s8695_s15 + $0x80] sm:$0x1] }
 0x104   : > { %2907 = vrot.lane.b32.xlu1 %v9586_v33, %s8623_s22  ;;  %12501 = vst [vmem:[#allocation11_spill] sm:$0xff] %v9664_v41  ;;  %v1826_v33 = vshrl.u32 %v7866_v39, 16  ;;  %v9700_v9 = vrot.slane %v1835_v63, 5  ;;  %v1841_v39 = vrot.slane %v1839_v16, 4  ;;  %v2129_v44 = vsel %vm8925_vm5, %v2127_v46, %v2128_v58  ;;  %v7784_v16 = vld [vmem:[%s8695_s15 + $0x60] sm:$0xf] }
 0x105   : > { %v9668_v37 = vpop.permute.xlu0 %2413  ;;  %v1845_v13 = vshll.u32 %v7890_v43, 16  ;;  %v7841_v47 = vrot.slane %v7825_v6, 9  ;;  %v1525_v48 = vrot.slane %v1523_v53, 4  ;;  %v1244_v11 = vshll.u32 %v7788_v18, 16 }
 0x106   : > { %12502 = vst [vmem:[#allocation12_spill] sm:$0xff] %v9668_v37  ;;  %v9675_v4 = vpop.permute.xlu1 %2485  ;;  %v1828_v21 = vrot.slane %v1826_v33, 4  ;;  %v1526_v33 = vrot.slane %v9709_v28, 5  ;;  %v1250_v51 = vshll.u32 %v9703_v42, 16  ;;  %v2807_v58 = vpack.c.b16 %v2782_v0, %v2781_v49 }
 0x107   : > { %v2862_v63 = vunpack.c.l.b16 %v2129_v44  ;;  %v1847_v6 = vrot.slane %v1845_v13, 5  ;;  %v1246_v5 = vrot.slane %v1244_v11, 5  ;;  %v1260_v49 = vshll.u32 %v9719_v29, 16 }
 0x108   : > { %v1832_v23 = vor.u32 %v1831_v61, %v1828_v21  ;;  %v2866_v21 = vunpack.c.l.b16 %v2143_v36  ;;  %v2861_v61 = vunpack.c.l.b16 %v9693_v55  ;;  %v1252_v24 = vrot.slane %v1250_v51, 5 }
 0x109   : > { %2657 = vrot.lane.b32.xlu2 %v2633_v19, %s8621_s20  ;;  %v1241_v19 = vshrl.u32 %v7788_v18, 16  ;;  %v9734_v37 = vsel %vm8925_vm5, %v1525_v48, %v1526_v33  ;;  %v1193_v36 = vshrl.u32 %v7784_v16, 16  ;;  %v1196_v44 = vshll.u32 %v7784_v16, 16 }
 0x10a   : > { %v1833_v18 = vrot.slane %v1832_v23, 4  ;;  %v1262_v13 = vrot.slane %v1260_v49, 5  ;;  %v1202_v11 = vshll.u32 %v9685_v22, 16 }
 0x10b   : > { %2827 = vrot.lane.b32.xlu0 %v2806_v54, %s8624_s23  ;;  %v9712_v32 = vpop.permute.xlu2 %2737  ;;  %v1842_v54 = vor.u32 %v1841_v39, %v9700_v9  ;;  %v1243_v43 = vrot.slane %v1241_v19, 4  ;;  %v8501_v39 = vld [vmem:[%s8695_s15 + $0x78] sm:$0xff]  ;;  %v9730_v19 = vsel %vm8925_vm5, %v7841_v47, %v1523_v53  ;;  %v1206_v53 = vshrl.u32 %v9685_v22, 16  ;;  %v3213_v47 = vld [vmem:[%s12471_s1 + $0x10] sm:$0x3] }
 0x10c   : > { %2653 = vrot.lane.b32.xlu1 %v2631_v50, %s8621_s20  ;;  %v1254_v50 = vshrl.u32 %v9703_v42, 16  ;;  %v1195_v33 = vrot.slane %v1193_v36, 4  ;;  %v3223_v49 = vunpack.c.l.b16 %v3213_v47 }
 0x10d   : > { %v9715_v30 = vpop.permute.xlu0 %2483  ;;  %v1843_v0 = vrot.slane %v1842_v54, 4  ;;  %v1247_v55 = vor.u32 %v1246_v5, %v1243_v43  ;;  %v1838_v5 = vsel %vm8723_vm2, %v1833_v18, %v9700_v9  ;;  %v1198_v54 = vrot.slane %v1196_v44, 5 }
 0x10e   : > { %v9723_v46 = vpop.permute.xlu1 %2491  ;;  %v1256_v41 = vrot.slane %v1254_v50, 4  ;;  %v1204_v43 = vrot.slane %v1202_v11, 5  ;;  %v1208_v51 = vrot.slane %v1206_v53, 4  ;;  %v1212_v50 = vshll.u32 %v9709_v28, 16  ;;  %v8499_v11 = vld [vmem:[%s8695_s15 + $0x60] sm:$0xff] }
 0x10f   : > { %v1248_v48 = vrot.slane %v1247_v55, 4  ;;  %v2887_v9 = vpack.c.b16 %v2862_v63, %v2861_v61  ;;  %v1199_v18 = vor.u32 %v1198_v54, %v1195_v33  ;;  %v9765_v53 = vunpack.c.l.b16 %v1838_v5  ;;  %v7905_v54 = vld [vmem:[%s8695_s15 + $0x6c] sm:$0xe] }
 0x110   : > { %v1257_v23 = vor.u32 %v1256_v41, %v1252_v24  ;;  %v1209_v28 = vor.u32 %v1208_v51, %v1204_v43  ;;  %v1214_v47 = vrot.slane %v1212_v50, 5  ;;  %v2984_v5 = vsel %vm12484_vm7, %v9436_v8, %v9486_v20  ;;  %v7865_v50 = vld [vmem:[%s8695_s15 + $0x70] sm:$0xf] }
 0x111   : > { %2829 = vrot.lane.b32.xlu2 %v2807_v58, %s8624_s23  ;;  %v1253_v36 = vsel %vm8723_vm2, %v1248_v48, %v1252_v24  ;;  %v1200_v61 = vrot.slane %v1199_v18, 4  ;;  %v1537_v33 = vrot.slane %v9703_v42, 5  ;;  %v9792_v8 = vsel %vm3011_vm8, %v9568_v27, %v9715_v30 }
 0x112   : > { %v1258_v22 = vrot.slane %v1257_v23, 4  ;;  %v7827_v23 = vld [vmem:[%s8695_s15 + $0x78] sm:$0xe]  ;;  %v1210_v63 = vrot.slane %v1209_v28, 4  ;;  %v9769_v24 = vunpack.c.l.b16 %v1253_v36  ;;  %v7921_v18 = vrot.slane %v7905_v54, 9 }
 0x113   : > { %2577 = vrot.lane.b32.xlu0 %v2553_v3, %s8622_s21  ;;  %v9748_v41 = vpop.permute.xlu2 %2507  ;;  %v12504_v3 = vunpack.c.l.b16 %v9679_v45  ;;  %v2607_v45 = vunpack.c.l.b16 %v9730_v19  ;;  %v7843_v48 = vrot.slane %v7827_v23, 9  ;;  %v1205_v20 = vsel %vm8723_vm2, %v1200_v61, %v1204_v43  ;;  %v8509_v61 = vld [vmem:[%s12471_s1] sm:$0xff] }
 0x114   : > { %2753 = vrot.lane.b32.xlu1 %v8501_v39, %s8620_s19  ;;  %12503 = vst [vmem:[#allocation13_spill] sm:$0xff] %v9748_v41  ;;  %v1848_v39 = vsel %vm8723_vm2, %v1843_v0, %v1847_v6  ;;  %v1263_v44 = vsel %vm8723_vm2, %v1258_v22, %v1262_v13  ;;  %v3226_v6 = vpack.c.b16 %v3223_v49, %v3223_v49  ;;  %v1539_v51 = vrot.slane %v1537_v33, 4 }
 0x115   : > { %v9751_v58 = vpop.permute.xlu0 %2489  ;;  %v2889_v16 = vpack.c.b16 %v2866_v21, %v12504_v3  ;;  %v2608_v21 = vunpack.c.l.b16 %v9734_v37  ;;  %v2786_v0 = vunpack.c.l.b16 %v1848_v39  ;;  %v9771_v13 = vunpack.c.l.b16 %v1263_v44  ;;  %v9819_v39 = vld [vmem:[%s8695_s15 + $0x88] sm:$0xf] }
 0x116   : > { %v9755_v55 = vpop.permute.xlu1 %2497  ;;  %v9779_v37 = vsel %vm3011_vm8, %v9642_v57, %v9515_v1  ;;  %v3264_v19 = vsel %vm12481_vm9, %v3226_v6, 0  ;;  %v9787_v22 = vsel %vm3011_vm8, %v2984_v5, %v9675_v4  ;;  %v8510_v1 = vld [vmem:[%s12471_s1 + $0x8] sm:$0xff]  ;;  %v1540_v57 = vrot.slane %v9719_v29, 5  ;;  %v7868_v4 = vld [vmem:[%s8695_s15 + $0x84] sm:$0xf]  ;;  %vm10219_vm9 = vmand %vm3462_vm0, %vm3525_vm4 }
 0x117   : > { %3271 = vmatpush.bf16.msra.mxu0 %v3264_v19  ;;  %v2632_v27 = vpack.c.b16 %v2608_v21, %v2607_v45  ;;  %v1215_v30 = vsel %vm8723_vm2, %v1210_v63, %v1214_v47  ;;  %v1538_v43 = vsel %vm8925_vm5, %v7843_v48, %v1537_v33  ;;  %8561 = vmatpush.bf16.msra.mxu2 %v3264_v19  ;;  %v2132_v49 = vrot.slane %v7865_v50, 5  ;;  %v7864_v6 = vld [vmem:[%s8695_s15 + $0x6c] sm:$0xf] }
 0x118   : > { %v2809_v29 = vpack.c.b16 %v2786_v0, %v9765_v53  ;;  %v9823_v44 = vunpack.c.l.b16 %v1205_v20  ;;  %v1541_v28 = vsel %vm8925_vm5, %v1539_v51, %v1540_v57  ;;  %v1850_v53 = vshrl.u32 %v7868_v4, 16 }
 0x119   : > { %2913 = vrot.lane.b32.xlu2 %v2889_v16, %s8623_s22  ;;  %v2554_v16 = vpack.c.b16 %v9771_v13, %v9769_v24  ;;  %v9831_v45 = vunpack.c.l.b16 %v1215_v30  ;;  %v2611_v21 = vunpack.c.l.b16 %v1538_v43  ;;  %v2133_v63 = vsel %vm8925_vm5, %v7921_v18, %v2132_v49 }
 0x11a   : > { %v2134_v47 = vrot.slane %v2132_v49, 4  ;;  %v2612_v0 = vunpack.c.l.b16 %v1541_v28  ;;  %v1852_v24 = vrot.slane %v1850_v53, 4  ;;  %v1853_v13 = vshll.u32 %v7868_v4, 16  ;;  %v7828_v53 = vld [vmem:[%s8695_s15 + $0x84] sm:$0xe] }
 0x11b   : > { %2749 = vrot.lane.b32.xlu0 %v8499_v11, %s8620_s19  ;;  %v9803_v42 = vpop.permute.xlu2 %2739  ;;  %v9829_v11 = vld [vmem:[%s8695_s15 + $0x8c] sm:$0x1]  ;;  %3272 = vmatpush.bf16.msra.mxu0 %v8510_v1  ;;  %v1859_v48 = vshll.u32 %v9819_v39, 16  ;;  %v2863_v19 = vunpack.c.l.b16 %v2133_v63  ;;  %v1863_v33 = vshrl.u32 %v9819_v39, 16  ;;  %v1802_v43 = vshrl.u32 %v7864_v6, 16 }
 0x11c   : > { %2909 = vrot.lane.b32.xlu1 %v2887_v9, %s8623_s22  ;;  %v9816_v9 = vld [vmem:[%s8695_s15 + $0x74] sm:$0x1]  ;;  %8562 = vmatpush.bf16.msra.mxu2 %v8510_v1  ;;  %v1869_v54 = vshll.u32 %v9829_v11, 16  ;;  %v1855_v57 = vrot.slane %v1853_v13, 5  ;;  %v2552_v1 = vpack.c.b16 %v9831_v45, %v9823_v44  ;;  %v1805_v51 = vshll.u32 %v7864_v6, 16  ;;  %v8502_v13 = vld [vmem:[%s8695_s15 + $0x84] sm:$0xff] }
 0x11d   : > { %v9810_v3 = vpop.permute.xlu0 %2495  ;;  %v2135_v23 = vrot.slane %v9816_v9, 5  ;;  %v1861_v30 = vrot.slane %v1859_v48, 5  ;;  %v1865_v4 = vrot.slane %v1863_v33, 4  ;;  %v1811_v18 = vshll.u32 %v7865_v50, 16  ;;  %v7791_v48 = vld [vmem:[%s8695_s15 + $0x88] sm:$0xf] }
 0x11e   : > { %v9821_v36 = vpop.permute.xlu1 %2503  ;;  %v1856_v28 = vor.u32 %v1855_v57, %v1852_v24  ;;  %v1871_v63 = vrot.slane %v1869_v54, 5  ;;  %v7812_v33 = vld [vmem:[%s8695_s15 + $0x8c] sm:$0x1]  ;;  %v7844_v57 = vrot.slane %v7828_v53, 9 }
 0x11f   : > { %12505 = vst [vmem:[#allocation14_spill] sm:$0xff] %v9821_v36  ;;  %v2136_v5 = vsel %vm8925_vm5, %v2134_v47, %v2135_v23  ;;  %3273 = vmatpush.bf16.msra.mxu0 %v8509_v61  ;;  %v1804_v23 = vrot.slane %v1802_v43, 4  ;;  %v1866_v45 = vor.u32 %v1865_v4, %v1861_v30  ;;  %v1813_v47 = vrot.slane %v1811_v18, 5  ;;  %v8500_v4 = vld [vmem:[%s8695_s15 + $0x6c] sm:$0xff]  ;;  %v7790_v36 = vld [vmem:[%s8695_s15 + $0x84] sm:$0xf] }
 0x120   : > { %v2864_v20 = vunpack.c.l.b16 %v2136_v5  ;;  %8563 = vmatpush.bf16.msra.mxu2 %v8509_v61  ;;  %v1544_v43 = vrot.slane %v7791_v48, 5  ;;  %v1547_v41 = vrot.slane %v7812_v33, 5 }
 0x121   : > { %2655 = vrot.lane.b32.xlu2 %v2632_v27, %s8621_s20  ;;  %v9851_v27 = vpack.c.b16 %v2612_v0, %v2611_v21  ;;  %v1857_v0 = vrot.slane %v1856_v28, 4  ;;  %v1867_v61 = vrot.slane %v1866_v45, 4 }
 0x122   : > { %v9857_v21 = vpack.c.b16 %v2864_v20, %v2863_v19  ;;  %v1546_v53 = vrot.slane %v1544_v43, 4 }
 0x123   : > { %2833 = vrot.lane.b32.xlu0 %v2809_v29, %s8624_s23  ;;  %v9849_v49 = vpop.permute.xlu2 %2565  ;;  %v1815_v29 = vshrl.u32 %v7865_v50, 16  ;;  %v1821_v50 = vshll.u32 %v9816_v9, 16  ;;  %v1862_v54 = vsel %vm8723_vm2, %v1857_v0, %v1861_v30  ;;  %v1872_v19 = vsel %vm8723_vm2, %v1867_v61, %v1871_v63 }
 0x124   : > { %2579 = vrot.lane.b32.xlu1 %v2554_v16, %s8622_s21  ;;  %v1807_v16 = vrot.slane %v1805_v51, 5  ;;  %v2787_v20 = vunpack.c.l.b16 %v1862_v54  ;;  %v1545_v9 = vsel %vm8925_vm5, %v7844_v57, %v1544_v43  ;;  %v1268_v63 = vshll.u32 %v7790_v36, 16  ;;  %v7907_v43 = vld [vmem:[%s8695_s15 + $0x84] sm:$0xe] }
 0x125   : > { %v9854_v44 = vpop.permute.xlu0 %2501  ;;  %v1817_v24 = vrot.slane %v1815_v29, 4  ;;  %v1823_v18 = vrot.slane %v1821_v50, 5  ;;  %v2613_v45 = vunpack.c.l.b16 %v1545_v9  ;;  %v1274_v0 = vshll.u32 %v7791_v48, 16 }
 0x126   : > { %v2642_v6 = vpop.permute.xlu1 %2641  ;;  %v1808_v5 = vor.u32 %v1807_v16, %v1804_v23  ;;  %v2788_v23 = vunpack.c.l.b16 %v1872_v19  ;;  %v1265_v16 = vshrl.u32 %v7790_v36, 16  ;;  %v1270_v57 = vrot.slane %v1268_v63, 5 }
 0x127   : > { %v1818_v51 = vor.u32 %v1817_v24, %v1813_v47  ;;  %v1278_v19 = vshrl.u32 %v7791_v48, 16  ;;  %v7923_v63 = vrot.slane %v7907_v43, 9  ;;  %v2146_v48 = vrot.slane %v9819_v39, 5 }
 0x128   : > { %v1809_v28 = vrot.slane %v1808_v5, 4  ;;  %v2810_v24 = vpack.c.b16 %v2788_v23, %v2787_v20  ;;  %v1267_v5 = vrot.slane %v1265_v16, 4  ;;  %v7908_v20 = vld [vmem:[%s8695_s15 + $0x90] sm:$0xe] }
 0x129   : > { %2755 = vrot.lane.b32.xlu2 %v8502_v13, %s8620_s19  ;;  %v1819_v29 = vrot.slane %v1818_v51, 4  ;;  %v2147_v39 = vsel %vm8925_vm5, %v7923_v63, %v2146_v48 }
 0x12a   : > { %v1814_v30 = vsel %vm8723_vm2, %v1809_v28, %v1813_v47 }
 0x12b   : > { %2575 = vrot.lane.b32.xlu0 %v2552_v1, %s8622_s21  ;;  %v1824_v13 = vsel %vm8723_vm2, %v1819_v29, %v1823_v18  ;;  %v9877_v50 = vunpack.c.l.b16 %v1814_v30  ;;  %v1548_v1 = vsel %vm8925_vm5, %v1546_v53, %v1547_v41  ;;  %v9886_v54 = vpop.permute.xlu2 %2821  ;;  %v1276_v18 = vrot.slane %v1274_v0, 5  ;;  %v7870_v53 = vld [vmem:[%s8695_s15 + $0x90] sm:$0xf] }
 0x12c   : > { %2751 = vrot.lane.b32.xlu1 %v8500_v4, %s8620_s19  ;;  %v9881_v47 = vunpack.c.l.b16 %v1824_v13  ;;  %v2614_v36 = vunpack.c.l.b16 %v1548_v1  ;;  %v1284_v41 = vshll.u32 %v7812_v33, 16  ;;  %v1271_v29 = vor.u32 %v1270_v57, %v1267_v5  ;;  %v7871_v13 = vld [vmem:[%s8695_s15 + $0x94] sm:$0xf]  ;;  %v7892_v1 = vld [vmem:[%s8695_s15 + $0x98] sm:$0x1] }
 0x12d   : > { %v2562_v61 = vpop.permute.xlu0 %2561  ;;  %v1280_v30 = vrot.slane %v1278_v19, 4  ;;  %v2149_v33 = vrot.slane %v9829_v11, 5  ;;  %v1877_v11 = vshll.u32 %v7870_v53, 16  ;;  %v2867_v57 = vunpack.c.l.b16 %v2147_v39 }
 0x12e   : > { %v3046_v4 = vsel %vm12483_vm10, %v9654_v31, %v2562_v61  ;;  %v2898_v51 = vpop.permute.xlu1 %2897  ;;  %v2808_v9 = vpack.c.b16 %v9881_v47, %v9877_v50  ;;  %v2635_v23 = vpack.c.b16 %v2614_v36, %v2613_v45  ;;  %v1286_v16 = vrot.slane %v1284_v41, 5 }
 0x12f   : > { %v3079_v28 = vsel %vm3077_vm11, %v3046_v4, %v2642_v6  ;;  %v1272_v0 = vrot.slane %v1271_v29, 4  ;;  %v7924_v6 = vrot.slane %v7908_v20, 9  ;;  %v1281_v45 = vor.u32 %v1280_v30, %v1276_v18  ;;  %v7829_v30 = vld [vmem:[%s8695_s15 + $0x90] sm:$0xe] }
 0x130   : > { %v3112_v31 = vsel %vm3110_vm12, %v3079_v28, %v9712_v32  ;;  %v2153_v50 = vrot.slane %v7871_v13, 5  ;;  %v2156_v61 = vrot.slane %v7892_v1, 5  ;;  %v1874_v47 = vshrl.u32 %v7870_v53, 16 }
 0x131   : > { %2911 = vrot.lane.b32.xlu2 %v9857_v21, %s8623_s22  ;;  %v1277_v32 = vsel %vm8723_vm2, %v1272_v0, %v1276_v18  ;;  %v2148_v36 = vrot.slane %v2146_v48, 4  ;;  %v1282_v5 = vrot.slane %v1281_v45, 4  ;;  %v1879_v53 = vrot.slane %v1877_v11, 5  ;;  %v7793_v11 = vld [vmem:[%s8695_s15 + $0x94] sm:$0xf] }
 0x132   : > { %v2533_v21 = vunpack.c.l.b16 %v1277_v32  ;;  %v2154_v43 = vsel %vm8925_vm5, %v7924_v6, %v2153_v50  ;;  %v2155_v19 = vrot.slane %v2153_v50, 4  ;;  %v1876_v41 = vrot.slane %v1874_v47, 4  ;;  %v7792_v47 = vld [vmem:[%s8695_s15 + $0x90] sm:$0xf] }
 0x133   : > { %2659 = vrot.lane.b32.xlu0 %v9851_v27, %s8621_s20  ;;  %v2150_v27 = vsel %vm8925_vm5, %v2148_v36, %v2149_v33  ;;  %v2869_v18 = vunpack.c.l.b16 %v2154_v43  ;;  %v1883_v33 = vshll.u32 %v7871_v13, 16  ;;  %v1893_v36 = vshll.u32 %v7892_v1, 16 }
 0x134   : > { %2835 = vrot.lane.b32.xlu1 %v2810_v24, %s8624_s23  ;;  %v1287_v24 = vsel %vm8723_vm2, %v1282_v5, %v1286_v16  ;;  %v2868_v29 = vunpack.c.l.b16 %v2150_v27  ;;  %v2157_v48 = vsel %vm8925_vm5, %v2155_v19, %v2156_v61  ;;  %v1880_v50 = vor.u32 %v1879_v53, %v1876_v41 }
 0x135   : > { %v2818_v4 = vpop.permute.xlu0 %2817  ;;  %v2534_v0 = vunpack.c.l.b16 %v1287_v24  ;;  %v2870_v45 = vunpack.c.l.b16 %v2157_v48  ;;  %v1887_v16 = vshrl.u32 %v7871_v13, 16  ;;  %v1885_v39 = vrot.slane %v1883_v33, 5 }
 0x136   : > { %v3145_v20 = vsel %vm3143_vm13, %v3112_v31, %v2818_v4  ;;  %v2644_v28 = vpop.permute.xlu1 %2643  ;;  %v9920_v31 = vpop.permute.xlu2 %2647  ;;  %v2890_v6 = vpack.c.b16 %v2868_v29, %v2867_v57  ;;  %v1881_v61 = vrot.slane %v1880_v50, 4  ;;  %v7813_v4 = vld [vmem:[%s8695_s15 + $0x98] sm:$0x1]  ;;  %v1551_v27 = vrot.slane %v7793_v11, 5 }
 0x137   : > { %v3178_v63 = vsel %vm12485_vm14, %v3145_v20, %v2898_v51  ;;  %v2555_v32 = vpack.c.b16 %v2534_v0, %v2533_v21  ;;  %v7845_v51 = vrot.slane %v7829_v30, 9  ;;  %v2891_v5 = vpack.c.b16 %v2870_v45, %v2869_v18 }
 0x138   : > { %8130 = vmatmul.msk.bf16.vlgmr.msra.gmra.mxu0 %vm3229_vm15, %v3178_v63  ;;  %v1889_v43 = vrot.slane %v1887_v16, 4  ;;  %v1895_v19 = vrot.slane %v1893_v36, 5  ;;  %v1554_v57 = vrot.slane %v7813_v4, 5  ;;  %v1289_v20 = vshrl.u32 %v7792_v47, 16 }
 0x139   : > { %2661 = vrot.lane.b32.xlu2 %v2635_v23, %s8621_s20  ;;  %v1292_v41 = vshll.u32 %v7792_v47, 16  ;;  %v1886_v13 = vsel %vm8723_vm2, %v1881_v61, %v1885_v39  ;;  %v1552_v23 = vsel %vm8925_vm5, %v7845_v51, %v1551_v27  ;;  %v1553_v21 = vrot.slane %v1551_v27, 4 }
 0x13a   : > { %v1890_v1 = vor.u32 %v1889_v43, %v1885_v39  ;;  %v2789_v24 = vunpack.c.l.b16 %v1886_v13  ;;  %v2615_v29 = vunpack.c.l.b16 %v1552_v23  ;;  %v1298_v33 = vshll.u32 %v7793_v11, 16  ;;  %v9939_v39 = vld [vmem:[%s8695_s15 + $0xa0] sm:$0xf]  ;;  %v7909_v13 = vld [vmem:[%s8695_s15 + $0x9c] sm:$0xe] }
 0x13b   : > { %2831 = vrot.lane.b32.xlu0 %v2808_v9, %s8624_s23  ;;  %v1291_v9 = vrot.slane %v1289_v20, 4  ;;  %v1294_v53 = vrot.slane %v1292_v41, 5  ;;  %v1555_v48 = vsel %vm8925_vm5, %v1553_v21, %v1554_v57  ;;  %v1302_v47 = vshrl.u32 %v7793_v11, 16  ;;  %v9951_v57 = vld [vmem:[%s8695_s15 + $0xa4] sm:$0x1] }
 0x13c   : > { %2581 = vrot.lane.b32.xlu1 %v2555_v32, %s8622_s21  ;;  %v1891_v0 = vrot.slane %v1890_v1, 4  ;;  %v2616_v50 = vunpack.c.l.b16 %v1555_v48  ;;  %v7794_v32 = vld [vmem:[%s8695_s15 + $0x9c] sm:$0xf]  ;;  %v1300_v51 = vrot.slane %v1298_v33, 5  ;;  %v1308_v61 = vshll.u32 %v7813_v4, 16 }
 0x13d   : > { %v2564_v18 = vpop.permute.xlu0 %2563  ;;  %v1295_v16 = vor.u32 %v1294_v53, %v1291_v9  ;;  %v1304_v11 = vrot.slane %v1302_v47, 4  ;;  %v1316_v41 = vshll.u32 %v7794_v32, 16  ;;  %v1326_v23 = vshrl.u32 %v9939_v39, 16  ;;  %v7873_v9 = vld [vmem:[%s8695_s15 + $0xa0] sm:$0xf] }
 0x13e   : > { %v3048_v30 = vsel %vm12483_vm10, %v9792_v8, %v2564_v18  ;;  %v2900_v63 = vpop.permute.xlu1 %2899  ;;  %v9944_v8 = vsel %vm3011_vm8, %v9631_v14, %v9751_v58  ;;  %v1896_v36 = vsel %vm8723_vm2, %v1891_v0, %v1895_v19  ;;  %v9953_v20 = vpop.permute.xlu2 %2903  ;;  %v2636_v14 = vpack.c.b16 %v2616_v50, %v2615_v29  ;;  %v7893_v0 = vld [vmem:[%s8695_s15 + $0xa4] sm:$0x1]  ;;  %v8504_v50 = vld [vmem:[%s8695_s15 + $0x9c] sm:$0xff] }
 0x13f   : > { %v3081_v45 = vsel %vm3077_vm11, %v3048_v30, %v2644_v28  ;;  %v2790_v43 = vunpack.c.l.b16 %v1896_v36  ;;  %v1296_v27 = vrot.slane %v1295_v16, 4  ;;  %v1313_v58 = vshrl.u32 %v7794_v32, 16  ;;  %v7872_v36 = vld [vmem:[%s8695_s15 + $0x9c] sm:$0xf] }
 0x140   : > { %v3114_v28 = vsel %vm3110_vm12, %v3081_v45, %v9803_v42  ;;  %v1322_v19 = vshll.u32 %v9939_v39, 16  ;;  %v1305_v4 = vor.u32 %v1304_v11, %v1300_v51  ;;  %v1310_v1 = vrot.slane %v1308_v61, 5  ;;  %v8503_v61 = vld [vmem:[%s8695_s15 + $0x90] sm:$0xff] }
 0x141   : > { %2917 = vrot.lane.b32.xlu2 %v2891_v5, %s8623_s22  ;;  %v2811_v42 = vpack.c.b16 %v2790_v43, %v2789_v24  ;;  %v1301_v21 = vsel %vm8723_vm2, %v1296_v27, %v1300_v51  ;;  %v1315_v18 = vrot.slane %v1313_v58, 4  ;;  %v1318_v5 = vrot.slane %v1316_v41, 5 }
 0x142   : > { %v1324_v29 = vrot.slane %v1322_v19, 5  ;;  %v1306_v30 = vrot.slane %v1305_v4, 4  ;;  %v1332_v24 = vshll.u32 %v9951_v57, 16  ;;  %v7925_v48 = vrot.slane %v7909_v13, 9 }
 0x143   : > { %2915 = vrot.lane.b32.xlu0 %v2890_v6, %s8623_s22  ;;  %v1328_v6 = vrot.slane %v1326_v23, 4  ;;  %v1319_v16 = vor.u32 %v1318_v5, %v1315_v18  ;;  %v2160_v47 = vrot.slane %v7873_v9, 5  ;;  %v2163_v32 = vrot.slane %v7893_v0, 5 }
 0x144   : > { %2837 = vrot.lane.b32.xlu1 %v2811_v42, %s8624_s23  ;;  %v1311_v43 = vsel %vm8723_vm2, %v1306_v30, %v1310_v1  ;;  %v1334_v11 = vrot.slane %v1332_v24, 5  ;;  %v2535_v58 = vunpack.c.l.b16 %v1301_v21  ;;  %v1898_v4 = vshrl.u32 %v7872_v36, 16  ;;  %v7874_v21 = vld [vmem:[%s8695_s15 + $0xa8] sm:$0xf] }
 0x145   : > { %v2820_v53 = vpop.permute.xlu0 %2819  ;;  %v1329_v27 = vor.u32 %v1328_v6, %v1324_v29  ;;  %v1320_v41 = vrot.slane %v1319_v16, 4  ;;  %v2162_v19 = vrot.slane %v2160_v47, 4  ;;  %v2536_v13 = vunpack.c.l.b16 %v1311_v43 }
 0x146   : > { %v3147_v33 = vsel %vm3143_vm13, %v3114_v28, %v2820_v53  ;;  %v2742_v45 = vpop.permute.xlu1 %2741  ;;  %v2161_v28 = vsel %vm8925_vm5, %v7925_v48, %v2160_v47  ;;  %v1901_v23 = vshll.u32 %v7872_v36, 16  ;;  %v1907_v5 = vshll.u32 %v7873_v9, 16  ;;  %v9985_v48 = vpop.permute.xlu2 %2649 }
 0x147   : > { %v3180_v51 = vsel %vm12485_vm14, %v3147_v33, %v2900_v63  ;;  %v1330_v42 = vrot.slane %v1329_v27, 4  ;;  %v1325_v63 = vsel %vm8723_vm2, %v1320_v41, %v1324_v29  ;;  %v2164_v1 = vsel %vm8925_vm5, %v2162_v19, %v2163_v32  ;;  %v9993_v19 = vld [vmem:[%s8695_s15 + $0xac] sm:$0xf] }
 0x148   : > { %8131 = vmatmul.msk.bf16.gmra.mxu0 %vm3229_vm15, %v3180_v51  ;;  %v2871_v18 = vunpack.c.l.b16 %v2161_v28  ;;  %v2537_v30 = vunpack.c.l.b16 %v1325_v63  ;;  %v2872_v6 = vunpack.c.l.b16 %v2164_v1  ;;  %v1900_v24 = vrot.slane %v1898_v4, 4 }
 0x149   : > { %2759 = vrot.lane.b32.xlu2 %v8504_v50, %s8620_s19  ;;  %v1335_v53 = vsel %vm8723_vm2, %v1330_v42, %v1334_v11  ;;  %v1903_v29 = vrot.slane %v1901_v23, 5  ;;  %v1909_v50 = vrot.slane %v1907_v5, 5  ;;  %v1911_v16 = vshrl.u32 %v7873_v9, 16  ;;  %v9996_v9 = vld [vmem:[%s8695_s15 + $0xb0] sm:$0x1] }
 0x14a   : > { %v2538_v33 = vunpack.c.l.b16 %v1335_v53  ;;  %v3050_v47 = vsel %vm12483_vm10, %v9787_v22, %v9849_v49  ;;  %v1917_v36 = vshll.u32 %v7893_v0, 16  ;;  %v1922_v51 = vshrl.u32 %v7874_v21, 16  ;;  %v7830_v23 = vld [vmem:[%s8695_s15 + $0x9c] sm:$0xe] }
 0x14b   : > { %2757 = vrot.lane.b32.xlu0 %v8503_v61, %s8620_s19  ;;  %v1925_v61 = vshll.u32 %v7874_v21, 16  ;;  %v1904_v41 = vor.u32 %v1903_v29, %v1900_v24  ;;  %v1913_v28 = vrot.slane %v1911_v16, 4  ;;  %v2556_v22 = vpack.c.b16 %v2536_v13, %v2535_v58  ;;  %v7831_v29 = vld [vmem:[%s8695_s15 + $0xa8] sm:$0xe] }
 0x14c   : > { %2663 = vrot.lane.b32.xlu1 %v2636_v14, %s8621_s20  ;;  %v2557_v11 = vpack.c.b16 %v2538_v33, %v2537_v30  ;;  %v2892_v49 = vpack.c.b16 %v2872_v6, %v2871_v18  ;;  %v1924_v4 = vrot.slane %v1922_v51, 4  ;;  %v1919_v1 = vrot.slane %v1917_v36, 5 }
 0x14d   : > { %v2646_v32 = vpop.permute.xlu0 %2645  ;;  %v1905_v0 = vrot.slane %v1904_v41, 4  ;;  %v1914_v63 = vor.u32 %v1913_v28, %v1909_v50  ;;  %v1927_v5 = vrot.slane %v1925_v61, 5  ;;  %v1931_v21 = vshll.u32 %v9993_v19, 16 }
 0x14e   : > { %v3083_v43 = vsel %vm3077_vm11, %v3050_v47, %v2646_v32  ;;  %v2568_v27 = vpop.permute.xlu1 %2567  ;;  %v1935_v53 = vshrl.u32 %v9993_v19, 16  ;;  %v1941_v30 = vshll.u32 %v9996_v9, 16  ;;  %v7846_v13 = vrot.slane %v7830_v23, 9  ;;  %v10018_v41 = vpop.permute.xlu2 %2905 }
 0x14f   : > { %v3116_v42 = vsel %vm3110_vm12, %v3083_v43, %v2742_v45  ;;  %v1910_v45 = vsel %vm8723_vm2, %v1905_v0, %v1909_v50  ;;  %v1915_v58 = vrot.slane %v1914_v63, 4  ;;  %v1928_v6 = vor.u32 %v1927_v5, %v1924_v4  ;;  %v7796_v0 = vld [vmem:[%s8695_s15 + $0xa8] sm:$0xf] }
 0x150   : > { %v3149_v14 = vsel %vm3143_vm13, %v3116_v42, %v9886_v54  ;;  %v1558_v54 = vrot.slane %v9939_v39, 5  ;;  %v2791_v18 = vunpack.c.l.b16 %v1910_v45  ;;  %v1933_v24 = vrot.slane %v1931_v21, 5 }
 0x151   : > { %2585 = vrot.lane.b32.xlu2 %v2557_v11, %s8622_s21  ;;  %v1937_v33 = vrot.slane %v1935_v53, 4  ;;  %v1920_v16 = vsel %vm8723_vm2, %v1915_v58, %v1919_v1  ;;  %v1943_v47 = vrot.slane %v1941_v30, 5  ;;  %v1929_v51 = vrot.slane %v1928_v6, 4  ;;  %v7797_v11 = vld [vmem:[%s8695_s15 + $0xac] sm:$0xf] }
 0x152   : > { %v1559_v50 = vsel %vm8925_vm5, %v7846_v13, %v1558_v54  ;;  %v1560_v32 = vrot.slane %v1558_v54, 4  ;;  %v2792_v39 = vunpack.c.l.b16 %v1920_v16  ;;  %v1561_v43 = vrot.slane %v9951_v57, 5  ;;  %v8505_v30 = vld [vmem:[%s8695_s15 + $0xa8] sm:$0xff] }
 0x153   : > { %2583 = vrot.lane.b32.xlu0 %v2556_v22, %s8622_s21  ;;  %v1938_v61 = vor.u32 %v1937_v33, %v1933_v24  ;;  %v3052_v28 = vsel %vm12483_vm10, %v9779_v37, %v2568_v27  ;;  %v7847_v4 = vrot.slane %v7831_v29, 9  ;;  %v1565_v23 = vrot.slane %v7797_v11, 5  ;;  %v7815_v27 = vld [vmem:[%s8695_s15 + $0xb0] sm:$0x1]  ;;  %v7910_v33 = vld [vmem:[%s8695_s15 + $0xa8] sm:$0xe] }
 0x154   : > { %2919 = vrot.lane.b32.xlu1 %v2892_v49, %s8623_s22  ;;  %v2812_v49 = vpack.c.b16 %v2792_v39, %v2791_v18  ;;  %v1934_v63 = vsel %vm8723_vm2, %v1929_v51, %v1933_v24  ;;  %v1562_v57 = vsel %vm8925_vm5, %v1560_v32, %v1561_v43  ;;  %v2617_v37 = vunpack.c.l.b16 %v1559_v50 }
 0x155   : > { %v2902_v36 = vpop.permute.xlu0 %2901  ;;  %v1939_v1 = vrot.slane %v1938_v61, 4  ;;  %v2793_v5 = vunpack.c.l.b16 %v1934_v63  ;;  %v1567_v21 = vrot.slane %v1565_v23, 4  ;;  %v2618_v45 = vunpack.c.l.b16 %v1562_v57  ;;  %v7911_v57 = vld [vmem:[%s8695_s15 + $0xb4] sm:$0xe] }
 0x156   : > { %v3182_v42 = vsel %vm12485_vm14, %v3149_v14, %v2902_v36  ;;  %v2824_v22 = vpop.permute.xlu1 %2823  ;;  %v1566_v14 = vsel %vm8925_vm5, %v7847_v4, %v1565_v23  ;;  %v1568_v58 = vrot.slane %v7815_v27, 5  ;;  %v1337_v13 = vshrl.u32 %v7796_v0, 16 }
 0x157   : > { %v1944_v53 = vsel %vm8723_vm2, %v1939_v1, %v1943_v47  ;;  %v2619_v18 = vunpack.c.l.b16 %v1566_v14  ;;  %v1340_v6 = vshll.u32 %v7796_v0, 16  ;;  %v1346_v24 = vshll.u32 %v7797_v11, 16  ;;  %v10049_v14 = vpop.permute.xlu2 %2747 }
 0x158   : > { %8132 = vmatmul.msk.bf16.gmra.mxu0 %vm3229_vm15, %v3182_v42  ;;  %v2794_v54 = vunpack.c.l.b16 %v1944_v53  ;;  %v1569_v29 = vsel %vm8925_vm5, %v1567_v21, %v1568_v58  ;;  %v1339_v16 = vrot.slane %v1337_v13, 4  ;;  %v1350_v50 = vshrl.u32 %v7797_v11, 16 }
 0x159   : > { %v1356_v32 = vshll.u32 %v7815_v27, 16  ;;  %v2620_v47 = vunpack.c.l.b16 %v1569_v29  ;;  %v1342_v39 = vrot.slane %v1340_v6, 5  ;;  %v1348_v51 = vrot.slane %v1346_v24, 5  ;;  %v7895_v27 = vld [vmem:[%s8695_s15 + $0xbc] sm:$0x1] }
 0x15a   : > { %v2813_v36 = vpack.c.b16 %v2794_v54, %v2793_v5  ;;  %v3085_v61 = vsel %vm3077_vm11, %v3052_v28, %v9920_v31  ;;  %v2637_v42 = vpack.c.b16 %v2618_v45, %v2617_v37  ;;  %v1352_v4 = vrot.slane %v1350_v50, 4  ;;  %v7877_v54 = vld [vmem:[%s8695_s15 + $0xb8] sm:$0xf] }
 0x15b   : > { %2839 = vrot.lane.b32.xlu0 %v2812_v49, %s8624_s23  ;;  %v7926_v23 = vrot.slane %v7910_v33, 9  ;;  %v1343_v49 = vor.u32 %v1342_v39, %v1339_v16  ;;  %v1358_v63 = vrot.slane %v1356_v32, 5  ;;  %v2167_v1 = vrot.slane %v9993_v19, 5  ;;  %v7876_v19 = vld [vmem:[%s8695_s15 + $0xb4] sm:$0xf] }
 0x15c   : > { %2761 = vrot.lane.b32.xlu1 %v8505_v30, %s8620_s19  ;;  %2841 = vrot.lane.b32.xlu2 %v2813_v36, %s8624_s23  ;;  %v2638_v28 = vpack.c.b16 %v2620_v47, %v2619_v18  ;;  %v1353_v5 = vor.u32 %v1352_v4, %v1348_v51  ;;  %v2170_v37 = vrot.slane %v9996_v9, 5  ;;  %v7927_v18 = vrot.slane %v7911_v57, 9  ;;  %v7798_v4 = vld [vmem:[%s8695_s15 + $0xb4] sm:$0xf] }
 0x15d   : > { %v2744_v43 = vpop.permute.xlu0 %2743  ;;  %v1344_v53 = vrot.slane %v1343_v49, 4  ;;  %v2168_v30 = vsel %vm8925_vm5, %v7926_v23, %v2167_v1  ;;  %v2169_v45 = vrot.slane %v2167_v1, 4  ;;  %v2177_v24 = vrot.slane %v7895_v27, 5  ;;  %v7799_v23 = vld [vmem:[%s8695_s15 + $0xb8] sm:$0xf] }
 0x15e   : > { %v3118_v0 = vsel %vm3110_vm12, %v3085_v61, %v2744_v43  ;;  %v2570_v11 = vpop.permute.xlu1 %2569  ;;  %v2873_v13 = vunpack.c.l.b16 %v2168_v30  ;;  %v1946_v16 = vshrl.u32 %v7876_v19, 16  ;;  %v1949_v47 = vshll.u32 %v7876_v19, 16 }
 0x15f   : > { %v3151_v31 = vsel %vm3143_vm13, %v3118_v0, %v2824_v22  ;;  %v3054_v21 = vsel %vm12483_vm10, %v9944_v8, %v2570_v11  ;;  %v1354_v22 = vrot.slane %v1353_v5, 4  ;;  %v1349_v9 = vsel %vm8723_vm2, %v1344_v53, %v1348_v51 }
 0x160   : > { %v3184_v58 = vsel %vm12485_vm14, %v3151_v31, %v9953_v20  ;;  %v2171_v6 = vsel %vm8925_vm5, %v2169_v45, %v2170_v37  ;;  %v2174_v8 = vrot.slane %v7877_v54, 5  ;;  %v2539_v20 = vunpack.c.l.b16 %v1349_v9  ;;  %v7816_v37 = vld [vmem:[%s8695_s15 + $0xbc] sm:$0x1]  ;;  %v7832_v45 = vld [vmem:[%s8695_s15 + $0xb4] sm:$0xe]  ;;  %v10081_v9 = vpop.permute.xlu2 %2573 }
 0x161   : > { %v1359_v33 = vsel %vm8723_vm2, %v1354_v22, %v1358_v63  ;;  %v2874_v29 = vunpack.c.l.b16 %v2171_v6  ;;  %v3087_v51 = vsel %vm3077_vm11, %v3054_v21, %v9985_v48  ;;  %v1948_v43 = vrot.slane %v1946_v16, 4 }
 0x162   : > { %v2540_v50 = vunpack.c.l.b16 %v1359_v33  ;;  %v2175_v32 = vsel %vm8925_vm5, %v7927_v18, %v2174_v8  ;;  %v2176_v36 = vrot.slane %v2174_v8, 4  ;;  %v1951_v1 = vrot.slane %v1949_v47, 5 }
 0x163   : > { %2665 = vrot.lane.b32.xlu0 %v2637_v42, %s8621_s20  ;;  %v2875_v61 = vunpack.c.l.b16 %v2175_v32  ;;  %v1955_v42 = vshll.u32 %v7877_v54, 16  ;;  %v2893_v11 = vpack.c.b16 %v2874_v29, %v2873_v13  ;;  %v1959_v5 = vshrl.u32 %v7877_v54, 16 }
 0x164   : > { %2667 = vrot.lane.b32.xlu2 %v2638_v28, %s8621_s20  ;;  %v2558_v0 = vpack.c.b16 %v2540_v50, %v2539_v20  ;;  %v2178_v63 = vsel %vm8925_vm5, %v2176_v36, %v2177_v24  ;;  %v1965_v48 = vshll.u32 %v7895_v27, 16  ;;  %v1952_v21 = vor.u32 %v1951_v1, %v1948_v43 }
 0x165   : > { %v10068_v39 = vpop.permute.xlu0 %2509  ;;  %v2876_v57 = vunpack.c.l.b16 %v2178_v63  ;;  %v1957_v31 = vrot.slane %v1955_v42, 5  ;;  %v1361_v53 = vshrl.u32 %v7798_v4, 16  ;;  %v1364_v28 = vshll.u32 %v7798_v4, 16 }
 0x166   : > { %v2826_v49 = vpop.permute.xlu1 %2825  ;;  %2587 = vrot.lane.b32.xlu1 %v2558_v0, %s8622_s21  ;;  %v1370_v30 = vshll.u32 %v7799_v23, 16  ;;  %v1961_v22 = vrot.slane %v1959_v5, 4  ;;  %v1967_v13 = vrot.slane %v1965_v48, 5  ;;  %v1374_v18 = vshrl.u32 %v7799_v23, 16 }
 0x167   : > { %v2894_v19 = vpack.c.b16 %v2876_v57, %v2875_v61  ;;  %v1953_v6 = vrot.slane %v1952_v21, 4  ;;  %v1363_v8 = vrot.slane %v1361_v53, 4  ;;  %v1366_v54 = vrot.slane %v1364_v28, 5 }
 0x168   : > { %8133 = vmatmul.msk.bf16.gmra.mxu0 %vm3229_vm15, %v3184_v58  ;;  %v1372_v27 = vrot.slane %v1370_v30, 5  ;;  %v1962_v58 = vor.u32 %v1961_v22, %v1957_v31  ;;  %v1376_v24 = vrot.slane %v1374_v18, 4  ;;  %v1380_v33 = vshll.u32 %v7816_v37, 16  ;;  %v8507_v18 = vld [vmem:[%s8695_s15 + $0xc0] sm:$0xff] }
 0x169   : > { %v7848_v20 = vrot.slane %v7832_v45, 9  ;;  %v1958_v29 = vsel %vm8723_vm2, %v1953_v6, %v1957_v31  ;;  %v1367_v16 = vor.u32 %v1366_v54, %v1363_v8  ;;  %v1572_v50 = vrot.slane %v7799_v23, 5  ;;  %v7878_v23 = vld [vmem:[%s8695_s15 + $0xc0] sm:$0xf]  ;;  %v8506_v31 = vld [vmem:[%s8695_s15 + $0xb4] sm:$0xff] }
 0x16a   : > { %v1575_v32 = vrot.slane %v7816_v37, 5  ;;  %v1963_v47 = vrot.slane %v1962_v58, 4  ;;  %v2795_v61 = vunpack.c.l.b16 %v1958_v29  ;;  %v1377_v43 = vor.u32 %v1376_v24, %v1372_v27  ;;  %v7879_v37 = vld [vmem:[%s8695_s15 + $0xc4] sm:$0xf]  ;;  %v7896_v45 = vld [vmem:[%s8695_s15 + $0xc8] sm:$0x1]  ;;  %v10114_v29 = vpop.permute.xlu2 %2657 }
 0x16b   : > { %2921 = vrot.lane.b32.xlu0 %v2893_v11, %s8623_s22  ;;  %v1382_v42 = vrot.slane %v1380_v33, 5  ;;  %v1368_v11 = vrot.slane %v1367_v16, 4  ;;  %v1573_v63 = vsel %vm8925_vm5, %v7848_v20, %v1572_v50  ;;  %v1574_v1 = vrot.slane %v1572_v50, 4  ;;  %v7800_v20 = vld [vmem:[%s8695_s15 + $0xc0] sm:$0xf] }
 0x16c   : > { %2923 = vrot.lane.b32.xlu2 %v2894_v19, %s8623_s22  ;;  %v2990_v57 = vsel %vm12484_vm7, %v9322_v10, %v9521_v17  ;;  %v1378_v48 = vrot.slane %v1377_v43, 4  ;;  %v2621_v30 = vunpack.c.l.b16 %v1573_v63  ;;  %v1970_v22 = vshrl.u32 %v7878_v23, 16 }
 0x16d   : > { %v2746_v36 = vpop.permute.xlu0 %2745  ;;  %v1373_v53 = vsel %vm8723_vm2, %v1368_v11, %v1372_v27  ;;  %v1576_v28 = vsel %vm8925_vm5, %v1574_v1, %v1575_v32  ;;  %v1973_v8 = vshll.u32 %v7878_v23, 16  ;;  %v1979_v54 = vshll.u32 %v7879_v37, 16  ;;  %v7801_v1 = vld [vmem:[%s8695_s15 + $0xc4] sm:$0xf] }
 0x16e   : > { %v3120_v4 = vsel %vm3110_vm12, %v3087_v51, %v2746_v36  ;;  %v10088_v0 = vpop.permute.xlu1 %2651  ;;  %v1968_v51 = vsel %vm8723_vm2, %v1963_v47, %v1967_v13  ;;  %v1383_v10 = vsel %vm8723_vm2, %v1378_v48, %v1382_v42  ;;  %v2541_v17 = vunpack.c.l.b16 %v1373_v53  ;;  %v7912_v13 = vld [vmem:[%s8695_s15 + $0xc0] sm:$0xe]  ;;  %v7817_v48 = vld [vmem:[%s8695_s15 + $0xc8] sm:$0x1] }
 0x16f   : > { %v3153_v5 = vsel %vm3143_vm13, %v3120_v4, %v2826_v49  ;;  %v2796_v21 = vunpack.c.l.b16 %v1968_v51  ;;  %v2622_v19 = vunpack.c.l.b16 %v1576_v28  ;;  %v2542_v6 = vunpack.c.l.b16 %v1383_v10 }
 0x170   : > { %v3023_v27 = vsel %vm3011_vm8, %v2990_v57, %v9723_v46  ;;  %v1972_v58 = vrot.slane %v1970_v22, 4  ;;  %v1983_v24 = vshrl.u32 %v7879_v37, 16  ;;  %v1989_v33 = vshll.u32 %v7896_v45, 16 }
 0x171   : > { %v2814_v49 = vpack.c.b16 %v2796_v21, %v2795_v61  ;;  %v3186_v16 = vsel %vm12485_vm14, %v3153_v5, %v10018_v41  ;;  %v1975_v50 = vrot.slane %v1973_v8, 5  ;;  %v1981_v32 = vrot.slane %v1979_v54, 5 }
 0x172   : > { %v7928_v36 = vrot.slane %v7912_v13, 9  ;;  %v2639_v46 = vpack.c.b16 %v2622_v19, %v2621_v30  ;;  %v1985_v61 = vrot.slane %v1983_v24, 4  ;;  %v2181_v43 = vrot.slane %v7879_v37, 5  ;;  %v8492_v19 = vld [vmem:[%s8695_s15 + $0xc0] sm:$0xff]  ;;  %v7880_v24 = vld [vmem:[%s8695_s15 + $0xcc] sm:$0xf] }
 0x173   : > { %2763 = vrot.lane.b32.xlu0 %v8506_v31, %s8620_s19  ;;  %2843 = vrot.lane.b32.xlu1 %v2814_v49, %s8624_s23  ;;  %v2184_v42 = vrot.slane %v7896_v45, 5  ;;  %v2559_v4 = vpack.c.b16 %v2542_v6, %v2541_v17  ;;  %v1976_v63 = vor.u32 %v1975_v50, %v1972_v58  ;;  %v1385_v23 = vshrl.u32 %v7800_v20, 16  ;;  %v7833_v6 = vld [vmem:[%s8695_s15 + $0xc0] sm:$0xe] }
 0x174   : > { %2765 = vrot.lane.b32.xlu2 %v8507_v18, %s8620_s19  ;;  %v1388_v57 = vshll.u32 %v7800_v20, 16  ;;  %v1986_v41 = vor.u32 %v1985_v61, %v1981_v32  ;;  %v1991_v31 = vrot.slane %v1989_v33, 5  ;;  %v2182_v51 = vsel %vm8925_vm5, %v7928_v36, %v2181_v43  ;;  %v10141_v61 = vpop.permute.xlu2 %2829 }
 0x175   : > { %v2572_v47 = vpop.permute.xlu0 %2571  ;;  %v2183_v5 = vrot.slane %v2181_v43, 4  ;;  %v1977_v21 = vrot.slane %v1976_v63, 4  ;;  %v2877_v53 = vunpack.c.l.b16 %v2182_v51  ;;  %v1387_v28 = vrot.slane %v1385_v23, 4  ;;  %v7881_v23 = vld [vmem:[%s8695_s15 + $0xd0] sm:$0xf] }
 0x176   : > { %v10120_v11 = vpop.permute.xlu1 %2907  ;;  %v3056_v37 = vsel %vm12483_vm10, %v3023_v27, %v2572_v47  ;;  %v1987_v30 = vrot.slane %v1986_v41, 4  ;;  %v1390_v10 = vrot.slane %v1388_v57, 5  ;;  %v1394_v17 = vshll.u32 %v7801_v1, 16 }
 0x177   : > { %v2185_v45 = vsel %vm8925_vm5, %v2183_v5, %v2184_v42  ;;  %v1982_v22 = vsel %vm8723_vm2, %v1977_v21, %v1981_v32  ;;  %v1398_v49 = vshrl.u32 %v7801_v1, 16  ;;  %v1404_v18 = vshll.u32 %v7817_v48, 16 }
 0x178   : > { %8134 = vmatmul.msk.bf16.gmra.mxu0 %vm3229_vm15, %v3186_v16  ;;  %v2878_v13 = vunpack.c.l.b16 %v2185_v45  ;;  %v1992_v8 = vsel %vm8723_vm2, %v1987_v30, %v1991_v31  ;;  %v2797_v54 = vunpack.c.l.b16 %v1982_v22  ;;  %v1391_v27 = vor.u32 %v1390_v10, %v1387_v28  ;;  %v7897_v31 = vld [vmem:[%s8695_s15 + $0xd4] sm:$0x1] }
 0x179   : > { %v1396_v58 = vrot.slane %v1394_v17, 5  ;;  %v3089_v33 = vsel %vm3077_vm11, %v3056_v37, %v10088_v0  ;;  %v2798_v20 = vunpack.c.l.b16 %v1992_v8  ;;  %v1400_v16 = vrot.slane %v1398_v49, 4  ;;  %v7913_v17 = vld [vmem:[%s8695_s15 + $0xcc] sm:$0xe] }
 0x17a   : > { %v1392_v32 = vrot.slane %v1391_v27, 4  ;;  %v7849_v36 = vrot.slane %v7833_v6, 9  ;;  %v1579_v47 = vrot.slane %v7801_v1, 5  ;;  %v1582_v63 = vrot.slane %v7817_v48, 5 }
 0x17b   : > { %2589 = vrot.lane.b32.xlu0 %v2559_v4, %s8622_s21  ;;  %2669 = vrot.lane.b32.xlu1 %v2639_v46, %s8621_s20  ;;  %v1401_v42 = vor.u32 %v1400_v16, %v1396_v58  ;;  %v1406_v4 = vrot.slane %v1404_v18, 5  ;;  %v1994_v0 = vshrl.u32 %v7880_v24, 16  ;;  %v3122_v46 = vsel %vm3110_vm12, %v3089_v33, %v10049_v14 }
 0x17c   : > { %2511 = vrot.lane.b32.xlu2 %v8492_v19, %s8619_s18  ;;  %v2815_v57 = vpack.c.b16 %v2798_v20, %v2797_v54  ;;  %v2895_v41 = vpack.c.b16 %v2878_v13, %v2877_v53  ;;  %v1397_v1 = vsel %vm8723_vm2, %v1392_v32, %v1396_v58  ;;  %v1580_v5 = vsel %vm8925_vm5, %v7849_v36, %v1579_v47  ;;  %v8508_v19 = vld [vmem:[%s8695_s15 + $0xcc] sm:$0xff] }
 0x17d   : > { %v2828_v50 = vpop.permute.xlu0 %2827  ;;  %v1402_v51 = vrot.slane %v1401_v42, 4  ;;  %v1581_v37 = vrot.slane %v1579_v47, 4  ;;  %v1996_v21 = vrot.slane %v1994_v0, 4  ;;  %v1997_v48 = vshll.u32 %v7880_v24, 16  ;;  %v2914_v0 = vpop.permute.xlu2 %2913 }
 0x17e   : > { %v10144_v43 = vpop.permute.xlu1 %2653  ;;  %v2003_v28 = vshll.u32 %v7881_v23, 16  ;;  %v2007_v30 = vshrl.u32 %v7881_v23, 16  ;;  %v3155_v45 = vsel %vm3143_vm13, %v3122_v46, %v2828_v50  ;;  %v2013_v10 = vshll.u32 %v7897_v31, 16 }
 0x17f   : > { %v1407_v14 = vsel %vm8723_vm2, %v1402_v51, %v1406_v4  ;;  %v1583_v53 = vsel %vm8925_vm5, %v1581_v37, %v1582_v63  ;;  %v2543_v22 = vunpack.c.l.b16 %v1397_v1  ;;  %v1999_v49 = vrot.slane %v1997_v48, 5  ;;  %v8467_v63 = vld [vmem:[%s8695_s15 + $0x48] sm:$0xff]  ;;  %v8469_v1 = vld [vmem:[%s8695_s15 + $0x60] sm:$0xff] }
 0x180   : > { %v2544_v13 = vunpack.c.l.b16 %v1407_v14  ;;  %v2005_v18 = vrot.slane %v2003_v28, 5  ;;  %v2623_v6 = vunpack.c.l.b16 %v1580_v5  ;;  %v2624_v8 = vunpack.c.l.b16 %v1583_v53 }
 0x181   : > { %v2009_v54 = vrot.slane %v2007_v30, 4  ;;  %v2188_v27 = vrot.slane %v7881_v23, 5  ;;  %v2000_v24 = vor.u32 %v1999_v49, %v1996_v21  ;;  %v7929_v33 = vrot.slane %v7913_v17, 9 }
 0x182   : > { %v2191_v20 = vrot.slane %v7897_v31, 5  ;;  %v2015_v32 = vrot.slane %v2013_v10, 5  ;;  %v3188_v47 = vsel %vm12485_vm14, %v3155_v45, %v10120_v11  ;;  %v2560_v42 = vpack.c.b16 %v2544_v13, %v2543_v22 }
 0x183   : > { %2845 = vrot.lane.b32.xlu0 %v2815_v57, %s8624_s23  ;;  %2925 = vrot.lane.b32.xlu1 %v2895_v41, %s8623_s22  ;;  %v2010_v50 = vor.u32 %v2009_v54, %v2005_v18  ;;  %v2190_v36 = vrot.slane %v2188_v27, 4  ;;  %v2001_v4 = vrot.slane %v2000_v24, 4  ;;  %v2640_v23 = vpack.c.b16 %v2624_v8, %v2623_v6 }
 0x184   : > { %2767 = vrot.lane.b32.xlu2 %v8508_v19, %s8620_s19  ;;  %v2189_v41 = vsel %vm8925_vm5, %v7929_v33, %v2188_v27  ;;  %v2950_v37 = vsel %vm2929_vm6, %v8467_v63, %v9288_v12  ;;  %v2956_v45 = vsel %vm2929_vm6, %v8469_v1, %v9109_v2 }
 0x185   : > { %v2578_v58 = vpop.permute.xlu0 %2577  ;;  %v2011_v46 = vrot.slane %v2010_v50, 4  ;;  %v2006_v57 = vsel %vm8723_vm2, %v2001_v4, %v2005_v18  ;;  %v2192_v31 = vsel %vm8925_vm5, %v2190_v36, %v2191_v20  ;;  %v2879_v21 = vunpack.c.l.b16 %v2189_v41  ;;  %v8468_v20 = vld [vmem:[%s8695_s15 + $0x54] sm:$0xff] }
 0x186   : > { %v2754_v16 = vpop.permute.xlu1 %2753  ;;  %v2799_v51 = vunpack.c.l.b16 %v2006_v57  ;;  %v2880_v48 = vunpack.c.l.b16 %v2192_v31  ;;  %v2992_v28 = vsel %vm12484_vm7, %v2950_v37, %v9491_v56  ;;  %v2996_v10 = vsel %vm12484_vm7, %v2956_v45, %v9575_v40  ;;  %v8471_v45 = vld [vmem:[%s8695_s15 + $0x78] sm:$0xff] }
 0x187   : > { %v2016_v11 = vsel %vm8723_vm2, %v2011_v46, %v2015_v32  ;;  %v3025_v14 = vsel %vm3011_vm8, %v2992_v28, %v9571_v38  ;;  %v3029_v19 = vsel %vm3011_vm8, %v2996_v10, %v9755_v55  ;;  %v2656_v38 = vpop.permute.xlu2 %2655  ;;  %v2953_v36 = vsel %vm2929_vm6, %v8468_v20, %v9254_v59  ;;  %v3477_v46 = vld [vmem:[#allocation2 + $0x18] sm:$0x1] }
 0x188   : > { %8135 = vmatmul.msk.bf16.gmra.mxu0 %vm3229_vm15, %v3188_v47  ;;  %v2800_v5 = vunpack.c.l.b16 %v2016_v11  ;;  %v3058_v12 = vsel %vm12483_vm10, %v3025_v14, %v10081_v9  ;;  %v2896_v22 = vpack.c.b16 %v2880_v48, %v2879_v21  ;;  %v3062_v2 = vsel %vm12483_vm10, %v3029_v19, %v2578_v58  ;;  %v10252_v48 = vld [vmem:[%s12472_s2] ss:$0 sm:$0xff] }
 0x189   : > { %v3091_v56 = vsel %vm3077_vm11, %v3058_v12, %v10144_v43  ;;  %v3095_v40 = vsel %vm3077_vm11, %v3062_v2, %v10114_v29  ;;  %v2994_v4 = vsel %vm12484_vm7, %v2953_v36, %v9365_v35  ;;  %v3478_v41 = vsel %vm10211_vm3, 0, %v3477_v46 }
 0x18a   : > { %v2816_v17 = vpack.c.b16 %v2800_v5, %v2799_v51  ;;  %v3128_v55 = vsel %vm3110_vm12, %v3095_v40, %v2754_v16  ;;  %v3530_v16 = vld [vmem:[#allocation2 + $0x14] sm:$0x1]  ;;  %v3027_v63 = vsel %vm3011_vm8, %v2994_v4, %v9810_v3  ;;  %3479 = vst [vmem:[#allocation2 + $0x18] sm:$0x1] %v3478_v41 }
 0x18b   : > { %2591 = vrot.lane.b32.xlu0 %v2560_v42, %s8622_s21  ;;  %2671 = vrot.lane.b32.xlu1 %v2640_v23, %s8621_s20  ;;  %v3531_v50 = vsel %vm10219_vm9, 0, %v3530_v16 }
 0x18c   : > { %3532 = vst [vmem:[#allocation2 + $0x14] sm:$0x1] %v3531_v50 }
 0x18d   : > { %v2750_v30 = vpop.permute.xlu0 %2749 }
 0x18e   : > { %v2910_v53 = vpop.permute.xlu1 %2909  ;;  %v3124_v13 = vsel %vm3110_vm12, %v3091_v56, %v2750_v30 }
 0x18f   : > { %v3157_v9 = vsel %vm3143_vm13, %v3124_v13, %v10141_v61  ;;  %v3474_v61 = vld [vmem:[#allocation2 + $0xc] sm:$0x1]  ;;  %v2756_v27 = vpop.permute.xlu2 %2755 }
 0x190   : > { %v3190_v43 = vsel %vm12485_vm14, %v3157_v9, %v2910_v53  ;;  %v3475_v54 = vsel %vm10211_vm3, 0, %v3474_v61  ;;  %v3480_v9 = vld [vmem:[#allocation2 + $0x24] sm:$0x1] }
 0x191   : > { %3476 = vst [vmem:[#allocation2 + $0xc] sm:$0x1] %v3475_v54 }
 0x193   : > { %2847 = vrot.lane.b32.xlu0 %v2816_v17, %s8624_s23  ;;  %2927 = vrot.lane.b32.xlu1 %v2896_v22, %s8623_s22  ;;  %v2962_v22 = vsel %vm2929_vm6, %v8471_v45, %v9327_v34  ;;  %v3942_v45 = vld [vmem:[#allocation2 + $0x14] sm:$0x1] }
 0x194   : > { %v3000_v2 = vsel %vm12484_vm7, %v2962_v22, %v9399_v62 }
 0x195   : > { %v2834_v49 = vpop.permute.xlu0 %2833  ;;  %v3033_v40 = vsel %vm3011_vm8, %v3000_v2, %v9854_v44  ;;  %v8472_v44 = vld [vmem:[%s8695_s15 + $0x84] sm:$0xff] }
 0x196   : > { %v3161_v18 = vsel %vm3143_vm13, %v3128_v55, %v2834_v49  ;;  %v2580_v6 = vpop.permute.xlu1 %2579  ;;  %v2965_v4 = vsel %vm2929_vm6, %v8472_v44, %v9143_v15 }
 0x197   : > { %v3194_v8 = vsel %vm12485_vm14, %v3161_v18, %v2914_v0  ;;  %v2912_v47 = vpop.permute.xlu2 %2911  ;;  %v8470_v0 = vld [vmem:[%s8695_s15 + $0x6c] sm:$0xff] }
 0x198   : > { %8136 = vmatmul.msk.bf16.gmra.mxu0 %vm3229_vm15, %v3190_v43  ;;  %8138 = vmatmul.msk.bf16.vlgmr.msra.gmra.mxu2 %vm3229_vm15, %v3194_v8  ;;  %v2959_v59 = vsel %vm2929_vm6, %v8470_v0, %v9349_v52  ;;  %v3481_v43 = vsel %vm10211_vm3, 0, %v3480_v9  ;;  %v8625_v8 = vmov 0   ;;  %v3938_v50 = vld [vmem:[#allocation2 + $0xc] sm:$0xf]  ;;  %v8474_v9 = vld [vmem:[%s8695_s15 + $0x9c] sm:$0xff] }
 0x199   : > { %v2998_v35 = vsel %vm12484_vm7, %v2959_v59, %v9530_v7  ;;  %v3533_v7 = vld [vmem:[#allocation2 + $0x20] sm:$0x1]  ;;  %3482 = vst [vmem:[#allocation2 + $0x24] sm:$0x1] %v3481_v43 }
 0x19a   : > { %v3031_v51 = vsel %vm3011_vm8, %v2998_v35, %v9607_v25  ;;  %v10258_v25 = vld [vmem:[%s12473_s3] ss:$0 sm:$0xff]  ;;  %v3534_v30 = vsel %vm10219_vm9, 0, %v3533_v7  ;;  %3460 = vst.msk [vmem:[#allocation2] sm:$0xf] %vm3459_vm1, %v8625_v8 }
 0x19b   : > { %v3064_v21 = vsel %vm12483_vm10, %v3031_v51, %v2580_v6  ;;  %3535 = vst [vmem:[#allocation2 + $0x20] sm:$0x1] %v3534_v30 }
 0x19c   : > { %3461 = vst.msk [vmem:[#allocation2 + $0x4] sm:$0xf] %vm3459_vm1, %v8625_v8 }
 0x19d   : > { %v2576_v58 = vpop.permute.xlu0 %2575  ;;  %3463 = vst.msk [vmem:[#allocation2 + $0x8] sm:$0x1] %vm3462_vm0, %v8625_v8 }
 0x19e   : > { %v2752_v24 = vpop.permute.xlu1 %2751  ;;  %v3060_v23 = vsel %vm12483_vm10, %v3027_v63, %v2576_v58  ;;  %3465 = vst.msk [vmem:[#allocation2 + $0xcc] sm:$0xf] %vm3459_vm1, %v8625_v8 }
 0x19f   : > { %v3093_v57 = vsel %vm3077_vm11, %v3060_v23, %v2656_v38  ;;  %v2662_v37 = vpop.permute.xlu2 %2661  ;;  %3466 = vst.msk [vmem:[#allocation2 + $0xd0] sm:$0xf] %vm3459_vm1, %v8625_v8 }
 0x1a0   : > { %v3126_v31 = vsel %vm3110_vm12, %v3093_v57, %v2752_v24  ;;  %3467 = vst.msk [vmem:[#allocation2 + $0xd4] sm:$0x1] %vm3462_vm0, %v8625_v8  ;;  %v12512_v57 = vld [vmem:[#allocation9_spill] sm:$0xff]  ;;  %vm12514_vm0 = vcmask 130048  }
 0x1a1   : > { %v3002_v41 = vsel %vm12484_vm7, %v2965_v4, %v12512_v57  ;;  %vm12515_vm7 = vsmask.f32 256 }
 0x1a5   : > { %v2660_v32 = vpop.permute.xlu0 %2659 }
 0x1a6   : > { %v2836_v42 = vpop.permute.xlu1 %2835  ;;  %v3097_v52 = vsel %vm3077_vm11, %v3064_v21, %v2660_v32 }
 0x1a7   : > { %v3130_v28 = vsel %vm3110_vm12, %v3097_v52, %v2756_v27  ;;  %v2918_v13 = vpop.permute.xlu2 %2917 }
 0x1a8   : > { %v3163_v14 = vsel %vm3143_vm13, %v3130_v28, %v2836_v42  ;;  %v3536_v42 = vld [vmem:[#allocation2 + $0x2c] sm:$0x1] }
 0x1a9   : > { %v3537_v46 = vsel %vm10219_vm9, 0, %v3536_v42  ;;  %v12518_v42 = vld [vmem:[#allocation4_spill] sm:$0xff] }
 0x1aa   : > { %3538 = vst [vmem:[#allocation2 + $0x2c] sm:$0x1] %v3537_v46  ;;  %v2971_v4 = vsel %vm2929_vm6, %v8474_v9, %v12518_v42 }
 0x1ad   : > { %v2832_v1 = vpop.permute.xlu0 %2831 }
 0x1ae   : > { %v3159_v3 = vsel %vm3143_vm13, %v3126_v31, %v2832_v1  ;;  %v2582_v11 = vpop.permute.xlu1 %2581  ;;  %v3471_v1 = vld [vmem:[#allocation2] sm:$0x1] }
 0x1af   : > { %v3192_v5 = vsel %vm12485_vm14, %v3159_v3, %v2912_v47  ;;  %v3066_v55 = vsel %vm12483_vm10, %v3033_v40, %v2582_v11  ;;  %vm10287_vm10 = vmand %vm3459_vm1, %vm3525_vm4  ;;  %v2760_v63 = vpop.permute.xlu2 %2759  ;;  %vm3613_vm4 = vsmask.f32 4368  ;;  %v12513_v11 = vld [vmem:[#allocation14_spill] sm:$0xff] }
 0x1b0   : > { %8137 = vmatmul.msk.bf16.gmra.mxu0 %vm3229_vm15, %v3192_v5  ;;  %v3099_v61 = vsel %vm3077_vm11, %v3066_v55, %v2662_v37  ;;  %v3035_v51 = vsel %vm3011_vm8, %v3002_v41, %v12513_v11  ;;  %v3472_v5 = vsel %vm10211_vm3, 0, %v3471_v1  ;;  %v3483_v40 = vld [vmem:[#allocation2 + $0x30] sm:$0x1] }
 0x1b1   : > { %3473 = vst [vmem:[#allocation2] sm:$0x1] %v3472_v5  ;;  %v8473_v55 = vld [vmem:[%s8695_s15 + $0x90] sm:$0xff] }
 0x1b5   : > { %v3275_v53 = vpop.f32.mrf.mxu0  ;;  %v2916_v10 = vpop.permute.xlu0 %2915 }
 0x1b6   : > { %v3359_v12 = vmul.f32 %v10252_v48, %v3275_v53  ;;  %v3196_v17 = vsel %vm12485_vm14, %v3163_v14, %v2916_v10  ;;  %v2838_v19 = vpop.permute.xlu1 %2837  ;;  %v3527_v14 = vld [vmem:[#allocation2 + $0x8] sm:$0x1] }
 0x1b7   : > { %8139 = vmatmul.msk.bf16.gmra.mxu2 %vm3229_vm15, %v3196_v17  ;;  %v2586_v44 = vpop.permute.xlu2 %2585 }
 0x1b8   : > { %v3395_v56 = vadd.f32 %v10258_v25, %v3359_v12 }
 0x1ba   : > { %v3427_v38 = vmax.f32 %v3395_v56, 0.0 }
 0x1bc   : > { %v3581_v49 = vpack.c.bf16 %v3427_v38, %v3427_v38 }
 0x1bd   : > { %v3277_v18 = vpop.f32.mrf.mxu0  ;;  %v2758_v6 = vpop.permute.xlu0 %2757 }
 0x1be   : > { %v3616_v34 = vshrl.u32 %v3581_v49, 16  ;;  %v3360_v62 = vmul.f32 %v10252_v48, %v3277_v18  ;;  %v3619_v27 = vshll.u32 %v3581_v49, 16  ;;  %v3132_v24 = vsel %vm3110_vm12, %v3099_v61, %v2758_v6  ;;  %v2664_v20 = vpop.permute.xlu1 %2663  ;;  %v4051_v61 = vld [vmem:[#allocation2 + $0x4] sm:$0xf] }
 0x1bf   : > { %v3165_v47 = vsel %vm3143_vm13, %v3132_v24, %v2838_v19  ;;  %v3528_v19 = vsel %vm10219_vm9, 0, %v3527_v14  ;;  %v3484_v24 = vsel %vm10211_vm3, 0, %v3483_v40  ;;  %v4112_v1 = vshrl.u32 %v4051_v61, 16 }
 0x1c0   : > { %v3618_v54 = vrot.slane %v3616_v34, 7  ;;  %v3396_v58 = vadd.f32 %v10258_v25, %v3360_v62  ;;  %v3198_v15 = vsel %vm12485_vm14, %v3165_v47, %v2918_v13  ;;  %vm10313_vm14 = vmor %vm12515_vm7, %vm3613_vm4  ;;  %3529 = vst [vmem:[#allocation2 + $0x8] sm:$0x1] %v3528_v19  ;;  %vm12521_vm7 = vcmask 64512  }
 0x1c1   : > { %3485 = vst [vmem:[#allocation2 + $0x30] sm:$0x1] %v3484_v24  ;;  %vm12523_vm4 = vmmov %vm12521_vm7 }
 0x1c2   : > { %v3621_v32 = vor.u32 %v3619_v27, %v3618_v54  ;;  %v3428_v36 = vmax.f32 %v3396_v58, 0.0  ;;  %v3622_v28 = vrot.slane %v3618_v54, 4 }
 0x1c4   : > { %v3939_v0 = vsel %vm10287_vm10, %v3621_v32, %v3938_v50  ;;  %v3582_v23 = vpack.c.bf16 %v3428_v36, %v3428_v36 }
 0x1c5   : > { %3940 = vst [vmem:[#allocation2 + $0xc] sm:$0xf] %v3939_v0  ;;  %v3280_v59 = vpop.f32.mrf.mxu0  ;;  %v2584_v31 = vpop.permute.xlu0 %2583 }
 0x1c6   : > { %v3624_v35 = vshrl.u32 %v3582_v23, 16  ;;  %v3361_v3 = vmul.f32 %v10252_v48, %v3280_v59  ;;  %v3627_v21 = vshll.u32 %v3582_v23, 16  ;;  %v3068_v7 = vsel %vm12514_vm0, %v3035_v51, %v2584_v31  ;;  %v2920_v17 = vpop.permute.xlu1 %2919  ;;  %v3945_v23 = vld [vmem:[#allocation2 + $0x18] sm:$0xf] }
 0x1c7   : > { %8140 = vmatmul.msk.bf16.gmra.mxu2 %vm3229_vm15, %v3198_v15  ;;  %v3101_v56 = vsel %vm3077_vm11, %v3068_v7, %v2664_v20  ;;  %v4050_v20 = vld [vmem:[#allocation2] sm:$0xf]  ;;  %v4108_v31 = vshll.u32 %v4051_v61, 16  ;;  %v4082_v9 = vld [vmem:[#allocation2 + $0x8] sm:$0x1] }
 0x1c8   : > { %v3626_v37 = vrot.slane %v3624_v35, 7  ;;  %v3397_v52 = vadd.f32 %v10258_v25, %v3361_v3  ;;  %v3134_v8 = vsel %vm3110_vm12, %v3101_v56, %v2760_v63  ;;  %v4099_v36 = vshrl.u32 %v4050_v20, 16  ;;  %v12519_v63 = vld [vmem:[#allocation5_spill] sm:$0xff]  ;;  %v12520_v35 = vld [vmem:[#allocation6_spill] sm:$0xff]  ;;  %v12522_v15 = vld [vmem:[#allocation8_spill] sm:$0xff] }
 0x1c9   : > { %v4102_v47 = vshll.u32 %v4050_v20, 16  ;;  %v2968_v0 = vsel %vm2929_vm6, %v8473_v55, %v12519_v63  ;;  %v10342_v3 = vsel %vm12521_vm7, %v2971_v4, %v12520_v35  ;;  %vm12525_vm7 = vcmask 261120  }
 0x1ca   : > { %v3629_v53 = vor.u32 %v3627_v21, %v3626_v37  ;;  %v3631_v10 = vrot.slane %v3626_v37, 4  ;;  %v3429_v12 = vmax.f32 %v3397_v52, 0.0  ;;  %v3004_v11 = vsel %vm12523_vm4, %v2968_v0, %v12522_v15  ;;  %v12524_v37 = vld [vmem:[#allocation11_spill] sm:$0xff]  ;;  %vm12527_vm4 = vmmov %vm12514_vm0 }
 0x1cb   : > { %v4101_v51 = vrot.slane %v4099_v36, 4  ;;  %v4104_v5 = vrot.slane %v4102_v47, 5  ;;  %v3037_v21 = vsel %vm3011_vm8, %v3004_v11, %v12524_v37  ;;  %v4110_v55 = vrot.slane %v4108_v31, 5  ;;  %v3486_v31 = vld [vmem:[#allocation2 + $0x3c] sm:$0x1] }
 0x1cc   : > { %v3630_v22 = vsel %vm10313_vm14, %v3622_v28, %v3629_v53  ;;  %v3943_v2 = vsel %vm10211_vm3, %v3631_v10, %v3942_v45  ;;  %v3583_v13 = vpack.c.bf16 %v3429_v12, %v3429_v12  ;;  %v4052_v38 = vld [vmem:[#allocation2 + $0xc] sm:$0xf]  ;;  %v3539_v53 = vld [vmem:[#allocation2 + $0x38] sm:$0x1]  ;;  %v3070_v10 = vsel %vm12514_vm0, %v3037_v21, %v2586_v44  ;;  %v2842_v44 = vpop.permute.xlu2 %2841  ;;  %vm12528_vm0 = vmmov %vm12525_vm7 }
 0x1cd   : > { %3941 = vst.msk [vmem:[#allocation2 + $0x10] sm:$0xf] %vm3459_vm1, %v3630_v22  ;;  %v3282_v49 = vpop.f32.mrf.mxu0  ;;  %v2840_v43 = vpop.permute.xlu0 %2839  ;;  %v4123_v18 = vshrl.u32 %v4052_v38, 16  ;;  %v4126_v6 = vshll.u32 %v4052_v38, 16  ;;  %v3540_v61 = vsel %vm10219_vm9, 0, %v3539_v53  ;;  %v4118_v20 = vshll.u32 %v4082_v9, 16 }
 0x1ce   : > { %3944 = vst [vmem:[#allocation2 + $0x14] sm:$0x1] %v3943_v2  ;;  %v3633_v34 = vshrl.u32 %v3583_v13, 16  ;;  %v3362_v62 = vmul.f32 %v10252_v48, %v3282_v49  ;;  %v3636_v54 = vshll.u32 %v3583_v13, 16  ;;  %v3167_v46 = vsel %vm3143_vm13, %v3134_v8, %v2840_v43  ;;  %v10350_v28 = vpop.permute.xlu1 %2761  ;;  %v12526_v53 = vld [vmem:[#allocation13_spill] sm:$0xff] }
 0x1cf   : > { %v4125_v27 = vrot.slane %v4123_v18, 4  ;;  %v4128_v58 = vrot.slane %v4126_v6, 5  ;;  %v3200_v56 = vsel %vm12525_vm7, %v3167_v46, %v2920_v17  ;;  %v4114_v49 = vrot.slane %v4112_v1, 4  ;;  %3541 = vst [vmem:[#allocation2 + $0x38] sm:$0x1] %v3540_v61 }
 0x1d0   : > { %v10331_v50 = vrot.slane %v3633_v34, 7  ;;  %v3398_v32 = vadd.f32 %v10258_v25, %v3362_v62  ;;  %v4105_v34 = vor.u32 %v4104_v5, %v4101_v51  ;;  %v3487_v51 = vsel %vm10211_vm3, 0, %v3486_v31  ;;  %v4483_v9 = vld [vmem:[#allocation2 + $0xc] sm:$0xe] }
 0x1d1   : > { %v4129_v57 = vor.u32 %v4128_v58, %v4125_v27  ;;  %v3949_v27 = vld [vmem:[#allocation2 + $0x20] sm:$0x1]  ;;  %v4115_v42 = vor.u32 %v4114_v49, %v4110_v55  ;;  %3488 = vst [vmem:[#allocation2 + $0x3c] sm:$0x1] %v3487_v51  ;;  %v3952_v49 = vld [vmem:[#allocation2 + $0x24] sm:$0xf] }
 0x1d2   : > { %v3638_v41 = vor.u32 %v3636_v54, %v10331_v50  ;;  %v3430_v59 = vmax.f32 %v3398_v32, 0.0  ;;  %v3639_v54 = vrot.slane %v10331_v50, 4  ;;  %vm12531_vm7 = vcmask 64512  }
 0x1d3   : > { %v4130_v14 = vrot.slane %v4129_v57, 4 }
 0x1d4   : > { %v3946_v52 = vsel %vm10287_vm10, %v3638_v41, %v3945_v23  ;;  %v3584_v7 = vpack.c.bf16 %v3430_v59, %v3430_v59  ;;  %v10352_v45 = vld [vmem:[#allocation2 + $0x10] sm:$0xf]  ;;  %v4106_v23 = vrot.slane %v4105_v34, 4 }
 0x1d5   : > { %3947 = vst [vmem:[#allocation2 + $0x18] sm:$0xf] %v3946_v52  ;;  %v3285_v12 = vpop.f32.mrf.mxu0  ;;  %v2666_v19 = vpop.permute.xlu0 %2665  ;;  %v10356_v22 = vld [vmem:[#allocation2 + $0x14] sm:$0x1]  ;;  %v4132_v2 = vshll.u32 %v10352_v45, 16  ;;  %v4136_v13 = vshrl.u32 %v10352_v45, 16 }
 0x1d6   : > { %v3641_v38 = vshrl.u32 %v3584_v7, 16  ;;  %v3363_v40 = vmul.f32 %v10252_v48, %v3285_v12  ;;  %v4142_v6 = vshll.u32 %v10356_v22, 16  ;;  %v3644_v62 = vshll.u32 %v3584_v7, 16 }
 0x1d7   : > { %8141 = vmatmul.msk.bf16.gmra.mxu2 %vm3229_vm15, %v3200_v56  ;;  %v4134_v43 = vrot.slane %v4132_v2, 5  ;;  %v4138_v18 = vrot.slane %v4136_v13, 4  ;;  %v3103_v4 = vsel %vm3077_vm11, %v3070_v10, %v2666_v19  ;;  %v3039_v10 = vsel %vm3011_vm8, %v10342_v3, %v12526_v53 }
 0x1d8   : > { %v3643_v17 = vrot.slane %v3641_v38, 7  ;;  %v3399_v8 = vadd.f32 %v10258_v25, %v3363_v40  ;;  %v4144_v0 = vrot.slane %v4142_v6, 5  ;;  %v2588_v37 = vpop.permute.xlu1 %2587  ;;  %v3136_v19 = vsel %vm3110_vm12, %v3103_v4, %v10350_v28 }
 0x1d9   : > { %v4135_v58 = vsel %vm8723_vm2, %v4130_v14, %v4134_v43  ;;  %v4139_v24 = vor.u32 %v4138_v18, %v4134_v43  ;;  %v4116_v14 = vrot.slane %v4115_v42, 4  ;;  %v4111_v56 = vsel %vm8723_vm2, %v4106_v23, %v4110_v55 }
 0x1da   : > { %v3646_v32 = vor.u32 %v3644_v62, %v3643_v17  ;;  %v3648_v36 = vrot.slane %v3643_v17, 4  ;;  %v3431_v47 = vmax.f32 %v3399_v8, 0.0  ;;  %v5941_v41 = vunpack.c.l.b16 %v4135_v58  ;;  %v2668_v17 = vpop.permute.xlu2 %2667 }
 0x1db   : > { %v4140_v63 = vrot.slane %v4139_v24, 4  ;;  %v4120_v40 = vrot.slane %v4118_v20, 5  ;;  %v3072_v43 = vsel %vm12527_vm4, %v3039_v10, %v2588_v37  ;;  %v5939_v6 = vunpack.c.l.b16 %v4111_v56  ;;  %vm12532_vm4 = vmmov %vm12528_vm0 }
 0x1dc   : > { %v3647_v46 = vsel %vm10313_vm14, %v3639_v54, %v3646_v32  ;;  %v3950_v50 = vsel %vm10211_vm3, %v3648_v36, %v3949_v27  ;;  %v3585_v57 = vpack.c.bf16 %v3431_v47, %v3431_v47  ;;  %v4054_v59 = vld [vmem:[#allocation2 + $0x18] sm:$0xf]  ;;  %v3169_v62 = vsel %vm3143_vm13, %v3136_v19, %v2842_v44  ;;  %v3542_v32 = vld [vmem:[#allocation2 + $0x44] sm:$0x1] }
 0x1dd   : > { %3948 = vst.msk [vmem:[#allocation2 + $0x1c] sm:$0xf] %vm3459_vm1, %v3647_v46  ;;  %v3287_v1 = vpop.f32.mrf.mxu0  ;;  %v4145_v35 = vsel %vm8723_vm2, %v4140_v63, %v4144_v0  ;;  %v4147_v15 = vshrl.u32 %v4054_v59, 16  ;;  %v4150_v11 = vshll.u32 %v4054_v59, 16  ;;  %v2922_v52 = vpop.permute.xlu0 %2921  ;;  %v4121_v55 = vsel %vm8723_vm2, %v4116_v14, %v4120_v40  ;;  %v4484_v61 = vld [vmem:[#allocation2 + $0x18] sm:$0xe] }
 0x1de   : > { %3951 = vst [vmem:[#allocation2 + $0x20] sm:$0x1] %v3950_v50  ;;  %v3650_v5 = vshrl.u32 %v3585_v57, 16  ;;  %v3364_v21 = vmul.f32 %v10252_v48, %v3287_v1  ;;  %v5942_v7 = vunpack.c.l.b16 %v4145_v35  ;;  %v3653_v12 = vshll.u32 %v3585_v57, 16 }
 0x1df   : > { %v4149_v18 = vrot.slane %v4147_v15, 4  ;;  %v4152_v3 = vrot.slane %v4150_v11, 5  ;;  %v5940_v8 = vunpack.c.l.b16 %v4121_v55  ;;  %v8147_v54 = vrot.slane %v4483_v9, 9 }
 0x1e0   : > { %v10387_v2 = vrot.slane %v3650_v5, 7  ;;  %v3400_v13 = vadd.f32 %v10258_v25, %v3364_v21  ;;  %v5972_v38 = vpack.c.b16 %v5942_v7, %v5941_v41  ;;  %v3105_v24 = vsel %vm3077_vm11, %v3072_v43, %v2668_v17  ;;  %v3956_v5 = vld [vmem:[#allocation2 + $0x2c] sm:$0x1] }
 0x1e1   : > { %v4555_v36 = vrot.slane %v10352_v45, 5  ;;  %v4153_v4 = vor.u32 %v4152_v3, %v4149_v18  ;;  %v5971_v0 = vpack.c.b16 %v5940_v8, %v5939_v6  ;;  %v3202_v50 = vsel %vm12528_vm0, %v3169_v62, %v2922_v52  ;;  %v3489_v18 = vld [vmem:[#allocation2 + $0x48] sm:$0x1] }
 0x1e2   : > { %v3655_v34 = vor.u32 %v3653_v12, %v10387_v2  ;;  %v3432_v28 = vmax.f32 %v3400_v13, 0.0  ;;  %5989 = vrot.lane.b32.xlu0 %v5972_v38, %s8617_s16  ;;  %v8148_v57 = vrot.slane %v4484_v61, 9  ;;  %v3656_v41 = vrot.slane %v10387_v2, 4  ;;  %v8475_v62 = vld [vmem:[%s8695_s15 + $0xa8] sm:$0xff] }
 0x1e3   : > { %5987 = vrot.lane.b32.xlu2 %v5971_v0, %s8617_s16  ;;  %v3543_v51 = vsel %vm10219_vm9, 0, %v3542_v32  ;;  %v4154_v37 = vrot.slane %v4153_v4, 4  ;;  %v10413_v7 = vsel %vm8925_vm5, %v8147_v54, %v4555_v36  ;;  %v4557_v12 = vrot.slane %v4555_v36, 4  ;;  %v3959_v0 = vld [vmem:[#allocation2 + $0x30] sm:$0xf] }
 0x1e4   : > { %v3953_v27 = vsel %vm10287_vm10, %v3655_v34, %v3952_v49  ;;  %v3586_v58 = vpack.c.bf16 %v3432_v28, %v3432_v28  ;;  %v4055_v20 = vld [vmem:[#allocation2 + $0x1c] sm:$0xf]  ;;  %3544 = vst [vmem:[#allocation2 + $0x44] sm:$0x1] %v3543_v51  ;;  %v3490_v17 = vsel %vm10211_vm3, 0, %v3489_v18  ;;  %v12530_v51 = vld [vmem:[#allocation12_spill] sm:$0xff] }
 0x1e5   : > { %3954 = vst [vmem:[#allocation2 + $0x24] sm:$0xf] %v3953_v27  ;;  %v3290_v47 = vpop.f32.mrf.mxu0  ;;  %v10400_v42 = vld [vmem:[#allocation2 + $0x20] sm:$0x1]  ;;  %v4156_v63 = vshll.u32 %v4055_v20, 16  ;;  %v4160_v44 = vshrl.u32 %v4055_v20, 16  ;;  %v2764_v11 = vpop.permute.xlu0 %2763 }
 0x1e6   : > { %v3658_v23 = vshrl.u32 %v3586_v58, 16  ;;  %v3365_v46 = vmul.f32 %v10252_v48, %v3290_v47  ;;  %v4166_v31 = vshll.u32 %v10400_v42, 16  ;;  %v3661_v35 = vshll.u32 %v3586_v58, 16  ;;  %v2844_v19 = vpop.permute.xlu1 %2843  ;;  %3491 = vst [vmem:[#allocation2 + $0x48] sm:$0x1] %v3490_v17 }
 0x1e7   : > { %8142 = vmatmul.msk.bf16.gmra.mxu2 %vm3229_vm15, %v3202_v50  ;;  %v4158_v59 = vrot.slane %v4156_v63, 5  ;;  %v4162_v45 = vrot.slane %v4160_v44, 4  ;;  %v4562_v52 = vrot.slane %v4055_v20, 5  ;;  %v4565_v54 = vrot.slane %v10400_v42, 5 }
 0x1e8   : > { %v3660_v1 = vrot.slane %v3658_v23, 7  ;;  %v3401_v15 = vadd.f32 %v10258_v25, %v3365_v46  ;;  %v4168_v13 = vrot.slane %v4166_v31, 5  ;;  %v4558_v27 = vrot.slane %v10356_v22, 5  ;;  %v2924_v31 = vpop.permute.xlu2 %2923 }
 0x1e9   : > { %v4163_v21 = vor.u32 %v4162_v45, %v4158_v59  ;;  %v4159_v56 = vsel %vm8723_vm2, %v4154_v37, %v4158_v59  ;;  %v4563_v38 = vsel %vm8925_vm5, %v8148_v57, %v4562_v52  ;;  %v4564_v3 = vrot.slane %v4562_v52, 4  ;;  %v12529_v57 = vld [vmem:[#allocation3_spill] sm:$0xff] }
 0x1ea   : > { %v3663_v14 = vor.u32 %v3661_v35, %v3660_v1  ;;  %v3665_v53 = vrot.slane %v3660_v1, 4  ;;  %v3433_v10 = vmax.f32 %v3401_v15, 0.0  ;;  %v3138_v58 = vsel %vm3110_vm12, %v3105_v24, %v2764_v11 }
 0x1eb   : > { %v4164_v2 = vrot.slane %v4163_v21, 4  ;;  %v5943_v20 = vunpack.c.l.b16 %v4159_v56  ;;  %v6023_v36 = vunpack.c.l.b16 %v4563_v38  ;;  %v4566_v44 = vsel %vm8925_vm5, %v4564_v3, %v4565_v54 }
 0x1ec   : > { %v3664_v40 = vsel %vm10313_vm14, %v3656_v41, %v3663_v14  ;;  %v3957_v9 = vsel %vm10211_vm3, %v3665_v53, %v3956_v5  ;;  %v3587_v49 = vpack.c.bf16 %v3433_v10, %v3433_v10  ;;  %v4056_v43 = vld [vmem:[#allocation2 + $0x24] sm:$0xf]  ;;  %v6024_v42 = vunpack.c.l.b16 %v4566_v44  ;;  %v3545_v14 = vld [vmem:[#allocation2 + $0x50] sm:$0x1] }
 0x1ed   : > { %3955 = vst.msk [vmem:[#allocation2 + $0x28] sm:$0xf] %vm3459_vm1, %v3664_v40  ;;  %v3292_v6 = vpop.f32.mrf.mxu0  ;;  %v4169_v34 = vsel %vm8723_vm2, %v4164_v2, %v4168_v13  ;;  %v4171_v28 = vshrl.u32 %v4056_v43, 16  ;;  %v4174_v55 = vshll.u32 %v4056_v43, 16  ;;  %v2974_v22 = vsel %vm2929_vm6, %v8475_v62, %v12529_v57  ;;  %v2590_v59 = vpop.permute.xlu0 %2589 }
 0x1ee   : > { %3958 = vst [vmem:[#allocation2 + $0x2c] sm:$0x1] %v3957_v9  ;;  %v3667_v8 = vshrl.u32 %v3587_v49, 16  ;;  %v3366_v61 = vmul.f32 %v10252_v48, %v3292_v6  ;;  %v5944_v32 = vunpack.c.l.b16 %v4169_v34  ;;  %v3670_v4 = vshll.u32 %v3587_v49, 16  ;;  %v2670_v53 = vpop.permute.xlu1 %2669 }
 0x1ef   : > { %v4173_v46 = vrot.slane %v4171_v28, 4  ;;  %v4176_v50 = vrot.slane %v4174_v55, 5  ;;  %v4559_v45 = vsel %vm8925_vm5, %v4557_v12, %v4558_v27  ;;  %v3171_v1 = vsel %vm3143_vm13, %v3138_v58, %v2844_v19  ;;  %v4485_v55 = vld [vmem:[#allocation2 + $0x24] sm:$0xe] }
 0x1f0   : > { %v3669_v47 = vrot.slane %v3667_v8, 7  ;;  %v3402_v63 = vadd.f32 %v10258_v25, %v3366_v61  ;;  %v5973_v23 = vpack.c.b16 %v5944_v32, %v5943_v20  ;;  %v10442_v35 = vpack.c.b16 %v6024_v42, %v6023_v36 }
 0x1f1   : > { %v6021_v15 = vunpack.c.l.b16 %v10413_v7  ;;  %v6022_v11 = vunpack.c.l.b16 %v4559_v45  ;;  %v3008_v5 = vsel %vm12531_vm7, %v2974_v22, %v12530_v51  ;;  %v4177_v19 = vor.u32 %v4176_v50, %v4173_v46  ;;  %v3492_v50 = vld [vmem:[#allocation2 + $0x54] sm:$0x1]  ;;  %vm12534_vm7 = vmmov %vm12532_vm4 }
 0x1f2   : > { %v3672_v24 = vor.u32 %v3670_v4, %v3669_v47  ;;  %v3434_v41 = vmax.f32 %v3402_v63, 0.0  ;;  %5991 = vrot.lane.b32.xlu1 %v5973_v23, %s8617_s16  ;;  %v3041_v7 = vsel %vm3011_vm8, %v3008_v5, %v10068_v39  ;;  %v3204_v9 = vsel %vm12532_vm4, %v3171_v1, %v2924_v31  ;;  %v3963_v39 = vld [vmem:[#allocation2 + $0x38] sm:$0x1] }
 0x1f3   : > { %v10449_v13 = vpack.c.b16 %v6022_v11, %v6021_v15  ;;  %v3546_v28 = vsel %vm10219_vm9, 0, %v3545_v14  ;;  %vm12533_vm0 = vcmask 130048   ;;  %v4178_v8 = vrot.slane %v4177_v19, 4  ;;  %v3966_v14 = vld [vmem:[#allocation2 + $0x3c] sm:$0xf] }
 0x1f4   : > { %v3960_v37 = vsel %vm10287_vm10, %v3672_v24, %v3959_v0  ;;  %v3588_v21 = vpack.c.bf16 %v3434_v41, %v3434_v41  ;;  %v4057_v52 = vld [vmem:[#allocation2 + $0x28] sm:$0xf]  ;;  %v3074_v62 = vsel %vm12533_vm0, %v3041_v7, %v2590_v59  ;;  %3547 = vst [vmem:[#allocation2 + $0x50] sm:$0x1] %v3546_v28  ;;  %v3673_v54 = vrot.slane %v3669_v47, 4  ;;  %v2766_v47 = vpop.permute.xlu2 %2765 }
 0x1f5   : > { %3961 = vst [vmem:[#allocation2 + $0x30] sm:$0xf] %v3960_v37  ;;  %v3295_v10 = vpop.f32.mrf.mxu0  ;;  %v4085_v12 = vld [vmem:[#allocation2 + $0x2c] sm:$0x1]  ;;  %v4180_v56 = vshll.u32 %v4057_v52, 16  ;;  %v4184_v2 = vshrl.u32 %v4057_v52, 16  ;;  %v2846_v46 = vpop.permute.xlu0 %2845  ;;  %v3107_v1 = vsel %vm3077_vm11, %v3074_v62, %v2670_v53 }
 0x1f6   : > { %v3675_v38 = vshrl.u32 %v3588_v21, 16  ;;  %v3367_v40 = vmul.f32 %v10252_v48, %v3295_v10  ;;  %v3678_v49 = vshll.u32 %v3588_v21, 16  ;;  %v4190_v3 = vshll.u32 %v4085_v12, 16  ;;  %v2926_v15 = vpop.permute.xlu1 %2925  ;;  %v3498_v7 = vld [vmem:[#allocation2 + $0x6c] sm:$0x1] }
 0x1f7   : > { %8143 = vmatmul.msk.bf16.gmra.mxu2 %vm3229_vm15, %v3204_v9  ;;  %v4182_v43 = vrot.slane %v4180_v56, 5  ;;  %v4186_v18 = vrot.slane %v4184_v2, 4  ;;  %v4569_v17 = vrot.slane %v4057_v52, 5  ;;  %v8149_v63 = vrot.slane %v4485_v55, 9 }
 0x1f8   : > { %v3677_v6 = vrot.slane %v3675_v38, 7  ;;  %v3403_v34 = vadd.f32 %v10258_v25, %v3367_v40  ;;  %v4192_v4 = vrot.slane %v4190_v3, 5  ;;  %v3493_v24 = vsel %vm10211_vm3, 0, %v3492_v50  ;;  %v3548_v3 = vld [vmem:[#allocation2 + $0x5c] sm:$0x1] }
 0x1f9   : > { %v4187_v61 = vor.u32 %v4186_v18, %v4182_v43  ;;  %v4183_v32 = vsel %vm8723_vm2, %v4178_v8, %v4182_v43  ;;  %v4571_v42 = vrot.slane %v4569_v17, 4  ;;  %v4570_v45 = vsel %vm8925_vm5, %v8149_v63, %v4569_v17  ;;  %3494 = vst [vmem:[#allocation2 + $0x54] sm:$0x1] %v3493_v24  ;;  %v12535_v8 = vld [vmem:[#allocation7_spill] sm:$0xff] }
 0x1fa   : > { %v3680_v27 = vor.u32 %v3678_v49, %v3677_v6  ;;  %v3682_v58 = vrot.slane %v3677_v6, 4  ;;  %v3435_v20 = vmax.f32 %v3403_v34, 0.0  ;;  %v4572_v31 = vrot.slane %v4085_v12, 5  ;;  %v8476_v49 = vld [vmem:[%s8695_s15 + $0xb4] sm:$0xff] }
 0x1fb   : > { %v4188_v36 = vrot.slane %v4187_v61, 4  ;;  %v5945_v11 = vunpack.c.l.b16 %v4183_v32  ;;  %v6025_v19 = vunpack.c.l.b16 %v4570_v45  ;;  %v3140_v12 = vsel %vm3110_vm12, %v3107_v1, %v2766_v47 }
 0x1fc   : > { %v3681_v44 = vsel %vm10313_vm14, %v3673_v54, %v3680_v27  ;;  %v3964_v0 = vsel %vm10211_vm3, %v3682_v58, %v3963_v39  ;;  %v3589_v23 = vpack.c.bf16 %v3435_v20, %v3435_v20  ;;  %v4573_v52 = vsel %vm8925_vm5, %v4571_v42, %v4572_v31  ;;  %v2512_v62 = vpop.permute.xlu2 %2511  ;;  %v12536_v20 = vld [vmem:[#allocation10_spill] sm:$0xff] }
 0x1fd   : > { %3962 = vst.msk [vmem:[#allocation2 + $0x34] sm:$0xf] %vm3459_vm1, %v3681_v44  ;;  %v3297_v57 = vpop.f32.mrf.mxu0  ;;  %v4193_v22 = vsel %vm8723_vm2, %v4188_v36, %v4192_v4  ;;  %v6026_v56 = vunpack.c.l.b16 %v4573_v52  ;;  %v3173_v38 = vsel %vm3143_vm13, %v3140_v12, %v2846_v46  ;;  %v3499_v40 = vsel %vm10211_vm3, 0, %v3498_v7  ;;  %v2592_v55 = vpop.permute.xlu0 %2591  ;;  %v3970_v36 = vld [vmem:[#allocation2 + $0x44] sm:$0x1] }
 0x1fe   : > { %3965 = vst [vmem:[#allocation2 + $0x38] sm:$0x1] %v3964_v0  ;;  %v3684_v41 = vshrl.u32 %v3589_v23, 16  ;;  %v3368_v59 = vmul.f32 %v10252_v48, %v3297_v57  ;;  %v5946_v51 = vunpack.c.l.b16 %v4193_v22  ;;  %v3687_v37 = vshll.u32 %v3589_v23, 16  ;;  %v2672_v4 = vpop.permute.xlu1 %2671  ;;  %v3554_v46 = vld [vmem:[#allocation2 + $0x74] sm:$0x1] }
 0x1ff   : > { %v10483_v9 = vpack.c.b16 %v6026_v56, %v6025_v19  ;;  %3500 = vst [vmem:[#allocation2 + $0x6c] sm:$0x1] %v3499_v40  ;;  %v3549_v34 = vsel %vm10219_vm9, 0, %v3548_v3  ;;  %v3206_v39 = vsel %vm12534_vm7, %v3173_v38, %v2926_v15  ;;  %v2977_v61 = vsel %vm2929_vm6, %v8476_v49, %v12535_v8  ;;  %v3495_v12 = vld [vmem:[#allocation2 + $0x60] sm:$0x1] }
 0x200   : > { %v3686_v5 = vrot.slane %v3684_v41, 7  ;;  %v3404_v21 = vadd.f32 %v10258_v25, %v3368_v59  ;;  %v5974_v10 = vpack.c.b16 %v5946_v51, %v5945_v11  ;;  %3550 = vst [vmem:[#allocation2 + $0x5c] sm:$0x1] %v3549_v34  ;;  %vm12537_vm4 = vcmask 64512  }
 0x201   : > { %v3010_v32 = vsel %vm12537_vm4, %v2977_v61, %v12536_v20  ;;  %v3555_v42 = vsel %vm10219_vm9, 0, %v3554_v46  ;;  %v3496_v7 = vsel %vm10211_vm3, 0, %v3495_v12  ;;  %v3980_v46 = vld [vmem:[#allocation2 + $0x54] sm:$0xf] }
 0x202   : > { %v3689_v2 = vor.u32 %v3687_v37, %v3686_v5  ;;  %v3436_v53 = vmax.f32 %v3404_v21, 0.0  ;;  %5993 = vrot.lane.b32.xlu2 %v5974_v10, %s8617_s16  ;;  %v3690_v63 = vrot.slane %v3686_v5, 4  ;;  %v3043_v50 = vsel %vm3011_vm8, %v3010_v32, %v2512_v62  ;;  %3556 = vst [vmem:[#allocation2 + $0x74] sm:$0x1] %v3555_v42  ;;  %v3973_v37 = vld [vmem:[#allocation2 + $0x48] sm:$0xf] }
 0x203   : > { %v3076_v22 = vsel %vm12533_vm0, %v3043_v50, %v2592_v55  ;;  %3497 = vst [vmem:[#allocation2 + $0x60] sm:$0x1] %v3496_v7  ;;  %v3501_v50 = vld [vmem:[#allocation2 + $0x78] sm:$0x1]  ;;  %vm12550_vm0 = vcmask 1041408  }
 0x204   : > { %v3967_v43 = vsel %vm10287_vm10, %v3689_v2, %v3966_v14  ;;  %v3590_v18 = vpack.c.bf16 %v3436_v53, %v3436_v53  ;;  %v3109_v31 = vsel %vm3077_vm11, %v3076_v22, %v2672_v4  ;;  %v2768_v1 = vpop.permute.xlu2 %2767 }
 0x205   : > { %3968 = vst [vmem:[#allocation2 + $0x3c] sm:$0xf] %v3967_v43  ;;  %v3300_v6 = vpop.f32.mrf.mxu0  ;;  %v2848_v51 = vpop.permute.xlu0 %2847  ;;  %v3142_v21 = vsel %vm3110_vm12, %v3109_v31, %v2768_v1 }
 0x206   : > { %v3692_v28 = vshrl.u32 %v3590_v18, 16  ;;  %v3369_v17 = vmul.f32 %v10252_v48, %v3300_v6  ;;  %v3695_v27 = vshll.u32 %v3590_v18, 16  ;;  %v3175_v10 = vsel %vm3143_vm13, %v3142_v21, %v2848_v51  ;;  %v2928_v19 = vpop.permute.xlu1 %2927  ;;  %v3977_v6 = vld [vmem:[#allocation2 + $0x50] sm:$0x1]  ;;  %v3994_v51 = vld [vmem:[#allocation2 + $0x6c] sm:$0xf] }
 0x207   : > { %8144 = vmatmul.msk.bf16.gmra.mxu2 %vm3229_vm15, %v3206_v39  ;;  %v3208_v49 = vsel %vm12534_vm7, %v3175_v10, %v2928_v19  ;;  %v3984_v19 = vld [vmem:[#allocation2 + $0x5c] sm:$0x1] }
 0x208   : > { %v3694_v54 = vrot.slane %v3692_v28, 7  ;;  %v3405_v58 = vadd.f32 %v10258_v25, %v3369_v17 }
 0x20a   : > { %v3697_v44 = vor.u32 %v3695_v27, %v3694_v54  ;;  %v3699_v0 = vrot.slane %v3694_v54, 4  ;;  %v3437_v23 = vmax.f32 %v3405_v58, 0.0  ;;  %v3551_v27 = vld [vmem:[#allocation2 + $0x68] sm:$0x1] }
 0x20b   : > { %v3552_v20 = vsel %vm10219_vm9, 0, %v3551_v27 }
 0x20c   : > { %v3698_v47 = vsel %vm10313_vm14, %v3690_v63, %v3697_v44  ;;  %v3971_v57 = vsel %vm10211_vm3, %v3699_v0, %v3970_v36  ;;  %v3591_v24 = vpack.c.bf16 %v3437_v23, %v3437_v23  ;;  %3553 = vst [vmem:[#allocation2 + $0x68] sm:$0x1] %v3552_v20 }
 0x20d   : > { %3969 = vst.msk [vmem:[#allocation2 + $0x40] sm:$0xf] %vm3459_vm1, %v3698_v47  ;;  %v3302_v41 = vpop.f32.mrf.mxu0 }
 0x20e   : > { %3972 = vst [vmem:[#allocation2 + $0x44] sm:$0x1] %v3971_v57  ;;  %v3701_v59 = vshrl.u32 %v3591_v24, 16  ;;  %v3370_v45 = vmul.f32 %v10252_v48, %v3302_v41  ;;  %v3704_v11 = vshll.u32 %v3591_v24, 16  ;;  %v3502_v24 = vsel %vm10211_vm3, 0, %v3501_v50 }
 0x20f   : > { %3503 = vst [vmem:[#allocation2 + $0x78] sm:$0x1] %v3502_v24 }
 0x210   : > { %v3703_v15 = vrot.slane %v3701_v59, 7  ;;  %v3406_v5 = vadd.f32 %v10258_v25, %v3370_v45 }
 0x212   : > { %v3706_v52 = vor.u32 %v3704_v11, %v3703_v15  ;;  %v3438_v14 = vmax.f32 %v3406_v5, 0.0  ;;  %v3707_v34 = vrot.slane %v3703_v15, 4 }
 0x214   : > { %v3974_v56 = vsel %vm10287_vm10, %v3706_v52, %v3973_v37  ;;  %v3592_v2 = vpack.c.bf16 %v3438_v14, %v3438_v14  ;;  %v4058_v14 = vld [vmem:[#allocation2 + $0x30] sm:$0xf] }
 0x215   : > { %3975 = vst [vmem:[#allocation2 + $0x48] sm:$0xf] %v3974_v56  ;;  %v3305_v53 = vpop.f32.mrf.mxu0 }
 0x216   : > { %v3709_v38 = vshrl.u32 %v3592_v2, 16  ;;  %v3371_v40 = vmul.f32 %v10252_v48, %v3305_v53  ;;  %v3712_v18 = vshll.u32 %v3592_v2, 16  ;;  %v3557_v2 = vld [vmem:[#allocation2 + $0x80] sm:$0x1] }
 0x217   : > { %8145 = vmatmul.msk.bf16.gmra.mxu2 %vm3229_vm15, %v3208_v49 }
 0x218   : > { %v3711_v43 = vrot.slane %v3709_v38, 7  ;;  %v3407_v3 = vadd.f32 %v10258_v25, %v3371_v40  ;;  %v3558_v38 = vsel %vm10219_vm9, 0, %v3557_v2 }
 0x219   : > { %3559 = vst [vmem:[#allocation2 + $0x80] sm:$0x1] %v3558_v38 }
 0x21a   : > { %v3714_v28 = vor.u32 %v3712_v18, %v3711_v43  ;;  %v3716_v55 = vrot.slane %v3711_v43, 4  ;;  %v3439_v17 = vmax.f32 %v3407_v3, 0.0  ;;  %v4195_v18 = vshrl.u32 %v4058_v14, 16 }
 0x21b   : > { %v3315_v39 = vpop.f32.mrf.mxu2 }
 0x21c   : > { %v3715_v62 = vsel %vm10313_vm14, %v3707_v34, %v3714_v28  ;;  %v3978_v8 = vsel %vm10211_vm3, %v3716_v55, %v3977_v6  ;;  %v3593_v61 = vpack.c.bf16 %v3439_v17, %v3439_v17  ;;  %v3375_v54 = vmul.f32 %v10252_v48, %v3315_v39  ;;  %v4658_v28 = vld [vmem:[#allocation2 + $0xc] sm:$0xf] }
 0x21d   : > { %3976 = vst.msk [vmem:[#allocation2 + $0x4c] sm:$0xf] %vm3459_vm1, %v3715_v62  ;;  %v3307_v58 = vpop.f32.mrf.mxu0  ;;  %v4198_v34 = vshll.u32 %v4058_v14, 16  ;;  %v10547_v62 = vld [vmem:[#allocation2 + $0x34] sm:$0xf]  ;;  %v4707_v27 = vshrl.u32 %v4658_v28, 16 }
 0x21e   : > { %3979 = vst [vmem:[#allocation2 + $0x50] sm:$0x1] %v3978_v8  ;;  %v3718_v32 = vshrl.u32 %v3593_v61, 16  ;;  %v3411_v36 = vadd.f32 %v10258_v25, %v3375_v54  ;;  %v3372_v4 = vmul.f32 %v10252_v48, %v3307_v58  ;;  %v3721_v44 = vshll.u32 %v3593_v61, 16  ;;  %v3998_v8 = vld [vmem:[#allocation2 + $0x74] sm:$0x1] }
 0x21f   : > { %v4197_v54 = vrot.slane %v4195_v18, 4 }
 0x220   : > { %v3720_v63 = vrot.slane %v3718_v32, 7  ;;  %v3443_v0 = vmax.f32 %v3411_v36, 0.0  ;;  %v3408_v23 = vadd.f32 %v10258_v25, %v3372_v4  ;;  %v3504_v36 = vld [vmem:[#allocation2 + $0x84] sm:$0x1]  ;;  %v4200_v4 = vrot.slane %v4198_v34, 5 }
 0x222   : > { %v3723_v42 = vor.u32 %v3721_v44, %v3720_v63  ;;  %v3597_v47 = vpack.c.bf16 %v3443_v0, %v3443_v0  ;;  %v3440_v57 = vmax.f32 %v3408_v23, 0.0  ;;  %v3724_v10 = vrot.slane %v3720_v63, 4 }
 0x223   : > { %v3317_v22 = vpop.f32.mrf.mxu2  ;;  %v3505_v0 = vsel %vm10211_vm3, 0, %v3504_v36  ;;  %v4208_v23 = vshrl.u32 %v10547_v62, 16 }
 0x224   : > { %v3981_v41 = vsel %vm10287_vm10, %v3723_v42, %v3980_v46  ;;  %v3752_v59 = vshrl.u32 %v3597_v47, 16  ;;  %v3594_v45 = vpack.c.bf16 %v3440_v57, %v3440_v57  ;;  %v3376_v31 = vmul.f32 %v10252_v48, %v3317_v22  ;;  %3506 = vst [vmem:[#allocation2 + $0x84] sm:$0x1] %v3505_v0 }
 0x225   : > { %3982 = vst [vmem:[#allocation2 + $0x54] sm:$0xf] %v3981_v41  ;;  %v3755_v15 = vshll.u32 %v3597_v47, 16  ;;  %v4710_v57 = vshll.u32 %v4658_v28, 16 }
 0x226   : > { %v3754_v1 = vrot.slane %v3752_v59, 7  ;;  %v3726_v11 = vshrl.u32 %v3594_v45, 16  ;;  %v3412_v5 = vadd.f32 %v10258_v25, %v3376_v31  ;;  %v3729_v52 = vshll.u32 %v3594_v45, 16  ;;  %v10559_v45 = vld [vmem:[#allocation2 + $0x30] sm:$0xe] }
 0x227   : > { %v4201_v59 = vor.u32 %v4200_v4, %v4197_v54 }
 0x228   : > { %v3757_v37 = vor.u32 %v3755_v15, %v3754_v1  ;;  %v3728_v21 = vrot.slane %v3726_v11, 7  ;;  %v3444_v56 = vmax.f32 %v3412_v5, 0.0  ;;  %v3758_v58 = vrot.slane %v3754_v1, 4  ;;  %v10564_v1 = vld [vmem:[%s12472_s2] ss:$0 sm:$0xff] }
 0x229   : > { %v10567_v11 = vld [vmem:[#allocation2 + $0x38] sm:$0x1]  ;;  %v10571_v5 = vrot.slane %v4208_v23, 4 }
 0x22a   : > { %v3995_v12 = vsel %vm10287_vm10, %v3757_v37, %v3994_v51  ;;  %v3731_v53 = vor.u32 %v3729_v52, %v3728_v21  ;;  %v3733_v7 = vrot.slane %v3728_v21, 4  ;;  %v3598_v40 = vpack.c.bf16 %v3444_v56, %v3444_v56 }
 0x22b   : > { %3996 = vst [vmem:[#allocation2 + $0x6c] sm:$0xf] %v3995_v12  ;;  %v4576_v37 = vrot.slane %v10547_v62, 5  ;;  %v10574_v21 = vrot.slane %v4707_v27, 4  ;;  %v8150_v56 = vrot.slane %v10559_v45, 9  ;;  %v4214_v38 = vshll.u32 %v10567_v11, 16 }
 0x22c   : > { %v3732_v49 = vsel %vm10313_vm14, %v3724_v10, %v3731_v53  ;;  %v3985_v43 = vsel %vm10211_vm3, %v3733_v7, %v3984_v19  ;;  %v3760_v3 = vshrl.u32 %v3598_v40, 16  ;;  %v3763_v39 = vshll.u32 %v3598_v40, 16  ;;  %v10579_v10 = vld [vmem:[%s12473_s3] ss:$0 sm:$0xff] }
 0x22d   : > { %3983 = vst.msk [vmem:[#allocation2 + $0x58] sm:$0xf] %vm3459_vm1, %v3732_v49  ;;  %v3310_v6 = vpop.f32.mrf.mxu0  ;;  %v3987_v12 = vld [vmem:[#allocation2 + $0x60] sm:$0xf]  ;;  %v10583_v7 = vrot.slane %v4201_v59, 4  ;;  %v10586_v40 = vrot.slane %v4710_v57, 5 }
 0x22e   : > { %3986 = vst [vmem:[#allocation2 + $0x5c] sm:$0x1] %v3985_v43  ;;  %v3373_v55 = vmul.f32 %v10252_v48, %v3310_v6  ;;  %v3762_v17 = vrot.slane %v3760_v3, 7  ;;  %v4204_v48 = vshll.u32 %v10547_v62, 16  ;;  %v3560_v3 = vld [vmem:[#allocation2 + $0x8c] sm:$0x1] }
 0x22f   : > { %v4579_v34 = vrot.slane %v10567_v11, 5  ;;  %v3991_v59 = vld [vmem:[#allocation2 + $0x68] sm:$0x1]  ;;  %v10647_v62 = vld [vmem:[#allocation2 + $0x40] sm:$0xf] }
 0x230   : > { %v3409_v61 = vadd.f32 %v10258_v25, %v3373_v55  ;;  %v3765_v20 = vor.u32 %v3763_v39, %v3762_v17  ;;  %v3767_v32 = vrot.slane %v3762_v17, 4  ;;  %v10569_v51 = vrot.slane %v4204_v48, 5 }
 0x231   : > { %v3561_v17 = vsel %vm10219_vm9, 0, %v3560_v3  ;;  %v10596_v39 = vrot.slane %v4576_v37, 4 }
 0x232   : > { %v3441_v63 = vmax.f32 %v3409_v61, 0.0  ;;  %v4068_v44 = vld [vmem:[#allocation2 + $0x6c] sm:$0xf]  ;;  %v3766_v46 = vsel %vm10313_vm14, %v3758_v58, %v3765_v20  ;;  %v3999_v25 = vsel %vm10211_vm3, %v3767_v32, %v3998_v8  ;;  %v4211_v6 = vor.u32 %v10571_v5, %v10569_v51  ;;  %3562 = vst [vmem:[#allocation2 + $0x8c] sm:$0x1] %v3561_v17 }
 0x233   : > { %v4315_v50 = vshrl.u32 %v4068_v44, 16  ;;  %v4318_v42 = vshll.u32 %v4068_v44, 16  ;;  %3997 = vst.msk [vmem:[#allocation2 + $0x70] sm:$0xf] %vm3459_vm1, %v3766_v46  ;;  %v4491_v2 = vld [vmem:[#allocation2 + $0x6c] sm:$0xe] }
 0x234   : > { %v3595_v47 = vpack.c.bf16 %v3441_v63, %v3441_v63  ;;  %4000 = vst [vmem:[#allocation2 + $0x74] sm:$0x1] %v3999_v25  ;;  %v8155_v8 = vrot.slane %v4491_v2, 9  ;;  %v10649_v5 = vld [vmem:[#allocation2 + $0x3c] sm:$0xe] }
 0x235   : > { %v3312_v22 = vpop.f32.mrf.mxu0  ;;  %v4317_v24 = vrot.slane %v4315_v50, 4  ;;  %v4320_v41 = vrot.slane %v4318_v42, 5 }
 0x236   : > { %v3735_v31 = vshrl.u32 %v3595_v47, 16  ;;  %v3374_v15 = vmul.f32 %v10564_v1, %v3312_v22  ;;  %v3738_v14 = vshll.u32 %v3595_v47, 16 }
 0x237   : > { %v4321_v53 = vor.u32 %v4320_v41, %v4317_v24  ;;  %v4060_v41 = vld [vmem:[#allocation2 + $0x3c] sm:$0xf] }
 0x238   : > { %v3737_v52 = vrot.slane %v3735_v31, 7  ;;  %v3410_v19 = vadd.f32 %v10579_v10, %v3374_v15 }
 0x239   : > { %v4322_v36 = vrot.slane %v4321_v53, 4 }
 0x23a   : > { %v3740_v49 = vor.u32 %v3738_v14, %v3737_v52  ;;  %v3442_v43 = vmax.f32 %v3410_v19, 0.0  ;;  %v3320_v18 = vpop.f32.mrf.mxu2  ;;  %v4069_v55 = vld [vmem:[#allocation2 + $0x70] sm:$0xf]  ;;  %v3741_v44 = vrot.slane %v3737_v52, 4 }
 0x23b   : > { %v3377_v28 = vmul.f32 %v10564_v1, %v3320_v18  ;;  %v4091_v27 = vld [vmem:[#allocation2 + $0x74] sm:$0x1]  ;;  %v4324_v58 = vshll.u32 %v4069_v55, 16  ;;  %v4328_v20 = vshrl.u32 %v4069_v55, 16  ;;  %v4611_v63 = vrot.slane %v4069_v55, 5 }
 0x23c   : > { %v3988_v61 = vsel %vm10287_vm10, %v3740_v49, %v3987_v12  ;;  %v3596_v54 = vpack.c.bf16 %v3442_v43, %v3442_v43  ;;  %v4334_v4 = vshll.u32 %v4091_v27, 16  ;;  %v4614_v25 = vrot.slane %v4091_v27, 5 }
 0x23d   : > { %3989 = vst [vmem:[#allocation2 + $0x60] sm:$0xf] %v3988_v61  ;;  %v3413_v32 = vadd.f32 %v10579_v10, %v3377_v28  ;;  %v4326_v48 = vrot.slane %v4324_v58, 5  ;;  %v4330_v23 = vrot.slane %v4328_v20, 4  ;;  %v4612_v50 = vsel %vm8925_vm5, %v8155_v8, %v4611_v63  ;;  %v3507_v61 = vld [vmem:[#allocation2 + $0x90] sm:$0x1] }
 0x23e   : > { %v3743_v0 = vshrl.u32 %v3596_v54, 16  ;;  %v4613_v42 = vrot.slane %v4611_v63, 4  ;;  %v3746_v57 = vshll.u32 %v3596_v54, 16  ;;  %v4336_v15 = vrot.slane %v4334_v4, 5  ;;  %v4001_v4 = vld [vmem:[#allocation2 + $0x78] sm:$0xf] }
 0x23f   : > { %v3445_v46 = vmax.f32 %v3413_v32, 0.0  ;;  %v4327_v22 = vsel %vm8723_vm2, %v4322_v36, %v4326_v48  ;;  %v4331_v24 = vor.u32 %v4330_v23, %v4326_v48  ;;  %v6037_v14 = vunpack.c.l.b16 %v4612_v50  ;;  %v4659_v36 = vld [vmem:[#allocation2 + $0x10] sm:$0xf] }
 0x240   : > { %v3745_v47 = vrot.slane %v3743_v0, 7  ;;  %v4615_v52 = vsel %vm8925_vm5, %v4613_v42, %v4614_v25  ;;  %v5957_v3 = vunpack.c.l.b16 %v4327_v22  ;;  %v4219_v28 = vshrl.u32 %v4060_v41, 16 }
 0x241   : > { %v3599_v31 = vpack.c.bf16 %v3445_v46, %v3445_v46  ;;  %v4332_v53 = vrot.slane %v4331_v24, 4  ;;  %v6038_v49 = vunpack.c.l.b16 %v4615_v52  ;;  %v3508_v63 = vsel %vm10211_vm3, 0, %v3507_v61 }
 0x242   : > { %v3748_v19 = vor.u32 %v3746_v57, %v3745_v47  ;;  %v3750_v2 = vrot.slane %v3745_v47, 4  ;;  %v3322_v12 = vpop.f32.mrf.mxu2  ;;  %3509 = vst [vmem:[#allocation2 + $0x90] sm:$0x1] %v3508_v63  ;;  %v4207_v46 = vsel %vm8723_vm2, %v10583_v7, %v10569_v51  ;;  %v4212_v25 = vrot.slane %v4211_v6, 4 }
 0x243   : > { %v3769_v43 = vshrl.u32 %v3599_v31, 16  ;;  %v3378_v18 = vmul.f32 %v10564_v1, %v3322_v12  ;;  %v4337_v8 = vsel %vm8723_vm2, %v4332_v53, %v4336_v15  ;;  %v10614_v54 = vpack.c.b16 %v6038_v49, %v6037_v14  ;;  %v4062_v49 = vld [vmem:[#allocation2 + $0x48] sm:$0xf] }
 0x244   : > { %v3749_v55 = vsel %vm10313_vm14, %v3741_v44, %v3748_v19  ;;  %v3992_v17 = vsel %vm10211_vm3, %v3750_v2, %v3991_v59  ;;  %v3772_v58 = vshll.u32 %v3599_v31, 16  ;;  %v5958_v32 = vunpack.c.l.b16 %v4337_v8  ;;  %v4690_v59 = vld [vmem:[#allocation2 + $0x14] sm:$0x1] }
 0x245   : > { %3990 = vst.msk [vmem:[#allocation2 + $0x64] sm:$0xf] %vm3459_vm1, %v3749_v55  ;;  %v3771_v27 = vrot.slane %v3769_v43, 7  ;;  %v3414_v20 = vadd.f32 %v10579_v10, %v3378_v18  ;;  %v4222_v44 = vshll.u32 %v4060_v41, 16  ;;  %v4216_v50 = vrot.slane %v4214_v38, 5 }
 0x246   : > { %3993 = vst [vmem:[#allocation2 + $0x68] sm:$0x1] %v3992_v17  ;;  %v5980_v23 = vpack.c.b16 %v5958_v32, %v5957_v3  ;;  %v10635_v42 = vsel %vm8925_vm5, %v8150_v56, %v4576_v37  ;;  %v4716_v47 = vshll.u32 %v4659_v36, 16  ;;  %v10645_v51 = vsel %vm8925_vm5, %v10596_v39, %v4579_v34  ;;  %v3563_v56 = vld [vmem:[#allocation2 + $0x98] sm:$0x1] }
 0x247   : > { %v3774_v0 = vor.u32 %v3772_v58, %v3771_v27  ;;  %v3446_v48 = vmax.f32 %v3414_v20, 0.0  ;;  %v4221_v45 = vrot.slane %v4219_v28, 4  ;;  %v10651_v38 = vunpack.c.l.b16 %v4207_v46  ;;  %v4005_v43 = vld [vmem:[#allocation2 + $0x80] sm:$0x1] }
 0x248   : > { %6005 = vrot.lane.b32.xlu2 %v5980_v23, %s8617_s16  ;;  %v4224_v6 = vrot.slane %v4222_v44, 5  ;;  %v4720_v11 = vshrl.u32 %v4659_v36, 16  ;;  %v3564_v34 = vsel %vm10219_vm9, 0, %v3563_v56  ;;  %v6027_v39 = vunpack.c.l.b16 %v10635_v42 }
 0x249   : > { %v4002_v57 = vsel %vm10287_vm10, %v3774_v0, %v4001_v4  ;;  %v3600_v7 = vpack.c.bf16 %v3446_v48, %v3446_v48  ;;  %3565 = vst [vmem:[#allocation2 + $0x98] sm:$0x1] %v3564_v34  ;;  %v4217_v31 = vsel %vm8723_vm2, %v4212_v25, %v4216_v50  ;;  %v6028_v15 = vunpack.c.l.b16 %v10645_v51 }
 0x24a   : > { %4003 = vst [vmem:[#allocation2 + $0x78] sm:$0xf] %v4002_v57  ;;  %v3325_v37 = vpop.f32.mrf.mxu2  ;;  %v4228_v52 = vshll.u32 %v10647_v62, 16  ;;  %v4232_v14 = vshrl.u32 %v10647_v62, 16  ;;  %v8151_v53 = vrot.slane %v10649_v5, 9  ;;  %v4225_v18 = vor.u32 %v4224_v6, %v4221_v45 }
 0x24b   : > { %v3777_v24 = vshrl.u32 %v3600_v7, 16  ;;  %v3379_v41 = vmul.f32 %v10564_v1, %v3325_v37  ;;  %v3780_v2 = vshll.u32 %v3600_v7, 16  ;;  %v10666_v3 = vrot.slane %v4716_v47, 5  ;;  %v10682_v45 = vld [vmem:[#allocation2 + $0x18] sm:$0xf] }
 0x24c   : > { %v4722_v28 = vrot.slane %v4720_v11, 4  ;;  %v4726_v55 = vshll.u32 %v4690_v59, 16  ;;  %v3775_v17 = vrot.slane %v3771_v27, 4  ;;  %v4230_v20 = vrot.slane %v4228_v52, 5  ;;  %v4087_v27 = vld [vmem:[#allocation2 + $0x44] sm:$0x1] }
 0x24d   : > { %v3779_v19 = vrot.slane %v3777_v24, 7  ;;  %v3415_v12 = vadd.f32 %v10579_v10, %v3379_v41  ;;  %v4234_v32 = vrot.slane %v4232_v14, 4  ;;  %v4243_v36 = vshrl.u32 %v4062_v49, 16  ;;  %v3510_v5 = vld [vmem:[#allocation2 + $0x9c] sm:$0x1] }
 0x24e   : > { %v4246_v4 = vshll.u32 %v4062_v49, 16  ;;  %v10674_v23 = vunpack.c.l.b16 %v4217_v31  ;;  %v4226_v42 = vrot.slane %v4225_v18, 4  ;;  %v10677_v47 = vrot.slane %v4726_v55, 5  ;;  %v4008_v31 = vld [vmem:[#allocation2 + $0x84] sm:$0xf] }
 0x24f   : > { %v3782_v8 = vor.u32 %v3780_v2, %v3779_v19  ;;  %v3784_v61 = vrot.slane %v3779_v19, 4  ;;  %v3447_v58 = vmax.f32 %v3415_v12, 0.0  ;;  %v4583_v51 = vrot.slane %v10647_v62, 5 }
 0x250   : > { %6071 = vrot.lane.b32.xlu2 %v10442_v35, %s8618_s17  ;;  %v4723_v35 = vor.u32 %v4722_v28, %v10666_v3  ;;  %v4235_v37 = vor.u32 %v4234_v32, %v4230_v20  ;;  %v4238_v56 = vshll.u32 %v4087_v27, 16  ;;  %v4245_v6 = vrot.slane %v4243_v36, 4 }
 0x251   : > { %v3783_v63 = vsel %vm10313_vm14, %v3775_v17, %v3782_v8  ;;  %v4006_v44 = vsel %vm10211_vm3, %v3784_v61, %v4005_v43  ;;  %v3601_v0 = vpack.c.bf16 %v3447_v58, %v3447_v58  ;;  %v4070_v48 = vld [vmem:[#allocation2 + $0x78] sm:$0xf]  ;;  %v4248_v11 = vrot.slane %v4246_v4, 5 }
 0x252   : > { %4004 = vst.msk [vmem:[#allocation2 + $0x7c] sm:$0xf] %vm3459_vm1, %v3783_v63  ;;  %v3327_v46 = vpop.f32.mrf.mxu2  ;;  %v4339_v25 = vshrl.u32 %v4070_v48, 16  ;;  %v4342_v50 = vshll.u32 %v4070_v48, 16  ;;  %v3511_v59 = vsel %vm10211_vm3, 0, %v3510_v5  ;;  %v5975_v62 = vpack.c.b16 %v10674_v23, %v10651_v38 }
 0x253   : > { %4007 = vst [vmem:[#allocation2 + $0x80] sm:$0x1] %v4006_v44  ;;  %v3786_v57 = vshrl.u32 %v3601_v0, 16  ;;  %v3380_v7 = vmul.f32 %v10564_v1, %v3327_v46  ;;  %v3789_v41 = vshll.u32 %v3601_v0, 16  ;;  %v10689_v19 = vpack.c.b16 %v6028_v15, %v6027_v39 }
 0x254   : > { %v4341_v52 = vrot.slane %v4339_v25, 4  ;;  %v4344_v14 = vrot.slane %v4342_v50, 5  ;;  %3512 = vst [vmem:[#allocation2 + $0x9c] sm:$0x1] %v3511_v59  ;;  %v4585_v49 = vrot.slane %v4583_v51, 4  ;;  %v4231_v18 = vsel %vm8723_vm2, %v4226_v42, %v4230_v20 }
 0x255   : > { %v3788_v24 = vrot.slane %v3786_v57, 7  ;;  %v3416_v34 = vadd.f32 %v10579_v10, %v3380_v7  ;;  %v10694_v28 = vrot.slane %v4238_v56, 5  ;;  %v4586_v55 = vrot.slane %v4087_v27, 5  ;;  %v3566_v27 = vld [vmem:[#allocation2 + $0xa4] sm:$0x1] }
 0x256   : > { %v10696_v17 = vrot.slane %v4723_v35, 4  ;;  %v10702_v39 = vrot.slane %v4235_v37, 4  ;;  %v10706_v15 = vsel %vm8925_vm5, %v8151_v53, %v4583_v51  ;;  %v4345_v36 = vor.u32 %v4344_v14, %v4341_v52  ;;  %v10719_v25 = vld [vmem:[#allocation2 + $0x48] sm:$0xe]  ;;  %v10729_v56 = vld [vmem:[#allocation2 + $0x4c] sm:$0xf] }
 0x257   : > { %v3791_v2 = vor.u32 %v3789_v41, %v3788_v24  ;;  %v3448_v12 = vmax.f32 %v3416_v34, 0.0  ;;  %v4249_v44 = vor.u32 %v4248_v11, %v4245_v6  ;;  %v10713_v46 = vunpack.c.l.b16 %v4231_v18  ;;  %v4012_v6 = vld [vmem:[#allocation2 + $0x8c] sm:$0x1] }
 0x258   : > { %v10717_v53 = vsel %vm8925_vm5, %v4585_v49, %v4586_v55  ;;  %v3567_v7 = vsel %vm10219_vm9, 0, %v3566_v27  ;;  %v4241_v37 = vsel %vm8723_vm2, %v10702_v39, %v10694_v28  ;;  %v4346_v11 = vrot.slane %v4345_v36, 4  ;;  %v10736_v55 = vld [vmem:[#allocation2 + $0x50] sm:$0x1] }
 0x259   : > { %v4009_v8 = vsel %vm10287_vm10, %v3791_v2, %v4008_v31  ;;  %v3602_v61 = vpack.c.bf16 %v3448_v12, %v3448_v12  ;;  %v10700_v58 = vld [vmem:[#allocation2 + $0x7c] sm:$0xf]  ;;  %3568 = vst [vmem:[#allocation2 + $0xa4] sm:$0x1] %v3567_v7  ;;  %v10731_v34 = vrot.slane %v4249_v44, 4  ;;  %v8152_v59 = vrot.slane %v10719_v25, 9 }
 0x25a   : > { %4010 = vst [vmem:[#allocation2 + $0x84] sm:$0xf] %v4009_v8  ;;  %v3330_v32 = vpop.f32.mrf.mxu2  ;;  %v10708_v20 = vld [vmem:[#allocation2 + $0x80] sm:$0x1]  ;;  %v4348_v4 = vshll.u32 %v10700_v58, 16  ;;  %v4352_v63 = vshrl.u32 %v10700_v58, 16 }
 0x25b   : > { %v3794_v0 = vshrl.u32 %v3602_v61, 16  ;;  %v3381_v48 = vmul.f32 %v10564_v1, %v3330_v32  ;;  %v4358_v57 = vshll.u32 %v10708_v20, 16  ;;  %v3797_v35 = vshll.u32 %v3602_v61, 16  ;;  %v8591_v44 = vld [vmem:[#allocation2 + $0x4] sm:$0xf] }
 0x25c   : > { %v4350_v50 = vrot.slane %v4348_v4, 5  ;;  %v4354_v42 = vrot.slane %v4352_v63, 4  ;;  %v3792_v31 = vrot.slane %v3788_v24, 4  ;;  %v4252_v28 = vshll.u32 %v10729_v56, 16  ;;  %v4482_v24 = vld [vmem:[#allocation2] sm:$0xe] }
 0x25d   : > { %v3796_v51 = vrot.slane %v3794_v0, 7  ;;  %v3417_v5 = vadd.f32 %v10579_v10, %v3381_v48  ;;  %v4360_v18 = vrot.slane %v4358_v57, 5  ;;  %v4256_v36 = vshrl.u32 %v10729_v56, 16  ;;  %v3513_v7 = vld [vmem:[#allocation2 + $0xa8] sm:$0x1] }
 0x25e   : > { %v4355_v41 = vor.u32 %v4354_v42, %v4350_v50  ;;  %v4351_v12 = vsel %vm8723_vm2, %v4346_v11, %v4350_v50  ;;  %v4548_v0 = vrot.slane %v8591_v44, 5 }
 0x25f   : > { %v3799_v52 = vor.u32 %v3797_v35, %v3796_v51  ;;  %v3801_v14 = vrot.slane %v3796_v51, 4  ;;  %v3449_v2 = vmax.f32 %v3417_v5, 0.0  ;;  %v5959_v42 = vunpack.c.l.b16 %v4351_v12 }
 0x260   : > { %v4356_v49 = vrot.slane %v4355_v41, 4  ;;  %v3514_v51 = vsel %vm10211_vm3, 0, %v3513_v7  ;;  %v10750_v35 = vrot.slane %v4252_v28, 5  ;;  %v4262_v5 = vshll.u32 %v10736_v55, 16 }
 0x261   : > { %v3800_v8 = vsel %vm10313_vm14, %v3792_v31, %v3799_v52  ;;  %v4013_v61 = vsel %vm10211_vm3, %v3801_v14, %v4012_v6  ;;  %v3603_v39 = vpack.c.bf16 %v3449_v2, %v3449_v2  ;;  %v4072_v32 = vld [vmem:[#allocation2 + $0x84] sm:$0xf]  ;;  %v4590_v6 = vrot.slane %v10729_v56, 5  ;;  %3515 = vst [vmem:[#allocation2 + $0xa8] sm:$0x1] %v3514_v51 }
 0x262   : > { %4011 = vst.msk [vmem:[#allocation2 + $0x88] sm:$0xf] %vm3459_vm1, %v3800_v8  ;;  %v3332_v4 = vpop.f32.mrf.mxu2  ;;  %v4361_v63 = vsel %vm8723_vm2, %v4356_v49, %v4360_v18  ;;  %v4363_v48 = vshrl.u32 %v4072_v32, 16  ;;  %v4366_v27 = vshll.u32 %v4072_v32, 16  ;;  %v4015_v14 = vld [vmem:[#allocation2 + $0x90] sm:$0xf]  ;;  %v6029_v56 = vunpack.c.l.b16 %v10706_v15 }
 0x263   : > { %4014 = vst [vmem:[#allocation2 + $0x8c] sm:$0x1] %v4013_v61  ;;  %v3803_v25 = vshrl.u32 %v3603_v39, 16  ;;  %v3382_v50 = vmul.f32 %v10564_v1, %v3332_v4  ;;  %v5960_v57 = vunpack.c.l.b16 %v4361_v63  ;;  %v3806_v41 = vshll.u32 %v3603_v39, 16  ;;  %v8592_v32 = vld [vmem:[#allocation2 + $0x8] sm:$0x1] }
 0x264   : > { %v8146_v2 = vrot.slane %v4482_v24, 9  ;;  %v4365_v12 = vrot.slane %v4363_v48, 4  ;;  %v4368_v49 = vrot.slane %v4366_v27, 5  ;;  %v4258_v18 = vrot.slane %v4256_v36, 4 }
 0x265   : > { %v3805_v11 = vrot.slane %v3803_v25, 7  ;;  %v3418_v31 = vadd.f32 %v10579_v10, %v3382_v50  ;;  %v5981_v52 = vpack.c.b16 %v5960_v57, %v5959_v42  ;;  %v4550_v28 = vrot.slane %v4548_v0, 4 }
 0x266   : > { %v4551_v4 = vrot.slane %v8592_v32, 5  ;;  %v10756_v63 = vunpack.c.l.b16 %v4241_v37  ;;  %v6030_v39 = vunpack.c.l.b16 %v10717_v53  ;;  %v4255_v24 = vsel %vm8723_vm2, %v10731_v34, %v10750_v35 }
 0x267   : > { %v3808_v8 = vor.u32 %v3806_v41, %v3805_v11  ;;  %v3450_v61 = vmax.f32 %v3418_v31, 0.0  ;;  %6007 = vrot.lane.b32.xlu0 %v5981_v52, %s8617_s16  ;;  %v10766_v27 = vrot.slane %v4262_v5, 5  ;;  %v10770_v37 = vsel %vm8925_vm5, %v8152_v59, %v4590_v6 }
 0x268   : > { %v4369_v42 = vor.u32 %v4368_v49, %v4365_v12  ;;  %v4259_v51 = vor.u32 %v4258_v18, %v10750_v35  ;;  %v4549_v52 = vsel %vm8925_vm5, %v8146_v2, %v4548_v0  ;;  %v4552_v5 = vsel %vm8925_vm5, %v4550_v28, %v4551_v4 }
 0x269   : > { %v4016_v36 = vsel %vm10287_vm10, %v3808_v8, %v4015_v14  ;;  %v3604_v44 = vpack.c.bf16 %v3450_v61, %v3450_v61  ;;  %v4073_v48 = vld [vmem:[#allocation2 + $0x88] sm:$0xf]  ;;  %v3569_v14 = vld [vmem:[#allocation2 + $0xb0] sm:$0x1]  ;;  %v6020_v22 = vunpack.c.l.b16 %v4552_v5  ;;  %v3809_v43 = vrot.slane %v3805_v11, 4 }
 0x26a   : > { %4017 = vst [vmem:[#allocation2 + $0x90] sm:$0xf] %v4016_v36  ;;  %v3335_v25 = vpop.f32.mrf.mxu2  ;;  %v4093_v50 = vld [vmem:[#allocation2 + $0x8c] sm:$0x1]  ;;  %v4372_v57 = vshll.u32 %v4073_v48, 16  ;;  %v4376_v7 = vshrl.u32 %v4073_v48, 16  ;;  %v10824_v15 = vunpack.c.l.b16 %v4255_v24  ;;  %v6031_v53 = vunpack.c.l.b16 %v10770_v37 }
 0x26b   : > { %v3811_v41 = vshrl.u32 %v3604_v44, 16  ;;  %v3383_v31 = vmul.f32 %v10564_v1, %v3335_v25  ;;  %v4382_v61 = vshll.u32 %v4093_v50, 16  ;;  %v3570_v12 = vsel %vm10219_vm9, 0, %v3569_v14  ;;  %v4019_v48 = vld [vmem:[#allocation2 + $0x98] sm:$0x1] }
 0x26c   : > { %v4374_v59 = vrot.slane %v4372_v57, 5  ;;  %v4378_v8 = vrot.slane %v4376_v7, 4  ;;  %v3814_v32 = vshll.u32 %v3604_v44, 16  ;;  %3571 = vst [vmem:[#allocation2 + $0xb0] sm:$0x1] %v3570_v12  ;;  %v4592_v36 = vrot.slane %v4590_v6, 4 }
 0x26d   : > { %v3813_v49 = vrot.slane %v3811_v41, 7  ;;  %v3419_v18 = vadd.f32 %v10579_v10, %v3383_v31  ;;  %v6019_v25 = vunpack.c.l.b16 %v4549_v52  ;;  %v4370_v0 = vrot.slane %v4369_v42, 4  ;;  %v4064_v5 = vld [vmem:[#allocation2 + $0x54] sm:$0xf] }
 0x26e   : > { %v4379_v2 = vor.u32 %v4378_v8, %v4374_v59  ;;  %v4384_v7 = vrot.slane %v4382_v61, 5  ;;  %v4593_v6 = vrot.slane %v10736_v55, 5  ;;  %v4260_v52 = vrot.slane %v4259_v51, 4  ;;  %v3516_v12 = vld [vmem:[#allocation2 + $0xb4] sm:$0x1] }
 0x26f   : > { %v3816_v28 = vor.u32 %v3814_v32, %v3813_v49  ;;  %v3818_v4 = vrot.slane %v3813_v49, 4  ;;  %v3451_v57 = vmax.f32 %v3419_v18, 0.0  ;;  %5995 = vrot.lane.b32.xlu0 %v5975_v62, %s8617_s16  ;;  %v4375_v44 = vsel %vm8723_vm2, %v4370_v0, %v4374_v59 }
 0x270   : > { %v4380_v50 = vrot.slane %v4379_v2, 4  ;;  %v6051_v23 = vpack.c.b16 %v6020_v22, %v6019_v25  ;;  %v5961_v8 = vunpack.c.l.b16 %v4375_v44  ;;  %v3517_v51 = vsel %vm10211_vm3, 0, %v3516_v12  ;;  %v4022_v2 = vld [vmem:[#allocation2 + $0x9c] sm:$0xf]  ;;  %v10811_v44 = vld [vmem:[#allocation2 + $0x58] sm:$0xf] }
 0x271   : > { %v3817_v42 = vsel %vm10313_vm14, %v3809_v43, %v3816_v28  ;;  %v4020_v11 = vsel %vm10211_vm3, %v3818_v4, %v4019_v48  ;;  %v3605_v41 = vpack.c.bf16 %v3451_v57, %v3451_v57  ;;  %v4074_v31 = vld [vmem:[#allocation2 + $0x90] sm:$0xf]  ;;  %v4594_v49 = vsel %vm8925_vm5, %v4592_v36, %v4593_v6  ;;  %3518 = vst [vmem:[#allocation2 + $0xb4] sm:$0x1] %v3517_v51 }
 0x272   : > { %4018 = vst.msk [vmem:[#allocation2 + $0x94] sm:$0xf] %vm3459_vm1, %v3817_v42  ;;  %v3337_v38 = vpop.f32.mrf.mxu2  ;;  %v4385_v62 = vsel %vm8723_vm2, %v4380_v50, %v4384_v7  ;;  %v4387_v14 = vshrl.u32 %v4074_v31, 16  ;;  %v4390_v59 = vshll.u32 %v4074_v31, 16  ;;  %v4267_v32 = vshrl.u32 %v4064_v5, 16 }
 0x273   : > { %4021 = vst [vmem:[#allocation2 + $0x98] sm:$0x1] %v4020_v11  ;;  %v3820_v55 = vshrl.u32 %v3605_v41, 16  ;;  %v3384_v43 = vmul.f32 %v10564_v1, %v3337_v38  ;;  %v5962_v61 = vunpack.c.l.b16 %v4385_v62  ;;  %v4270_v22 = vshll.u32 %v4064_v5, 16  ;;  %v10829_v42 = vld [vmem:[#allocation2 + $0x54] sm:$0xe] }
 0x274   : > { %v3823_v48 = vshll.u32 %v3605_v41, 16  ;;  %v4389_v28 = vrot.slane %v4387_v14, 4  ;;  %v4392_v4 = vrot.slane %v4390_v59, 5  ;;  %v5976_v57 = vpack.c.b16 %v10756_v63, %v10713_v46 }
 0x275   : > { %v10800_v18 = vrot.slane %v3820_v55, 7  ;;  %v3420_v25 = vadd.f32 %v10579_v10, %v3384_v43  ;;  %v5982_v0 = vpack.c.b16 %v5962_v61, %v5961_v8  ;;  %v10809_v36 = vpack.c.b16 %v6030_v39, %v6029_v56  ;;  %v3572_v55 = vld [vmem:[#allocation2 + $0xbc] sm:$0x1] }
 0x276   : > { %v4265_v6 = vsel %vm8723_vm2, %v4260_v52, %v10766_v27  ;;  %v6032_v56 = vunpack.c.l.b16 %v4594_v49  ;;  %v10827_v39 = vrot.slane %v4267_v32, 4  ;;  %v12538_v11 = vshrl.u32 %v10682_v45, 16 }
 0x277   : > { %v3825_v50 = vor.u32 %v3823_v48, %v10800_v18  ;;  %v3452_v7 = vmax.f32 %v3420_v25, 0.0  ;;  %6067 = vrot.lane.b32.xlu0 %v6051_v23, %s8618_s17  ;;  %6009 = vrot.lane.b32.xlu1 %v5982_v0, %s8617_s16  ;;  %v10837_v5 = vrot.slane %v4270_v22, 5  ;;  %v4276_v34 = vshll.u32 %v10811_v44, 16  ;;  %v4026_v0 = vld [vmem:[#allocation2 + $0xa4] sm:$0x1] }
 0x278   : > { %v10833_v41 = vrot.slane %v12538_v11, 4  ;;  %v4393_v37 = vor.u32 %v4392_v4, %v4389_v28  ;;  %v10840_v62 = vunpack.c.l.b16 %v4265_v6  ;;  %v4280_v43 = vshrl.u32 %v10811_v44, 16  ;;  %v10850_v4 = vld [vmem:[#allocation2 + $0x5c] sm:$0x1] }
 0x279   : > { %v4023_v27 = vsel %vm10287_vm10, %v3825_v50, %v4022_v2  ;;  %v3606_v31 = vpack.c.bf16 %v3452_v7, %v3452_v7  ;;  %v4075_v52 = vld [vmem:[#allocation2 + $0x94] sm:$0xf]  ;;  %v8153_v8 = vrot.slane %v10829_v42, 9  ;;  %v3573_v49 = vsel %vm10219_vm9, 0, %v3572_v55 }
 0x27a   : > { %4024 = vst [vmem:[#allocation2 + $0x9c] sm:$0xf] %v4023_v27  ;;  %v3340_v35 = vpop.f32.mrf.mxu2  ;;  %v4094_v24 = vld [vmem:[#allocation2 + $0x98] sm:$0x1]  ;;  %v4396_v38 = vshll.u32 %v4075_v52, 16  ;;  %v4400_v23 = vshrl.u32 %v4075_v52, 16  ;;  %v10848_v25 = vpack.c.b16 %v6032_v56, %v6031_v53  ;;  %v4273_v50 = vor.u32 %v10837_v5, %v10827_v39 }
 0x27b   : > { %v3828_v14 = vshrl.u32 %v3606_v31, 16  ;;  %v3385_v59 = vmul.f32 %v10564_v1, %v3340_v35  ;;  %v4406_v51 = vshll.u32 %v4094_v24, 16  ;;  %v3831_v22 = vshll.u32 %v3606_v31, 16  ;;  %3574 = vst [vmem:[#allocation2 + $0xbc] sm:$0x1] %v3573_v49 }
 0x27c   : > { %v4398_v61 = vrot.slane %v4396_v38, 5  ;;  %v4402_v12 = vrot.slane %v4400_v23, 4  ;;  %v4394_v2 = vrot.slane %v4393_v37, 4  ;;  %v10854_v7 = vrot.slane %v4276_v34, 5 }
 0x27d   : > { %v3830_v32 = vrot.slane %v3828_v14, 7  ;;  %v3421_v48 = vadd.f32 %v10579_v10, %v3385_v59  ;;  %v3826_v6 = vrot.slane %v10800_v18, 4  ;;  %v4408_v52 = vrot.slane %v4406_v51, 5 }
 0x27e   : > { %v4403_v28 = vor.u32 %v4402_v12, %v4398_v61  ;;  %v4399_v53 = vsel %vm8723_vm2, %v4394_v2, %v4398_v61  ;;  %v4282_v35 = vrot.slane %v4280_v43, 4  ;;  %v4286_v24 = vshll.u32 %v10850_v4, 16  ;;  %v3519_v12 = vld [vmem:[#allocation2 + $0xc0] sm:$0x1] }
 0x27f   : > { %v3833_v11 = vor.u32 %v3831_v22, %v3830_v32  ;;  %v3835_v27 = vrot.slane %v3830_v32, 4  ;;  %v3453_v31 = vmax.f32 %v3421_v48, 0.0  ;;  %6073 = vrot.lane.b32.xlu0 %v10483_v9, %s8618_s17  ;;  %6069 = vrot.lane.b32.xlu1 %v10449_v13, %s8618_s17  ;;  %v10868_v9 = vld [vmem:[#allocation2 + $0x6c] sm:$0xf]  ;;  %v4597_v14 = vrot.slane %v10811_v44, 5 }
 0x280   : > { %v4404_v56 = vrot.slane %v4403_v28, 4  ;;  %v5963_v43 = vunpack.c.l.b16 %v4399_v53  ;;  %v4618_v51 = vrot.slane %v10700_v58, 5  ;;  %v3520_v49 = vsel %vm10211_vm3, 0, %v3519_v12  ;;  %v10883_v28 = vld [vmem:[#allocation2 + $0x70] sm:$0xf] }
 0x281   : > { %v3834_v39 = vsel %vm10313_vm14, %v3826_v6, %v3833_v11  ;;  %v4027_v18 = vsel %vm10211_vm3, %v3835_v27, %v4026_v0  ;;  %v3607_v5 = vpack.c.bf16 %v3453_v31, %v3453_v31  ;;  %v4076_v34 = vld [vmem:[#allocation2 + $0x9c] sm:$0xf]  ;;  %v4283_v32 = vor.u32 %v4282_v35, %v10854_v7  ;;  %3521 = vst [vmem:[#allocation2 + $0xc0] sm:$0x1] %v3520_v49  ;;  %v4029_v6 = vld [vmem:[#allocation2 + $0xa8] sm:$0xf] }
 0x282   : > { %4025 = vst.msk [vmem:[#allocation2 + $0xa0] sm:$0xf] %vm3459_vm1, %v3834_v39  ;;  %v3342_v13 = vpop.f32.mrf.mxu2  ;;  %v4409_v37 = vsel %vm8723_vm2, %v4404_v56, %v4408_v52  ;;  %v4411_v38 = vshrl.u32 %v4076_v34, 16  ;;  %v4414_v23 = vshll.u32 %v4076_v34, 16  ;;  %v4899_v22 = vshrl.u32 %v10868_v9, 16 }
 0x283   : > { %4028 = vst [vmem:[#allocation2 + $0xa4] sm:$0x1] %v4027_v18  ;;  %v3837_v59 = vshrl.u32 %v3607_v5, 16  ;;  %v3386_v55 = vmul.f32 %v10564_v1, %v3342_v13  ;;  %v5964_v61 = vunpack.c.l.b16 %v4409_v37  ;;  %v3840_v0 = vshll.u32 %v3607_v5, 16  ;;  %v3575_v49 = vld [vmem:[#allocation2 + $0xc8] sm:$0x1] }
 0x284   : > { %v4413_v11 = vrot.slane %v4411_v38, 4  ;;  %v4416_v27 = vrot.slane %v4414_v23, 5  ;;  %v10885_v58 = vrot.slane %v4273_v50, 4  ;;  %v4600_v31 = vrot.slane %v10850_v4, 5  ;;  %v4492_v50 = vld [vmem:[#allocation2 + $0x78] sm:$0xe] }
 0x285   : > { %v10880_v48 = vrot.slane %v3837_v59, 7  ;;  %v3422_v44 = vadd.f32 %v10579_v10, %v3386_v55  ;;  %v5983_v2 = vpack.c.b16 %v5964_v61, %v5963_v43  ;;  %v10892_v52 = vrot.slane %v4286_v24, 5 }
 0x286   : > { %v10898_v35 = vsel %vm8925_vm5, %v8153_v8, %v4597_v14  ;;  %v10900_v39 = vrot.slane %v4283_v32, 4  ;;  %v10902_v18 = vrot.slane %v4597_v14, 4  ;;  %v4902_v5 = vshll.u32 %v10868_v9, 16 }
 0x287   : > { %v3842_v53 = vor.u32 %v3840_v0, %v10880_v48  ;;  %v3454_v56 = vmax.f32 %v3422_v44, 0.0  ;;  %6075 = vrot.lane.b32.xlu1 %v10689_v19, %s8618_s17  ;;  %6011 = vrot.lane.b32.xlu2 %v5983_v2, %s8617_s16  ;;  %v4908_v34 = vshll.u32 %v10883_v28, 16  ;;  %v4620_v13 = vrot.slane %v4618_v51, 4 }
 0x288   : > { %v10908_v42 = vrot.slane %v4899_v22, 4  ;;  %v4417_v23 = vor.u32 %v4416_v27, %v4413_v11  ;;  %v4279_v9 = vsel %vm8723_vm2, %v10885_v58, %v10854_v7  ;;  %v8156_v61 = vrot.slane %v4492_v50, 9 }
 0x289   : > { %v4030_v19 = vsel %vm10287_vm10, %v3842_v53, %v4029_v6  ;;  %v3608_v24 = vpack.c.bf16 %v3454_v56, %v3454_v56  ;;  %v4077_v37 = vld [vmem:[#allocation2 + $0xa0] sm:$0xf]  ;;  %v4621_v12 = vrot.slane %v10708_v20, 5  ;;  %v3576_v44 = vsel %vm10219_vm9, 0, %v3575_v49  ;;  %v4033_v53 = vld [vmem:[#allocation2 + $0xb0] sm:$0x1] }
 0x28a   : > { %4031 = vst [vmem:[#allocation2 + $0xa8] sm:$0xf] %v4030_v19  ;;  %v3345_v8 = vpop.f32.mrf.mxu2  ;;  %v4095_v38 = vld [vmem:[#allocation2 + $0xa4] sm:$0x1]  ;;  %v4420_v59 = vshll.u32 %v4077_v37, 16  ;;  %v4424_v55 = vshrl.u32 %v4077_v37, 16  ;;  %v4619_v56 = vsel %vm8925_vm5, %v8156_v61, %v4618_v51  ;;  %v6033_v4 = vunpack.c.l.b16 %v10898_v35 }
 0x28b   : > { %v3845_v14 = vshrl.u32 %v3608_v24, 16  ;;  %v3387_v43 = vmul.f32 %v10564_v1, %v3345_v8  ;;  %v4430_v0 = vshll.u32 %v4095_v38, 16  ;;  %v3848_v6 = vshll.u32 %v3608_v24, 16  ;;  %3577 = vst [vmem:[#allocation2 + $0xc8] sm:$0x1] %v3576_v44 }
 0x28c   : > { %v4422_v32 = vrot.slane %v4420_v59, 5  ;;  %v4426_v22 = vrot.slane %v4424_v55, 4  ;;  %v4622_v27 = vsel %vm8925_vm5, %v4620_v13, %v4621_v12  ;;  %v4418_v20 = vrot.slane %v4417_v23, 4 }
 0x28d   : > { %v3847_v2 = vrot.slane %v3845_v14, 7  ;;  %v3423_v11 = vadd.f32 %v10579_v10, %v3387_v43  ;;  %v4912_v19 = vshrl.u32 %v10883_v28, 16  ;;  %v3843_v37 = vrot.slane %v10880_v48, 4 }
 0x28e   : > { %v4427_v50 = vor.u32 %v4426_v22, %v4422_v32  ;;  %v6040_v24 = vunpack.c.l.b16 %v4622_v27  ;;  %v4423_v51 = vsel %vm8723_vm2, %v4418_v20, %v4422_v32  ;;  %v4432_v23 = vrot.slane %v4430_v0, 5 }
 0x28f   : > { %v3850_v8 = vor.u32 %v3848_v6, %v3847_v2  ;;  %v3852_v38 = vrot.slane %v3847_v2, 4  ;;  %v3455_v59 = vmax.f32 %v3423_v11, 0.0  ;;  %5997 = vrot.lane.b32.xlu1 %v5976_v57, %s8617_s16  ;;  %6077 = vrot.lane.b32.xlu2 %v10809_v36, %s8618_s17  ;;  %v4904_v61 = vrot.slane %v4902_v5, 5 }
 0x290   : > { %v4428_v13 = vrot.slane %v4427_v50, 4  ;;  %v6039_v63 = vunpack.c.l.b16 %v4619_v56  ;;  %v5965_v22 = vunpack.c.l.b16 %v4423_v51  ;;  %v4289_v5 = vsel %vm8723_vm2, %v10900_v39, %v10892_v52  ;;  %v8535_v56 = vld [vmem:[#allocation2 + $0x6c] sm:$0xff]  ;;  %v10950_v50 = vld [vmem:[#allocation2 + $0x74] sm:$0x1] }
 0x291   : > { %v3851_v48 = vsel %vm10313_vm14, %v3843_v37, %v3850_v8  ;;  %v4034_v55 = vsel %vm10211_vm3, %v3852_v38, %v4033_v53  ;;  %v3609_v14 = vpack.c.bf16 %v3455_v59, %v3455_v59  ;;  %v4078_v43 = vld [vmem:[#allocation2 + $0xa8] sm:$0xf]  ;;  %v10945_v2 = vrot.slane %v4908_v34, 5 }
 0x292   : > { %4032 = vst.msk [vmem:[#allocation2 + $0xac] sm:$0xf] %vm3459_vm1, %v3851_v48  ;;  %v3347_v46 = vpop.f32.mrf.mxu2  ;;  %v4433_v57 = vsel %vm8723_vm2, %v4428_v13, %v4432_v23  ;;  %v4435_v36 = vshrl.u32 %v4078_v43, 16  ;;  %v4438_v12 = vshll.u32 %v4078_v43, 16  ;;  %v6061_v44 = vpack.c.b16 %v6040_v24, %v6039_v63  ;;  %v5098_v24 = vld [vmem:[#allocation2 + $0x6c] sm:$0xe] }
 0x293   : > { %4035 = vst [vmem:[#allocation2 + $0xb0] sm:$0x1] %v4034_v55  ;;  %v3854_v49 = vshrl.u32 %v3609_v14, 16  ;;  %v3388_v32 = vmul.f32 %v10564_v1, %v3347_v46  ;;  %v5966_v0 = vunpack.c.l.b16 %v4433_v57  ;;  %v4914_v6 = vrot.slane %v4912_v19, 4  ;;  %v4036_v1 = vld [vmem:[#allocation2 + $0xb4] sm:$0xf] }
 0x294   : > { %v3857_v27 = vshll.u32 %v3609_v14, 16  ;;  %v5977_v37 = vpack.c.b16 %v10840_v62, %v10824_v15  ;;  %v4437_v8 = vrot.slane %v4435_v36, 4  ;;  %v4440_v38 = vrot.slane %v4438_v12, 5  ;;  %v8593_v43 = vld [vmem:[%s12472_s2] ss:$0 sm:$0xff] }
 0x295   : > { %v10947_v11 = vrot.slane %v3854_v49, 7  ;;  %v3424_v53 = vadd.f32 %v10579_v10, %v3388_v32  ;;  %v5984_v20 = vpack.c.b16 %v5966_v0, %v5965_v22  ;;  %v5319_v52 = vshll.u32 %v10682_v45, 16  ;;  %v8594_v22 = vld [vmem:[%s12473_s3] ss:$0 sm:$0xff] }
 0x296   : > { %v10963_v10 = vsel %vm8925_vm5, %v10902_v18, %v4600_v31  ;;  %v4905_v15 = vor.u32 %v4904_v61, %v10908_v42  ;;  %v10972_v62 = vunpack.c.l.b16 %v4279_v9  ;;  %v10974_v19 = vunpack.c.l.b16 %v4289_v5  ;;  %v4040_v5 = vld [vmem:[#allocation2 + $0xbc] sm:$0x1] }
 0x297   : > { %v3859_v39 = vor.u32 %v3857_v27, %v10947_v11  ;;  %v3456_v34 = vmax.f32 %v3424_v53, 0.0  ;;  %6087 = vrot.lane.b32.xlu1 %v6061_v44, %s8618_s17  ;;  %6179 = vrot.lane.b32.xlu2 %v8535_v56, %s8619_s18  ;;  %v4918_v59 = vshll.u32 %v10950_v50, 16  ;;  %v4915_v51 = vor.u32 %v4914_v6, %v10945_v2 }
 0x298   : > { %6013 = vrot.lane.b32.xlu0 %v5984_v20, %s8617_s16  ;;  %v5212_v13 = vrot.slane %v10883_v28, 5  ;;  %v4441_v9 = vor.u32 %v4440_v38, %v4437_v8  ;;  %v6034_v55 = vunpack.c.l.b16 %v10963_v10  ;;  %v4906_v46 = vrot.slane %v4905_v15, 4 }
 0x299   : > { %v4037_v31 = vsel %vm10287_vm10, %v3859_v39, %v4036_v1  ;;  %v3610_v18 = vpack.c.bf16 %v3456_v34, %v3456_v34  ;;  %v4079_v42 = vld [vmem:[#allocation2 + $0xac] sm:$0xf]  ;;  %v8170_v63 = vrot.slane %v5098_v24, 9  ;;  %v5215_v28 = vrot.slane %v10950_v50, 5 }
 0x29a   : > { %4038 = vst [vmem:[#allocation2 + $0xb4] sm:$0xf] %v4037_v31  ;;  %v3350_v7 = vpop.f32.mrf.mxu2  ;;  %v4096_v58 = vld [vmem:[#allocation2 + $0xb0] sm:$0x1]  ;;  %v4444_v23 = vshll.u32 %v4079_v42, 16  ;;  %v4448_v48 = vshrl.u32 %v4079_v42, 16  ;;  %v4911_v15 = vsel %vm8723_vm2, %v4906_v46, %v10945_v2 }
 0x29b   : > { %v3862_v14 = vshrl.u32 %v3610_v18, 16  ;;  %v3389_v61 = vmul.f32 %v8593_v43, %v3350_v7  ;;  %v4454_v12 = vshll.u32 %v4096_v58, 16  ;;  %v3865_v32 = vshll.u32 %v3610_v18, 16  ;;  %v5283_v31 = vld [vmem:[#allocation2 + $0x78] sm:$0xf] }
 0x29c   : > { %v4446_v57 = vrot.slane %v4444_v23, 5  ;;  %v4450_v36 = vrot.slane %v4448_v48, 4  ;;  %v4916_v44 = vrot.slane %v4915_v51, 4  ;;  %v4442_v6 = vrot.slane %v4441_v9, 4  ;;  %v11014_v46 = vld [vmem:[#allocation2 + $0x7c] sm:$0xf] }
 0x29d   : > { %v3864_v49 = vrot.slane %v3862_v14, 7  ;;  %v3425_v0 = vadd.f32 %v8594_v22, %v3389_v61  ;;  %v4920_v53 = vrot.slane %v4918_v59, 5  ;;  %v5214_v56 = vrot.slane %v5212_v13, 4 }
 0x29e   : > { %v4451_v27 = vor.u32 %v4450_v36, %v4446_v57  ;;  %v3860_v20 = vrot.slane %v10947_v11, 4  ;;  %v4447_v50 = vsel %vm8723_vm2, %v4442_v6, %v4446_v57  ;;  %v4456_v34 = vrot.slane %v4454_v12, 5 }
 0x29f   : > { %v3867_v1 = vor.u32 %v3865_v32, %v3864_v49  ;;  %v3869_v8 = vrot.slane %v3864_v49, 4  ;;  %v3457_v38 = vmax.f32 %v3425_v0, 0.0  ;;  %5999 = vrot.lane.b32.xlu2 %v5977_v37, %s8617_s16  ;;  %v4921_v37 = vsel %vm8723_vm2, %v4916_v44, %v4920_v53  ;;  %v8551_v32 = vld [vmem:[#allocation2 + $0x78] sm:$0xff]  ;;  %v4043_v44 = vld [vmem:[#allocation2 + $0xc0] sm:$0xf] }
 0x2a0   : > { %6079 = vrot.lane.b32.xlu0 %v10848_v25, %s8618_s17  ;;  %v4452_v39 = vrot.slane %v4451_v27, 4  ;;  %v5216_v2 = vsel %vm8925_vm5, %v5214_v56, %v5215_v28  ;;  %v5967_v23 = vunpack.c.l.b16 %v4447_v50  ;;  %v11010_v14 = vunpack.c.l.b16 %v4921_v37 }
 0x2a1   : > { %v3868_v11 = vsel %vm10313_vm14, %v3860_v20, %v3867_v1  ;;  %v4041_v59 = vsel %vm10211_vm3, %v3869_v8, %v4040_v5  ;;  %v3611_v24 = vpack.c.bf16 %v3457_v38, %v3457_v38  ;;  %v4080_v25 = vld [vmem:[#allocation2 + $0xb4] sm:$0xf]  ;;  %v5213_v61 = vsel %vm8925_vm5, %v8170_v63, %v5212_v13  ;;  %v11035_v38 = vld [vmem:[#allocation2 + $0x80] sm:$0x1] }
 0x2a2   : > { %4039 = vst.msk [vmem:[#allocation2 + $0xb8] sm:$0xf] %vm3459_vm1, %v3868_v11  ;;  %v3352_v18 = vpop.f32.mrf.mxu2  ;;  %v4457_v42 = vsel %vm8723_vm2, %v4452_v39, %v4456_v34  ;;  %v4459_v51 = vshrl.u32 %v4080_v25, 16  ;;  %v4462_v7 = vshll.u32 %v4080_v25, 16  ;;  %v5508_v57 = vshrl.u32 %v5283_v31, 16 }
 0x2a3   : > { %4042 = vst [vmem:[#allocation2 + $0xbc] sm:$0x1] %v4041_v59  ;;  %v3871_v58 = vshrl.u32 %v3611_v24, 16  ;;  %v3390_v9 = vmul.f32 %v8593_v43, %v3352_v18  ;;  %v5968_v48 = vunpack.c.l.b16 %v4457_v42  ;;  %v5511_v36 = vshll.u32 %v5283_v31, 16  ;;  %v4497_v33 = vld [vmem:[#allocation2 + $0xb4] sm:$0xe] }
 0x2a4   : > { %v3874_v49 = vshll.u32 %v3611_v24, 16  ;;  %v11018_v5 = vunpack.c.l.b16 %v4911_v15  ;;  %v6292_v43 = vunpack.c.l.b16 %v5216_v2  ;;  %v4461_v6 = vrot.slane %v4459_v51, 4 }
 0x2a5   : > { %v11016_v12 = vrot.slane %v3871_v58, 7  ;;  %v3426_v28 = vadd.f32 %v8594_v22, %v3390_v9  ;;  %v5985_v0 = vpack.c.b16 %v5968_v48, %v5967_v23  ;;  %v4464_v27 = vrot.slane %v4462_v7, 5  ;;  %v4047_v58 = vld [vmem:[#allocation2 + $0xc8] sm:$0x1] }
 0x2a6   : > { %v5517_v13 = vshll.u32 %v11014_v46, 16  ;;  %v5521_v63 = vshrl.u32 %v11014_v46, 16  ;;  %v5978_v22 = vpack.c.b16 %v10974_v19, %v10972_v62  ;;  %v6058_v20 = vpack.c.b16 %v6034_v55, %v6033_v4  ;;  %v11043_v62 = vld [vmem:[#allocation2 + $0x64] sm:$0xf] }
 0x2a7   : > { %v3876_v53 = vor.u32 %v3874_v49, %v11016_v12  ;;  %v3458_v56 = vmax.f32 %v3426_v28, 0.0  ;;  %6435 = vrot.lane.b32.xlu2 %v8551_v32, %s8620_s19  ;;  %6015 = vrot.lane.b32.xlu1 %v5985_v0, %s8617_s16  ;;  %v6235_v1 = vpack.c.b16 %v11010_v14, %v11018_v5  ;;  %v6291_v8 = vunpack.c.l.b16 %v5213_v61  ;;  %v4066_v28 = vld [vmem:[#allocation2 + $0x60] sm:$0xf] }
 0x2a8   : > { %6085 = vrot.lane.b32.xlu0 %v10614_v54, %s8618_s17  ;;  %v11039_v54 = vrot.slane %v5508_v57, 4  ;;  %v11041_v15 = vrot.slane %v5511_v36, 5  ;;  %v4465_v19 = vor.u32 %v4464_v27, %v4461_v6  ;;  %v11045_v59 = vrot.slane %v5517_v13, 5  ;;  %v11060_v6 = vld [vmem:[#allocation2 + $0x1c] sm:$0xf] }
 0x2a9   : > { %v4044_v50 = vsel %vm10287_vm10, %v3876_v53, %v4043_v44  ;;  %v3612_v39 = vpack.c.bf16 %v3458_v56, %v3458_v56  ;;  %v4081_v34 = vld [vmem:[#allocation2 + $0xb8] sm:$0xf]  ;;  %v6315_v35 = vpack.c.b16 %v6292_v43, %v6291_v8  ;;  %v5523_v24 = vrot.slane %v5521_v63, 4  ;;  %v4090_v56 = vld [vmem:[#allocation2 + $0x68] sm:$0x1]  ;;  %vm12541_vm10 = vmmov %vm12537_vm4 }
 0x2aa   : > { %4045 = vst [vmem:[#allocation2 + $0xc0] sm:$0xf] %v4044_v50  ;;  %v4097_v10 = vld [vmem:[#allocation2 + $0xbc] sm:$0x1]  ;;  %v4468_v4 = vshll.u32 %v4081_v34, 16  ;;  %v4472_v55 = vshrl.u32 %v4081_v34, 16  ;;  %v5514_v48 = vor.u32 %v11041_v15, %v11039_v54 }
 0x2ab   : > { %v3879_v11 = vshrl.u32 %v3612_v39, 16  ;;  %v5527_v16 = vshll.u32 %v11035_v38, 16  ;;  %v4478_v31 = vshll.u32 %v4097_v10, 16  ;;  %v5821_v18 = vrot.slane %v11014_v46, 5  ;;  %v5707_v53 = vld [vmem:[#allocation2 + $0x78] sm:$0xe] }
 0x2ac   : > { %v4470_v37 = vrot.slane %v4468_v4, 5  ;;  %v4474_v25 = vrot.slane %v4472_v55, 4  ;;  %v3882_v2 = vshll.u32 %v3612_v39, 16  ;;  %v4300_v51 = vshll.u32 %v11043_v62, 16  ;;  %v4490_v15 = vld [vmem:[#allocation2 + $0x60] sm:$0xe] }
 0x2ad   : > { %v3881_v42 = vrot.slane %v3879_v11, 7  ;;  %v4304_v7 = vshrl.u32 %v11043_v62, 16  ;;  %v4466_v9 = vrot.slane %v4465_v19, 4  ;;  %v4604_v61 = vrot.slane %v11043_v62, 5  ;;  %v11098_v5 = vld [vmem:[#allocation2 + $0x20] sm:$0x1] }
 0x2ae   : > { %v4475_v23 = vor.u32 %v4474_v25, %v4470_v37  ;;  %v3877_v57 = vrot.slane %v11016_v12, 4  ;;  %v5524_v46 = vor.u32 %v5523_v24, %v11045_v59  ;;  %v4480_v44 = vrot.slane %v4478_v31, 5 }
 0x2af   : > { %v3884_v36 = vor.u32 %v3882_v2, %v3881_v42  ;;  %v3886_v49 = vrot.slane %v3881_v42, 4  ;;  %6081 = vrot.lane.b32.xlu1 %v6058_v20, %s8618_s17  ;;  %v4471_v32 = vsel %vm8723_vm2, %v4466_v9, %v4470_v37  ;;  %v5823_v43 = vrot.slane %v5821_v18, 4 }
 0x2b0   : > { %6001 = vrot.lane.b32.xlu0 %v5978_v22, %s8617_s16  ;;  %v4476_v0 = vrot.slane %v4475_v23, 4  ;;  %v11066_v13 = vrot.slane %v4300_v51, 5  ;;  %v4306_v63 = vrot.slane %v4304_v7, 4  ;;  %v4606_v20 = vrot.slane %v4604_v61, 4 }
 0x2b1   : > { %v3885_v12 = vsel %vm10313_vm14, %v3877_v57, %v3884_v36  ;;  %v4048_v27 = vsel %vm10211_vm3, %v3886_v49, %v4047_v58  ;;  %v4291_v8 = vshrl.u32 %v4066_v28, 16  ;;  %v4294_v50 = vshll.u32 %v4066_v28, 16  ;;  %vm12542_vm14 = vmmov %vm12537_vm4 }
 0x2b2   : > { %4046 = vst.msk [vmem:[#allocation2 + $0xc4] sm:$0xf] %vm3459_vm1, %v3885_v12  ;;  %v4481_v22 = vsel %vm8723_vm2, %v4476_v0, %v4480_v44  ;;  %v5969_v39 = vunpack.c.l.b16 %v4471_v32  ;;  %v5525_v34 = vrot.slane %v5524_v46, 4  ;;  %v5824_v54 = vrot.slane %v11035_v38, 5  ;;  %v11107_v0 = vld [vmem:[#allocation2 + $0x7c] sm:$0xf]  ;;  %vm12545_vm1 = vmmov %vm12537_vm4 }
 0x2b3   : > { %4049 = vst [vmem:[#allocation2 + $0xc8] sm:$0x1] %v4048_v27  ;;  %v5970_v30 = vunpack.c.l.b16 %v4481_v22  ;;  %v5529_v62 = vrot.slane %v5527_v16, 5  ;;  %v4607_v10 = vrot.slane %v4090_v56, 5  ;;  %v5325_v19 = vshll.u32 %v11060_v6, 16  ;;  %v11110_v27 = vpop.permute.xlu2 %5987  ;;  %vm12548_vm4 = vmmov %vm12545_vm1 }
 0x2b4   : > { %v5329_v4 = vshrl.u32 %v11060_v6, 16  ;;  %v8186_v11 = vrot.slane %v5707_v53, 9  ;;  %v5825_v24 = vsel %vm8925_vm5, %v5823_v43, %v5824_v54  ;;  %v4307_v37 = vor.u32 %v4306_v63, %v11066_v13  ;;  %v8595_v43 = vld [vmem:[#allocation2 + $0x10] sm:$0xf]  ;;  %v4676_v22 = vld [vmem:[#allocation2 + $0x78] sm:$0xf]  ;;  %vm12554_vm7 = vmmov %vm12545_vm1 }
 0x2b5   : > { %v5986_v55 = vpack.c.b16 %v5970_v30, %v5969_v39  ;;  %v8154_v25 = vrot.slane %v4490_v15, 9  ;;  %v4608_v31 = vsel %vm8925_vm5, %v4606_v20, %v4607_v10  ;;  %v4293_v42 = vrot.slane %v4291_v8, 4 }
 0x2b6   : > { %v4296_v38 = vrot.slane %v4294_v50, 5  ;;  %v5515_v16 = vrot.slane %v5514_v48, 4  ;;  %v5530_v2 = vsel %vm8723_vm2, %v5525_v34, %v5529_v62  ;;  %v5822_v51 = vsel %vm8925_vm5, %v8186_v11, %v5821_v18 }
 0x2b7   : > { %6339 = vrot.lane.b32.xlu1 %v6315_v35, %s8621_s20  ;;  %6017 = vrot.lane.b32.xlu2 %v5986_v55, %s8617_s16  ;;  %v4310_v7 = vshll.u32 %v4090_v56, 16  ;;  %v6548_v58 = vunpack.c.l.b16 %v5825_v24  ;;  %v4605_v9 = vsel %vm8925_vm5, %v8154_v25, %v4604_v61  ;;  %v11091_v35 = vrot.slane %v5325_v19, 5 }
 0x2b8   : > { %6259 = vrot.lane.b32.xlu0 %v6235_v1, %s8622_s21  ;;  %v5331_v23 = vrot.slane %v5329_v4, 4  ;;  %v5520_v48 = vsel %vm8723_vm2, %v5515_v16, %v11045_v59  ;;  %v6036_v57 = vunpack.c.l.b16 %v4608_v31  ;;  %v4308_v36 = vrot.slane %v4307_v37, 4  ;;  %v8596_v4 = vld [vmem:[#allocation2 + $0x14] sm:$0x1] }
 0x2b9   : > { %v5321_v18 = vrot.slane %v5319_v52, 5  ;;  %v6468_v49 = vunpack.c.l.b16 %v5530_v2  ;;  %v6547_v46 = vunpack.c.l.b16 %v5822_v51  ;;  %v4297_v14 = vor.u32 %v4296_v38, %v4293_v42  ;;  %v5699_v2 = vld [vmem:[#allocation2 + $0x18] sm:$0xe] }
 0x2ba   : > { %v6035_v1 = vunpack.c.l.b16 %v4605_v9  ;;  %v12539_v61 = vor.u32 %v10586_v40, %v10574_v21  ;;  %v4729_v59 = vsel %vm8723_vm2, %v10696_v17, %v10677_v47  ;;  %v4312_v32 = vrot.slane %v4310_v7, 5  ;;  %v5090_v47 = vld [vmem:[#allocation2 + $0xc] sm:$0xe] }
 0x2bb   : > { %v6467_v45 = vunpack.c.l.b16 %v5520_v48  ;;  %v6571_v52 = vpack.c.b16 %v6548_v58, %v6547_v46  ;;  %v5332_v44 = vor.u32 %v5331_v23, %v11091_v35  ;;  %v5156_v12 = vrot.slane %v8595_v43, 5  ;;  %v8527_v9 = vld [vmem:[#allocation2 + $0xc] sm:$0xff]  ;;  %v11141_v23 = vld [vmem:[#allocation2 + $0x80] sm:$0x1]  ;;  %v4660_v48 = vld [vmem:[#allocation2 + $0x18] sm:$0xf] }
 0x2bc   : > { %v4714_v28 = vrot.slane %v12539_v61, 4  ;;  %v6059_v53 = vpack.c.b16 %v6036_v57, %v6035_v1  ;;  %v4313_v21 = vsel %vm8723_vm2, %v4308_v36, %v4312_v32  ;;  %v5322_v40 = vor.u32 %v5321_v18, %v10833_v41  ;;  %v5285_v18 = vld [vmem:[#allocation2 + $0x84] sm:$0xf] }
 0x2bd   : > { %v5335_v56 = vshll.u32 %v11098_v5, 16  ;;  %v6491_v17 = vpack.c.b16 %v6468_v49, %v6467_v45  ;;  %v4298_v63 = vrot.slane %v4297_v14, 4  ;;  %v4932_v20 = vshll.u32 %v11107_v0, 16  ;;  %v11146_v14 = vpop.permute.xlu2 %5993 }
 0x2be   : > { %v4936_v8 = vshrl.u32 %v11107_v0, 16  ;;  %v4719_v50 = vsel %vm8723_vm2, %v4714_v28, %v10666_v3  ;;  %v6196_v39 = vunpack.c.l.b16 %v4729_v59  ;;  %v5956_v30 = vunpack.c.l.b16 %v4313_v21 }
 0x2bf   : > { %6595 = vrot.lane.b32.xlu1 %v6571_v52, %s8623_s22  ;;  %6083 = vrot.lane.b32.xlu2 %v6059_v53, %s8618_s17  ;;  %v4303_v41 = vsel %vm8723_vm2, %v4298_v63, %v11066_v13  ;;  %v5333_v34 = vrot.slane %v5332_v44, 4  ;;  %v5158_v54 = vrot.slane %v5156_v12, 4  ;;  %v5323_v15 = vrot.slane %v5322_v40, 4  ;;  %v11132_v13 = vld [vmem:[#allocation2 + $0x88] sm:$0xf] }
 0x2c0   : > { %6515 = vrot.lane.b32.xlu0 %v6491_v17, %s8624_s23  ;;  %v5337_v62 = vrot.slane %v5335_v56, 5  ;;  %v8162_v10 = vrot.slane %v5090_v47, 9  ;;  %v4923_v19 = vshrl.u32 %v4676_v22, 16  ;;  %v5159_v55 = vrot.slane %v8596_v4, 5  ;;  %v11153_v44 = vld [vmem:[#allocation2 + $0x1c] sm:$0xf] }
 0x2c1   : > { %v4926_v11 = vshll.u32 %v4676_v22, 16  ;;  %v11127_v24 = vrot.slane %v4932_v20, 5  ;;  %v4938_v3 = vrot.slane %v4936_v8, 4  ;;  %v6195_v37 = vunpack.c.l.b16 %v4719_v50  ;;  %v8543_v50 = vld [vmem:[#allocation2 + $0x18] sm:$0xff] }
 0x2c2   : > { %v5955_v25 = vunpack.c.l.b16 %v4303_v41  ;;  %v5328_v31 = vsel %vm8723_vm2, %v5323_v15, %v11091_v35  ;;  %v5338_v42 = vsel %vm8723_vm2, %v5333_v34, %v5337_v62  ;;  %v5157_v38 = vsel %vm8925_vm5, %v8162_v10, %v5156_v12 }
 0x2c3   : > { %v5160_v16 = vsel %vm8925_vm5, %v5158_v54, %v5159_v55  ;;  %v5765_v51 = vrot.slane %v11060_v6, 5  ;;  %v6227_v7 = vpack.c.b16 %v6196_v39, %v6195_v37  ;;  %v4925_v35 = vrot.slane %v4923_v19, 4 }
 0x2c4   : > { %v5979_v58 = vpack.c.b16 %v5956_v30, %v5955_v25  ;;  %v4928_v57 = vrot.slane %v4926_v11, 5  ;;  %v4939_v36 = vor.u32 %v4938_v3, %v11127_v24  ;;  %v5541_v49 = vshll.u32 %v11132_v13, 16  ;;  %v11163_v30 = vld [vmem:[#allocation2 + $0x8c] sm:$0x1] }
 0x2c5   : > { %v5545_v46 = vshrl.u32 %v11132_v13, 16  ;;  %v6451_v6 = vunpack.c.l.b16 %v5328_v31  ;;  %v6452_v1 = vunpack.c.l.b16 %v5338_v42  ;;  %v6275_v61 = vunpack.c.l.b16 %v5157_v38  ;;  %v11169_v11 = vpop.permute.xlu2 %6005  ;;  %v11180_v38 = vld [vmem:[#allocation2 + $0x20] sm:$0x1] }
 0x2c6   : > { %v6276_v28 = vunpack.c.l.b16 %v5160_v16  ;;  %v4942_v59 = vshll.u32 %v11141_v23, 16  ;;  %v8178_v32 = vrot.slane %v5699_v2, 9  ;;  %v5767_v45 = vrot.slane %v5765_v51, 4 }
 0x2c7   : > { %6003 = vrot.lane.b32.xlu1 %v5979_v58, %s8617_s16  ;;  %6163 = vrot.lane.b32.xlu2 %v8527_v9, %s8619_s18  ;;  %v5768_v52 = vrot.slane %v11098_v5, 5  ;;  %v5532_v43 = vshrl.u32 %v5285_v18, 16  ;;  %v5535_v12 = vshll.u32 %v5285_v18, 16  ;;  %v4731_v53 = vshrl.u32 %v4660_v48, 16  ;;  %v5099_v18 = vld [vmem:[#allocation2 + $0x78] sm:$0xe] }
 0x2c8   : > { %6243 = vrot.lane.b32.xlu0 %v6227_v7, %s8622_s21  ;;  %v4734_v21 = vshll.u32 %v4660_v48, 16  ;;  %v4929_v40 = vor.u32 %v4928_v57, %v4925_v35  ;;  %v4940_v56 = vrot.slane %v4939_v36, 4  ;;  %v11155_v47 = vrot.slane %v5541_v49, 5  ;;  %v5269_v7 = vld [vmem:[#allocation2 + $0x24] sm:$0xf] }
 0x2c9   : > { %v5547_v17 = vrot.slane %v5545_v46, 4  ;;  %v6483_v63 = vpack.c.b16 %v6452_v1, %v6451_v6  ;;  %v4740_v22 = vshll.u32 %v11153_v44, 16  ;;  %v4744_v20 = vshrl.u32 %v11153_v44, 16  ;;  %v11184_v48 = vld [vmem:[#allocation2 + $0x28] sm:$0xf] }
 0x2ca   : > { %v6307_v8 = vpack.c.b16 %v6276_v28, %v6275_v61  ;;  %v4944_v39 = vrot.slane %v4942_v59, 5  ;;  %v5766_v5 = vsel %vm8925_vm5, %v8178_v32, %v5765_v51  ;;  %v5769_v41 = vsel %vm8925_vm5, %v5767_v45, %v5768_v52  ;;  %v8536_v59 = vld [vmem:[#allocation2 + $0x78] sm:$0xff] }
 0x2cb   : > { %v5534_v34 = vrot.slane %v5532_v43, 4  ;;  %v5537_v54 = vrot.slane %v5535_v12, 5  ;;  %v4733_v15 = vrot.slane %v4731_v53, 4  ;;  %v4736_v62 = vrot.slane %v4734_v21, 5 }
 0x2cc   : > { %v4930_v10 = vrot.slane %v4929_v40, 4  ;;  %v4945_v19 = vsel %vm8723_vm2, %v4940_v56, %v4944_v39  ;;  %v5548_v4 = vor.u32 %v5547_v17, %v11155_v47  ;;  %v5219_v55 = vrot.slane %v11107_v0, 5  ;;  %v11182_v0 = vpop.permute.xlu0 %5989 }
 0x2cd   : > { %v6532_v3 = vunpack.c.l.b16 %v5769_v41  ;;  %v11173_v37 = vrot.slane %v4740_v22, 5  ;;  %v4746_v25 = vrot.slane %v4744_v20, 4  ;;  %v5551_v42 = vshll.u32 %v11163_v30, 16  ;;  %v11204_v22 = vpop.permute.xlu2 %6071 }
 0x2ce   : > { %v4935_v31 = vsel %vm8723_vm2, %v4930_v10, %v11127_v24  ;;  %v6214_v16 = vunpack.c.l.b16 %v4945_v19  ;;  %v6531_v2 = vunpack.c.l.b16 %v5766_v5  ;;  %v5538_v51 = vor.u32 %v5537_v54, %v5534_v34 }
 0x2cf   : > { %6323 = vrot.lane.b32.xlu1 %v6307_v8, %s8621_s20  ;;  %6419 = vrot.lane.b32.xlu2 %v8543_v50, %s8620_s19  ;;  %v5549_v58 = vrot.slane %v5548_v4, 4  ;;  %v5221_v9 = vrot.slane %v5219_v55, 4  ;;  %v4737_v35 = vor.u32 %v4736_v62, %v4733_v15  ;;  %v6213_v57 = vunpack.c.l.b16 %v4935_v31  ;;  %v11210_v62 = vld [vmem:[#allocation2 + $0x88] sm:$0xf] }
 0x2d0   : > { %6499 = vrot.lane.b32.xlu0 %v6483_v63, %s8624_s23  ;;  %v6563_v36 = vpack.c.b16 %v6532_v3, %v6531_v2  ;;  %v4747_v24 = vor.u32 %v4746_v25, %v11173_v37  ;;  %v4750_v49 = vshll.u32 %v11180_v38, 16  ;;  %v5553_v46 = vrot.slane %v5551_v42, 5  ;;  %v8552_v42 = vld [vmem:[#allocation2 + $0x84] sm:$0xff] }
 0x2d1   : > { %v5222_v6 = vrot.slane %v11141_v23, 5  ;;  %v5340_v1 = vshrl.u32 %v5269_v7, 16  ;;  %v5343_v61 = vshll.u32 %v5269_v7, 16  ;;  %v6236_v28 = vpack.c.b16 %v6214_v16, %v6213_v57 }
 0x2d2   : > { %v5539_v32 = vrot.slane %v5538_v51, 4  ;;  %v5349_v45 = vshll.u32 %v11184_v48, 16  ;;  %v5353_v52 = vshrl.u32 %v11184_v48, 16  ;;  %v5554_v43 = vsel %vm8723_vm2, %v5549_v58, %v5553_v46 }
 0x2d3   : > { %v8171_v12 = vrot.slane %v5099_v18, 9  ;;  %v5223_v53 = vsel %vm8925_vm5, %v5221_v9, %v5222_v6  ;;  %v5828_v21 = vrot.slane %v11132_v13, 5  ;;  %v4748_v23 = vrot.slane %v4747_v24, 4  ;;  %v4678_v9 = vld [vmem:[#allocation2 + $0x84] sm:$0xf] }
 0x2d4   : > { %v5544_v40 = vsel %vm8723_vm2, %v5539_v32, %v11155_v47  ;;  %v5342_v17 = vrot.slane %v5340_v1, 4  ;;  %v5345_v63 = vrot.slane %v5343_v61, 5  ;;  %v6470_v13 = vunpack.c.l.b16 %v5554_v43  ;;  %v5708_v47 = vld [vmem:[#allocation2 + $0x84] sm:$0xe]  ;;  %v5091_v18 = vld [vmem:[#allocation2 + $0x18] sm:$0xe] }
 0x2d5   : > { %v5220_v56 = vsel %vm8925_vm5, %v8171_v12, %v5219_v55  ;;  %v6294_v8 = vunpack.c.l.b16 %v5223_v53  ;;  %v11208_v50 = vrot.slane %v5349_v45, 5  ;;  %v5355_v39 = vrot.slane %v5353_v52, 4  ;;  %v11218_v55 = vld [vmem:[#allocation2 + $0x2c] sm:$0x1]  ;;  %v8511_v53 = vld [vmem:[#allocation2] sm:$0xff] }
 0x2d6   : > { %v4738_v5 = vrot.slane %v4737_v35, 4  ;;  %v4752_v41 = vrot.slane %v4750_v49, 5  ;;  %v5830_v34 = vrot.slane %v5828_v21, 4  ;;  %v6469_v54 = vunpack.c.l.b16 %v5544_v40  ;;  %v11229_v35 = vpop.permute.xlu1 %5991 }
 0x2d7   : > { %6579 = vrot.lane.b32.xlu1 %v6563_v36, %s8623_s22  ;;  %6181 = vrot.lane.b32.xlu2 %v8536_v59, %s8619_s18  ;;  %v6293_v15 = vunpack.c.l.b16 %v5220_v56  ;;  %v5831_v4 = vrot.slane %v11163_v30, 5  ;;  %v5346_v3 = vor.u32 %v5345_v63, %v5342_v17  ;;  %v5356_v16 = vor.u32 %v5355_v39, %v11208_v50  ;;  %v11244_v56 = vld [vmem:[#allocation2 + $0x94] sm:$0xf]  ;;  %v8528_v63 = vld [vmem:[#allocation2 + $0x18] sm:$0xff] }
 0x2d8   : > { %6261 = vrot.lane.b32.xlu0 %v6236_v28, %s8622_s21  ;;  %v4743_v10 = vsel %vm8723_vm2, %v4738_v5, %v11173_v37  ;;  %v4753_v19 = vsel %vm8723_vm2, %v4748_v23, %v4752_v41  ;;  %v6492_v25 = vpack.c.b16 %v6470_v13, %v6469_v54  ;;  %v5163_v2 = vrot.slane %v11153_v44, 5  ;;  %v11253_v41 = vld [vmem:[#allocation2 + $0x8c] sm:$0x1]  ;;  %v5700_v54 = vld [vmem:[#allocation2 + $0x24] sm:$0xe] }
 0x2d9   : > { %v11206_v20 = vpop.permute.xlu0 %6007  ;;  %v6316_v31 = vpack.c.b16 %v6294_v8, %v6293_v15  ;;  %v8187_v51 = vrot.slane %v5708_v47, 9  ;;  %v5832_v7 = vsel %vm8925_vm5, %v5830_v34, %v5831_v4  ;;  %v4956_v37 = vshll.u32 %v11210_v62, 16  ;;  %v5287_v15 = vld [vmem:[#allocation2 + $0x90] sm:$0xf] }
 0x2da   : > { %v4960_v58 = vshrl.u32 %v11210_v62, 16  ;;  %v5359_v30 = vshll.u32 %v11218_v55, 16  ;;  %v6197_v44 = vunpack.c.l.b16 %v4743_v10  ;;  %v6198_v57 = vunpack.c.l.b16 %v4753_v19 }
 0x2db   : > { %v5829_v36 = vsel %vm8925_vm5, %v8187_v51, %v5828_v21  ;;  %v6550_v46 = vunpack.c.l.b16 %v5832_v7  ;;  %v5347_v6 = vrot.slane %v5346_v3, 4  ;;  %v5357_v1 = vrot.slane %v5356_v16, 4 }
 0x2dc   : > { %v5165_v61 = vrot.slane %v5163_v2, 4  ;;  %v4947_v28 = vshrl.u32 %v4678_v9, 16  ;;  %v4950_v59 = vshll.u32 %v4678_v9, 16  ;;  %v11238_v32 = vrot.slane %v4956_v37, 5  ;;  %v11266_v9 = vld [vmem:[#allocation2 + $0x28] sm:$0xf] }
 0x2dd   : > { %v4962_v45 = vrot.slane %v4960_v58, 4  ;;  %v6549_v52 = vunpack.c.l.b16 %v5829_v36  ;;  %v5361_v43 = vrot.slane %v5359_v30, 5  ;;  %v8163_v12 = vrot.slane %v5091_v18, 9 }
 0x2de   : > { %v6228_v23 = vpack.c.b16 %v6198_v57, %v6197_v44  ;;  %v5352_v21 = vsel %vm8723_vm2, %v5347_v6, %v11208_v50  ;;  %v5166_v40 = vrot.slane %v11180_v38, 5  ;;  %v5772_v39 = vrot.slane %v11184_v48, 5 }
 0x2df   : > { %6341 = vrot.lane.b32.xlu1 %v6316_v31, %s8621_s20  ;;  %6437 = vrot.lane.b32.xlu2 %v8552_v42, %s8620_s19  ;;  %v6572_v17 = vpack.c.b16 %v6550_v46, %v6549_v52  ;;  %v5362_v13 = vsel %vm8723_vm2, %v5357_v1, %v5361_v43  ;;  %v5164_v8 = vsel %vm8925_vm5, %v8163_v12, %v5163_v2  ;;  %v4949_v50 = vrot.slane %v4947_v28, 4  ;;  %v4662_v2 = vld [vmem:[#allocation2 + $0x24] sm:$0xf] }
 0x2e0   : > { %6517 = vrot.lane.b32.xlu0 %v6492_v25, %s8624_s23  ;;  %v5167_v5 = vsel %vm8925_vm5, %v5165_v61, %v5166_v40  ;;  %v4952_v34 = vrot.slane %v4950_v59, 5  ;;  %v4963_v38 = vor.u32 %v4962_v45, %v11238_v32  ;;  %v5565_v47 = vshll.u32 %v11244_v56, 16  ;;  %v8544_v59 = vld [vmem:[#allocation2 + $0x24] sm:$0xff] }
 0x2e1   : > { %v11234_v24 = vpop.permute.xlu2 %6011  ;;  %v11236_v49 = vpop.permute.xlu0 %5995  ;;  %v5569_v10 = vshrl.u32 %v11244_v56, 16  ;;  %v6613_v48 = vsel %vm2929_vm6, %v8511_v53, %v11110_v27  ;;  %v6453_v19 = vunpack.c.l.b16 %v5352_v21  ;;  %v6454_v4 = vunpack.c.l.b16 %v5362_v13 }
 0x2e2   : > { %v6277_v25 = vunpack.c.l.b16 %v5164_v8  ;;  %v6278_v31 = vunpack.c.l.b16 %v5167_v5  ;;  %v4966_v42 = vshll.u32 %v11253_v41, 16  ;;  %v8179_v16 = vrot.slane %v5700_v54, 9  ;;  %v11297_v54 = vld [vmem:[#allocation2 + $0x34] sm:$0xf] }
 0x2e3   : > { %v4953_v7 = vor.u32 %v4952_v34, %v4949_v50  ;;  %v4964_v37 = vrot.slane %v4963_v38, 4  ;;  %v5774_v58 = vrot.slane %v5772_v39, 4  ;;  %v5556_v30 = vshrl.u32 %v5287_v15, 16 }
 0x2e4   : > { %v5559_v57 = vshll.u32 %v5287_v15, 16  ;;  %v11273_v36 = vrot.slane %v5565_v47, 5  ;;  %v5571_v18 = vrot.slane %v5569_v10, 4  ;;  %v6484_v46 = vpack.c.b16 %v6454_v4, %v6453_v19 }
 0x2e5   : > { %v5775_v6 = vrot.slane %v11218_v55, 5  ;;  %v4755_v1 = vshrl.u32 %v4662_v2, 16  ;;  %v4758_v61 = vshll.u32 %v4662_v2, 16  ;;  %v6308_v28 = vpack.c.b16 %v6278_v31, %v6277_v25  ;;  %v5100_v25 = vld [vmem:[#allocation2 + $0x84] sm:$0xe] }
 0x2e6   : > { %v4968_v45 = vrot.slane %v4966_v42, 5  ;;  %v5773_v52 = vsel %vm8925_vm5, %v8179_v16, %v5772_v39  ;;  %v4764_v43 = vshll.u32 %v11266_v9, 16  ;;  %v4954_v12 = vrot.slane %v4953_v7, 4  ;;  %v5271_v39 = vld [vmem:[#allocation2 + $0x30] sm:$0xf] }
 0x2e7   : > { %6597 = vrot.lane.b32.xlu1 %v6572_v17, %s8623_s22  ;;  %6165 = vrot.lane.b32.xlu2 %v8528_v63, %s8619_s18  ;;  %v5776_v53 = vsel %vm8925_vm5, %v5774_v58, %v5775_v6  ;;  %v5226_v21 = vrot.slane %v11210_v62, 5  ;;  %v4768_v55 = vshrl.u32 %v11266_v9, 16  ;;  %v5558_v17 = vrot.slane %v5556_v30, 4  ;;  %v8537_v30 = vld [vmem:[#allocation2 + $0x84] sm:$0xff] }
 0x2e8   : > { %6245 = vrot.lane.b32.xlu0 %v6228_v23, %s8622_s21  ;;  %v11281_v23 = vld [vmem:[#allocation2 + $0x98] sm:$0x1]  ;;  %v4969_v40 = vsel %vm8723_vm2, %v4964_v37, %v4968_v45  ;;  %v5561_v63 = vrot.slane %v5559_v57, 5  ;;  %v5572_v13 = vor.u32 %v5571_v18, %v11273_v36  ;;  %v4757_v8 = vrot.slane %v4755_v1, 4 }
 0x2e9   : > { %v11263_v3 = vpop.permute.xlu1 %6009  ;;  %v6068_v51 = vpop.permute.xlu0 %6067  ;;  %v4959_v62 = vsel %vm8723_vm2, %v4954_v12, %v11238_v32  ;;  %v6534_v50 = vunpack.c.l.b16 %v5776_v53  ;;  %v5575_v34 = vshll.u32 %v11281_v23, 16  ;;  %v4760_v38 = vrot.slane %v4758_v61, 5  ;;  %v11302_v32 = vld [vmem:[#allocation2 + $0x2c] sm:$0x1] }
 0x2ea   : > { %v11268_v27 = vpop.permute.xlu2 %6077  ;;  %v11271_v44 = vsel %vm12541_vm10, %v6613_v48, %v6068_v51  ;;  %v6216_v15 = vunpack.c.l.b16 %v4969_v40  ;;  %v6533_v47 = vunpack.c.l.b16 %v5773_v52  ;;  %v5228_v10 = vrot.slane %v5226_v21, 4 }
 0x2eb   : > { %12540 = vst [vmem:[#allocation9_spill] sm:$0xff] %v11268_v27  ;;  %v11299_v48 = vrot.slane %v4764_v43, 5  ;;  %v5562_v19 = vor.u32 %v5561_v63, %v5558_v17  ;;  %v5573_v4 = vrot.slane %v5572_v13, 4  ;;  %v4770_v31 = vrot.slane %v4768_v55, 4  ;;  %v8513_v27 = vld [vmem:[#allocation2 + $0x18] sm:$0xff] }
 0x2ec   : > { %v5364_v42 = vshrl.u32 %v5271_v39, 16  ;;  %v6215_v16 = vunpack.c.l.b16 %v4959_v62  ;;  %v5229_v2 = vrot.slane %v11253_v41, 5  ;;  %v5373_v51 = vshll.u32 %v11297_v54, 16 }
 0x2ed   : > { %v5377_v7 = vshrl.u32 %v11297_v54, 16  ;;  %v6564_v58 = vpack.c.b16 %v6534_v50, %v6533_v47  ;;  %v5577_v57 = vrot.slane %v5575_v34, 5  ;;  %v4761_v18 = vor.u32 %v4760_v38, %v4757_v8  ;;  %v5709_v38 = vld [vmem:[#allocation2 + $0x90] sm:$0xe] }
 0x2ee   : > { %v6237_v6 = vpack.c.b16 %v6216_v15, %v6215_v16  ;;  %v8172_v1 = vrot.slane %v5100_v25, 9  ;;  %v5230_v61 = vsel %vm8925_vm5, %v5228_v10, %v5229_v2  ;;  %v5835_v41 = vrot.slane %v11244_v56, 5  ;;  %v11330_v15 = vld [vmem:[#allocation2 + $0x38] sm:$0x1] }
 0x2ef   : > { %6325 = vrot.lane.b32.xlu1 %v6308_v28, %s8621_s20  ;;  %6421 = vrot.lane.b32.xlu2 %v8544_v59, %s8620_s19  ;;  %v8515_v28 = vld [vmem:[#allocation2 + $0x30] sm:$0xff]  ;;  %v5563_v59 = vrot.slane %v5562_v19, 4  ;;  %v5578_v45 = vsel %vm8723_vm2, %v5573_v4, %v5577_v57  ;;  %v4771_v52 = vor.u32 %v4770_v31, %v11299_v48  ;;  %v4774_v43 = vshll.u32 %v11302_v32, 16 }
 0x2f0   : > { %6501 = vrot.lane.b32.xlu0 %v6484_v46, %s8624_s23  ;;  %v5367_v46 = vshll.u32 %v5271_v39, 16  ;;  %v5227_v12 = vsel %vm8925_vm5, %v8172_v1, %v5226_v21  ;;  %v5366_v53 = vrot.slane %v5364_v42, 4  ;;  %v11320_v56 = vrot.slane %v5373_v51, 5  ;;  %v8553_v4 = vld [vmem:[#allocation2 + $0x90] sm:$0xff] }
 0x2f1   : > { %v11291_v5 = vpop.permute.xlu1 %6069  ;;  %v5379_v55 = vrot.slane %v5377_v7, 4  ;;  %v6625_v40 = vsel %vm2929_vm6, %v8515_v28, %v11236_v49  ;;  %v5568_v63 = vsel %vm8723_vm2, %v5563_v59, %v11273_v36  ;;  %v6296_v13 = vunpack.c.l.b16 %v5230_v61  ;;  %v11352_v28 = vpop.permute.xlu0 %6073 }
 0x2f2   : > { %v11306_v37 = vpop.permute.xlu2 %6179  ;;  %v5369_v8 = vrot.slane %v5367_v46, 5  ;;  %v6472_v62 = vunpack.c.l.b16 %v5578_v45  ;;  %v5837_v50 = vrot.slane %v5835_v41, 4  ;;  %v6295_v21 = vunpack.c.l.b16 %v5227_v12 }
 0x2f3   : > { %v4772_v34 = vrot.slane %v4771_v52, 4  ;;  %v6471_v47 = vunpack.c.l.b16 %v5568_v63  ;;  %v5838_v49 = vrot.slane %v11281_v23, 5  ;;  %v5380_v10 = vor.u32 %v5379_v55, %v11320_v56 }
 0x2f4   : > { %v5170_v19 = vrot.slane %v11266_v9, 5  ;;  %v6317_v36 = vpack.c.b16 %v6296_v13, %v6295_v21  ;;  %v4762_v25 = vrot.slane %v4761_v18, 4  ;;  %v4776_v31 = vrot.slane %v4774_v43, 5  ;;  %v5092_v18 = vld [vmem:[#allocation2 + $0x24] sm:$0xe] }
 0x2f5   : > { %v5370_v42 = vor.u32 %v5369_v8, %v5366_v53  ;;  %v6493_v16 = vpack.c.b16 %v6472_v62, %v6471_v47  ;;  %v8188_v2 = vrot.slane %v5709_v38, 9  ;;  %v5839_v51 = vsel %vm8925_vm5, %v5837_v50, %v5838_v49  ;;  %v11355_v43 = vld [vmem:[#allocation2 + $0x94] sm:$0xf]  ;;  %v8597_v13 = vld [vmem:[#allocation2 + $0x88] sm:$0xf] }
 0x2f6   : > { %v5383_v7 = vshll.u32 %v11330_v15, 16  ;;  %v4777_v9 = vsel %vm8723_vm2, %v4772_v34, %v4776_v31  ;;  %v4767_v23 = vsel %vm8723_vm2, %v4762_v25, %v11299_v48  ;;  %v5381_v57 = vrot.slane %v5380_v10, 4  ;;  %v8529_v62 = vld [vmem:[#allocation2 + $0x24] sm:$0xff]  ;;  %v8521_v34 = vld [vmem:[#allocation2 + $0x78] sm:$0xff]  ;;  %v4680_v47 = vld [vmem:[#allocation2 + $0x90] sm:$0xf] }
 0x2f7   : > { %6581 = vrot.lane.b32.xlu1 %v6564_v58, %s8623_s22  ;;  %6183 = vrot.lane.b32.xlu2 %v8537_v30, %s8619_s18  ;;  %v5836_v30 = vsel %vm8925_vm5, %v8188_v2, %v5835_v41  ;;  %v5172_v46 = vrot.slane %v5170_v19, 4  ;;  %v6552_v1 = vunpack.c.l.b16 %v5839_v51  ;;  %v5371_v61 = vrot.slane %v5370_v42, 4  ;;  %v11374_v42 = vld [vmem:[#allocation2 + $0x34] sm:$0xf]  ;;  %v4493_v51 = vld [vmem:[#allocation2 + $0x84] sm:$0xe] }
 0x2f8   : > { %6263 = vrot.lane.b32.xlu0 %v6237_v6, %s8622_s21  ;;  %v6200_v59 = vunpack.c.l.b16 %v4777_v9  ;;  %v5385_v45 = vrot.slane %v5383_v7, 5  ;;  %v5173_v52 = vrot.slane %v11302_v32, 5  ;;  %v6199_v12 = vunpack.c.l.b16 %v4767_v23 }
 0x2f9   : > { %v6076_v17 = vpop.permute.xlu1 %6075  ;;  %v6551_v48 = vunpack.c.l.b16 %v5836_v30  ;;  %v5376_v41 = vsel %vm8723_vm2, %v5371_v61, %v11320_v56  ;;  %v8164_v53 = vrot.slane %v5092_v18, 9  ;;  %v5779_v63 = vrot.slane %v11297_v54, 5 }
 0x2fa   : > { %v11328_v39 = vsel %vm12542_vm14, %v6625_v40, %v6076_v17  ;;  %v11338_v58 = vpop.permute.xlu2 %5999  ;;  %v5386_v55 = vsel %vm8723_vm2, %v5381_v57, %v5385_v45  ;;  %v5174_v40 = vsel %vm8925_vm5, %v5172_v46, %v5173_v52  ;;  %v5701_v17 = vld [vmem:[#allocation2 + $0x30] sm:$0xe]  ;;  %v4625_v32 = vrot.slane %v8597_v13, 5  ;;  %v8598_v57 = vld [vmem:[#allocation2 + $0x8c] sm:$0x1] }
 0x2fb   : > { %12543 = vst [vmem:[#allocation14_spill] sm:$0xff] %v11328_v39  ;;  %v6573_v8 = vpack.c.b16 %v6552_v1, %v6551_v48  ;;  %v5171_v50 = vsel %vm8925_vm5, %v8164_v53, %v5170_v19  ;;  %v4980_v21 = vshll.u32 %v11355_v43, 16  ;;  %v4984_v56 = vshrl.u32 %v11355_v43, 16  ;;  %v11388_v52 = vld [vmem:[#allocation2 + $0xa0] sm:$0xf] }
 0x2fc   : > { %v6229_v38 = vpack.c.b16 %v6200_v59, %v6199_v12  ;;  %v6455_v49 = vunpack.c.l.b16 %v5376_v41  ;;  %v6456_v54 = vunpack.c.l.b16 %v5386_v55  ;;  %v6280_v10 = vunpack.c.l.b16 %v5174_v40  ;;  %v4701_v53 = vld [vmem:[#allocation2 + $0x98] sm:$0x1]  ;;  %v11394_v55 = vld [vmem:[#allocation2 + $0x30] sm:$0xf] }
 0x2fd   : > { %v6279_v19 = vunpack.c.l.b16 %v5171_v50  ;;  %v5781_v25 = vrot.slane %v5779_v63, 4  ;;  %v4627_v31 = vrot.slane %v4625_v32, 4  ;;  %v4971_v7 = vshrl.u32 %v4680_v47, 16 }
 0x2fe   : > { %v4974_v9 = vshll.u32 %v4680_v47, 16  ;;  %v11378_v23 = vrot.slane %v4980_v21, 5  ;;  %v4986_v30 = vrot.slane %v4984_v56, 4  ;;  %v4628_v18 = vrot.slane %v8598_v57, 5  ;;  %v5289_v47 = vld [vmem:[#allocation2 + $0x9c] sm:$0xf] }
 0x2ff   : > { %6343 = vrot.lane.b32.xlu1 %v6317_v36, %s8621_s20  ;;  %6439 = vrot.lane.b32.xlu2 %v8553_v4, %s8620_s19  ;;  %v8180_v36 = vrot.slane %v5701_v17, 9  ;;  %v6643_v4 = vsel %vm2929_vm6, %v8521_v34, %v11206_v20  ;;  %v5782_v1 = vrot.slane %v11330_v15, 5  ;;  %v6485_v61 = vpack.c.b16 %v6456_v54, %v6455_v49  ;;  %v8545_v15 = vld [vmem:[#allocation2 + $0x30] sm:$0xff] }
 0x300   : > { %6519 = vrot.lane.b32.xlu0 %v6493_v16, %s8624_s23  ;;  %v6309_v59 = vpack.c.b16 %v6280_v10, %v6279_v19  ;;  %v8157_v48 = vrot.slane %v4493_v51, 9  ;;  %v4629_v41 = vsel %vm8925_vm5, %v4627_v31, %v4628_v18  ;;  %v4788_v40 = vshll.u32 %v11374_v42, 16  ;;  %v5101_v51 = vld [vmem:[#allocation2 + $0x90] sm:$0xe] }
 0x301   : > { %v11350_v6 = vpop.permute.xlu1 %5997  ;;  %v5780_v45 = vsel %vm8925_vm5, %v8180_v36, %v5779_v63  ;;  %v5783_v12 = vsel %vm8925_vm5, %v5781_v25, %v5782_v1  ;;  %v4973_v17 = vrot.slane %v4971_v7, 4  ;;  %v4976_v13 = vrot.slane %v4974_v9, 5 }
 0x302   : > { %12544 = vst [vmem:[#allocation4_spill] sm:$0xff] %v11350_v6  ;;  %v11376_v16 = vpop.permute.xlu2 %6435  ;;  %v5233_v63 = vrot.slane %v11355_v43, 5  ;;  %v6535_v50 = vunpack.c.l.b16 %v5780_v45  ;;  %v4626_v21 = vsel %vm8925_vm5, %v8157_v48, %v4625_v32  ;;  %v5589_v56 = vshll.u32 %v11388_v52, 16 }
 0x303   : > { %v5593_v34 = vshrl.u32 %v11388_v52, 16  ;;  %v4779_v49 = vshrl.u32 %v11394_v55, 16  ;;  %v4782_v54 = vshll.u32 %v11394_v55, 16  ;;  %v4792_v43 = vshrl.u32 %v11374_v42, 16 }
 0x304   : > { %v6536_v32 = vunpack.c.l.b16 %v5783_v12  ;;  %v6042_v36 = vunpack.c.l.b16 %v4629_v41  ;;  %v6041_v25 = vunpack.c.l.b16 %v4626_v21  ;;  %v4977_v31 = vor.u32 %v4976_v13, %v4973_v17 }
 0x305   : > { %v5235_v7 = vrot.slane %v5233_v63, 4  ;;  %v5583_v57 = vshll.u32 %v5289_v47, 16  ;;  %v11415_v18 = vrot.slane %v5589_v56, 5  ;;  %v5595_v1 = vrot.slane %v5593_v34, 4  ;;  %v8538_v56 = vld [vmem:[#allocation2 + $0x90] sm:$0xff] }
 0x306   : > { %v5236_v45 = vrot.slane %v4701_v53, 5  ;;  %v6565_v48 = vpack.c.b16 %v6536_v32, %v6535_v50  ;;  %v6062_v41 = vpack.c.b16 %v6042_v36, %v6041_v25  ;;  %v8173_v55 = vrot.slane %v5101_v51, 9 }
 0x307   : > { %6599 = vrot.lane.b32.xlu1 %v6573_v8, %s8623_s22  ;;  %6167 = vrot.lane.b32.xlu2 %v8529_v62, %s8619_s18  ;;  %v4987_v8 = vor.u32 %v4986_v30, %v11378_v23  ;;  %v8517_v62 = vld [vmem:[#allocation2 + $0x48] sm:$0xff]  ;;  %v5580_v30 = vshrl.u32 %v5289_v47, 16  ;;  %v4978_v17 = vrot.slane %v4977_v31, 4  ;;  %v5842_v50 = vrot.slane %v11388_v52, 5  ;;  %v5273_v52 = vld [vmem:[#allocation2 + $0x3c] sm:$0xf] }
 0x308   : > { %6247 = vrot.lane.b32.xlu0 %v6229_v38, %s8622_s21  ;;  %v4990_v38 = vshll.u32 %v4701_v53, 16  ;;  %v6631_v10 = vsel %vm2929_vm6, %v8517_v62, %v11338_v58  ;;  %v6887_v58 = vld [vmem:[%s12474_s4 + $0x10] sm:$0x3]  ;;  %v5310_v62 = vld [vmem:[#allocation2 + $0xa4] sm:$0x1]  ;;  %v5596_v53 = vor.u32 %v5595_v1, %v11415_v18  ;;  %v5234_v32 = vsel %vm8925_vm5, %v8173_v55, %v5233_v63 }
 0x309   : > { %v6088_v2 = vpop.permute.xlu1 %6087  ;;  %v6897_v12 = vunpack.c.l.b16 %v6887_v58  ;;  %v5582_v34 = vrot.slane %v5580_v30, 4  ;;  %v5599_v36 = vshll.u32 %v5310_v62, 16  ;;  %v4781_v25 = vrot.slane %v4779_v49, 4  ;;  %v5093_v49 = vld [vmem:[#allocation2 + $0x30] sm:$0xe] }
 0x30a   : > { %v11381_v20 = vsel %vm12545_vm1, %v6643_v4, %v6088_v2  ;;  %v11383_v46 = vpop.permute.xlu0 %6013  ;;  %v11411_v4 = vrot.slane %v4788_v40, 5  ;;  %v4988_v2 = vrot.slane %v4987_v8, 4  ;;  %v11423_v40 = vld [vmem:[#allocation2 + $0x38] sm:$0x1]  ;;  %v5237_v8 = vsel %vm8925_vm5, %v5235_v7, %v5236_v45 }
 0x30b   : > { %12546 = vst [vmem:[#allocation5_spill] sm:$0xff] %v11383_v46  ;;  %v6900_v21 = vpack.c.b16 %v6897_v12, %v6897_v12  ;;  %v4798_v47 = vshll.u32 %v11423_v40, 16  ;;  %v6298_v7 = vunpack.c.l.b16 %v5237_v8  ;;  %v5597_v63 = vrot.slane %v5596_v53, 4  ;;  %v5102_v46 = vld [vmem:[#allocation2 + $0x9c] sm:$0xe] }
 0x30c   : > { %v5844_v58 = vrot.slane %v5842_v50, 4  ;;  %v6297_v12 = vunpack.c.l.b16 %v5234_v32  ;;  %v5391_v55 = vshll.u32 %v5273_v52, 16  ;;  %vm12555_vm10 = vcmask 130048  }
 0x30d   : > { %vm12556_vm14 = vcmask 261120   ;;  %vm12557_vm1 = vmmov %vm12555_vm10 }
 0x30f   : > { %6327 = vrot.lane.b32.xlu1 %v6309_v59, %s8621_s20  ;;  %6423 = vrot.lane.b32.xlu2 %v8545_v15, %s8620_s19  ;;  %v4992_v59 = vrot.slane %v4990_v38, 5  ;;  %v4794_v15 = vrot.slane %v4792_v43, 4  ;;  %v5585_v38 = vrot.slane %v5583_v57, 5  ;;  %v6936_v43 = vsel %vm12550_vm0, %v6900_v21, 0  ;;  %v11446_v57 = vld [vmem:[#allocation2 + $0x40] sm:$0xf]  ;;  %vm12559_vm0 = vmmov %vm12554_vm7 }
 0x310   : > { %6503 = vrot.lane.b32.xlu0 %v6485_v61, %s8624_s23  ;;  %8564 = vmatpush.bf16.msra.mxu3 %v6936_v43  ;;  %v6318_v21 = vpack.c.b16 %v6298_v7, %v6297_v12 }
 0x311   : > { %v11413_v19 = vpop.permute.xlu2 %6017  ;;  %v4993_v13 = vsel %vm8723_vm2, %v4988_v2, %v4992_v59  ;;  %v4795_v30 = vor.u32 %v4794_v15, %v11411_v4  ;;  %6943 = vmatpush.bf16.msra.mxu1 %v6936_v43  ;;  %v5586_v1 = vor.u32 %v5585_v38, %v5582_v34  ;;  %v5177_v59 = vrot.slane %v11374_v42, 5  ;;  %v8560_v38 = vld [vmem:[%s12474_s4 + $0x8] sm:$0xff]  ;;  %v8554_v42 = vld [vmem:[#allocation2 + $0x9c] sm:$0xff] }
 0x312   : > { %12547 = vst [vmem:[#allocation6_spill] sm:$0xff] %v11413_v19  ;;  %v6080_v9 = vpop.permute.xlu0 %6079  ;;  %v6218_v51 = vunpack.c.l.b16 %v4993_v13  ;;  %v5397_v15 = vshll.u32 %v11446_v57, 16  ;;  %v5401_v13 = vshrl.u32 %v11446_v57, 16  ;;  %v8165_v34 = vrot.slane %v5093_v49, 9 }
 0x313   : > { %v11421_v61 = vsel %vm12548_vm4, %v6631_v10, %v6080_v9  ;;  %v4983_v10 = vsel %vm8723_vm2, %v4978_v17, %v11378_v23  ;;  %v4784_v9 = vrot.slane %v4782_v54, 5  ;;  %v5601_v17 = vrot.slane %v5599_v36, 5  ;;  %vm12558_vm4 = vmmov %vm12556_vm14 }
 0x314   : > { %12549 = vst [vmem:[#allocation8_spill] sm:$0xff] %v11421_v61  ;;  %v6217_v45 = vunpack.c.l.b16 %v4983_v10  ;;  %v5845_v54 = vrot.slane %v5310_v62, 5  ;;  %v5587_v53 = vrot.slane %v5586_v1, 4  ;;  %v4796_v32 = vrot.slane %v4795_v30, 4  ;;  %8565 = vmatpush.bf16.msra.mxu3 %v8560_v38  ;;  %v8559_v30 = vld [vmem:[%s12474_s4] sm:$0xff] }
 0x315   : > { %v5602_v43 = vsel %vm8723_vm2, %v5597_v63, %v5601_v17  ;;  %v5179_v36 = vrot.slane %v5177_v59, 4  ;;  %v11468_v1 = vrot.slane %v5397_v15, 5  ;;  %v5403_v63 = vrot.slane %v5401_v13, 4  ;;  %6944 = vmatpush.bf16.msra.mxu1 %v8560_v38 }
 0x316   : > { %v6238_v8 = vpack.c.b16 %v6218_v51, %v6217_v45  ;;  %v5846_v62 = vsel %vm8925_vm5, %v5844_v58, %v5845_v54  ;;  %v8512_v51 = vld [vmem:[#allocation2 + $0xc] sm:$0xff]  ;;  %v5592_v7 = vsel %vm8723_vm2, %v5587_v53, %v11415_v18  ;;  %v6474_v45 = vunpack.c.l.b16 %v5602_v43  ;;  %v11486_v54 = vld [vmem:[#allocation2 + $0xa0] sm:$0xf] }
 0x317   : > { %6583 = vrot.lane.b32.xlu1 %v6565_v48, %s8623_s22  ;;  %6089 = vrot.lane.b32.xlu2 %v6062_v41, %s8618_s17  ;;  %v5710_v48 = vld [vmem:[#allocation2 + $0x9c] sm:$0xe]  ;;  %v5388_v41 = vshrl.u32 %v5273_v52, 16  ;;  %v5393_v52 = vrot.slane %v5391_v55, 5  ;;  %v6554_v12 = vunpack.c.l.b16 %v5846_v62  ;;  %v11479_v18 = vsel %vm2929_vm6, %v8512_v51, %v11182_v0  ;;  %v5302_v0 = vld [vmem:[#allocation2 + $0x44] sm:$0x1] }
 0x318   : > { %6185 = vrot.lane.b32.xlu0 %v8538_v56, %s8619_s18  ;;  %v4785_v56 = vor.u32 %v4784_v9, %v4781_v25  ;;  %v8189_v10 = vrot.slane %v5710_v48, 9  ;;  %v5178_v55 = vsel %vm8925_vm5, %v8165_v34, %v5177_v59  ;;  %v5180_v17 = vrot.slane %v11423_v40, 5  ;;  %8566 = vmatpush.bf16.msra.mxu3 %v8559_v30  ;;  %v8530_v62 = vld [vmem:[#allocation2 + $0x30] sm:$0xff]  ;;  %v4682_v51 = vld [vmem:[#allocation2 + $0x9c] sm:$0xf] }
 0x319   : > { %v11441_v31 = vpop.permute.xlu1 %6015  ;;  %v11443_v2 = vpop.permute.xlu2 %6083  ;;  %v5390_v25 = vrot.slane %v5388_v41, 4  ;;  %v4800_v41 = vrot.slane %v4798_v47, 5  ;;  %v6473_v15 = vunpack.c.l.b16 %v5592_v7  ;;  %v5404_v40 = vor.u32 %v5403_v63, %v11468_v1  ;;  %6945 = vmatpush.bf16.msra.mxu1 %v8559_v30 }
 0x31a   : > { %12551 = vst [vmem:[#allocation11_spill] sm:$0xff] %v11441_v31  ;;  %v11448_v23 = vpop.permute.xlu0 %6085  ;;  %v5843_v9 = vsel %vm8925_vm5, %v8189_v10, %v5842_v50  ;;  %v4786_v48 = vrot.slane %v4785_v56, 4  ;;  %v8514_v56 = vld [vmem:[#allocation2 + $0x24] sm:$0xff]  ;;  %v5181_v38 = vsel %vm8925_vm5, %v5179_v36, %v5180_v17  ;;  %v5786_v34 = vrot.slane %v11446_v57, 5 }
 0x31b   : > { %v6553_v13 = vunpack.c.l.b16 %v5843_v9  ;;  %v5394_v59 = vor.u32 %v5393_v52, %v5390_v25  ;;  %v5004_v43 = vshll.u32 %v11486_v54, 16  ;;  %v11501_v10 = vsel %vm2929_vm6, %v8514_v56, %v11146_v14 }
 0x31c   : > { %v4791_v47 = vsel %vm8723_vm2, %v4786_v48, %v11411_v4  ;;  %v5008_v4 = vshrl.u32 %v11486_v54, 16  ;;  %v5407_v25 = vshll.u32 %v5302_v0, 16  ;;  %v6281_v9 = vunpack.c.l.b16 %v5178_v55  ;;  %v11508_v48 = vld [vmem:[#allocation2 + $0x3c] sm:$0xf] }
 0x31d   : > { %v6574_v53 = vpack.c.b16 %v6554_v12, %v6553_v13  ;;  %v6201_v57 = vunpack.c.l.b16 %v4791_v47  ;;  %v6282_v63 = vunpack.c.l.b16 %v5181_v38  ;;  %v5395_v30 = vrot.slane %v5394_v59, 4 }
 0x31e   : > { %v5788_v12 = vrot.slane %v5786_v34, 4  ;;  %v4998_v13 = vshll.u32 %v4682_v51, 16  ;;  %v11514_v47 = vrot.slane %v5004_v43, 5  ;;  %v5010_v55 = vrot.slane %v5008_v4, 4 }
 0x31f   : > { %6265 = vrot.lane.b32.xlu1 %v6238_v8, %s8622_s21  ;;  %6345 = vrot.lane.b32.xlu2 %v6318_v21, %s8621_s20  ;;  %v4801_v8 = vsel %vm8723_vm2, %v4796_v32, %v4800_v41  ;;  %v5702_v21 = vld [vmem:[#allocation2 + $0x3c] sm:$0xe]  ;;  %v8599_v32 = vld [vmem:[#allocation2 + $0x94] sm:$0xf]  ;;  %v4803_v43 = vshrl.u32 %v11508_v48, 16 }
 0x320   : > { %6441 = vrot.lane.b32.xlu0 %v8554_v42, %s8620_s19  ;;  %v6494_v42 = vpack.c.b16 %v6474_v45, %v6473_v15  ;;  %v4632_v36 = vrot.slane %v8599_v32, 5  ;;  %v8181_v52 = vrot.slane %v5702_v21, 9  ;;  %v6202_v7 = vunpack.c.l.b16 %v4801_v8  ;;  %v11516_v8 = vld [vmem:[#allocation2 + $0x40] sm:$0xf]  ;;  %v8600_v21 = vld [vmem:[#allocation2 + $0x98] sm:$0x1] }
 0x321   : > { %v11473_v58 = vpop.permute.xlu1 %6081  ;;  %v11475_v49 = vpop.permute.xlu2 %6163  ;;  %v5405_v45 = vrot.slane %v5404_v40, 4  ;;  %v4995_v15 = vshrl.u32 %v4682_v51, 16  ;;  %v4635_v56 = vrot.slane %v8600_v21, 5  ;;  %v5409_v40 = vrot.slane %v5407_v25, 5  ;;  %v4702_v25 = vld [vmem:[#allocation2 + $0xa4] sm:$0x1] }
 0x322   : > { %12552 = vst [vmem:[#allocation13_spill] sm:$0xff] %v11473_v58  ;;  %v11481_v50 = vpop.permute.xlu0 %6001  ;;  %v5787_v14 = vsel %vm8925_vm5, %v8181_v52, %v5786_v34  ;;  %v4634_v59 = vrot.slane %v4632_v36, 4  ;;  %v5789_v34 = vrot.slane %v5302_v0, 5  ;;  %v5400_v32 = vsel %vm8723_vm2, %v5395_v30, %v11468_v1  ;;  %v11523_v52 = vld [vmem:[#allocation2 + $0xac] sm:$0xf] }
 0x323   : > { %12553 = vst [vmem:[#allocation3_spill] sm:$0xff] %v11481_v50  ;;  %v5410_v4 = vsel %vm8723_vm2, %v5405_v45, %v5409_v40  ;;  %v6537_v21 = vunpack.c.l.b16 %v5787_v14  ;;  %v4812_v0 = vshll.u32 %v11516_v8, 16  ;;  %v4816_v1 = vshrl.u32 %v11516_v8, 16 }
 0x324   : > { %v5790_v51 = vsel %vm8925_vm5, %v5788_v12, %v5789_v34  ;;  %v4636_v58 = vsel %vm8925_vm5, %v4634_v59, %v4635_v56  ;;  %v5613_v45 = vshll.u32 %v11523_v52, 16  ;;  %v5617_v40 = vshrl.u32 %v11523_v52, 16 }
 0x325   : > { %v6457_v14 = vunpack.c.l.b16 %v5400_v32  ;;  %v6458_v12 = vunpack.c.l.b16 %v5410_v4  ;;  %v5014_v56 = vshll.u32 %v4702_v25, 16  ;;  %v4806_v59 = vshll.u32 %v11508_v48, 16 }
 0x326   : > { %v11552_v61 = vrot.slane %v5613_v45, 5  ;;  %v11559_v45 = vld [vmem:[#allocation2 + $0x44] sm:$0x1] }
 0x327   : > { %6521 = vrot.lane.b32.xlu1 %v6494_v42, %s8624_s23  ;;  %6601 = vrot.lane.b32.xlu2 %v6574_v53, %s8623_s22  ;;  %v6230_v42 = vpack.c.b16 %v6202_v7, %v6201_v57  ;;  %v6310_v53 = vpack.c.b16 %v6282_v63, %v6281_v9  ;;  %v4997_v57 = vrot.slane %v4995_v15, 4  ;;  %v5000_v7 = vrot.slane %v4998_v13, 5  ;;  %v8546_v63 = vld [vmem:[#allocation2 + $0x3c] sm:$0xff] }
 0x328   : > { %6169 = vrot.lane.b32.xlu0 %v8530_v62, %s8619_s18  ;;  %v4494_v62 = vld [vmem:[#allocation2 + $0x90] sm:$0xe]  ;;  %v5011_v9 = vor.u32 %v5010_v55, %v11514_v47  ;;  %v6538_v15 = vunpack.c.l.b16 %v5790_v51  ;;  %v5240_v13 = vrot.slane %v11486_v54, 5  ;;  %v5291_v55 = vld [vmem:[#allocation2 + $0xa8] sm:$0xf]  ;;  %v4818_v51 = vrot.slane %v4816_v1, 4 }
 0x329   : > { %v11510_v41 = vpop.permute.xlu1 %6339  ;;  %v11512_v17 = vpop.permute.xlu2 %6419  ;;  %v8158_v30 = vrot.slane %v4494_v62, 9  ;;  %v11544_v62 = vrot.slane %v4812_v0, 5  ;;  %v5001_v32 = vor.u32 %v5000_v7, %v4997_v57  ;;  %v5604_v19 = vshrl.u32 %v5291_v55, 16 }
 0x32a   : > { %v11518_v38 = vpop.permute.xlu0 %6259  ;;  %v5012_v4 = vrot.slane %v5011_v9, 4  ;;  %v6566_v31 = vpack.c.b16 %v6538_v15, %v6537_v21  ;;  %v5242_v48 = vrot.slane %v5240_v13, 4  ;;  %v5184_v0 = vrot.slane %v11516_v8, 5 }
 0x32b   : > { %v4633_v34 = vsel %vm8925_vm5, %v8158_v30, %v4632_v36  ;;  %v5619_v36 = vrot.slane %v5617_v40, 4  ;;  %v6486_v6 = vpack.c.b16 %v6458_v12, %v6457_v14  ;;  %v5016_v39 = vrot.slane %v5014_v56, 5 }
 0x32c   : > { %v6043_v30 = vunpack.c.l.b16 %v4633_v34  ;;  %v11557_v57 = vrot.slane %v4806_v59, 5  ;;  %v5243_v9 = vrot.slane %v4702_v25, 5  ;;  %v5002_v1 = vrot.slane %v5001_v32, 4 }
 0x32d   : > { %v4819_v40 = vor.u32 %v4818_v51, %v11544_v62  ;;  %v5017_v21 = vsel %vm8723_vm2, %v5012_v4, %v5016_v39  ;;  %v5606_v15 = vrot.slane %v5604_v19, 4  ;;  %v5620_v14 = vor.u32 %v5619_v36, %v11552_v61  ;;  %v8519_v39 = vld [vmem:[#allocation2 + $0x60] sm:$0xff] }
 0x32e   : > { %v8174_v25 = vrot.slane %v5102_v46, 9  ;;  %v5244_v12 = vsel %vm8925_vm5, %v5242_v48, %v5243_v9  ;;  %v5849_v56 = vrot.slane %v11523_v52, 5  ;;  %v5007_v19 = vsel %vm8723_vm2, %v5002_v1, %v11514_v47  ;;  %v5275_v48 = vld [vmem:[#allocation2 + $0x48] sm:$0xf] }
 0x32f   : > { %6249 = vrot.lane.b32.xlu1 %v6230_v42, %s8622_s21  ;;  %6329 = vrot.lane.b32.xlu2 %v6310_v53, %s8621_s20  ;;  %v6044_v53 = vunpack.c.l.b16 %v4636_v58  ;;  %v11555_v58 = vrot.slane %v4803_v43, 4  ;;  %v11567_v43 = vsel %vm2929_vm6, %v8513_v27, %v11229_v35  ;;  %v11580_v35 = vrot.slane %v5184_v0, 4 }
 0x330   : > { %6425 = vrot.lane.b32.xlu0 %v8546_v63, %s8620_s19  ;;  %v5607_v63 = vshll.u32 %v5291_v55, 16  ;;  %v5311_v55 = vld [vmem:[#allocation2 + $0xb0] sm:$0x1]  ;;  %v4822_v27 = vshll.u32 %v11559_v45, 16  ;;  %v5241_v52 = vsel %vm8925_vm5, %v8174_v25, %v5240_v13  ;;  %v11591_v47 = vrot.slane %v4819_v40, 4 }
 0x331   : > { %v11546_v50 = vpop.permute.xlu1 %6595  ;;  %v11548_v42 = vpop.permute.xlu2 %6181  ;;  %v6063_v7 = vpack.c.b16 %v6044_v53, %v6043_v30  ;;  %v5623_v59 = vshll.u32 %v5311_v55, 16  ;;  %v6220_v53 = vunpack.c.l.b16 %v5017_v21  ;;  %v4809_v32 = vor.u32 %v11557_v57, %v11555_v58  ;;  %v5711_v57 = vld [vmem:[#allocation2 + $0xa8] sm:$0xe] }
 0x332   : > { %v11550_v54 = vpop.permute.xlu0 %6515  ;;  %v5609_v34 = vrot.slane %v5607_v63, 5  ;;  %v6300_v63 = vunpack.c.l.b16 %v5244_v12  ;;  %v5621_v30 = vrot.slane %v5620_v14, 4  ;;  %v6219_v9 = vunpack.c.l.b16 %v5007_v19 }
 0x333   : > { %v5851_v1 = vrot.slane %v5849_v56, 4  ;;  %v6299_v58 = vunpack.c.l.b16 %v5241_v52  ;;  %v5625_v40 = vrot.slane %v5623_v59, 5  ;;  %v5852_v12 = vrot.slane %v5311_v55, 5 }
 0x334   : > { %v5610_v36 = vor.u32 %v5609_v34, %v5606_v15  ;;  %v8539_v34 = vld [vmem:[#allocation2 + $0x9c] sm:$0xff]  ;;  %v6239_v14 = vpack.c.b16 %v6220_v53, %v6219_v9  ;;  %v5415_v52 = vshll.u32 %v5275_v48, 16 }
 0x335   : > { %v5853_v55 = vsel %vm8925_vm5, %v5851_v1, %v5852_v12  ;;  %v5094_v9 = vld [vmem:[#allocation2 + $0x3c] sm:$0xe] }
 0x337   : > { %6505 = vrot.lane.b32.xlu1 %v6486_v6, %s8624_s23  ;;  %6585 = vrot.lane.b32.xlu2 %v6566_v31, %s8623_s22  ;;  %v11583_v6 = vld [vmem:[#allocation2 + $0x4c] sm:$0xf] }
 0x338   : > { %6091 = vrot.lane.b32.xlu0 %v6063_v7, %s8618_s17  ;;  %v5421_v13 = vshll.u32 %v11583_v6, 16  ;;  %v5425_v25 = vshrl.u32 %v11583_v6, 16 }
 0x339   : > { %v6004_v46 = vpop.permute.xlu1 %6003  ;;  %v11585_v31 = vpop.permute.xlu2 %6437 }
 0x33a   : > { %v6637_v4 = vsel %vm2929_vm6, %v8519_v39, %v6004_v46  ;;  %v6244_v51 = vpop.permute.xlu0 %6243  ;;  %v5412_v39 = vshrl.u32 %v5275_v48, 16  ;;  %v5611_v46 = vrot.slane %v5610_v36, 4 }
 0x33b   : > { %v6676_v7 = vsel %vm12554_vm7, %v6637_v4, %v11443_v2  ;;  %v6319_v2 = vpack.c.b16 %v6300_v63, %v6299_v58  ;;  %v11618_v4 = vrot.slane %v5421_v13, 5  ;;  %v5427_v63 = vrot.slane %v5425_v25, 4  ;;  %vm12560_vm7 = vmmov %vm12557_vm1 }
 0x33c   : > { %v6708_v21 = vsel %vm3011_vm8, %v6676_v7, %v11306_v37  ;;  %v5626_v37 = vsel %vm8723_vm2, %v5621_v30, %v5625_v40  ;;  %v5616_v53 = vsel %vm8723_vm2, %v5611_v46, %v11552_v61  ;;  %v6556_v13 = vunpack.c.l.b16 %v5853_v55 }
 0x33d   : > { %v6740_v15 = vsel %vm12555_vm10, %v6708_v21, %v11518_v38  ;;  %v8190_v38 = vrot.slane %v5711_v57, 9  ;;  %v6476_v7 = vunpack.c.l.b16 %v5626_v37  ;;  %v5187_v21 = vrot.slane %v11559_v45, 5  ;;  %v4684_v37 = vld [vmem:[#allocation2 + $0xa8] sm:$0xf]  ;;  %vm12561_vm10 = vmmov %vm12559_vm0 }
 0x33e   : > { %v6772_v19 = vsel %vm3077_vm11, %v6740_v15, %v11510_v41  ;;  %v6475_v58 = vunpack.c.l.b16 %v5616_v53  ;;  %v5414_v57 = vrot.slane %v5412_v39, 4  ;;  %v5417_v40 = vrot.slane %v5415_v52, 5  ;;  %v5703_v15 = vld [vmem:[#allocation2 + $0x48] sm:$0xe]  ;;  %v5303_v39 = vld [vmem:[#allocation2 + $0x50] sm:$0x1] }
 0x33f   : > { %6187 = vrot.lane.b32.xlu1 %v8539_v34, %s8619_s18  ;;  %6267 = vrot.lane.b32.xlu2 %v6239_v14, %s8622_s21  ;;  %v6804_v59 = vsel %vm3110_vm12, %v6772_v19, %v11376_v16  ;;  %v6692_v16 = vsel %vm3011_vm8, %v11271_v44, %v11475_v49  ;;  %v4824_v44 = vrot.slane %v4822_v27, 5  ;;  %v5793_v34 = vrot.slane %v11583_v6, 5  ;;  %v8555_v14 = vld [vmem:[#allocation2 + $0xa8] sm:$0xff] }
 0x340   : > { %6347 = vrot.lane.b32.xlu0 %v6319_v2, %s8621_s20  ;;  %v6836_v41 = vsel %vm3143_vm13, %v6804_v59, %v11550_v54  ;;  %v5850_v54 = vsel %vm8925_vm5, %v8190_v38, %v5849_v56  ;;  %v6724_v61 = vsel %vm12557_vm1, %v6692_v16, %v6244_v51  ;;  %v8166_v56 = vrot.slane %v5094_v9, 9  ;;  %v8520_v53 = vld [vmem:[#allocation2 + $0x6c] sm:$0xff] }
 0x341   : > { %v6324_v36 = vpop.permute.xlu1 %6323  ;;  %v11623_v30 = vpop.permute.xlu2 %6165  ;;  %v6868_v48 = vsel %vm12556_vm14, %v6836_v41, %v11546_v50  ;;  %v11633_v50 = vld [vmem:[#allocation2 + $0xac] sm:$0xf]  ;;  %v6555_v25 = vunpack.c.l.b16 %v5850_v54  ;;  %v5188_v51 = vsel %vm8925_vm5, %v11580_v35, %v5187_v21  ;;  %v6495_v12 = vpack.c.b16 %v6476_v7, %v6475_v58  ;;  %vm12562_vm14 = vmmov %vm12558_vm4 }
 0x342   : > { %v6500_v1 = vpop.permute.xlu0 %6499  ;;  %8402 = vmatmul.msk.bf16.vlgmr.msra.gmra.mxu3 %vm3229_vm15, %v6868_v48  ;;  %v6756_v49 = vsel %vm3077_vm11, %v6724_v61, %v6324_v36  ;;  %v4810_v45 = vrot.slane %v4809_v32, 4  ;;  %v4825_v27 = vsel %vm8723_vm2, %v11591_v47, %v4824_v44  ;;  %v5428_v2 = vor.u32 %v5427_v63, %v11618_v4 }
 0x343   : > { %v6788_v19 = vsel %vm3110_vm12, %v6756_v49, %v11512_v17  ;;  %v6575_v46 = vpack.c.b16 %v6556_v13, %v6555_v25  ;;  %v5028_v35 = vshll.u32 %v11633_v50, 16  ;;  %v5032_v59 = vshrl.u32 %v11633_v50, 16 }
 0x344   : > { %v5185_v6 = vsel %vm8925_vm5, %v8166_v56, %v5184_v0  ;;  %v6284_v32 = vunpack.c.l.b16 %v5188_v51  ;;  %v8182_v47 = vrot.slane %v5703_v15, 9  ;;  %v5418_v38 = vor.u32 %v5417_v40, %v5414_v57  ;;  %v11673_v56 = vld [vmem:[#allocation2 + $0xb8] sm:$0xf]  ;;  %v8531_v51 = vld [vmem:[#allocation2 + $0x3c] sm:$0xff] }
 0x345   : > { %v4815_v17 = vsel %vm8723_vm2, %v4810_v45, %v11544_v62  ;;  %v5795_v55 = vrot.slane %v5793_v34, 4  ;;  %v5796_v52 = vrot.slane %v5303_v39, 5  ;;  %v5431_v41 = vshll.u32 %v5303_v39, 16  ;;  %v11663_v62 = vld [vmem:[#allocation2 + $0xa4] sm:$0x1] }
 0x346   : > { %v6820_v63 = vsel %vm3143_vm13, %v6788_v19, %v6500_v1  ;;  %v6204_v36 = vunpack.c.l.b16 %v4825_v27  ;;  %v5019_v0 = vshrl.u32 %v4684_v37, 16  ;;  %v5022_v48 = vshll.u32 %v4684_v37, 16  ;;  %v4668_v45 = vld [vmem:[#allocation2 + $0x48] sm:$0xf]  ;;  %v8602_v19 = vld [vmem:[#allocation2 + $0xa0] sm:$0xf] }
 0x347   : > { %6443 = vrot.lane.b32.xlu1 %v8555_v14, %s8620_s19  ;;  %6523 = vrot.lane.b32.xlu2 %v6495_v12, %s8624_s23  ;;  %v5429_v9 = vrot.slane %v5428_v2, 4  ;;  %v11661_v61 = vrot.slane %v5028_v35, 5  ;;  %v5034_v13 = vrot.slane %v5032_v59, 4  ;;  %v4642_v21 = vrot.slane %v11663_v62, 5 }
 0x348   : > { %6603 = vrot.lane.b32.xlu0 %v6575_v46, %s8623_s22  ;;  %v6640_v1 = vsel %vm2929_vm6, %v8520_v53, %v11169_v11  ;;  %v6203_v44 = vunpack.c.l.b16 %v4815_v17  ;;  %v5419_v49 = vrot.slane %v5418_v38, 4  ;;  %v6283_v58 = vunpack.c.l.b16 %v5185_v6 }
 0x349   : > { %v6580_v16 = vpop.permute.xlu1 %6579  ;;  %v11658_v8 = vpop.permute.xlu2 %6421  ;;  %v5794_v57 = vsel %vm8925_vm5, %v8182_v47, %v5793_v34  ;;  %v5797_v40 = vsel %vm8925_vm5, %v5795_v55, %v5796_v52  ;;  %v5433_v25 = vrot.slane %v5431_v41, 5  ;;  %v5021_v14 = vrot.slane %v5019_v0, 4  ;;  %v11680_v34 = vld [vmem:[#allocation2 + $0xb0] sm:$0x1] }
 0x34a   : > { %v6262_v54 = vpop.permute.xlu0 %6261  ;;  %v6852_v7 = vsel %vm12558_vm4, %v6820_v63, %v6580_v16  ;;  %v6231_v15 = vpack.c.b16 %v6204_v36, %v6203_v44  ;;  %v5424_v11 = vsel %vm8723_vm2, %v5419_v49, %v11618_v4  ;;  %v5024_v12 = vrot.slane %v5022_v48, 5  ;;  %v5293_v4 = vld [vmem:[#allocation2 + $0xb4] sm:$0xf]  ;;  %v11695_v36 = vld [vmem:[#allocation2 + $0x4c] sm:$0xf]  ;;  %vm12563_vm4 = vmmov %vm12559_vm0 }
 0x34b   : > { %8394 = vmatmul.msk.bf16.vlgmr.msra.gmra.mxu1 %vm3229_vm15, %v6852_v7  ;;  %v6311_v27 = vpack.c.b16 %v6284_v32, %v6283_v58  ;;  %v5434_v39 = vsel %vm8723_vm2, %v5429_v9, %v5433_v25  ;;  %v5035_v2 = vor.u32 %v5034_v13, %v11661_v61  ;;  %v4639_v46 = vrot.slane %v8602_v19, 5  ;;  %v4495_v7 = vld [vmem:[#allocation2 + $0x9c] sm:$0xe] }
 0x34c   : > { %v6539_v37 = vunpack.c.l.b16 %v5794_v57  ;;  %v6540_v35 = vunpack.c.l.b16 %v5797_v40  ;;  %v5637_v59 = vshll.u32 %v11673_v56, 16  ;;  %v5641_v6 = vshrl.u32 %v11673_v56, 16 }
 0x34d   : > { %v6678_v32 = vsel %vm12559_vm0, %v6640_v1, %v11448_v23  ;;  %v6459_v47 = vunpack.c.l.b16 %v5424_v11  ;;  %v4827_v38 = vshrl.u32 %v4668_v45, 16  ;;  %v4830_v17 = vshll.u32 %v4668_v45, 16  ;;  %vm12564_vm0 = vmmov %vm12562_vm14 }
 0x34e   : > { %v6710_v55 = vsel %vm3011_vm8, %v6678_v32, %v11548_v42  ;;  %v6460_v53 = vunpack.c.l.b16 %v5434_v39  ;;  %v5025_v63 = vor.u32 %v5024_v12, %v5021_v14  ;;  %v5038_v16 = vshll.u32 %v11680_v34, 16 }
 0x34f   : > { %6171 = vrot.lane.b32.xlu1 %v8531_v51, %s8619_s18  ;;  %6251 = vrot.lane.b32.xlu2 %v6231_v15, %s8622_s21  ;;  %v6742_v0 = vsel %vm12560_vm7, %v6710_v55, %v6262_v54  ;;  %v5036_v48 = vrot.slane %v5035_v2, 4  ;;  %v4641_v9 = vrot.slane %v4639_v46, 4  ;;  %v5628_v13 = vshrl.u32 %v5293_v4, 16  ;;  %v8547_v51 = vld [vmem:[#allocation2 + $0x48] sm:$0xff]  ;;  %v11714_v2 = vld [vmem:[#allocation2 + $0xbc] sm:$0x1]  ;;  %vm12565_vm7 = vmmov %vm12557_vm1 }
 0x350   : > { %6331 = vrot.lane.b32.xlu0 %v6311_v27, %s8621_s20  ;;  %v5631_v44 = vshll.u32 %v5293_v4, 16  ;;  %v11699_v42 = vrot.slane %v5637_v59, 5  ;;  %v5643_v49 = vrot.slane %v5641_v6, 4  ;;  %v6567_v58 = vpack.c.b16 %v6540_v35, %v6539_v37  ;;  %v11721_v4 = vld [vmem:[#allocation2 + $0x50] sm:$0x1] }
 0x351   : > { %v6342_v52 = vpop.permute.xlu1 %6341  ;;  %v11692_v41 = vpop.permute.xlu2 %6183  ;;  %v11701_v57 = vrot.slane %v4827_v38, 4  ;;  %v4836_v40 = vshll.u32 %v11695_v36, 16  ;;  %v4840_v25 = vshrl.u32 %v11695_v36, 16  ;;  %v6487_v54 = vpack.c.b16 %v6460_v53, %v6459_v47 }
 0x352   : > { %v6518_v23 = vpop.permute.xlu0 %6517  ;;  %v6774_v1 = vsel %vm3077_vm11, %v6742_v0, %v6342_v52  ;;  %v5040_v15 = vrot.slane %v5038_v16, 5  ;;  %v8159_v11 = vrot.slane %v4495_v7, 9  ;;  %v11705_v14 = vrot.slane %v4830_v17, 5  ;;  %v5103_v0 = vld [vmem:[#allocation2 + $0xa8] sm:$0xe] }
 0x353   : > { %v6806_v12 = vsel %vm3110_vm12, %v6774_v1, %v11585_v31  ;;  %v5026_v45 = vrot.slane %v5025_v63, 4  ;;  %v4643_v27 = vsel %vm8925_vm5, %v4641_v9, %v4642_v21  ;;  %v5247_v39 = vrot.slane %v11633_v50, 5  ;;  %v11745_v1 = vld [vmem:[#allocation2 + $0x58] sm:$0xf] }
 0x354   : > { %v5041_v19 = vsel %vm8723_vm2, %v5036_v48, %v5040_v15  ;;  %v5630_v37 = vrot.slane %v5628_v13, 4  ;;  %v5633_v35 = vrot.slane %v5631_v44, 5  ;;  %v5644_v31 = vor.u32 %v5643_v49, %v11699_v42 }
 0x355   : > { %v6662_v62 = vsel %vm12561_vm10, %v11479_v18, %v11291_v5  ;;  %v4640_v50 = vsel %vm8925_vm5, %v8159_v11, %v4639_v46  ;;  %v11729_v21 = vrot.slane %v4836_v40, 5  ;;  %v4842_v59 = vrot.slane %v4840_v25, 4  ;;  %v5277_v18 = vld [vmem:[#allocation2 + $0x54] sm:$0xf]  ;;  %vm12566_vm10 = vmmov %vm12564_vm0 }
 0x356   : > { %v6838_v6 = vsel %vm3143_vm13, %v6806_v12, %v6518_v23  ;;  %v5031_v38 = vsel %vm8723_vm2, %v5026_v45, %v11661_v61  ;;  %v6046_v17 = vunpack.c.l.b16 %v4643_v27  ;;  %v5647_v5 = vshll.u32 %v11714_v2, 16 }
 0x357   : > { %6427 = vrot.lane.b32.xlu1 %v8547_v51, %s8620_s19  ;;  %6507 = vrot.lane.b32.xlu2 %v6487_v54, %s8624_s23  ;;  %v6222_v46 = vunpack.c.l.b16 %v5041_v19  ;;  %v5249_v53 = vrot.slane %v5247_v39, 4  ;;  %v4846_v63 = vshll.u32 %v11721_v4, 16  ;;  %v6045_v16 = vunpack.c.l.b16 %v4640_v50 }
 0x358   : > { %6587 = vrot.lane.b32.xlu0 %v6567_v58, %s8623_s22  ;;  %v5634_v23 = vor.u32 %v5633_v35, %v5630_v37  ;;  %v5645_v48 = vrot.slane %v5644_v31, 4  ;;  %v4833_v61 = vor.u32 %v11705_v14, %v11701_v57  ;;  %v6221_v7 = vunpack.c.l.b16 %v5031_v38  ;;  %v8540_v58 = vld [vmem:[#allocation2 + $0xa8] sm:$0xff] }
 0x359   : > { %v6598_v32 = vpop.permute.xlu1 %6597  ;;  %v11732_v47 = vpop.permute.xlu2 %6439  ;;  %v5250_v9 = vrot.slane %v11680_v34, 5  ;;  %v4843_v13 = vor.u32 %v4842_v59, %v11729_v21  ;;  %v5436_v44 = vshrl.u32 %v5277_v18, 16  ;;  %v6064_v49 = vpack.c.b16 %v6046_v17, %v6045_v16 }
 0x35a   : > { %v6246_v55 = vpop.permute.xlu0 %6245  ;;  %v6870_v52 = vsel %vm12562_vm14, %v6838_v6, %v6598_v32  ;;  %v5649_v40 = vrot.slane %v5647_v5, 5  ;;  %v5191_v25 = vrot.slane %v11695_v36, 5  ;;  %v5439_v51 = vshll.u32 %v5277_v18, 16  ;;  %v5095_v6 = vld [vmem:[#allocation2 + $0x48] sm:$0xe]  ;;  %vm12567_vm14 = vmmov %vm12557_vm1 }
 0x35b   : > { %8403 = vmatmul.msk.bf16.gmra.mxu3 %vm3229_vm15, %v6870_v52  ;;  %v6240_v54 = vpack.c.b16 %v6222_v46, %v6221_v7  ;;  %v8175_v15 = vrot.slane %v5103_v0, 9  ;;  %v5251_v11 = vsel %vm8925_vm5, %v5249_v53, %v5250_v9  ;;  %v5856_v57 = vrot.slane %v11673_v56, 5  ;;  %v5304_v9 = vld [vmem:[#allocation2 + $0x5c] sm:$0x1] }
 0x35c   : > { %v5635_v34 = vrot.slane %v5634_v23, 4  ;;  %v5650_v14 = vsel %vm8723_vm2, %v5645_v48, %v5649_v40  ;;  %v5445_v12 = vshll.u32 %v11745_v1, 16  ;;  %v5449_v36 = vshrl.u32 %v11745_v1, 16  ;;  %v8556_v48 = vld [vmem:[#allocation2 + $0xb4] sm:$0xff] }
 0x35d   : > { %v5248_v45 = vsel %vm8925_vm5, %v8175_v15, %v5247_v39  ;;  %v4844_v27 = vrot.slane %v4843_v13, 4  ;;  %v4848_v19 = vrot.slane %v4846_v63, 5  ;;  %v5438_v56 = vrot.slane %v5436_v44, 4 }
 0x35e   : > { %v6694_v37 = vsel %vm3011_vm8, %v6662_v62, %v11623_v30  ;;  %v6302_v50 = vunpack.c.l.b16 %v5251_v11  ;;  %v5640_v59 = vsel %vm8723_vm2, %v5635_v34, %v11699_v42  ;;  %v5441_v32 = vrot.slane %v5439_v51, 5  ;;  %v5712_v30 = vld [vmem:[#allocation2 + $0xb4] sm:$0xe] }
 0x35f   : > { %6093 = vrot.lane.b32.xlu1 %v6064_v49, %s8618_s17  ;;  %6189 = vrot.lane.b32.xlu2 %v8540_v58, %s8619_s18  ;;  %v6726_v38 = vsel %vm12557_vm1, %v6694_v37, %v6246_v55  ;;  %v6478_v39 = vunpack.c.l.b16 %v5650_v14  ;;  %v5858_v5 = vrot.slane %v5856_v57, 4  ;;  %v5193_v18 = vrot.slane %v5191_v25, 4  ;;  %v5704_v51 = vld [vmem:[#allocation2 + $0x54] sm:$0xe]  ;;  %v11802_v37 = vld [vmem:[#allocation2 + $0xb8] sm:$0xf]  ;;  %vm12568_vm1 = vmmov %vm12564_vm0 }
 0x360   : > { %6269 = vrot.lane.b32.xlu0 %v6240_v54, %s8622_s21  ;;  %v6301_v46 = vunpack.c.l.b16 %v5248_v45  ;;  %v11769_v62 = vrot.slane %v5445_v12, 5  ;;  %v5451_v53 = vrot.slane %v5449_v36, 4  ;;  %v6477_v63 = vunpack.c.l.b16 %v5640_v59 }
 0x361   : > { %v6326_v35 = vpop.permute.xlu1 %6325  ;;  %v11762_v31 = vpop.permute.xlu2 %6167  ;;  %v5859_v16 = vrot.slane %v11714_v2, 5  ;;  %v4834_v0 = vrot.slane %v4833_v61, 4  ;;  %v8167_v42 = vrot.slane %v5095_v6, 9  ;;  %v4849_v55 = vsel %vm8723_vm2, %v4844_v27, %v4848_v19 }
 0x362   : > { %v6502_v17 = vpop.permute.xlu0 %6501  ;;  %v6758_v52 = vsel %vm3077_vm11, %v6726_v38, %v6326_v35  ;;  %v6320_v23 = vpack.c.b16 %v6302_v50, %v6301_v46  ;;  %v5194_v7 = vrot.slane %v11721_v4, 5  ;;  %v5442_v13 = vor.u32 %v5441_v32, %v5438_v56  ;;  %v11805_v50 = vld [vmem:[#allocation2 + $0x58] sm:$0xf] }
 0x363   : > { %v6790_v44 = vsel %vm3110_vm12, %v6758_v52, %v11658_v8  ;;  %v6496_v49 = vpack.c.b16 %v6478_v39, %v6477_v63  ;;  %v8191_v58 = vrot.slane %v5712_v30, 9  ;;  %v5860_v40 = vsel %vm8925_vm5, %v5858_v5, %v5859_v16  ;;  %v4670_v39 = vld [vmem:[#allocation2 + $0x54] sm:$0xf]  ;;  %v8603_v52 = vld [vmem:[#allocation2 + $0xac] sm:$0xf] }
 0x364   : > { %v4839_v2 = vsel %vm8723_vm2, %v4834_v0, %v11729_v21  ;;  %v5195_v4 = vsel %vm8925_vm5, %v5193_v18, %v5194_v7  ;;  %v5452_v61 = vor.u32 %v5451_v53, %v11769_v62  ;;  %v5192_v54 = vsel %vm8925_vm5, %v8167_v42, %v5191_v25  ;;  %v8532_v18 = vld [vmem:[#allocation2 + $0x48] sm:$0xff]  ;;  %v4686_v30 = vld [vmem:[#allocation2 + $0xb4] sm:$0xf] }
 0x365   : > { %v5857_v8 = vsel %vm8925_vm5, %v8191_v58, %v5856_v57  ;;  %v5455_v15 = vshll.u32 %v5304_v9, 16  ;;  %v5800_v11 = vrot.slane %v11745_v1, 5  ;;  %v11796_v21 = vsel %vm12563_vm4, %v11567_v43, %v11204_v22 }
 0x366   : > { %v6822_v34 = vsel %vm3143_vm13, %v6790_v44, %v6502_v17  ;;  %v6558_v36 = vunpack.c.l.b16 %v5860_v40  ;;  %v6206_v45 = vunpack.c.l.b16 %v4849_v55  ;;  %v6286_v19 = vunpack.c.l.b16 %v5195_v4  ;;  %v11814_v17 = vld [vmem:[#allocation2 + $0x54] sm:$0xe]  ;;  %v4496_v44 = vld [vmem:[#allocation2 + $0xa8] sm:$0xe] }
 0x367   : > { %6349 = vrot.lane.b32.xlu1 %v6320_v23, %s8621_s20  ;;  %6445 = vrot.lane.b32.xlu2 %v8556_v48, %s8620_s19  ;;  %v5443_v25 = vrot.slane %v5442_v13, 4  ;;  %v8183_v56 = vrot.slane %v5704_v51, 9  ;;  %v6557_v1 = vunpack.c.l.b16 %v5857_v8  ;;  %v6205_v22 = vunpack.c.l.b16 %v4839_v2 }
 0x368   : > { %6525 = vrot.lane.b32.xlu0 %v6496_v49, %s8624_s23  ;;  %v6285_v43 = vunpack.c.l.b16 %v5192_v54  ;;  %v5453_v35 = vrot.slane %v5452_v61, 4  ;;  %v5457_v6 = vrot.slane %v5455_v15, 5  ;;  %v5802_v38 = vrot.slane %v5800_v11, 4 }
 0x369   : > { %v6582_v14 = vpop.permute.xlu1 %6581  ;;  %v11799_v12 = vpop.permute.xlu2 %6423  ;;  %v5448_v59 = vsel %vm8723_vm2, %v5443_v25, %v11769_v62  ;;  %v11812_v32 = vsel %vm8925_vm5, %v8183_v56, %v5800_v11  ;;  %v6576_v5 = vpack.c.b16 %v6558_v36, %v6557_v1  ;;  %v4646_v46 = vrot.slane %v8603_v52, 5  ;;  %v4704_v56 = vld [vmem:[#allocation2 + $0xbc] sm:$0x1]  ;;  %v5295_v52 = vld [vmem:[#allocation2 + $0xc0] sm:$0xf] }
 0x36a   : > { %v6264_v27 = vpop.permute.xlu0 %6263  ;;  %v6854_v57 = vsel %vm12564_vm0, %v6822_v34, %v6582_v14  ;;  %v5052_v53 = vshll.u32 %v11802_v37, 16  ;;  %v5056_v63 = vshrl.u32 %v11802_v37, 16  ;;  %v6232_v16 = vpack.c.b16 %v6206_v45, %v6205_v22 }
 0x36b   : > { %8395 = vmatmul.msk.bf16.gmra.mxu1 %vm3229_vm15, %v6854_v57  ;;  %v6312_v62 = vpack.c.b16 %v6286_v19, %v6285_v43  ;;  %v5803_v0 = vrot.slane %v5304_v9, 5  ;;  %v5198_v42 = vrot.slane %v11805_v50, 5  ;;  %v5458_v23 = vsel %vm8723_vm2, %v5453_v35, %v5457_v6  ;;  %v11843_v57 = vld [vmem:[#allocation2 + $0xc4] sm:$0xf]  ;;  %v8548_v43 = vld [vmem:[#allocation2 + $0x54] sm:$0xff] }
 0x36c   : > { %v6541_v48 = vunpack.c.l.b16 %v11812_v32  ;;  %v8168_v55 = vrot.slane %v11814_v17, 9  ;;  %v4851_v7 = vshrl.u32 %v4670_v39, 16  ;;  %v6461_v13 = vunpack.c.l.b16 %v5448_v59  ;;  %v5313_v32 = vld [vmem:[#allocation2 + $0xc8] sm:$0x1] }
 0x36d   : > { %v11828_v9 = vsel %vm8925_vm5, %v5802_v38, %v5803_v0  ;;  %v5043_v49 = vshrl.u32 %v4686_v30, 16  ;;  %v5046_v58 = vshll.u32 %v4686_v30, 16  ;;  %v6712_v40 = vsel %vm3011_vm8, %v11381_v20, %v11692_v41  ;;  %v8604_v20 = vld [vmem:[#allocation2 + $0xb0] sm:$0x1] }
 0x36e   : > { %v4648_v61 = vrot.slane %v4646_v46, 4  ;;  %v11835_v51 = vrot.slane %v5052_v53, 5  ;;  %v5058_v8 = vrot.slane %v5056_v63, 4  ;;  %v6744_v54 = vsel %vm12565_vm7, %v6712_v40, %v6264_v27 }
 0x36f   : > { %6605 = vrot.lane.b32.xlu1 %v6576_v5, %s8623_s22  ;;  %6173 = vrot.lane.b32.xlu2 %v8532_v18, %s8619_s18  ;;  %v6462_v11 = vunpack.c.l.b16 %v5458_v23  ;;  %v11840_v34 = vrot.slane %v5198_v42, 4  ;;  %v4854_v14 = vshll.u32 %v4670_v39, 16  ;;  %v8160_v45 = vrot.slane %v4496_v44, 9  ;;  %v4696_v39 = vld [vmem:[#allocation2 + $0x5c] sm:$0x1] }
 0x370   : > { %6253 = vrot.lane.b32.xlu0 %v6232_v16, %s8622_s21  ;;  %v4649_v41 = vrot.slane %v8604_v20, 5  ;;  %v4860_v19 = vshll.u32 %v11805_v50, 16  ;;  %v6542_v25 = vunpack.c.l.b16 %v11828_v9  ;;  %v5045_v27 = vrot.slane %v5043_v49, 4 }
 0x371   : > { %v6344_v2 = vpop.permute.xlu1 %6343  ;;  %v11833_v4 = vpop.permute.xlu2 %6089  ;;  %v5048_v1 = vrot.slane %v5046_v58, 5  ;;  %v4853_v22 = vrot.slane %v4851_v7, 4  ;;  %v4647_v35 = vsel %vm8925_vm5, %v8160_v45, %v4646_v46  ;;  %v5059_v6 = vor.u32 %v5058_v8, %v11835_v51 }
 0x372   : > { %v6520_v15 = vpop.permute.xlu0 %6519  ;;  %v6776_v36 = vsel %vm3077_vm11, %v6744_v54, %v6344_v2  ;;  %v4650_v59 = vsel %vm8925_vm5, %v4648_v61, %v4649_v41  ;;  %v5254_v38 = vrot.slane %v11802_v37, 5  ;;  %v6488_v18 = vpack.c.b16 %v6462_v11, %v6461_v13  ;;  %v5104_v61 = vld [vmem:[#allocation2 + $0xb4] sm:$0xe] }
 0x373   : > { %v6808_v5 = vsel %vm3110_vm12, %v6776_v36, %v11732_v47  ;;  %v5661_v30 = vshll.u32 %v11843_v57, 16  ;;  %v5665_v53 = vshrl.u32 %v11843_v57, 16  ;;  %v5062_v46 = vshll.u32 %v4704_v56, 16 }
 0x374   : > { %v4856_v63 = vrot.slane %v4854_v14, 5  ;;  %v11859_v16 = vrot.slane %v4860_v19, 5  ;;  %v4864_v37 = vshrl.u32 %v11805_v50, 16  ;;  %v6047_v0 = vunpack.c.l.b16 %v4647_v35 }
 0x375   : > { %v6048_v47 = vunpack.c.l.b16 %v4650_v59  ;;  %v5049_v23 = vor.u32 %v5048_v1, %v5045_v27  ;;  %v4870_v7 = vshll.u32 %v4696_v39, 16  ;;  %v6840_v13 = vsel %vm3143_vm13, %v6808_v5, %v6520_v15 }
 0x376   : > { %v5256_v49 = vrot.slane %v5254_v38, 4  ;;  %v5652_v58 = vshrl.u32 %v5295_v52, 16  ;;  %v5655_v8 = vshll.u32 %v5295_v52, 16  ;;  %v11867_v54 = vrot.slane %v5661_v30, 5 }
 0x377   : > { %6333 = vrot.lane.b32.xlu1 %v6312_v62, %s8621_s20  ;;  %6429 = vrot.lane.b32.xlu2 %v8548_v43, %s8620_s19  ;;  %v5060_v62 = vrot.slane %v5059_v6, 4  ;;  %v5667_v11 = vrot.slane %v5665_v53, 4  ;;  %v5064_v14 = vrot.slane %v5062_v46, 5  ;;  %v5257_v36 = vrot.slane %v4704_v56, 5 }
 0x378   : > { %6509 = vrot.lane.b32.xlu0 %v6488_v18, %s8624_s23  ;;  %v4857_v45 = vor.u32 %v4856_v63, %v4853_v22  ;;  %v4866_v15 = vrot.slane %v4864_v37, 4  ;;  %v6568_v20 = vpack.c.b16 %v6542_v25, %v6541_v48  ;;  %v6065_v41 = vpack.c.b16 %v6048_v47, %v6047_v0  ;;  %v11884_v48 = vld [vmem:[#allocation2 + $0x64] sm:$0xf]  ;;  %v8541_v25 = vld [vmem:[#allocation2 + $0xb4] sm:$0xff] }
 0x379   : > { %v6600_v9 = vpop.permute.xlu1 %6599  ;;  %v11864_v44 = vpop.permute.xlu2 %6345  ;;  %v11878_v19 = vsel %vm8925_vm5, %v8168_v55, %v5198_v42  ;;  %v5201_v27 = vrot.slane %v4696_v39, 5  ;;  %v5050_v1 = vrot.slane %v5049_v23, 4  ;;  %v5065_v43 = vsel %vm8723_vm2, %v5060_v62, %v5064_v14  ;;  %v5279_v55 = vld [vmem:[#allocation2 + $0x60] sm:$0xf] }
 0x37a   : > { %v6248_v40 = vpop.permute.xlu0 %6247  ;;  %v6872_v2 = vsel %vm12566_vm10, %v6840_v13, %v6600_v9  ;;  %v8176_v56 = vrot.slane %v5104_v61, 9  ;;  %v5258_v22 = vsel %vm8925_vm5, %v5256_v49, %v5257_v36  ;;  %v5863_v50 = vrot.slane %v11843_v57, 5  ;;  %vm12571_vm10 = vmmov %vm12564_vm0 }
 0x37b   : > { %8404 = vmatmul.msk.bf16.gmra.mxu3 %vm3229_vm15, %v6872_v2  ;;  %v5654_v17 = vrot.slane %v5652_v58, 4  ;;  %v5657_v35 = vrot.slane %v5655_v8, 5  ;;  %v5668_v42 = vor.u32 %v5667_v11, %v11867_v54  ;;  %v11893_v59 = vsel %vm8925_vm5, %v11840_v34, %v5201_v27 }
 0x37c   : > { %v11895_v6 = vrot.slane %v4857_v45, 4  ;;  %v4867_v39 = vor.u32 %v4866_v15, %v11859_v16  ;;  %v11898_v5 = vrot.slane %v4870_v7, 5  ;;  %v5055_v57 = vsel %vm8723_vm2, %v5050_v1, %v11835_v51  ;;  %v5713_v51 = vld [vmem:[#allocation2 + $0xc0] sm:$0xe]  ;;  %v11924_v1 = vld [vmem:[#allocation2 + $0x68] sm:$0x1] }
 0x37d   : > { %v5255_v18 = vsel %vm8925_vm5, %v8176_v56, %v5254_v38  ;;  %v5671_v52 = vshll.u32 %v5313_v32, 16  ;;  %v5807_v30 = vrot.slane %v11884_v48, 5  ;;  %v6696_v34 = vsel %vm3011_vm8, %v11796_v21, %v11762_v31  ;;  %v5705_v21 = vld [vmem:[#allocation2 + $0x60] sm:$0xe] }
 0x37e   : > { %v6224_v63 = vunpack.c.l.b16 %v5065_v43  ;;  %v6304_v37 = vunpack.c.l.b16 %v5258_v22  ;;  %v5460_v0 = vshrl.u32 %v5279_v55, 16  ;;  %v6728_v47 = vsel %vm12567_vm14, %v6696_v34, %v6248_v40  ;;  %v8557_v15 = vld [vmem:[#allocation2 + $0xc0] sm:$0xff] }
 0x37f   : > { %6589 = vrot.lane.b32.xlu1 %v6568_v20, %s8623_s22  ;;  %6095 = vrot.lane.b32.xlu2 %v6065_v41, %s8618_s17  ;;  %v5865_v7 = vrot.slane %v5863_v50, 4  ;;  %v5658_v13 = vor.u32 %v5657_v35, %v5654_v17  ;;  %v5669_v38 = vrot.slane %v5668_v42, 4  ;;  %v6223_v62 = vunpack.c.l.b16 %v5055_v57 }
 0x380   : > { %6191 = vrot.lane.b32.xlu0 %v8541_v25, %s8619_s18  ;;  %v6303_v49 = vunpack.c.l.b16 %v5255_v18  ;;  %v5463_v58 = vshll.u32 %v5279_v55, 16  ;;  %v5866_v2 = vrot.slane %v5313_v32, 5  ;;  %v5673_v31 = vrot.slane %v5671_v52, 5 }
 0x381   : > { %v6328_v53 = vpop.permute.xlu1 %6327  ;;  %v11910_v46 = vpop.permute.xlu2 %6601  ;;  %v5469_v61 = vshll.u32 %v11884_v48, 16  ;;  %v5473_v8 = vshrl.u32 %v11884_v48, 16  ;;  %v6241_v11 = vpack.c.b16 %v6224_v63, %v6223_v62  ;;  %v8192_v40 = vrot.slane %v5713_v51, 9 }
 0x382   : > { %v6504_v23 = vpop.permute.xlu0 %6503  ;;  %v6760_v9 = vsel %vm3077_vm11, %v6728_v47, %v6328_v53  ;;  %v6321_v14 = vpack.c.b16 %v6304_v37, %v6303_v49  ;;  %v4868_v36 = vrot.slane %v4867_v39, 4  ;;  %v5867_v20 = vsel %vm8925_vm5, %v5865_v7, %v5866_v2  ;;  %v11951_v47 = vld [vmem:[#allocation2 + $0xc4] sm:$0xf] }
 0x383   : > { %v6792_v45 = vsel %vm3110_vm12, %v6760_v9, %v11799_v12  ;;  %v5659_v41 = vrot.slane %v5658_v13, 4  ;;  %v5674_v27 = vsel %vm8723_vm2, %v5669_v38, %v5673_v31  ;;  %v8184_v43 = vrot.slane %v5705_v21, 9  ;;  %v3522_v13 = vld [vmem:[#allocation2 + $0xcc] sm:$0x1]  ;;  %v8533_v38 = vld [vmem:[#allocation2 + $0x54] sm:$0xff] }
 0x384   : > { %v5809_v56 = vrot.slane %v5807_v30, 4  ;;  %v5462_v22 = vrot.slane %v5460_v0, 4  ;;  %v5465_v32 = vrot.slane %v5463_v58, 5  ;;  %v5864_v12 = vsel %vm8925_vm5, %v8192_v40, %v5863_v50  ;;  %v4688_v58 = vld [vmem:[#allocation2 + $0xc0] sm:$0xf] }
 0x385   : > { %v5664_v48 = vsel %vm8723_vm2, %v5659_v41, %v11867_v54  ;;  %v11932_v25 = vrot.slane %v5469_v61, 5  ;;  %v5475_v17 = vrot.slane %v5473_v8, 4  ;;  %v6824_v35 = vsel %vm3143_vm13, %v6792_v45, %v6504_v23  ;;  %v8522_v23 = vld [vmem:[#allocation2 + $0x84] sm:$0xff]  ;;  %v8605_v61 = vld [vmem:[#allocation2 + $0xb8] sm:$0xf] }
 0x386   : > { %v6560_v39 = vunpack.c.l.b16 %v5867_v20  ;;  %v6480_v57 = vunpack.c.l.b16 %v5674_v27  ;;  %v4873_v18 = vsel %vm8723_vm2, %v4868_v36, %v11898_v5  ;;  %v6287_v34 = vunpack.c.l.b16 %v11878_v19  ;;  %v11975_v36 = vld [vmem:[#allocation2 + $0x60] sm:$0xf] }
 0x387   : > { %6271 = vrot.lane.b32.xlu1 %v6241_v11, %s8622_s21  ;;  %6351 = vrot.lane.b32.xlu2 %v6321_v14, %s8621_s20  ;;  %v6288_v54 = vunpack.c.l.b16 %v11893_v59  ;;  %v5810_v53 = vrot.slane %v11924_v1, 5  ;;  %v6559_v63 = vunpack.c.l.b16 %v5864_v12  ;;  %v6479_v37 = vunpack.c.l.b16 %v5664_v48  ;;  %v3578_v11 = vld [vmem:[#allocation2 + $0xd4] sm:$0x1] }
 0x388   : > { %6447 = vrot.lane.b32.xlu0 %v8557_v15, %s8620_s19  ;;  %v4863_v0 = vsel %vm8723_vm2, %v11895_v6, %v11859_v16  ;;  %v5808_v5 = vsel %vm8925_vm5, %v8184_v43, %v5807_v30  ;;  %v11953_v19 = vunpack.c.l.b16 %v4873_v18  ;;  %v5466_v51 = vor.u32 %v5465_v32, %v5462_v22  ;;  %v11982_v43 = vld [vmem:[#allocation2 + $0xd0] sm:$0xf]  ;;  %v4705_v18 = vld [vmem:[#allocation2 + $0xc8] sm:$0x1] }
 0x389   : > { %v6584_v42 = vpop.permute.xlu1 %6583  ;;  %v11935_v55 = vpop.permute.xlu2 %6329  ;;  %v5811_v59 = vsel %vm8925_vm5, %v5809_v56, %v5810_v53  ;;  %v5476_v7 = vor.u32 %v5475_v17, %v11932_v25  ;;  %v6577_v9 = vpack.c.b16 %v6560_v39, %v6559_v63  ;;  %v6497_v62 = vpack.c.b16 %v6480_v57, %v6479_v37 }
 0x38a   : > { %v6186_v52 = vpop.permute.xlu0 %6185  ;;  %v6856_v50 = vsel %vm12568_vm1, %v6824_v35, %v6584_v42  ;;  %v5479_v16 = vshll.u32 %v11924_v1, 16  ;;  %v3523_v6 = vsel %vm10211_vm3, 0, %v3522_v13  ;;  %v6646_v30 = vsel %vm2929_vm6, %v8522_v23, %v11263_v3  ;;  %vm12569_vm3 = vmmov %vm12563_vm4  ;;  %v8549_v23 = vld [vmem:[#allocation2 + $0x60] sm:$0xff] }
 0x38b   : > { %8396 = vmatmul.msk.bf16.gmra.mxu1 %vm3229_vm15, %v6856_v50  ;;  %v11966_v49 = vsel %vm12563_vm4, %v11501_v10, %v11352_v28  ;;  %v5076_v2 = vshll.u32 %v11951_v47, 16  ;;  %v5080_v31 = vshrl.u32 %v11951_v47, 16  ;;  %3524 = vst [vmem:[#allocation2 + $0xcc] sm:$0x1] %v3523_v6  ;;  %v6313_v29 = vpack.c.b16 %v6288_v54, %v6287_v34  ;;  %v8606_v54 = vld [vmem:[#allocation2 + $0xbc] sm:$0x1]  ;;  %vm12572_vm14 = vmmov %vm12569_vm3 }
 0x38c   : > { %v6207_v21 = vunpack.c.l.b16 %v4863_v0  ;;  %v4653_v8 = vrot.slane %v8605_v61, 5  ;;  %v6544_v3 = vunpack.c.l.b16 %v5811_v59  ;;  %v6543_v28 = vunpack.c.l.b16 %v5808_v5  ;;  %vm12573_vm1 = vmmov %vm12565_vm7 }
 0x38d   : > { %v5467_v10 = vrot.slane %v5466_v51, 4  ;;  %v5477_v14 = vrot.slane %v5476_v7, 4  ;;  %v3579_v40 = vsel %vm10219_vm9, 0, %v3578_v11  ;;  %v6682_v45 = vsel %vm12569_vm3, %v6646_v30, %v11833_v4  ;;  %vm12570_vm9 = vmmov %vm12565_vm7  ;;  %v11999_v51 = vld [vmem:[#allocation2 + $0x64] sm:$0xf] }
 0x38e   : > { %v6233_v41 = vpack.c.b16 %v11953_v19, %v6207_v21  ;;  %v5067_v27 = vshrl.u32 %v4688_v58, 16  ;;  %v5070_v1 = vshll.u32 %v4688_v58, 16  ;;  %3580 = vst [vmem:[#allocation2 + $0xd4] sm:$0x1] %v3579_v40  ;;  %v6714_v56 = vsel %vm3011_vm8, %v6682_v45, %v6186_v52  ;;  %v5105_v11 = vld [vmem:[#allocation2 + $0xc0] sm:$0xe]  ;;  %vm12576_vm4 = vmmov %vm12573_vm1 }
 0x38f   : > { %6607 = vrot.lane.b32.xlu2 %v6577_v9, %s8623_s22  ;;  %6527 = vrot.lane.b32.xlu1 %v6497_v62, %s8624_s23  ;;  %v5481_v32 = vrot.slane %v5479_v16, 5  ;;  %v11985_v12 = vrot.slane %v5076_v2, 5  ;;  %v5082_v48 = vrot.slane %v5080_v31, 4  ;;  %v4655_v17 = vrot.slane %v4653_v8, 4  ;;  %vm12577_vm3 = vmmov %vm12564_vm0 }
 0x390   : > { %6175 = vrot.lane.b32.xlu0 %v8533_v38, %s8619_s18  ;;  %v6569_v35 = vpack.c.b16 %v6544_v3, %v6543_v28  ;;  %v4875_v42 = vshrl.u32 %v11975_v36, 16  ;;  %v5472_v39 = vsel %vm8723_vm2, %v5467_v10, %v11932_v25  ;;  %v5685_v52 = vshll.u32 %v11982_v43, 16 }
 0x391   : > { %v6266_v15 = vpop.permute.xlu1 %6265  ;;  %v11979_v20 = vpop.permute.xlu2 %6585  ;;  %v5482_v57 = vsel %vm8723_vm2, %v5477_v14, %v5481_v32  ;;  %v5689_v50 = vshrl.u32 %v11982_v43, 16  ;;  %v8161_v34 = vrot.slane %v4497_v33, 9  ;;  %v4656_v53 = vrot.slane %v8606_v54, 5 }
 0x392   : > { %v6442_v22 = vpop.permute.xlu0 %6441  ;;  %v6746_v4 = vsel %vm12570_vm9, %v6714_v56, %v6266_v15  ;;  %v5069_v63 = vrot.slane %v5067_v27, 4  ;;  %v5072_v37 = vrot.slane %v5070_v1, 5  ;;  %v5297_v0 = vld [vmem:[#allocation2 + $0xcc] sm:$0xf]  ;;  %v5083_v25 = vor.u32 %v5082_v48, %v11985_v12  ;;  %vm12579_vm9 = vmmov %vm12572_vm14 }
 0x393   : > { %v6778_v5 = vsel %vm3077_vm11, %v6746_v4, %v11864_v44  ;;  %v5676_v19 = vshrl.u32 %v5297_v0, 16  ;;  %v5679_v59 = vshll.u32 %v5297_v0, 16  ;;  %v4654_v7 = vsel %vm8925_vm5, %v8161_v34, %v4653_v8 }
 0x394   : > { %v4657_v13 = vsel %vm8925_vm5, %v4655_v17, %v4656_v53  ;;  %v5261_v38 = vrot.slane %v11951_v47, 5  ;;  %v5086_v44 = vshll.u32 %v4705_v18, 16  ;;  %v12009_v16 = vrot.slane %v5685_v52, 5 }
 0x395   : > { %v5678_v9 = vrot.slane %v5676_v19, 4  ;;  %v5681_v62 = vrot.slane %v5679_v59, 5  ;;  %v5691_v6 = vrot.slane %v5689_v50, 4  ;;  %v6810_v30 = vsel %vm3110_vm12, %v6778_v5, %v6442_v22  ;;  %v5314_v21 = vld [vmem:[#allocation2 + $0xd4] sm:$0x1] }
 0x396   : > { %v6463_v31 = vunpack.c.l.b16 %v5472_v39  ;;  %v4884_v61 = vshll.u32 %v11999_v51, 16  ;;  %v6050_v3 = vunpack.c.l.b16 %v4657_v13  ;;  %v5073_v28 = vor.u32 %v5072_v37, %v5069_v63  ;;  %v5714_v39 = vld [vmem:[#allocation2 + $0xcc] sm:$0xe] }
 0x397   : > { %6335 = vrot.lane.b32.xlu2 %v6313_v29, %s8621_s20  ;;  %6255 = vrot.lane.b32.xlu1 %v6233_v41, %s8622_s21  ;;  %v6464_v29 = vunpack.c.l.b16 %v5482_v57  ;;  %v5084_v10 = vrot.slane %v5083_v25, 4  ;;  %v6049_v40 = vunpack.c.l.b16 %v4654_v7  ;;  %v5263_v45 = vrot.slane %v5261_v38, 4 }
 0x398   : > { %6431 = vrot.lane.b32.xlu0 %v8549_v23, %s8620_s19  ;;  %v4888_v15 = vshrl.u32 %v11999_v51, 16  ;;  %v5088_v41 = vrot.slane %v5086_v44, 5  ;;  %v5682_v27 = vor.u32 %v5681_v62, %v5678_v9  ;;  %v5692_v1 = vor.u32 %v5691_v6, %v12009_v16  ;;  %v12045_v9 = vld [vmem:[#allocation2 + $0x70] sm:$0xf] }
 0x399   : > { %v6522_v58 = vpop.permute.xlu1 %6521  ;;  %v12012_v2 = vpop.permute.xlu2 %6267  ;;  %v5695_v56 = vshll.u32 %v5314_v21, 16  ;;  %v6489_v22 = vpack.c.b16 %v6464_v29, %v6463_v31  ;;  %v8177_v33 = vrot.slane %v5105_v11, 9  ;;  %v5264_v32 = vrot.slane %v4705_v18, 5 }
 0x39a   : > { %v6842_v47 = vsel %vm3143_vm13, %v6810_v30, %v6522_v58  ;;  %v6170_v8 = vpop.permute.xlu0 %6169  ;;  %v5870_v48 = vrot.slane %v11982_v43, 5  ;;  %v6066_v4 = vpack.c.b16 %v6050_v3, %v6049_v40  ;;  %v5074_v17 = vrot.slane %v5073_v28, 4  ;;  %v8542_v58 = vld [vmem:[#allocation2 + $0xc0] sm:$0xff] }
 0x39b   : > { %v6874_v14 = vsel %vm12564_vm0, %v6842_v47, %v11910_v46  ;;  %v5089_v46 = vsel %vm8723_vm2, %v5084_v10, %v5088_v41  ;;  %v4878_v57 = vshll.u32 %v11975_v36, 16  ;;  %v5262_v52 = vsel %vm8925_vm5, %v8177_v33, %v5261_v38  ;;  %v5097_v41 = vld [vmem:[#allocation2 + $0x60] sm:$0xe] }
 0x39c   : > { %8405 = vmatmul.msk.bf16.gmra.mxu3 %vm3229_vm15, %v6874_v14  ;;  %v5265_v18 = vsel %vm8925_vm5, %v5263_v45, %v5264_v32  ;;  %v12031_v50 = vrot.slane %v4884_v61, 5  ;;  %v4890_v43 = vrot.slane %v4888_v15, 4  ;;  %v5079_v34 = vsel %vm8723_vm2, %v5074_v17, %v11985_v12 }
 0x39d   : > { %v5683_v54 = vrot.slane %v5682_v27, 4  ;;  %v5693_v53 = vrot.slane %v5692_v1, 4  ;;  %v6226_v0 = vunpack.c.l.b16 %v5089_v46  ;;  %v8193_v5 = vrot.slane %v5714_v39, 9  ;;  %v8558_v46 = vld [vmem:[#allocation2 + $0xcc] sm:$0xff] }
 0x39e   : > { %v5872_v23 = vrot.slane %v5870_v48, 4  ;;  %v5873_v25 = vrot.slane %v5314_v21, 5  ;;  %v6698_v19 = vsel %vm3011_vm8, %v11966_v49, %v6170_v8  ;;  %v6306_v7 = vunpack.c.l.b16 %v5265_v18 }
 0x39f   : > { %6591 = vrot.lane.b32.xlu2 %v6569_v35, %s8623_s22  ;;  %6511 = vrot.lane.b32.xlu1 %v6489_v22, %s8624_s23  ;;  %v5697_v35 = vrot.slane %v5695_v56, 5  ;;  %v6225_v38 = vunpack.c.l.b16 %v5079_v34  ;;  %v5205_v12 = vrot.slane %v11999_v51, 5  ;;  %v4877_v44 = vrot.slane %v4875_v42, 4  ;;  %v4697_v42 = vld [vmem:[#allocation2 + $0x68] sm:$0x1] }
 0x3a0   : > { %6097 = vrot.lane.b32.xlu0 %v6066_v4, %s8618_s17  ;;  %v6305_v62 = vunpack.c.l.b16 %v5262_v52  ;;  %v5688_v6 = vsel %vm8723_vm2, %v5683_v54, %v12009_v16  ;;  %v4880_v30 = vrot.slane %v4878_v57, 5  ;;  %v5871_v29 = vsel %vm8925_vm5, %v8193_v5, %v5870_v48  ;;  %v5281_v16 = vld [vmem:[#allocation2 + $0x6c] sm:$0xf]  ;;  %v5306_v54 = vld [vmem:[#allocation2 + $0x74] sm:$0x1] }
 0x3a1   : > { %v6250_v63 = vpop.permute.xlu1 %6249  ;;  %v12037_v37 = vpop.permute.xlu2 %6523  ;;  %v5698_v49 = vsel %vm8723_vm2, %v5693_v53, %v5697_v35  ;;  %v6242_v31 = vpack.c.b16 %v6226_v0, %v6225_v38  ;;  %v5874_v36 = vsel %vm8925_vm5, %v5872_v23, %v5873_v25  ;;  %v4891_v51 = vor.u32 %v4890_v43, %v12031_v50  ;;  %v8523_v23 = vld [vmem:[#allocation2 + $0x90] sm:$0xff] }
 0x3a2   : > { %v6426_v59 = vpop.permute.xlu0 %6425  ;;  %v6730_v13 = vsel %vm12565_vm7, %v6698_v19, %v6250_v63  ;;  %v6322_v61 = vpack.c.b16 %v6306_v7, %v6305_v62  ;;  %v5493_v47 = vshll.u32 %v12045_v9, 16  ;;  %v5497_v8 = vshrl.u32 %v12045_v9, 16  ;;  %v8434_v19 = vld [vmem:[%s8695_s15 + $0x6c] sm:$0xf]  ;;  %vm12581_vm7 = vmmov %vm12577_vm3 }
 0x3a3   : > { %v6762_v21 = vsel %vm3077_vm11, %v6730_v13, %v11935_v55  ;;  %v6481_v3 = vunpack.c.l.b16 %v5688_v6  ;;  %v6482_v11 = vunpack.c.l.b16 %v5698_v49  ;;  %v6561_v28 = vunpack.c.l.b16 %v5871_v29  ;;  %v5706_v49 = vld [vmem:[#allocation2 + $0x6c] sm:$0xe] }
 0x3a4   : > { %v6562_v10 = vunpack.c.l.b16 %v5874_v36  ;;  %v5207_v14 = vrot.slane %v5205_v12, 4  ;;  %v4894_v40 = vshll.u32 %v4697_v42, 16  ;;  %v6794_v55 = vsel %vm3110_vm12, %v6762_v21, %v6426_v59 }
 0x3a5   : > { %v4881_v27 = vor.u32 %v4880_v30, %v4877_v44  ;;  %v5484_v1 = vshrl.u32 %v5281_v16, 16  ;;  %v5487_v56 = vshll.u32 %v5281_v16, 16  ;;  %v4892_v32 = vrot.slane %v4891_v51, 4 }
 0x3a6   : > { %v12068_v48 = vrot.slane %v5493_v47, 5  ;;  %v5499_v4 = vrot.slane %v5497_v8, 4  ;;  %v6498_v39 = vpack.c.b16 %v6482_v11, %v6481_v3  ;;  %v5208_v57 = vrot.slane %v4697_v42, 5  ;;  %v8410_v42 = vld [vmem:[%s8695_s15 + $0xc] sm:$0xf]  ;;  %v8534_v8 = vld [vmem:[#allocation2 + $0x60] sm:$0xff] }
 0x3a7   : > { %6193 = vrot.lane.b32.xlu1 %v8542_v58, %s8619_s18  ;;  %6273 = vrot.lane.b32.xlu2 %v6242_v31, %s8622_s21  ;;  %v6578_v52 = vpack.c.b16 %v6562_v10, %v6561_v28  ;;  %v8169_v18 = vrot.slane %v5097_v41, 9  ;;  %v4896_v43 = vrot.slane %v4894_v40, 5  ;;  %v5486_v53 = vrot.slane %v5484_v1, 4 }
 0x3a8   : > { %6353 = vrot.lane.b32.xlu0 %v6322_v61, %s8621_s20  ;;  %v5209_v34 = vsel %vm8925_vm5, %v5207_v14, %v5208_v57  ;;  %v5489_v35 = vrot.slane %v5487_v56, 5  ;;  %v4882_v0 = vrot.slane %v4881_v27, 4  ;;  %v5500_v5 = vor.u32 %v5499_v4, %v12068_v48  ;;  %v8435_v27 = vld [vmem:[%s8695_s15 + $0x70] sm:$0xf] }
 0x3a9   : > { %v6506_v45 = vpop.permute.xlu1 %6505  ;;  %v12065_v15 = vpop.permute.xlu2 %6251  ;;  %v5206_v63 = vsel %vm8925_vm5, %v8169_v18, %v5205_v12  ;;  %v5814_v25 = vrot.slane %v12045_v9, 5  ;;  %v6290_v59 = vunpack.c.l.b16 %v5209_v34  ;;  %v5503_v13 = vshll.u32 %v5306_v54, 16 }
 0x3aa   : > { %v6826_v22 = vsel %vm3143_vm13, %v6794_v55, %v6506_v45  ;;  %v6092_v33 = vpop.permute.xlu0 %6091  ;;  %v4887_v7 = vsel %vm8723_vm2, %v4882_v0, %v12031_v50  ;;  %v6649_v38 = vsel %vm2929_vm6, %v8523_v23, %v11234_v24  ;;  %v6289_v62 = vunpack.c.l.b16 %v5206_v63 }
 0x3ab   : > { %v6858_v17 = vsel %vm12571_vm10, %v6826_v22, %v11979_v20  ;;  %v4897_v20 = vsel %vm8723_vm2, %v4892_v32, %v4896_v43  ;;  %v5490_v9 = vor.u32 %v5489_v35, %v5486_v53  ;;  %v6684_v30 = vsel %vm12572_vm14, %v6649_v38, %v6092_v33  ;;  %v8550_v35 = vld [vmem:[#allocation2 + $0x6c] sm:$0xff]  ;;  %vm12584_vm10 = vmmov %vm12579_vm9 }
 0x3ac   : > { %8397 = vmatmul.msk.bf16.gmra.mxu1 %vm3229_vm15, %v6858_v17  ;;  %v6210_v6 = vunpack.c.l.b16 %v4897_v20  ;;  %v5501_v31 = vrot.slane %v5500_v5, 4  ;;  %v7340_v29 = vshrl.u32 %v8434_v19, 16  ;;  %v7343_v36 = vshll.u32 %v8434_v19, 16 }
 0x3ad   : > { %v6209_v51 = vunpack.c.l.b16 %v4887_v7  ;;  %v5816_v21 = vrot.slane %v5814_v25, 4  ;;  %v6314_v61 = vpack.c.b16 %v6290_v59, %v6289_v62  ;;  %v8185_v24 = vrot.slane %v5706_v49, 9  ;;  %v8436_v59 = vld [vmem:[%s8695_s15 + $0x74] sm:$0x1]  ;;  %v12126_v62 = vld [vmem:[%s12475_s5] ss:$0 sm:$0xff] }
 0x3ae   : > { %v5817_v16 = vrot.slane %v5306_v54, 5  ;;  %v5505_v47 = vrot.slane %v5503_v13, 5  ;;  %v5491_v11 = vrot.slane %v5490_v9, 4  ;;  %v7148_v28 = vshrl.u32 %v8410_v42, 16  ;;  %v12575_v9 = vld [vmem:[#allocation14_spill] sm:$0xff] }
 0x3af   : > { %6449 = vrot.lane.b32.xlu1 %v8558_v46, %s8620_s19  ;;  %6529 = vrot.lane.b32.xlu2 %v6498_v39, %s8624_s23  ;;  %v6234_v3 = vpack.c.b16 %v6210_v6, %v6209_v51  ;;  %v7151_v10 = vshll.u32 %v8410_v42, 16  ;;  %v7342_v55 = vrot.slane %v7340_v29, 4  ;;  %v7345_v45 = vrot.slane %v7343_v36, 5  ;;  %v8412_v29 = vld [vmem:[%s8695_s15 + $0x14] sm:$0x1] }
 0x3b0   : > { %6609 = vrot.lane.b32.xlu0 %v6578_v52, %s8623_s22  ;;  %v5506_v40 = vsel %vm8723_vm2, %v5501_v31, %v5505_v47  ;;  %v5818_v41 = vsel %vm8925_vm5, %v5816_v21, %v5817_v16  ;;  %v5815_v1 = vsel %vm8925_vm5, %v8185_v24, %v5814_v25  ;;  %v7150_v32 = vrot.slane %v7148_v28, 4  ;;  %vm12574_vm5 = vmmov %vm12564_vm0  ;;  %v12138_v42 = vld [vmem:[%s12476_s6] ss:$0 sm:$0xff] }
 0x3b1   : > { %v6188_v12 = vpop.permute.xlu1 %6187  ;;  %v12090_v44 = vpop.permute.xlu2 %6507  ;;  %v6466_v33 = vunpack.c.l.b16 %v5506_v40  ;;  %v7153_v4 = vrot.slane %v7151_v10, 5  ;;  %v6546_v57 = vunpack.c.l.b16 %v5818_v41  ;;  %v7346_v52 = vor.u32 %v7345_v45, %v7342_v55  ;;  %v8437_v45 = vld [vmem:[%s8695_s15 + $0x78] sm:$0xf]  ;;  %vm12580_vm0 = vmmov %vm12573_vm1 }
 0x3b2   : > { %v6348_v58 = vpop.permute.xlu0 %6347  ;;  %v6716_v50 = vsel %vm3011_vm8, %v6684_v30, %v6188_v12  ;;  %v7349_v18 = vshll.u32 %v8435_v27, 16  ;;  %v6545_v53 = vunpack.c.l.b16 %v5815_v1  ;;  %v7157_v20 = vshll.u32 %v8411_v60, 16  ;;  %vm12585_vm14 = vmmov %vm12580_vm0 }
 0x3b3   : > { %v6748_v14 = vsel %vm12573_vm1, %v6716_v50, %v12012_v2  ;;  %v5496_v2 = vsel %vm8723_vm2, %v5491_v11, %v12068_v48  ;;  %v7353_v48 = vshrl.u32 %v8435_v27, 16  ;;  %v7154_v0 = vor.u32 %v7153_v4, %v7150_v32  ;;  %vm12586_vm1 = vmmov %vm12577_vm3 }
 0x3b4   : > { %v6780_v56 = vsel %vm3077_vm11, %v6748_v14, %v6348_v58  ;;  %v6465_v34 = vunpack.c.l.b16 %v5496_v2  ;;  %v6570_v5 = vpack.c.b16 %v6546_v57, %v6545_v53  ;;  %v7347_v23 = vrot.slane %v7346_v52, 4  ;;  %v8438_v53 = vld [vmem:[%s8695_s15 + $0x7c] sm:$0xf] }
 0x3b5   : > { %v7351_v25 = vrot.slane %v7349_v18, 5  ;;  %v7161_v19 = vshrl.u32 %v8411_v60, 16  ;;  %v7155_v13 = vrot.slane %v7154_v0, 4  ;;  %v7159_v38 = vrot.slane %v7157_v20, 5  ;;  %v8524_v0 = vld [vmem:[#allocation2 + $0x9c] sm:$0xff] }
 0x3b6   : > { %v6490_v63 = vpack.c.b16 %v6466_v33, %v6465_v34  ;;  %v7359_v31 = vshll.u32 %v8436_v59, 16  ;;  %v7167_v47 = vshll.u32 %v8412_v29, 16 }
 0x3b7   : > { %6177 = vrot.lane.b32.xlu1 %v8534_v8, %s8619_s18  ;;  %6257 = vrot.lane.b32.xlu2 %v6234_v3, %s8622_s21  ;;  %v7352_v6 = vsel %vm8723_vm2, %v7347_v23, %v7351_v25  ;;  %v7163_v49 = vrot.slane %v7161_v19, 4  ;;  %v7160_v21 = vsel %vm8723_vm2, %v7155_v13, %v7159_v38  ;;  %s8460_s21 = sshll.u32 %s12604_s7, 8  ;;  %v7373_v13 = vshll.u32 %v8438_v53, 16 }
 0x3b8   : > { %6337 = vrot.lane.b32.xlu0 %v6314_v61, %s8621_s20  ;;  %v7579_v51 = vunpack.c.l.bf16 %v7352_v6  ;;  %v7361_v3 = vrot.slane %v7359_v31, 5  ;;  %v7563_v40 = vunpack.c.l.bf16 %v7160_v21  ;;  %v7169_v2 = vrot.slane %v7167_v47, 5  ;;  %s12154_s7 = scalar_lea.vmem %s12480_s10, %s8460_s21  ;;  %v8439_v47 = vld [vmem:[%s8695_s15 + $0x80] sm:$0x1] }
 0x3b9   : > { %v6444_v22 = vpop.permute.xlu1 %6443  ;;  %v12112_v46 = vpop.permute.xlu2 %6189  ;;  %v7164_v16 = vor.u32 %v7163_v49, %v7159_v38  ;;  %v8413_v38 = vld [vmem:[%s8695_s15 + $0x18] sm:$0xf] }
 0x3ba   : > { %v6812_v17 = vsel %vm3110_vm12, %v6780_v56, %v6444_v22  ;;  %v6604_v39 = vpop.permute.xlu0 %6603  ;;  %v7175_v31 = vshll.u32 %v8413_v38, 16 }
 0x3bb   : > { %v6844_v43 = vsel %vm3143_vm13, %v6812_v17, %v12037_v37  ;;  %v7355_v37 = vrot.slane %v7353_v48, 4  ;;  %v7165_v1 = vrot.slane %v7164_v16, 4  ;;  %v7364_v17 = vshrl.u32 %v8437_v45, 16 }
 0x3bc   : > { %v6876_v54 = vsel %vm12574_vm5, %v6844_v43, %v6604_v39  ;;  %v7367_v39 = vshll.u32 %v8437_v45, 16  ;;  %vm12588_vm5 = vmmov %vm12579_vm9 }
 0x3bd   : > { %8406 = vmatmul.msk.bf16.gmra.mxu3 %vm3229_vm15, %v6876_v54  ;;  %v7356_v58 = vor.u32 %v7355_v37, %v7351_v25  ;;  %v7170_v43 = vsel %vm8723_vm2, %v7165_v1, %v7169_v2  ;;  %v12578_v37 = vld [vmem:[#allocation5_spill] sm:$0xff] }
 0x3be   : > { %v6652_v59 = vsel %vm2929_vm6, %v8524_v0, %v12578_v37  ;;  %v12583_v37 = vld [vmem:[#allocation9_spill] sm:$0xff] }
 0x3bf   : > { %6433 = vrot.lane.b32.xlu1 %v8550_v35, %s8620_s19  ;;  %6513 = vrot.lane.b32.xlu2 %v6490_v63, %s8624_s23  ;;  %v7357_v8 = vrot.slane %v7356_v58, 4  ;;  %v7366_v35 = vrot.slane %v7364_v17, 4  ;;  %v7369_v63 = vrot.slane %v7367_v39, 5  ;;  %v7172_v58 = vshrl.u32 %v8413_v38, 16 }
 0x3c0   : > { %6593 = vrot.lane.b32.xlu0 %v6570_v5, %s8623_s22  ;;  %v7564_v5 = vunpack.c.l.bf16 %v7170_v43  ;;  %v8516_v43 = vld [vmem:[#allocation2 + $0x3c] sm:$0xff] }
 0x3c1   : > { %v6172_v7 = vpop.permute.xlu1 %6171  ;;  %v12133_v36 = vpop.permute.xlu2 %6445  ;;  %v7362_v33 = vsel %vm8723_vm2, %v7357_v8, %v7361_v3  ;;  %v7370_v49 = vor.u32 %v7369_v63, %v7366_v35 }
 0x3c2   : > { %v6332_v12 = vpop.permute.xlu0 %6331  ;;  %v6700_v30 = vsel %vm3011_vm8, %v12575_v9, %v6172_v7  ;;  %v7580_v60 = vunpack.c.l.bf16 %v7362_v33  ;;  %v7377_v9 = vshrl.u32 %v8438_v53, 16  ;;  %v12582_v53 = vld [vmem:[#allocation4_spill] sm:$0xff] }
 0x3c3   : > { %v6732_v61 = vsel %vm12576_vm4, %v6700_v30, %v12065_v15  ;;  %v7371_v21 = vrot.slane %v7370_v49, 4  ;;  %v6628_v35 = vsel %vm2929_vm6, %v8516_v43, %v12582_v53  ;;  %vm12589_vm4 = vmmov %vm12580_vm0 }
 0x3c4   : > { %v6764_v10 = vsel %vm3077_vm11, %v6732_v61, %v6332_v12  ;;  %v7375_v61 = vrot.slane %v7373_v13, 5 }
 0x3c5   : > { %v6987_v50 = vpop.f32.mrf.mxu3 }
 0x3c6   : > { %v7047_v24 = vmul.f32 %v12126_v62, %v6987_v50 }
 0x3c8   : > { %v7083_v11 = vadd.f32 %v12138_v42, %v7047_v24  ;;  %v6947_v28 = vpop.f32.mrf.mxu1  ;;  %v7379_v24 = vrot.slane %v7377_v9, 4  ;;  %v8440_v9 = vld [vmem:[%s8695_s15 + $0x84] sm:$0xf] }
 0x3c9   : > { %v7031_v14 = vmul.f32 %v12126_v62, %v6947_v28  ;;  %v6428_v55 = vpop.permute.xlu1 %6427  ;;  %v12165_v18 = vpop.permute.xlu2 %6173  ;;  %v7177_v28 = vrot.slane %v7175_v31, 5 }
 0x3ca   : > { %v7611_v41 = vadd.f32 %v7579_v51, %v7083_v11  ;;  %v6796_v15 = vsel %vm3110_vm12, %v6764_v10, %v6428_v55  ;;  %v6588_v27 = vpop.permute.xlu0 %6587  ;;  %v7174_v11 = vrot.slane %v7172_v58, 4  ;;  %v7383_v55 = vshll.u32 %v8439_v47, 16 }
 0x3cb   : > { %v7067_v56 = vadd.f32 %v12138_v42, %v7031_v14  ;;  %v6828_v22 = vsel %vm3143_vm13, %v6796_v15, %v12090_v44  ;;  %v8414_v14 = vld [vmem:[%s8695_s15 + $0x1c] sm:$0xf] }
 0x3cc   : > { %v7643_v32 = vmax.f32 %v7611_v41, 0.0  ;;  %v6860_v4 = vsel %vm12577_vm3, %v6828_v22, %v6588_v27  ;;  %v7178_v15 = vor.u32 %v7177_v28, %v7174_v11  ;;  %v7181_v27 = vshll.u32 %v8414_v14, 16  ;;  %vm12590_vm3 = vmmov %vm12586_vm1 }
 0x3cd   : > { %v7595_v57 = vadd.f32 %v7563_v40, %v7067_v56  ;;  %8398 = vmatmul.msk.bf16.gmra.mxu1 %vm3229_vm15, %v6860_v4  ;;  %v6989_v52 = vpop.f32.mrf.mxu3  ;;  %v7380_v40 = vor.u32 %v7379_v24, %v7375_v61  ;;  %v7185_v1 = vshrl.u32 %v8414_v14, 16  ;;  %v7385_v33 = vrot.slane %v7383_v55, 5 }
 0x3ce   : > { %7675 = vst.msk [vmem:[%s12154_s7 + $0x80] sm:$0xff] %vm2929_vm6, %v7643_v32  ;;  %v7048_v44 = vmul.f32 %v12126_v62, %v6989_v52  ;;  %v7179_v52 = vrot.slane %v7178_v15, 4  ;;  %v7388_v24 = vshrl.u32 %v8440_v9, 16  ;;  %v8441_v15 = vld [vmem:[%s8695_s15 + $0x88] sm:$0xf] }
 0x3cf   : > { %v7627_v34 = vmax.f32 %v7595_v57, 0.0  ;;  %v7381_v22 = vrot.slane %v7380_v40, 4 }
 0x3d0   : > { %v7084_v48 = vadd.f32 %v12138_v42, %v7048_v44  ;;  %v6949_v54 = vpop.f32.mrf.mxu1  ;;  %v7183_v44 = vrot.slane %v7181_v27, 5  ;;  %v7390_v14 = vrot.slane %v7388_v24, 4 }
 0x3d1   : > { %7659 = vst.msk [vmem:[%s12154_s7] sm:$0xff] %vm2929_vm6, %v7627_v34  ;;  %v7032_v20 = vmul.f32 %v12126_v62, %v6949_v54  ;;  %v6094_v23 = vpop.permute.xlu1 %6093  ;;  %v12184_v51 = vpop.permute.xlu2 %6429  ;;  %v7386_v54 = vsel %vm8723_vm2, %v7381_v22, %v7385_v33  ;;  %v7397_v22 = vshll.u32 %v8441_v15, 16  ;;  %v7401_v33 = vshrl.u32 %v8441_v15, 16 }
 0x3d2   : > { %v7612_v25 = vadd.f32 %v7580_v60, %v7084_v48  ;;  %v6270_v19 = vpop.permute.xlu0 %6269  ;;  %v6686_v6 = vsel %vm12579_vm9, %v6652_v59, %v6094_v23  ;;  %v7187_v60 = vrot.slane %v7185_v1, 4  ;;  %v8415_v48 = vld [vmem:[%s8695_s15 + $0x20] sm:$0x1]  ;;  %v6670_v59 = vsel %vm12584_vm10, %v6628_v35, %v12583_v37  ;;  %v8442_v35 = vld [vmem:[%s8695_s15 + $0x8c] sm:$0x1]  ;;  %vm12592_vm9 = vmmov %vm12580_vm0 }
 0x3d3   : > { %v7068_v7 = vadd.f32 %v12138_v42, %v7032_v20  ;;  %v6718_v50 = vsel %vm3011_vm8, %v6686_v6, %v12112_v46  ;;  %v7376_v46 = vsel %vm8723_vm2, %v7371_v21, %v7375_v61  ;;  %v7184_v20 = vsel %vm8723_vm2, %v7179_v52, %v7183_v44  ;;  %vm12596_vm10 = vmmov %vm12589_vm4 }
 0x3d4   : > { %v7644_v12 = vmax.f32 %v7612_v25, 0.0  ;;  %v6750_v8 = vsel %vm12580_vm0, %v6718_v50, %v6270_v19  ;;  %v7581_v56 = vunpack.c.l.bf16 %v7376_v46  ;;  %v7191_v23 = vshll.u32 %v8415_v48, 16  ;;  %vm12593_vm0 = vmmov %vm12586_vm1 }
 0x3d5   : > { %v7596_v30 = vadd.f32 %v7564_v5, %v7068_v7  ;;  %v7188_v5 = vor.u32 %v7187_v60, %v7183_v44  ;;  %v7582_v19 = vunpack.c.l.bf16 %v7386_v54  ;;  %v6702_v13 = vsel %vm3011_vm8, %v6670_v59, %v12165_v18  ;;  %v12587_v44 = vld [vmem:[#allocation11_spill] sm:$0xff] }
 0x3d6   : > { %7676 = vst.msk [vmem:[%s12154_s7 + $0x88] sm:$0xff] %vm2929_vm6, %v7644_v12  ;;  %v7565_v6 = vunpack.c.l.bf16 %v7184_v20  ;;  %v7403_v48 = vrot.slane %v7401_v33, 4  ;;  %v7407_v59 = vshll.u32 %v8442_v35, 16  ;;  %v12591_v33 = vld [vmem:[#allocation8_spill] sm:$0xff] }
 0x3d7   : > { %v7628_v29 = vmax.f32 %v7596_v30, 0.0  ;;  %v7189_v31 = vrot.slane %v7188_v5, 4 }
 0x3d9   : > { %7660 = vst.msk [vmem:[%s12154_s7 + $0x8] sm:$0xff] %vm2929_vm6, %v7628_v29  ;;  %v6350_v16 = vpop.permute.xlu1 %6349  ;;  %v12199_v39 = vpop.permute.xlu2 %6095  ;;  %v7193_v29 = vrot.slane %v7191_v23, 5 }
 0x3da   : > { %v6526_v3 = vpop.permute.xlu0 %6525  ;;  %v6782_v10 = vsel %vm3077_vm11, %v6750_v8, %v6350_v16  ;;  %v7391_v16 = vshll.u32 %v8440_v9, 16 }
 0x3db   : > { %v6814_v45 = vsel %vm3110_vm12, %v6782_v10, %v12133_v36  ;;  %v7194_v11 = vsel %vm8723_vm2, %v7189_v31, %v7193_v29 }
 0x3dc   : > { %v6846_v32 = vsel %vm3143_vm13, %v6814_v45, %v6526_v3  ;;  %v7393_v46 = vrot.slane %v7391_v16, 5  ;;  %v7566_v45 = vunpack.c.l.bf16 %v7194_v11 }
 0x3de   : > { %v6992_v41 = vpop.f32.mrf.mxu3 }
 0x3df   : > { %v7049_v2 = vmul.f32 %v12126_v62, %v6992_v41 }
 0x3e1   : > { %v7085_v4 = vadd.f32 %v12138_v42, %v7049_v2  ;;  %v6606_v17 = vpop.permute.xlu1 %6605  ;;  %v6352_v18 = vpop.permute.xlu2 %6351  ;;  %v8416_v2 = vld [vmem:[%s8695_s15 + $0x24] sm:$0xf] }
 0x3e2   : > { %v6254_v57 = vpop.permute.xlu0 %6253  ;;  %v6878_v36 = vsel %vm12581_vm7, %v6846_v32, %v6606_v17  ;;  %vm12595_vm7 = vmmov %vm12588_vm5 }
 0x3e3   : > { %v7613_v34 = vadd.f32 %v7581_v56, %v7085_v4  ;;  %8407 = vmatmul.msk.bf16.gmra.mxu3 %vm3229_vm15, %v6878_v36  ;;  %v6734_v30 = vsel %vm12585_vm14, %v6702_v13, %v6254_v57  ;;  %v7394_v56 = vor.u32 %v7393_v46, %v7390_v14  ;;  %v8525_v4 = vld [vmem:[#allocation2 + $0xa8] sm:$0xff]  ;;  %v7196_v57 = vshrl.u32 %v8416_v2, 16  ;;  %vm12597_vm14 = vmmov %vm12593_vm0 }
 0x3e4   : > { %v7199_v36 = vshll.u32 %v8416_v2, 16  ;;  %v6655_v60 = vsel %vm2929_vm6, %v8525_v4, %v12587_v44 }
 0x3e5   : > { %v7645_v63 = vmax.f32 %v7613_v34, 0.0  ;;  %v7395_v43 = vrot.slane %v7394_v56, 4  ;;  %v7399_v34 = vrot.slane %v7397_v22, 5  ;;  %v6688_v54 = vsel %vm12588_vm5, %v6655_v60, %v12199_v39 }
 0x3e6   : > { %v6994_v0 = vpop.f32.mrf.mxu3  ;;  %v7198_v20 = vrot.slane %v7196_v57, 4  ;;  %v7201_v5 = vrot.slane %v7199_v36, 5 }
 0x3e7   : > { %7677 = vst.msk [vmem:[%s12154_s7 + $0x90] sm:$0xff] %vm2929_vm6, %v7645_v63  ;;  %v7050_v25 = vmul.f32 %v12126_v62, %v6994_v0  ;;  %v7404_v37 = vor.u32 %v7403_v48, %v7399_v34 }
 0x3e8   : > { %v6952_v7 = vpop.f32.mrf.mxu1 }
 0x3e9   : > { %v7086_v38 = vadd.f32 %v12138_v42, %v7050_v25  ;;  %v7033_v12 = vmul.f32 %v12126_v62, %v6952_v7  ;;  %v6334_v49 = vpop.permute.xlu1 %6333  ;;  %v6608_v17 = vpop.permute.xlu2 %6607  ;;  %v8417_v25 = vld [vmem:[%s8695_s15 + $0x28] sm:$0xf] }
 0x3ea   : > { %v6510_v58 = vpop.permute.xlu0 %6509  ;;  %v6766_v61 = vsel %vm3077_vm11, %v6734_v30, %v6334_v49  ;;  %v7209_v7 = vshrl.u32 %v8417_v25, 16  ;;  %v7405_v30 = vrot.slane %v7404_v37, 4 }
 0x3eb   : > { %v7614_v50 = vadd.f32 %v7582_v19, %v7086_v38  ;;  %v7069_v21 = vadd.f32 %v12138_v42, %v7033_v12  ;;  %v6798_v3 = vsel %vm3110_vm12, %v6766_v61, %v12184_v51  ;;  %v7400_v19 = vsel %vm8723_vm2, %v7395_v43, %v7399_v34  ;;  %v8418_v61 = vld [vmem:[%s8695_s15 + $0x2c] sm:$0x1] }
 0x3ec   : > { %v6830_v40 = vsel %vm3143_vm13, %v6798_v3, %v6510_v58  ;;  %v7202_v38 = vor.u32 %v7201_v5, %v7198_v20  ;;  %v7205_v12 = vshll.u32 %v8417_v25, 16  ;;  %v7583_v49 = vunpack.c.l.bf16 %v7400_v19 }
 0x3ed   : > { %v7646_v47 = vmax.f32 %v7614_v50, 0.0  ;;  %v7597_v8 = vadd.f32 %v7565_v6, %v7069_v21  ;;  %v7409_v58 = vrot.slane %v7407_v59, 5  ;;  %v7211_v31 = vrot.slane %v7209_v7, 4  ;;  %v8444_v59 = vld [vmem:[%s8695_s15 + $0x94] sm:$0xf] }
 0x3ee   : > { %v7203_v16 = vrot.slane %v7202_v38, 4  ;;  %v8419_v38 = vld [vmem:[%s8695_s15 + $0x30] sm:$0xf] }
 0x3ef   : > { %7678 = vst.msk [vmem:[%s12154_s7 + $0x98] sm:$0xff] %vm2929_vm6, %v7646_v47  ;;  %v7629_v28 = vmax.f32 %v7597_v8, 0.0  ;;  %v7207_v47 = vrot.slane %v7205_v12, 5  ;;  %v7410_v11 = vsel %vm8723_vm2, %v7405_v30, %v7409_v58  ;;  %v8526_v30 = vld [vmem:[#allocation2 + $0xb4] sm:$0xff] }
 0x3f0   : > { %v6954_v10 = vpop.f32.mrf.mxu1 }
 0x3f1   : > { %7661 = vst.msk [vmem:[%s12154_s7 + $0x10] sm:$0xff] %vm2929_vm6, %v7629_v28  ;;  %v7034_v55 = vmul.f32 %v12126_v62, %v6954_v10  ;;  %v6590_v41 = vpop.permute.xlu1 %6589  ;;  %v6336_v9 = vpop.permute.xlu2 %6335  ;;  %v7212_v28 = vor.u32 %v7211_v31, %v7207_v47  ;;  %v7215_v10 = vshll.u32 %v8418_v61, 16  ;;  %v7220_v31 = vshrl.u32 %v8419_v38, 16 }
 0x3f2   : > { %v6192_v51 = vpop.permute.xlu0 %6191  ;;  %v6862_v27 = vsel %vm12586_vm1, %v6830_v40, %v6590_v41  ;;  %v7208_v40 = vsel %vm8723_vm2, %v7203_v16, %v7207_v47  ;;  %vm12600_vm1 = vmmov %vm12588_vm5 }
 0x3f3   : > { %v7070_v1 = vadd.f32 %v12138_v42, %v7034_v55  ;;  %8399 = vmatmul.msk.bf16.gmra.mxu1 %vm3229_vm15, %v6862_v27  ;;  %v6720_v63 = vsel %vm3011_vm8, %v6688_v54, %v6192_v51  ;;  %v7213_v15 = vrot.slane %v7212_v28, 4  ;;  %v7217_v51 = vrot.slane %v7215_v10, 5  ;;  %vm12601_vm5 = vmmov %vm12589_vm4 }
 0x3f4   : > { %v7567_v2 = vunpack.c.l.bf16 %v7208_v40  ;;  %v7222_v28 = vrot.slane %v7220_v31, 4 }
 0x3f5   : > { %v7598_v32 = vadd.f32 %v7566_v45, %v7070_v1  ;;  %v7584_v45 = vunpack.c.l.bf16 %v7410_v11  ;;  %v7218_v44 = vsel %vm8723_vm2, %v7213_v15, %v7217_v51 }
 0x3f7   : > { %v7630_v52 = vmax.f32 %v7598_v32, 0.0 }
 0x3f9   : > { %7662 = vst.msk [vmem:[%s12154_s7 + $0x18] sm:$0xff] %vm2929_vm6, %v7630_v52  ;;  %v6272_v53 = vpop.permute.xlu1 %6271  ;;  %v6592_v22 = vpop.permute.xlu2 %6591 }
 0x3fa   : > { %v6448_v0 = vpop.permute.xlu0 %6447  ;;  %v6752_v23 = vsel %vm12589_vm4, %v6720_v63, %v6272_v53  ;;  %v7568_v63 = vunpack.c.l.bf16 %v7218_v44  ;;  %v8421_v44 = vld [vmem:[%s8695_s15 + $0x38] sm:$0x1] }
 0x3fb   : > { %v6784_v39 = vsel %vm3077_vm11, %v6752_v23, %v6352_v18 }
 0x3fc   : > { %v6816_v29 = vsel %vm3110_vm12, %v6784_v39, %v6448_v0 }
 0x3fe   : > { %v6997_v13 = vpop.f32.mrf.mxu3 }
 0x3ff   : > { %v7051_v6 = vmul.f32 %v12126_v62, %v6997_v13 }
 0x401   : > { %v7087_v50 = vadd.f32 %v12138_v42, %v7051_v6  ;;  %v6528_v21 = vpop.permute.xlu1 %6527  ;;  %v6274_v13 = vpop.permute.xlu2 %6273 }
 0x402   : > { %v6848_v24 = vsel %vm3143_vm13, %v6816_v29, %v6528_v21  ;;  %v6176_v18 = vpop.permute.xlu0 %6175  ;;  %v7223_v29 = vshll.u32 %v8419_v38, 16 }
 0x403   : > { %v7615_v8 = vadd.f32 %v7583_v49, %v7087_v50  ;;  %v6880_v3 = vsel %vm12590_vm3, %v6848_v24, %v6608_v17  ;;  %v6704_v32 = vsel %vm3011_vm8, %v12591_v33, %v6176_v18  ;;  %v8443_v17 = vld [vmem:[%s8695_s15 + $0x90] sm:$0xf]  ;;  %v7421_v49 = vshll.u32 %v8444_v59, 16 }
 0x404   : > { %8408 = vmatmul.msk.bf16.gmra.mxu3 %vm3229_vm15, %v6880_v3  ;;  %v7412_v34 = vshrl.u32 %v8443_v17, 16  ;;  %v7415_v48 = vshll.u32 %v8443_v17, 16  ;;  %v12594_v50 = vld [vmem:[#allocation6_spill] sm:$0xff]  ;;  %v8445_v3 = vld [vmem:[%s8695_s15 + $0x98] sm:$0x1]  ;;  %v7225_v10 = vrot.slane %v7223_v29, 5 }
 0x405   : > { %v7647_v14 = vmax.f32 %v7615_v8, 0.0  ;;  %v6658_v21 = vsel %vm2929_vm6, %v8526_v30, %v12594_v50  ;;  %v7423_v18 = vrot.slane %v7421_v49, 5  ;;  %v12599_v49 = vld [vmem:[#allocation13_spill] sm:$0xff]  ;;  %v8446_v29 = vld [vmem:[%s8695_s15 + $0x9c] sm:$0xf] }
 0x406   : > { %v6999_v46 = vpop.f32.mrf.mxu3  ;;  %v7414_v23 = vrot.slane %v7412_v34, 4  ;;  %v7417_v25 = vrot.slane %v7415_v48, 5 }
 0x407   : > { %7679 = vst.msk [vmem:[%s12154_s7 + $0xa0] sm:$0xff] %vm2929_vm6, %v7647_v14  ;;  %v7052_v55 = vmul.f32 %v12126_v62, %v6999_v46  ;;  %v8420_v14 = vld [vmem:[%s8695_s15 + $0x34] sm:$0xf] }
 0x408   : > { %v6957_v41 = vpop.f32.mrf.mxu1  ;;  %v7418_v6 = vor.u32 %v7417_v25, %v7414_v23 }
 0x409   : > { %v7088_v27 = vadd.f32 %v12138_v42, %v7052_v55  ;;  %v7035_v1 = vmul.f32 %v12126_v62, %v6957_v41  ;;  %v6256_v56 = vpop.permute.xlu1 %6255  ;;  %v7431_v55 = vshll.u32 %v8445_v3, 16  ;;  %v6530_v41 = vpop.permute.xlu2 %6529  ;;  %v7439_v3 = vshll.u32 %v8446_v29, 16 }
 0x40a   : > { %v6432_v4 = vpop.permute.xlu0 %6431  ;;  %v6736_v52 = vsel %vm12592_vm9, %v6704_v32, %v6256_v56  ;;  %v7419_v24 = vrot.slane %v7418_v6, 4 }
 0x40b   : > { %v7616_v57 = vadd.f32 %v7584_v45, %v7088_v27  ;;  %v7071_v36 = vadd.f32 %v12138_v42, %v7035_v1  ;;  %v6768_v54 = vsel %vm3077_vm11, %v6736_v52, %v6336_v9  ;;  %v7425_v9 = vshrl.u32 %v8444_v59, 16 }
 0x40c   : > { %v6800_v0 = vsel %vm3110_vm12, %v6768_v54, %v6432_v4  ;;  %v7424_v46 = vsel %vm8723_vm2, %v7419_v24, %v7423_v18  ;;  %v7233_v45 = vshrl.u32 %v8420_v14, 16  ;;  %v7226_v27 = vor.u32 %v7225_v10, %v7222_v28 }
 0x40d   : > { %v7648_v60 = vmax.f32 %v7616_v57, 0.0  ;;  %v7599_v43 = vadd.f32 %v7567_v2, %v7071_v36  ;;  %v7427_v16 = vrot.slane %v7425_v9, 4  ;;  %v7229_v1 = vshll.u32 %v8420_v14, 16 }
 0x40e   : > { %v7585_v56 = vunpack.c.l.bf16 %v7424_v46  ;;  %v7433_v4 = vrot.slane %v7431_v55, 5  ;;  %v7235_v17 = vrot.slane %v7233_v45, 4 }
 0x40f   : > { %7680 = vst.msk [vmem:[%s12154_s7 + $0xa8] sm:$0xff] %vm2929_vm6, %v7648_v60  ;;  %v7631_v53 = vmax.f32 %v7599_v43, 0.0  ;;  %v7428_v40 = vor.u32 %v7427_v16, %v7423_v18  ;;  %v7227_v43 = vrot.slane %v7226_v27, 4  ;;  %v7231_v34 = vrot.slane %v7229_v1, 5  ;;  %v8447_v1 = vld [vmem:[%s8695_s15 + $0xa0] sm:$0xf] }
 0x410   : > { %v6959_v35 = vpop.f32.mrf.mxu1  ;;  %v7436_v18 = vshrl.u32 %v8446_v29, 16 }
 0x411   : > { %7663 = vst.msk [vmem:[%s12154_s7 + $0x20] sm:$0xff] %vm2929_vm6, %v7631_v53  ;;  %v7036_v20 = vmul.f32 %v12126_v62, %v6959_v35  ;;  %v6512_v5 = vpop.permute.xlu1 %6511  ;;  %v7429_v32 = vrot.slane %v7428_v40, 4  ;;  %v8518_v53 = vld [vmem:[#allocation2 + $0x54] sm:$0xff] }
 0x412   : > { %v6832_v19 = vsel %vm3143_vm13, %v6800_v0, %v6512_v5  ;;  %v6098_v37 = vpop.permute.xlu0 %6097  ;;  %v7239_v0 = vshll.u32 %v8421_v44, 16  ;;  %v12598_v5 = vld [vmem:[#allocation3_spill] sm:$0xff] }
 0x413   : > { %v7072_v7 = vadd.f32 %v12138_v42, %v7036_v20  ;;  %v6864_v39 = vsel %vm12593_vm0, %v6832_v19, %v6592_v22  ;;  %v6690_v47 = vsel %vm12595_vm7, %v6658_v21, %v6098_v37  ;;  %v7434_v35 = vsel %vm8723_vm2, %v7429_v32, %v7433_v4  ;;  %v6258_v37 = vpop.permute.xlu2 %6257 }
 0x414   : > { %8400 = vmatmul.msk.bf16.gmra.mxu1 %vm3229_vm15, %v6864_v39  ;;  %v6634_v23 = vsel %vm2929_vm6, %v8518_v53, %v12598_v5  ;;  %v7232_v19 = vsel %vm8723_vm2, %v7227_v43, %v7231_v34  ;;  %v7445_v4 = vshll.u32 %v8447_v1, 16  ;;  %v8423_v53 = vld [vmem:[%s8695_s15 + $0x40] sm:$0xf] }
 0x415   : > { %v7600_v12 = vadd.f32 %v7568_v63, %v7072_v7  ;;  %v7236_v63 = vor.u32 %v7235_v17, %v7231_v34  ;;  %v7586_v7 = vunpack.c.l.bf16 %v7434_v35  ;;  %v6674_v9 = vsel %vm12600_vm1, %v6634_v23, %v12599_v49  ;;  %v8448_v34 = vld [vmem:[%s8695_s15 + $0xa4] sm:$0x1] }
 0x416   : > { %v7449_v17 = vshrl.u32 %v8447_v1, 16  ;;  %v7253_v23 = vshll.u32 %v8423_v53, 16  ;;  %v8424_v49 = vld [vmem:[%s8695_s15 + $0x44] sm:$0x1] }
 0x417   : > { %v7632_v58 = vmax.f32 %v7600_v12, 0.0  ;;  %v7237_v38 = vrot.slane %v7236_v63, 4  ;;  %v7241_v12 = vrot.slane %v7239_v0, 5  ;;  %v7455_v0 = vshll.u32 %v8448_v34, 16 }
 0x418   : > { %v7451_v43 = vrot.slane %v7449_v17, 4 }
 0x419   : > { %7664 = vst.msk [vmem:[%s12154_s7 + $0x28] sm:$0xff] %vm2929_vm6, %v7632_v58  ;;  %v6194_v61 = vpop.permute.xlu1 %6193  ;;  %v7569_v58 = vunpack.c.l.bf16 %v7232_v19  ;;  %v7242_v24 = vsel %vm8723_vm2, %v7237_v38, %v7241_v12  ;;  %v7255_v38 = vrot.slane %v7253_v23, 5 }
 0x41a   : > { %v6354_v8 = vpop.permute.xlu0 %6353  ;;  %v6722_v11 = vsel %vm3011_vm8, %v6690_v47, %v6194_v61  ;;  %v7570_v46 = vunpack.c.l.bf16 %v7242_v24 }
 0x41b   : > { %v6754_v15 = vsel %vm12596_vm10, %v6722_v11, %v6274_v13  ;;  %v6514_v40 = vpop.permute.xlu2 %6513 }
 0x41c   : > { %v6786_v22 = vsel %vm3077_vm11, %v6754_v15, %v6354_v8  ;;  %v7441_v15 = vrot.slane %v7439_v3, 5 }
 0x41f   : > { %v7002_v51 = vpop.f32.mrf.mxu3 }
 0x420   : > { %v7053_v2 = vmul.f32 %v12126_v62, %v7002_v51 }
 0x421   : > { %v6450_v33 = vpop.permute.xlu1 %6449 }
 0x422   : > { %v7089_v57 = vadd.f32 %v12138_v42, %v7053_v2  ;;  %v6818_v36 = vsel %vm3110_vm12, %v6786_v22, %v6450_v33  ;;  %v6610_v52 = vpop.permute.xlu0 %6609  ;;  %v8422_v22 = vld [vmem:[%s8695_s15 + $0x3c] sm:$0xf] }
 0x423   : > { %v6850_v60 = vsel %vm3143_vm13, %v6818_v36, %v6530_v41  ;;  %v7438_v41 = vrot.slane %v7436_v18, 4  ;;  %v7244_v36 = vshrl.u32 %v8422_v22, 16 }
 0x424   : > { %v7617_v48 = vadd.f32 %v7585_v56, %v7089_v57  ;;  %v6882_v54 = vsel %vm12597_vm14, %v6850_v60, %v6610_v52  ;;  %v7247_v52 = vshll.u32 %v8422_v22, 16  ;;  %v7447_v60 = vrot.slane %v7445_v4, 5  ;;  %v8425_v4 = vld [vmem:[%s8695_s15 + $0x48] sm:$0xf] }
 0x425   : > { %8409 = vmatmul.msk.bf16.gmra.mxu3 %vm3229_vm15, %v6882_v54  ;;  %v7442_v32 = vor.u32 %v7441_v15, %v7438_v41 }
 0x426   : > { %v7649_v20 = vmax.f32 %v7617_v48, 0.0  ;;  %v7246_v48 = vrot.slane %v7244_v36, 4  ;;  %v7249_v54 = vrot.slane %v7247_v52, 5  ;;  %v7452_v63 = vor.u32 %v7451_v43, %v7447_v60 }
 0x427   : > { %v7004_v25 = vpop.f32.mrf.mxu3  ;;  %v7443_v44 = vrot.slane %v7442_v32, 4  ;;  %v8450_v32 = vld [vmem:[%s8695_s15 + $0xac] sm:$0xf]  ;;  %v7268_v52 = vshrl.u32 %v8425_v4, 16 }
 0x428   : > { %7681 = vst.msk [vmem:[%s12154_s7 + $0xb0] sm:$0xff] %vm2929_vm6, %v7649_v20  ;;  %v7054_v59 = vmul.f32 %v12126_v62, %v7004_v25  ;;  %v7250_v5 = vor.u32 %v7249_v54, %v7246_v48  ;;  %v7257_v25 = vshrl.u32 %v8423_v53, 16  ;;  %v7473_v36 = vshrl.u32 %v8450_v32, 16  ;;  %v8451_v48 = vld [vmem:[%s8695_s15 + $0xb0] sm:$0x1] }
 0x429   : > { %v6178_v39 = vpop.permute.xlu1 %6177  ;;  %v6962_v13 = vpop.f32.mrf.mxu1  ;;  %v7448_v35 = vsel %vm8723_vm2, %v7443_v44, %v7447_v60  ;;  %v7271_v44 = vshll.u32 %v8425_v4, 16  ;;  %v7270_v54 = vrot.slane %v7268_v52, 4 }
 0x42a   : > { %v7090_v6 = vadd.f32 %v12138_v42, %v7054_v59  ;;  %v7037_v30 = vmul.f32 %v12126_v62, %v6962_v13  ;;  %v6338_v31 = vpop.permute.xlu0 %6337  ;;  %v6706_v50 = vsel %vm3011_vm8, %v6674_v9, %v6178_v39  ;;  %vm12602_vm8 = vmmov %vm12593_vm0  ;;  %v7453_v59 = vrot.slane %v7452_v63, 4 }
 0x42b   : > { %v6738_v8 = vsel %vm12601_vm5, %v6706_v50, %v6258_v37  ;;  %v7587_v37 = vunpack.c.l.bf16 %v7448_v35  ;;  %v7251_v13 = vrot.slane %v7250_v5, 4  ;;  %v7259_v12 = vrot.slane %v7257_v25, 4  ;;  %v8426_v35 = vld [vmem:[%s8695_s15 + $0x4c] sm:$0xf] }
 0x42c   : > { %v7618_v21 = vadd.f32 %v7586_v7, %v7090_v6  ;;  %v7073_v61 = vadd.f32 %v12138_v42, %v7037_v30  ;;  %v6770_v28 = vsel %vm3077_vm11, %v6738_v8, %v6338_v31  ;;  %v7457_v7 = vrot.slane %v7455_v0, 5 }
 0x42d   : > { %v7256_v31 = vsel %vm8723_vm2, %v7251_v13, %v7255_v38  ;;  %v7260_v29 = vor.u32 %v7259_v12, %v7255_v38  ;;  %v7263_v50 = vshll.u32 %v8424_v49, 16  ;;  %v7475_v34 = vrot.slane %v7473_v36, 4 }
 0x42e   : > { %v7650_v16 = vmax.f32 %v7618_v21, 0.0  ;;  %v7601_v47 = vadd.f32 %v7569_v58, %v7073_v61  ;;  %v7458_v9 = vsel %vm8723_vm2, %v7453_v59, %v7457_v7  ;;  %v7273_v53 = vrot.slane %v7271_v44, 5 }
 0x42f   : > { %v7588_v61 = vunpack.c.l.bf16 %v7458_v9  ;;  %v7261_v8 = vrot.slane %v7260_v29, 4  ;;  %v7265_v3 = vrot.slane %v7263_v50, 5  ;;  %v7277_v25 = vshll.u32 %v8426_v35, 16  ;;  %v8427_v9 = vld [vmem:[%s8695_s15 + $0x50] sm:$0x1] }
 0x430   : > { %7682 = vst.msk [vmem:[%s12154_s7 + $0xb8] sm:$0xff] %vm2929_vm6, %v7650_v16  ;;  %v7633_v11 = vmax.f32 %v7601_v47, 0.0  ;;  %v7571_v47 = vunpack.c.l.bf16 %v7256_v31  ;;  %v7274_v23 = vor.u32 %v7273_v53, %v7270_v54  ;;  %v8454_v54 = vld [vmem:[%s8695_s15 + $0xbc] sm:$0x1] }
 0x431   : > { %v6434_v10 = vpop.permute.xlu1 %6433  ;;  %v6964_v14 = vpop.f32.mrf.mxu1  ;;  %v7279_v12 = vrot.slane %v7277_v25, 5 }
 0x432   : > { %7665 = vst.msk [vmem:[%s12154_s7 + $0x30] sm:$0xff] %vm2929_vm6, %v7633_v11  ;;  %v6802_v55 = vsel %vm3110_vm12, %v6770_v28, %v6434_v10  ;;  %v7038_v45 = vmul.f32 %v12126_v62, %v6964_v14  ;;  %v6594_v51 = vpop.permute.xlu0 %6593  ;;  %v7275_v38 = vrot.slane %v7274_v23, 4 }
 0x433   : > { %v6834_v27 = vsel %vm3143_vm13, %v6802_v55, %v6514_v40  ;;  %v8449_v55 = vld [vmem:[%s8695_s15 + $0xa8] sm:$0xf] }
 0x434   : > { %v7074_v2 = vadd.f32 %v12138_v42, %v7038_v45  ;;  %v6866_v56 = vsel %vm12602_vm8, %v6834_v27, %v6594_v51  ;;  %v7460_v51 = vshrl.u32 %v8449_v55, 16  ;;  %v7463_v27 = vshll.u32 %v8449_v55, 16 }
 0x435   : > { %8401 = vmatmul.msk.bf16.gmra.mxu1 %vm3229_vm15, %v6866_v56  ;;  %v7280_v29 = vsel %vm8723_vm2, %v7275_v38, %v7279_v12 }
 0x436   : > { %v7602_v33 = vadd.f32 %v7570_v46, %v7074_v2  ;;  %v7266_v46 = vsel %vm8723_vm2, %v7261_v8, %v7265_v3  ;;  %v7462_v56 = vrot.slane %v7460_v51, 4  ;;  %v7465_v22 = vrot.slane %v7463_v27, 5 }
 0x437   : > { %v7572_v15 = vunpack.c.l.bf16 %v7266_v46  ;;  %v7573_v8 = vunpack.c.l.bf16 %v7280_v29 }
 0x438   : > { %v7634_v57 = vmax.f32 %v7602_v33, 0.0  ;;  %v7466_v17 = vor.u32 %v7465_v22, %v7462_v56  ;;  %v8453_v22 = vld [vmem:[%s8695_s15 + $0xb8] sm:$0xf] }
 0x439   : > { %v7497_v36 = vshrl.u32 %v8453_v22, 16 }
 0x43a   : > { %7666 = vst.msk [vmem:[%s12154_s7 + $0x38] sm:$0xff] %vm2929_vm6, %v7634_v57  ;;  %v7469_v57 = vshll.u32 %v8450_v32, 16  ;;  %v7467_v60 = vrot.slane %v7466_v17, 4  ;;  %v8428_v32 = vld [vmem:[%s8695_s15 + $0x54] sm:$0xf] }
 0x43b   : > { %v7292_v44 = vshrl.u32 %v8428_v32, 16 }
 0x43c   : > { %v7471_v43 = vrot.slane %v7469_v57, 5  ;;  %v7493_v57 = vshll.u32 %v8453_v22, 16 }
 0x43d   : > { %v7294_v53 = vrot.slane %v7292_v44, 4 }
 0x43e   : > { %v7472_v63 = vsel %vm8723_vm2, %v7467_v60, %v7471_v43  ;;  %v7476_v0 = vor.u32 %v7475_v34, %v7471_v43  ;;  %v7295_v60 = vshll.u32 %v8428_v32, 16  ;;  %v7495_v34 = vrot.slane %v7493_v57, 5 }
 0x43f   : > { %v7589_v59 = vunpack.c.l.bf16 %v7472_v63  ;;  %v8429_v63 = vld [vmem:[%s8695_s15 + $0x58] sm:$0xf] }
 0x440   : > { %v7007_v20 = vpop.f32.mrf.mxu3  ;;  %v7477_v7 = vrot.slane %v7476_v0, 4 }
 0x441   : > { %v7055_v19 = vmul.f32 %v12126_v62, %v7007_v20  ;;  %v7479_v20 = vshll.u32 %v8451_v48, 16  ;;  %v7499_v48 = vrot.slane %v7497_v36, 4 }
 0x443   : > { %v7091_v39 = vadd.f32 %v12138_v42, %v7055_v19  ;;  %v7281_v19 = vshrl.u32 %v8426_v35, 16  ;;  %v7297_v35 = vrot.slane %v7295_v60, 5 }
 0x445   : > { %v7619_v6 = vadd.f32 %v7587_v37, %v7091_v39  ;;  %v7481_v39 = vrot.slane %v7479_v20, 5  ;;  %v7500_v20 = vor.u32 %v7499_v48, %v7495_v34  ;;  %v7298_v25 = vor.u32 %v7297_v35, %v7294_v53  ;;  %v8457_v53 = vld [vmem:[%s8695_s15 + $0xc8] sm:$0x1] }
 0x447   : > { %v7651_v30 = vmax.f32 %v7619_v6, 0.0  ;;  %v7283_v6 = vrot.slane %v7281_v19, 4  ;;  %v7301_v19 = vshll.u32 %v8429_v63, 16 }
 0x448   : > { %v7009_v58 = vpop.f32.mrf.mxu3 }
 0x449   : > { %7683 = vst.msk [vmem:[%s12154_s7 + $0xc0] sm:$0xff] %vm2929_vm6, %v7651_v30  ;;  %v7056_v21 = vmul.f32 %v12126_v62, %v7009_v58  ;;  %v7482_v30 = vsel %vm8723_vm2, %v7477_v7, %v7481_v39  ;;  %v7284_v50 = vor.u32 %v7283_v6, %v7279_v12  ;;  %v7501_v39 = vrot.slane %v7500_v20, 4 }
 0x44a   : > { %v6967_v24 = vpop.f32.mrf.mxu1  ;;  %v7299_v12 = vrot.slane %v7298_v25, 4  ;;  %v7303_v6 = vrot.slane %v7301_v19, 5 }
 0x44b   : > { %v7092_v18 = vadd.f32 %v12138_v42, %v7056_v21  ;;  %v7039_v16 = vmul.f32 %v12126_v62, %v6967_v24  ;;  %v7287_v21 = vshll.u32 %v8427_v9, 16  ;;  %v7590_v24 = vunpack.c.l.bf16 %v7482_v30  ;;  %v8430_v30 = vld [vmem:[%s8695_s15 + $0x5c] sm:$0x1] }
 0x44c   : > { %v7285_v3 = vrot.slane %v7284_v50, 4 }
 0x44d   : > { %v7620_v11 = vadd.f32 %v7588_v61, %v7092_v18  ;;  %v7075_v28 = vadd.f32 %v12138_v42, %v7039_v16 }
 0x44f   : > { %v7652_v10 = vmax.f32 %v7620_v11, 0.0  ;;  %v7603_v14 = vadd.f32 %v7571_v47, %v7075_v28  ;;  %v7289_v11 = vrot.slane %v7287_v21, 5  ;;  %v8452_v28 = vld [vmem:[%s8695_s15 + $0xb4] sm:$0xf]  ;;  %v7311_v21 = vshll.u32 %v8430_v30, 16 }
 0x450   : > { %v7484_v55 = vshrl.u32 %v8452_v28, 16 }
 0x451   : > { %7684 = vst.msk [vmem:[%s12154_s7 + $0xc8] sm:$0xff] %vm2929_vm6, %v7652_v10  ;;  %v7635_v40 = vmax.f32 %v7603_v14, 0.0 }
 0x452   : > { %v6969_v45 = vpop.f32.mrf.mxu1 }
 0x453   : > { %7667 = vst.msk [vmem:[%s12154_s7 + $0x40] sm:$0xff] %vm2929_vm6, %v7635_v40  ;;  %v7040_v41 = vmul.f32 %v12126_v62, %v6969_v45  ;;  %v7487_v45 = vshll.u32 %v8452_v28, 16  ;;  %v7313_v28 = vrot.slane %v7311_v21, 5 }
 0x455   : > { %v7076_v1 = vadd.f32 %v12138_v42, %v7040_v41  ;;  %v7290_v41 = vsel %vm8723_vm2, %v7285_v3, %v7289_v11  ;;  %v7489_v56 = vrot.slane %v7487_v45, 5 }
 0x457   : > { %v7604_v2 = vadd.f32 %v7572_v15, %v7076_v1  ;;  %v7574_v1 = vunpack.c.l.bf16 %v7290_v41 }
 0x459   : > { %v7636_v33 = vmax.f32 %v7604_v2, 0.0  ;;  %v7486_v2 = vrot.slane %v7484_v55, 4 }
 0x45b   : > { %7668 = vst.msk [vmem:[%s12154_s7 + $0x48] sm:$0xff] %vm2929_vm6, %v7636_v33  ;;  %v7490_v17 = vor.u32 %v7489_v56, %v7486_v2 }
 0x45d   : > { %v7491_v43 = vrot.slane %v7490_v17, 4 }
 0x45f   : > { %v7496_v0 = vsel %vm8723_vm2, %v7491_v43, %v7495_v34 }
 0x460   : > { %v7591_v7 = vunpack.c.l.bf16 %v7496_v0  ;;  %v8432_v0 = vld [vmem:[%s8695_s15 + $0x64] sm:$0xf] }
 0x466   : > { %v7012_v5 = vpop.f32.mrf.mxu3 }
 0x467   : > { %v7057_v37 = vmul.f32 %v12126_v62, %v7012_v5  ;;  %v7503_v5 = vshll.u32 %v8454_v54, 16 }
 0x469   : > { %v7093_v13 = vadd.f32 %v12138_v42, %v7057_v37  ;;  %v7305_v37 = vshrl.u32 %v8429_v63, 16 }
 0x46b   : > { %v7621_v49 = vadd.f32 %v7589_v59, %v7093_v13  ;;  %v7505_v13 = vrot.slane %v7503_v5, 5 }
 0x46d   : > { %v7653_v58 = vmax.f32 %v7621_v49, 0.0  ;;  %v7307_v49 = vrot.slane %v7305_v37, 4  ;;  %v7325_v37 = vshll.u32 %v8432_v0, 16 }
 0x46e   : > { %v7014_v31 = vpop.f32.mrf.mxu3 }
 0x46f   : > { %7685 = vst.msk [vmem:[%s12154_s7 + $0xd0] sm:$0xff] %vm2929_vm6, %v7653_v58  ;;  %v7058_v61 = vmul.f32 %v12126_v62, %v7014_v31  ;;  %v7506_v58 = vsel %vm8723_vm2, %v7501_v39, %v7505_v13  ;;  %v7308_v50 = vor.u32 %v7307_v49, %v7303_v6  ;;  %v7327_v49 = vrot.slane %v7325_v37, 5 }
 0x470   : > { %v6972_v18 = vpop.f32.mrf.mxu1 }
 0x471   : > { %v7094_v16 = vadd.f32 %v12138_v42, %v7058_v61  ;;  %v7041_v47 = vmul.f32 %v12126_v62, %v6972_v18  ;;  %v7309_v11 = vrot.slane %v7308_v50, 4 }
 0x473   : > { %v7622_v10 = vadd.f32 %v7590_v24, %v7094_v16  ;;  %v7077_v14 = vadd.f32 %v12138_v42, %v7041_v47  ;;  %v7592_v24 = vunpack.c.l.bf16 %v7506_v58  ;;  %v12422_v16 = vld [vmem:[%s12476_s6] ss:$0 sm:$0xff]  ;;  %v8433_v58 = vld [vmem:[%s8695_s15 + $0x68] sm:$0x1] }
 0x475   : > { %v7654_v46 = vmax.f32 %v7622_v10, 0.0  ;;  %v7605_v40 = vadd.f32 %v7573_v8, %v7077_v14  ;;  %v8455_v10 = vld [vmem:[%s8695_s15 + $0xc0] sm:$0xf] }
 0x476   : > { %v7508_v45 = vshrl.u32 %v8455_v10, 16  ;;  %v7511_v41 = vshll.u32 %v8455_v10, 16 }
 0x477   : > { %7686 = vst.msk [vmem:[%s12154_s7 + $0xd8] sm:$0xff] %vm2929_vm6, %v7654_v46  ;;  %v7637_v15 = vmax.f32 %v7605_v40, 0.0 }
 0x478   : > { %v6974_v51 = vpop.f32.mrf.mxu1  ;;  %v7510_v56 = vrot.slane %v7508_v45, 4  ;;  %v7513_v22 = vrot.slane %v7511_v41, 5 }
 0x479   : > { %7669 = vst.msk [vmem:[%s12154_s7 + $0x50] sm:$0xff] %vm2929_vm6, %v7637_v15  ;;  %v7042_v27 = vmul.f32 %v12126_v62, %v6974_v51  ;;  %v7314_v15 = vsel %vm8723_vm2, %v7309_v11, %v7313_v28 }
 0x47a   : > { %v7576_v2 = vunpack.c.l.bf16 %v7314_v15  ;;  %v7514_v57 = vor.u32 %v7513_v22, %v7510_v56 }
 0x47b   : > { %v7078_v33 = vadd.f32 %v12138_v42, %v7042_v27 }
 0x47c   : > { %v7515_v34 = vrot.slane %v7514_v57, 4 }
 0x47d   : > { %v7606_v4 = vadd.f32 %v7574_v1, %v7078_v33  ;;  %v8456_v33 = vld [vmem:[%s8695_s15 + $0xc4] sm:$0xf] }
 0x47e   : > { %v7517_v36 = vshll.u32 %v8456_v33, 16 }
 0x47f   : > { %v7638_v52 = vmax.f32 %v7606_v4, 0.0  ;;  %v8431_v4 = vld [vmem:[%s8695_s15 + $0x60] sm:$0xf] }
 0x480   : > { %v7316_v60 = vshrl.u32 %v8431_v4, 16  ;;  %v7319_v43 = vshll.u32 %v8431_v4, 16  ;;  %v7519_v48 = vrot.slane %v7517_v36, 5 }
 0x481   : > { %7670 = vst.msk [vmem:[%s12154_s7 + $0x58] sm:$0xff] %vm2929_vm6, %v7638_v52  ;;  %v7521_v52 = vshrl.u32 %v8456_v33, 16 }
 0x482   : > { %v7318_v35 = vrot.slane %v7316_v60, 4  ;;  %v7321_v63 = vrot.slane %v7319_v43, 5  ;;  %v7520_v20 = vsel %vm8723_vm2, %v7515_v34, %v7519_v48 }
 0x483   : > { %v7523_v54 = vrot.slane %v7521_v52, 4  ;;  %v7593_v39 = vunpack.c.l.bf16 %v7520_v20 }
 0x484   : > { %v7322_v19 = vor.u32 %v7321_v63, %v7318_v35 }
 0x485   : > { %v7524_v5 = vor.u32 %v7523_v54, %v7519_v48 }
 0x487   : > { %v7017_v23 = vpop.f32.mrf.mxu3  ;;  %v7525_v13 = vrot.slane %v7524_v5, 4 }
 0x488   : > { %v7059_v59 = vmul.f32 %v12126_v62, %v7017_v23  ;;  %v7304_v62 = vsel %vm8723_vm2, %v7299_v12, %v7303_v6  ;;  %v7527_v23 = vshll.u32 %v8457_v53, 16  ;;  %v7323_v6 = vrot.slane %v7322_v19, 4 }
 0x489   : > { %v7575_v3 = vunpack.c.l.bf16 %v7304_v62 }
 0x48a   : > { %v7095_v38 = vadd.f32 %v12138_v42, %v7059_v59  ;;  %v12416_v42 = vld [vmem:[%s12475_s5] ss:$0 sm:$0xff]  ;;  %v7329_v59 = vshrl.u32 %v8432_v0, 16  ;;  %v7328_v50 = vsel %vm8723_vm2, %v7323_v6, %v7327_v49 }
 0x48b   : > { %v7577_v11 = vunpack.c.l.bf16 %v7328_v50 }
 0x48c   : > { %v7623_v9 = vadd.f32 %v7591_v7, %v7095_v38  ;;  %v7529_v38 = vrot.slane %v7527_v23, 5 }
 0x48e   : > { %v7655_v31 = vmax.f32 %v7623_v9, 0.0  ;;  %v7331_v9 = vrot.slane %v7329_v59, 4 }
 0x48f   : > { %v7019_v29 = vpop.f32.mrf.mxu3 }
 0x490   : > { %7687 = vst.msk [vmem:[%s12154_s7 + $0xe0] sm:$0xff] %vm2929_vm6, %v7655_v31  ;;  %v7060_v61 = vmul.f32 %v12416_v42, %v7019_v29  ;;  %v7530_v31 = vsel %vm8723_vm2, %v7525_v13, %v7529_v38  ;;  %v7332_v21 = vor.u32 %v7331_v9, %v7327_v49 }
 0x491   : > { %v6977_v18 = vpop.f32.mrf.mxu1 }
 0x492   : > { %v7096_v47 = vadd.f32 %v12422_v16, %v7060_v61  ;;  %v7043_v8 = vmul.f32 %v12416_v42, %v6977_v18  ;;  %v7335_v61 = vshll.u32 %v8433_v58, 16  ;;  %v7594_v18 = vunpack.c.l.bf16 %v7530_v31 }
 0x493   : > { %v7333_v28 = vrot.slane %v7332_v21, 4 }
 0x494   : > { %v7624_v14 = vadd.f32 %v7592_v24, %v7096_v47  ;;  %v7079_v46 = vadd.f32 %v12422_v16, %v7043_v8  ;;  %v7337_v10 = vrot.slane %v7335_v61, 5 }
 0x496   : > { %v7656_v40 = vmax.f32 %v7624_v14, 0.0  ;;  %v7607_v55 = vadd.f32 %v7575_v3, %v7079_v46  ;;  %v7338_v45 = vsel %vm8723_vm2, %v7333_v28, %v7337_v10 }
 0x498   : > { %7688 = vst.msk [vmem:[%s12154_s7 + $0xe8] sm:$0xff] %vm2929_vm6, %v7656_v40  ;;  %v7639_v51 = vmax.f32 %v7607_v55, 0.0 }
 0x499   : > { %v6979_v27 = vpop.f32.mrf.mxu1 }
 0x49a   : > { %7671 = vst.msk [vmem:[%s12154_s7 + $0x60] sm:$0xff] %vm2929_vm6, %v7639_v51  ;;  %v7044_v1 = vmul.f32 %v12416_v42, %v6979_v27  ;;  %v7578_v27 = vunpack.c.l.bf16 %v7338_v45 }
 0x49c   : > { %v7080_v32 = vadd.f32 %v12422_v16, %v7044_v1 }
 0x49e   : > { %v7608_v17 = vadd.f32 %v7576_v2, %v7080_v32 }
 0x4a0   : > { %v7640_v44 = vmax.f32 %v7608_v17, 0.0 }
 0x4a2   : > { %7672 = vst.msk [vmem:[%s12154_s7 + $0x68] sm:$0xff] %vm2929_vm6, %v7640_v44 }
 0x4a8   : > { %v7022_v25 = vpop.f32.mrf.mxu3 }
 0x4a9   : > { %v7061_v7 = vmul.f32 %v12416_v42, %v7022_v25 }
 0x4ab   : > { %v7097_v12 = vadd.f32 %v12422_v16, %v7061_v7 }
 0x4ad   : > { %v7625_v30 = vadd.f32 %v7593_v39, %v7097_v12 }
 0x4af   : > { %v7657_v29 = vmax.f32 %v7625_v30, 0.0 }
 0x4b0   : > { %v7024_v62 = vpop.f32.mrf.mxu3 }
 0x4b1   : > { %7689 = vst.msk [vmem:[%s12154_s7 + $0xf0] sm:$0xff] %vm2929_vm6, %v7657_v29  ;;  %v7062_v24 = vmul.f32 %v12416_v42, %v7024_v62 }
 0x4b2   : > { %v6982_v47 = vpop.f32.mrf.mxu1 }
 0x4b3   : > { %v7098_v8 = vadd.f32 %v12422_v16, %v7062_v24  ;;  %v7045_v3 = vmul.f32 %v12416_v42, %v6982_v47 }
 0x4b5   : > { %v7626_v14 = vadd.f32 %v7594_v18, %v7098_v8  ;;  %v7081_v46 = vadd.f32 %v12422_v16, %v7045_v3 }
 0x4b7   : > { %v7658_v40 = vmax.f32 %v7626_v14, 0.0  ;;  %v7609_v55 = vadd.f32 %v7577_v11, %v7081_v46 }
 0x4b9   : > { %7690 = vst.msk [vmem:[%s12154_s7 + $0xf8] sm:$0xff] %vm2929_vm6, %v7658_v40  ;;  %v7641_v41 = vmax.f32 %v7609_v55, 0.0 }
 0x4ba   : > { %v6984_v15 = vpop.f32.mrf.mxu1 }
 0x4bb   : > { %7673 = vst.msk [vmem:[%s12154_s7 + $0x70] sm:$0xff] %vm2929_vm6, %v7641_v41  ;;  %v7046_v51 = vmul.f32 %v12416_v42, %v6984_v15 }
 0x4bd   : > { %v7082_v1 = vadd.f32 %v12422_v16, %v7046_v51 }
 0x4bf   : > { %v7610_v2 = vadd.f32 %v7578_v27, %v7082_v1 }
 0x4c1   : > { %v7642_v56 = vmax.f32 %v7610_v2, 0.0 }
 0x4c3   : > { %7674 = vst.msk [vmem:[%s12154_s7 + $0x78] sm:$0xff] %vm2929_vm6, %v7642_v56 }
 0x4c4 PF: > { %s20_s13 = sadd.s32 1, %s8615_s13  }
 0x4c5   : > { %p17_p4 = scmp.ge.s32.totalorder %s20_s13, 4  }
 0x4c7   :  { %19 = sbr.rel (!%p17_p4) target bundleno = 1 (0x1), region = 95 }

</bundles_post_ra>
